<compile_context>
chip_gen: v6e
topology: v6e:2x2x1
jax: 0.10.0
libtpu: 0.0.40
codegen_flags: <defaults>
</compile_context>

<pallas_src>
import functools

import jax
import jax.numpy as jnp
from jax import lax
from jax.experimental import pallas as pl
from jax.experimental.pallas import tpu as pltpu

Z_DIM = 512          # resnet18-style fc.in_features
KH = KW = 7
STRIDE = 2
PAD = 3
NUM_VIEWS = 8        # 6 whole views + 2 section views (exercises both branches)
NUM_FEATS = 1
NUM_CLASSES = 10

K_RAW = 1 * KH * KW  # C * KH * KW = 49 (single input channel)
K_PAD = 64           # zero-padded contraction dim -> clean sublane/lane tiles

_VMEM = pl.BlockSpec(memory_space=pltpu.MemorySpace.VMEM)


def _round_up(x, m):
    return (x + m - 1) // m * m


# ------------------------------------------------------------------ backbone

def _backbone_kernel(patches_ref, w_ref, out_ref, acc_ref, *, inv_p):
    # patches_ref: (tn, tp, Kp) bf16 im2col patch tile
    # w_ref:       (Kp, Z)      bf16 conv weight (block index constant -> resident)
    # out_ref:     (tn, Z)      f32  pooled features (resident across p)
    # acc_ref:     (tn, Z)      f32  running pool sum
    p_idx = pl.program_id(1)

    @pl.when(p_idx == 0)
    def _():
        acc_ref[...] = jnp.zeros_like(acc_ref)

    tn, tp, kp = patches_ref.shape
    # One tall matmul keeps the MXU full (no batched per-n small matmuls).
    x2d = patches_ref[...].reshape(tn * tp, kp)
    y = jnp.dot(x2d, w_ref[...], preferred_element_type=jnp.float32)   # (tn*tp, Z) f32
    y = jnp.maximum(y, 0.0)                                            # ReLU (conv has no bias)
    # Partial global-average-pool: zero-padded P rows contribute exactly 0.
    acc_ref[...] += y.reshape(tn, tp, -1).sum(axis=1)

    @pl.when(p_idx == pl.num_programs(1) - 1)
    def _():
        out_ref[...] = (acc_ref[...] * inv_p).astype(out_ref.dtype)


def _backbone_apply(patches, w_im2col, *, tn, tp, true_p):
    # patches: (N_pad, P_pad, K_PAD) bf16,  w_im2col: (K_PAD, Z) bf16
    n_pad, p_pad, kp = patches.shape
    z = w_im2col.shape[1]
    assert n_pad % tn == 0 and p_pad % tp == 0
    grid = (n_pad // tn, p_pad // tp)

    # VMEM budget: double-buffered bf16 patch tiles + resident weight
    # + f32 matmul temp + double-buffered f32 out + f32 accumulator.
    est = (2 * tn * tp * kp * 2 + 2 * kp * z * 2 + tn * tp * z * 4
           + 2 * tn * z * 4 + tn * z * 4)
    vmem_limit = int(min(max(2 * est, 32 << 20), 56 << 20))   # headroom; v7x (64 MiB) safe

    kernel = functools.partial(_backbone_kernel, inv_p=1.0 / float(true_p))
    return pl.pallas_call(
        kernel,
        out_shape=jax.ShapeDtypeStruct((n_pad, z), jnp.float32),
        grid_spec=pltpu.PrefetchScalarGridSpec(
            num_scalar_prefetch=0,
            grid=grid,
            in_specs=[
                pl.BlockSpec((tn, tp, kp), lambda n, p: (n, p, 0)),
                pl.BlockSpec((kp, z), lambda n, p: (0, 0)),      # weight stays resident
            ],
            out_specs=pl.BlockSpec((tn, z), lambda n, p: (n, 0)),
            scratch_shapes=[pltpu.VMEM((tn, z), jnp.float32)],
        ),
        compiler_params=pltpu.CompilerParams(
            dimension_semantics=("parallel", "arbitrary"),       # N sharded, P reduction last
            vmem_limit_bytes=vmem_limit,
        ),
    )(patches, w_im2col)


# ------------------------------------------------------------------ fused feats-MLP + head

def _head_kernel(z_ref, f_ref, fw1_ref, fb1_ref, fw2_ref, fb2_ref, fw3_ref, fb3_ref,
                 hw1z_ref, hw1f_ref, hb1_ref, hw2_ref, hb2_ref, out_ref):
    f = f_ref[...]
    if f.shape[1] == 1:
        # Degenerate K=1 contraction -> VPU broadcast (no wasted MXU pass).
        h = f * fw1_ref[...] + fb1_ref[...]
    else:
        h = jnp.dot(f, fw1_ref[...], preferred_element_type=jnp.float32) + fb1_ref[...]
    h = jnp.maximum(h, 0.0)
    h = jnp.maximum(jnp.dot(h, fw2_ref[...], preferred_element_type=jnp.float32)
                    + fb2_ref[...], 0.0)
    fz = jnp.dot(h, fw3_ref[...], preferred_element_type=jnp.float32) + fb3_ref[...]

    # fc head on concat([z_views, feats_z]) without materializing the concat:
    hd = (jnp.dot(z_ref[...], hw1z_ref[...], preferred_element_type=jnp.float32)
          + jnp.dot(fz, hw1f_ref[...], preferred_element_type=jnp.float32)
          + hb1_ref[...])
    hd = jnp.maximum(hd, 0.0)
    out_ref[...] = (jnp.dot(hd, hw2_ref[...], preferred_element_type=jnp.float32)
                    + hb2_ref[...]).astype(out_ref.dtype)


def _head_apply(z_all, f, p):
    b = z_all.shape[0]
    return pl.pallas_call(
        _head_kernel,
        out_shape=jax.ShapeDtypeStruct((b, NUM_CLASSES), jnp.float32),
        in_specs=[_VMEM] * 13,
        out_specs=_VMEM,
    )(z_all, f, p['fw1'], p['fb1'], p['fw2'], p['fb2'], p['fw3'], p['fb3'],
      p['hw1_z'], p['hw1_f'], p['hb1'], p['hw2'], p['hb2'])


# ------------------------------------------------------------------ glue

def _im2col(x, kh, kw, stride, pad):
    # x: (N, C, H, W)  ->  (N, OH*OW, C*kh*kw), flattened (C, kh, kw)-major.
    # Built from kh*kw static strided slices (no XLA gather on the critical path).
    n, c, h, w = x.shape
    xp = jnp.pad(x, ((0, 0), (0, 0), (pad, pad), (pad, pad)))
    oh = (h + 2 * pad - kh) // stride + 1
    ow = (w + 2 * pad - kw) // stride + 1
    slabs = []
    for i in range(kh):
        for j in range(kw):
            sl = lax.slice(xp, (0, 0, i, j),
                           (n, c, i + (oh - 1) * stride + 1, j + (ow - 1) * stride + 1),
                           (1, 1, stride, stride))            # (n, c, oh, ow)
            slabs.append(sl)
    patches = jnp.stack(slabs, axis=2)                        # (n, c, kh*kw, oh, ow)
    patches = jnp.transpose(patches, (0, 3, 4, 1, 2))         # (n, oh, ow, c, kh*kw)
    return patches.reshape(n, oh * ow, c * kh * kw)


def detailview_forward(x, feats, params):
    """x: (b, v, c, h, w) float32,  feats: (b, num_feats) float32."""
    b, v, c, h, w = x.shape
    if v < 6:
        raise ValueError("DetailView_DfModel requires at least 6 (whole) views.")

    # Fused backbone pass over all views (whole + section share the same weights;
    # view-ordering of the fused output equals concat(z_whole, z_section)).
    x_all = x.reshape(b * v, c, h, w)
    patches = _im2col(x_all, KH, KW, STRIDE, PAD)             # (N, P, K_RAW)
    n, p_true, k = patches.shape

    tn = 8
    tp = min(512, _round_up(p_true, 16))
    n_pad = _round_up(n, tn)
    p_pad = _round_up(p_true, tp)
    patches = jnp.pad(patches, ((0, n_pad - n), (0, p_pad - p_true), (0, K_PAD - k)))
    patches = patches.astype(jnp.bfloat16)                    # bf16 MXU inputs, f32 accumulate

    z_all = _backbone_apply(patches, params['conv_w_im2col'],
                            tn=tn, tp=tp, true_p=p_true)      # (n_pad, Z)
    z_all = z_all[:n].reshape(b, v * Z_DIM)

    # drop_rate = 0.0 -> dropout is identity.
    return _head_apply(z_all, feats.reshape(-1, NUM_FEATS), params)


# ------------------------------------------------------------------ reference

def _reference_forward(x, feats, params):
    def backbone(xin):
        y = lax.conv_general_dilated(
            xin, params['conv_w_oihw'], (STRIDE, STRIDE),
            ((PAD, PAD), (PAD, PAD)),
            dimension_numbers=('NCHW', 'OIHW', 'NCHW'))
        return jnp.mean(jnp.maximum(y, 0.0), axis=(2, 3))

    b, v, c, h, w = x.shape
    parts = [backbone(x[:, :6].reshape(b * 6, c, h, w)).reshape(b, -1)]
    if v > 6:
        v_sec = v - 6
        parts.append(backbone(x[:, 6:].reshape(b * v_sec, c, h, w)).reshape(b, -1))
    f = feats.reshape(-1, NUM_FEATS)
    hd = jnp.maximum(f @ params['fw1'] + params['fb1'], 0.0)
    hd = jnp.maximum(hd @ params['fw2'] + params['fb2'], 0.0)
    parts.append(hd @ params['fw3'] + params['fb3'])
    out_all = jnp.concatenate(parts, axis=1)
    h1 = jnp.maximum(out_all @ params['hw1'] + params['hb1'], 0.0)
    return h1 @ params['hw2'] + params['hb2']


# ------------------------------------------------------------------ params

def init_params(key):
    ks = jax.random.split(key, 12)
    conv_w = jax.random.normal(ks[0], (Z_DIM, 1, KH, KW), jnp.float32) * 0.05
    w_im2col = conv_w.reshape(Z_DIM, K_RAW).T                          # (49, Z)
    w_im2col = jnp.pad(w_im2col, ((0, K_PAD - K_RAW), (0, 0)))         # (64, Z)
    fc_in = Z_DIM * (NUM_VIEWS + 1)
    hw1 = jax.random.normal(ks[7], (fc_in, 256), jnp.float32) * 0.02
    return {
        'conv_w_oihw': conv_w,
        'conv_w_im2col': w_im2col.astype(jnp.bfloat16),
        'fw1': jax.random.normal(ks[1], (NUM_FEATS, 512), jnp.float32) * 0.05,
        'fb1': jax.random.normal(ks[2], (1, 512), jnp.float32) * 0.01,
        'fw2': jax.random.normal(ks[3], (512, 512), jnp.float32) * 0.02,
        'fb2': jax.random.normal(ks[4], (1, 512), jnp.float32) * 0.01,
        'fw3': jax.random.normal(ks[5], (512, Z_DIM), jnp.float32) * 0.02,
        'fb3': jax.random.normal(ks[6], (1, Z_DIM), jnp.float32) * 0.01,
        'hw1': hw1,
        'hw1_z': hw1[:Z_DIM * NUM_VIEWS],                              # view-feature rows
        'hw1_f': hw1[Z_DIM * NUM_VIEWS:],                              # feats-MLP rows
        'hb1': jax.random.normal(ks[8], (1, 256), jnp.float32) * 0.01,
        'hw2': jax.random.normal(ks[9], (256, NUM_CLASSES), jnp.float32) * 0.02,
        'hb2': jax.random.normal(ks[10], (1, NUM_CLASSES), jnp.float32) * 0.01,
    }


# ------------------------------------------------------------------ main

if __name__ == "__main__":
    key = jax.random.PRNGKey(0)
    kx, kf, kp = jax.random.split(key, 3)

    b, v, c, h, w = 2, NUM_VIEWS, 1, 16, 16
    x = jax.random.normal(kx, (b, v, c, h, w), jnp.float32)
    feats = jax.random.normal(kf, (b, NUM_FEATS), jnp.float32)
    params = init_params(kp)

    cls = jax.jit(detailview_forward)(x, feats, params)
    cls = jax.block_until_ready(cls)

    assert cls.shape == (b, NUM_CLASSES), cls.shape
    assert bool(jnp.all(jnp.isfinite(cls)))

    ref = _reference_forward(x, feats, params)
    assert jnp.allclose(cls, ref, rtol=5e-2, atol=5e-2), (
        float(jnp.max(jnp.abs(cls - ref))))

    print("KERNEL_OK")
</pallas_src>

<mosaic_0001>
module attributes {stable_mosaic.version = 11 : i64} {
  func.func @_backbone_kernel(%arg0: i32, %arg1: i32, %arg2: memref<8x64x64xbf16, #tpu.memory_space<vmem>>, %arg3: memref<64x512xbf16, #tpu.memory_space<vmem>>, %arg4: memref<8x512xf32, #tpu.memory_space<vmem>>, %arg5: memref<8x512xf32, #tpu.memory_space<vmem>>) attributes {dimension_semantics = [#tpu.dimension_semantics<parallel>, #tpu.dimension_semantics<arbitrary>], iteration_bounds = array<i64: 2, 1>, scalar_prefetch = 0 : i64, scratch_operands = 1 : i64, tpu.core_type = #tpu.core_type<tc>, window_params = [{transform_indices = @transform_0, window_bounds = array<i64: 8, 64, 64>}, {pipeline_mode = #tpu.pipeline_mode<synchronous>, transform_indices = @transform_1, window_bounds = array<i64: 64, 512>}, {transform_indices = @transform_2, window_bounds = array<i64: 8, 512>}]} {
    %c0_i32 = arith.constant 0 : i32
    %0 = arith.cmpi eq, %arg1, %c0_i32 : i32
    %1 = arith.extui %0 : i1 to i32
    %c0_i32_0 = arith.constant 0 : i32
    %2 = arith.cmpi ne, %1, %c0_i32_0 : i32
    scf.if %2 {
      %cst_13 = arith.constant 0.000000e+00 : f32
      %17 = vector.broadcast %cst_13 : f32 to vector<8x512xf32>
      %c0_14 = arith.constant 0 : index
      %c0_15 = arith.constant 0 : index
      %18 = vector.load %arg5[%c0_14, %c0_15] : memref<8x512xf32, #tpu.memory_space<vmem>>, vector<8x512xf32>
      tpu.vector_store %arg5[%c0_14, %c0_15], %17 {strides = array<i32>} : memref<8x512xf32, #tpu.memory_space<vmem>>, vector<8x512xf32>,
    } else {
    }
    %c0 = arith.constant 0 : index
    %c0_1 = arith.constant 0 : index
    %c0_2 = arith.constant 0 : index
    %3 = vector.load %arg2[%c0, %c0_1, %c0_2] : memref<8x64x64xbf16, #tpu.memory_space<vmem>>, vector<8x64x64xbf16>
    %4 = vector.shape_cast %3 : vector<8x64x64xbf16> to vector<512x64xbf16>
    %c0_3 = arith.constant 0 : index
    %c0_4 = arith.constant 0 : index
    %5 = vector.load %arg3[%c0_3, %c0_4] : memref<64x512xbf16, #tpu.memory_space<vmem>>, vector<64x512xbf16>
    %cst = arith.constant dense<0.000000e+00> : vector<512x512xf32>
    %6 = tpu.matmul %4, %5, %cst {dimension_numbers = #tpu.dot_dimension_numbers<[1], [0], [0], [1], [0, 0, 1, 1], [], []>} : vector<512x64xbf16>, vector<64x512xbf16>, vector<512x512xf32> -> vector<512x512xf32>
    %cst_5 = arith.constant 0.000000e+00 : f32
    %7 = vector.broadcast %cst_5 : f32 to vector<512x512xf32>
    %8 = arith.maximumf %6, %7 : vector<512x512xf32>
    %c0_6 = arith.constant 0 : index
    %c0_7 = arith.constant 0 : index
    %9 = vector.load %arg5[%c0_6, %c0_7] : memref<8x512xf32, #tpu.memory_space<vmem>>, vector<8x512xf32>
    %10 = vector.shape_cast %8 : vector<512x512xf32> to vector<8x64x512xf32>
    %cst_8 = arith.constant dense<0.000000e+00> : vector<8x512xf32>
    %11 = vector.multi_reduction <add>, %10, %cst_8 [1] : vector<8x64x512xf32> to vector<8x512xf32>
    %12 = arith.addf %9, %11 : vector<8x512xf32>
    %c0_9 = arith.constant 0 : index
    %c0_10 = arith.constant 0 : index
    %13 = vector.load %arg5[%c0_9, %c0_10] : memref<8x512xf32, #tpu.memory_space<vmem>>, vector<8x512xf32>
    tpu.vector_store %arg5[%c0_9, %c0_10], %12 {strides = array<i32>} : memref<8x512xf32, #tpu.memory_space<vmem>>, vector<8x512xf32>,
    %c0_i32_11 = arith.constant 0 : i32
    %14 = arith.cmpi eq, %arg1, %c0_i32_11 : i32
    %15 = arith.extui %14 : i1 to i32
    %c0_i32_12 = arith.constant 0 : i32
    %16 = arith.cmpi ne, %15, %c0_i32_12 : i32
    scf.if %16 {
      %c0_13 = arith.constant 0 : index
      %c0_14 = arith.constant 0 : index
      %17 = vector.load %arg5[%c0_13, %c0_14] : memref<8x512xf32, #tpu.memory_space<vmem>>, vector<8x512xf32>
      %cst_15 = arith.constant 1.562500e-02 : f32
      %18 = vector.broadcast %cst_15 : f32 to vector<8x512xf32>
      %19 = arith.mulf %17, %18 : vector<8x512xf32>
      %c0_16 = arith.constant 0 : index
      %c0_17 = arith.constant 0 : index
      %20 = vector.load %arg4[%c0_16, %c0_17] : memref<8x512xf32, #tpu.memory_space<vmem>>, vector<8x512xf32>
      tpu.vector_store %arg4[%c0_16, %c0_17], %19 {strides = array<i32>} : memref<8x512xf32, #tpu.memory_space<vmem>>, vector<8x512xf32>,
    } else {
    }
    return
  }
  func.func @transform_0(%arg0: i32, %arg1: i32) -> (i32, i32, i32) {
    %c0_i32 = arith.constant 0 : i32
    %c0_i32_0 = arith.constant 0 : i32
    return %arg0, %arg1, %c0_i32 : i32, i32, i32
  }
  func.func @transform_1(%arg0: i32, %arg1: i32) -> (i32, i32) {
    %c0_i32 = arith.constant 0 : i32
    %c0_i32_0 = arith.constant 0 : i32
    %c0_i32_1 = arith.constant 0 : i32
    return %c0_i32, %c0_i32_0 : i32, i32
  }
  func.func @transform_2(%arg0: i32, %arg1: i32) -> (i32, i32) {
    %c0_i32 = arith.constant 0 : i32
    %c0_i32_0 = arith.constant 0 : i32
    return %arg0, %c0_i32 : i32, i32
  }
}

module attributes {stable_mosaic.version = 11 : i64} {
  func.func @_head_kernel(%arg0: memref<2x4096xf32, #tpu.memory_space<vmem>>, %arg1: memref<2x1xf32, #tpu.memory_space<vmem>>, %arg2: memref<1x512xf32, #tpu.memory_space<vmem>>, %arg3: memref<1x512xf32, #tpu.memory_space<vmem>>, %arg4: memref<512x512xf32, #tpu.memory_space<vmem>>, %arg5: memref<1x512xf32, #tpu.memory_space<vmem>>, %arg6: memref<512x512xf32, #tpu.memory_space<vmem>>, %arg7: memref<1x512xf32, #tpu.memory_space<vmem>>, %arg8: memref<4096x256xf32, #tpu.memory_space<vmem>>, %arg9: memref<512x256xf32, #tpu.memory_space<vmem>>, %arg10: memref<1x256xf32, #tpu.memory_space<vmem>>, %arg11: memref<256x10xf32, #tpu.memory_space<vmem>>, %arg12: memref<1x10xf32, #tpu.memory_space<vmem>>, %arg13: memref<2x10xf32, #tpu.memory_space<vmem>>) attributes {dimension_semantics = [], scalar_prefetch = 0 : i64, scratch_operands = 0 : i64, tpu.core_type = #tpu.core_type<tc>} {
    %c0 = arith.constant 0 : index
    %c0_0 = arith.constant 0 : index
    %0 = vector.load %arg1[%c0, %c0_0] : memref<2x1xf32, #tpu.memory_space<vmem>>, vector<2x1xf32>
    %c0_1 = arith.constant 0 : index
    %c0_2 = arith.constant 0 : index
    %1 = vector.load %arg2[%c0_1, %c0_2] : memref<1x512xf32, #tpu.memory_space<vmem>>, vector<1x512xf32>
    %2 = vector.broadcast %0 : vector<2x1xf32> to vector<2x512xf32>
    %3 = vector.broadcast %1 : vector<1x512xf32> to vector<2x512xf32>
    %4 = arith.mulf %2, %3 : vector<2x512xf32>
    %c0_3 = arith.constant 0 : index
    %c0_4 = arith.constant 0 : index
    %5 = vector.load %arg3[%c0_3, %c0_4] : memref<1x512xf32, #tpu.memory_space<vmem>>, vector<1x512xf32>
    %6 = vector.broadcast %5 : vector<1x512xf32> to vector<2x512xf32>
    %7 = arith.addf %4, %6 : vector<2x512xf32>
    %cst = arith.constant 0.000000e+00 : f32
    %8 = vector.broadcast %cst : f32 to vector<2x512xf32>
    %9 = arith.maximumf %7, %8 : vector<2x512xf32>
    %c0_5 = arith.constant 0 : index
    %c0_6 = arith.constant 0 : index
    %10 = vector.load %arg4[%c0_5, %c0_6] : memref<512x512xf32, #tpu.memory_space<vmem>>, vector<512x512xf32>
    %cst_7 = arith.constant dense<0.000000e+00> : vector<2x512xf32>
    %11 = tpu.matmul %9, %10, %cst_7 {dimension_numbers = #tpu.dot_dimension_numbers<[1], [0], [0], [1], [0, 0, 1, 1], [], []>} : vector<2x512xf32>, vector<512x512xf32>, vector<2x512xf32> -> vector<2x512xf32>
    %c0_8 = arith.constant 0 : index
    %c0_9 = arith.constant 0 : index
    %12 = vector.load %arg5[%c0_8, %c0_9] : memref<1x512xf32, #tpu.memory_space<vmem>>, vector<1x512xf32>
    %13 = vector.broadcast %12 : vector<1x512xf32> to vector<2x512xf32>
    %14 = arith.addf %11, %13 : vector<2x512xf32>
    %cst_10 = arith.constant 0.000000e+00 : f32
    %15 = vector.broadcast %cst_10 : f32 to vector<2x512xf32>
    %16 = arith.maximumf %14, %15 : vector<2x512xf32>
    %c0_11 = arith.constant 0 : index
    %c0_12 = arith.constant 0 : index
    %17 = vector.load %arg6[%c0_11, %c0_12] : memref<512x512xf32, #tpu.memory_space<vmem>>, vector<512x512xf32>
    %cst_13 = arith.constant dense<0.000000e+00> : vector<2x512xf32>
    %18 = tpu.matmul %16, %17, %cst_13 {dimension_numbers = #tpu.dot_dimension_numbers<[1], [0], [0], [1], [0, 0, 1, 1], [], []>} : vector<2x512xf32>, vector<512x512xf32>, vector<2x512xf32> -> vector<2x512xf32>
    %c0_14 = arith.constant 0 : index
    %c0_15 = arith.constant 0 : index
    %19 = vector.load %arg7[%c0_14, %c0_15] : memref<1x512xf32, #tpu.memory_space<vmem>>, vector<1x512xf32>
    %20 = vector.broadcast %19 : vector<1x512xf32> to vector<2x512xf32>
    %21 = arith.addf %18, %20 : vector<2x512xf32>
    %c0_16 = arith.constant 0 : index
    %c0_17 = arith.constant 0 : index
    %22 = vector.load %arg0[%c0_16, %c0_17] : memref<2x4096xf32, #tpu.memory_space<vmem>>, vector<2x4096xf32>
    %c0_18 = arith.constant 0 : index
    %c0_19 = arith.constant 0 : index
    %23 = vector.load %arg8[%c0_18, %c0_19] : memref<4096x256xf32, #tpu.memory_space<vmem>>, vector<4096x256xf32>
    %cst_20 = arith.constant dense<0.000000e+00> : vector<2x256xf32>
    %24 = tpu.matmul %22, %23, %cst_20 {dimension_numbers = #tpu.dot_dimension_numbers<[1], [0], [0], [1], [0, 0, 1, 1], [], []>} : vector<2x4096xf32>, vector<4096x256xf32>, vector<2x256xf32> -> vector<2x256xf32>
    %c0_21 = arith.constant 0 : index
    %c0_22 = arith.constant 0 : index
    %25 = vector.load %arg9[%c0_21, %c0_22] : memref<512x256xf32, #tpu.memory_space<vmem>>, vector<512x256xf32>
    %cst_23 = arith.constant dense<0.000000e+00> : vector<2x256xf32>
    %26 = tpu.matmul %21, %25, %cst_23 {dimension_numbers = #tpu.dot_dimension_numbers<[1], [0], [0], [1], [0, 0, 1, 1], [], []>} : vector<2x512xf32>, vector<512x256xf32>, vector<2x256xf32> -> vector<2x256xf32>
    %27 = arith.addf %24, %26 : vector<2x256xf32>
    %c0_24 = arith.constant 0 : index
    %c0_25 = arith.constant 0 : index
    %28 = vector.load %arg10[%c0_24, %c0_25] : memref<1x256xf32, #tpu.memory_space<vmem>>, vector<1x256xf32>
    %29 = vector.broadcast %28 : vector<1x256xf32> to vector<2x256xf32>
    %30 = arith.addf %27, %29 : vector<2x256xf32>
    %cst_26 = arith.constant 0.000000e+00 : f32
    %31 = vector.broadcast %cst_26 : f32 to vector<2x256xf32>
    %32 = arith.maximumf %30, %31 : vector<2x256xf32>
    %c0_27 = arith.constant 0 : index
    %c0_28 = arith.constant 0 : index
    %33 = vector.load %arg11[%c0_27, %c0_28] : memref<256x10xf32, #tpu.memory_space<vmem>>, vector<256x10xf32>
    %cst_29 = arith.constant dense<0.000000e+00> : vector<2x10xf32>
    %34 = tpu.matmul %32, %33, %cst_29 {dimension_numbers = #tpu.dot_dimension_numbers<[1], [0], [0], [1], [0, 0, 1, 1], [], []>} : vector<2x256xf32>, vector<256x10xf32>, vector<2x10xf32> -> vector<2x10xf32>
    %c0_30 = arith.constant 0 : index
    %c0_31 = arith.constant 0 : index
    %35 = vector.load %arg12[%c0_30, %c0_31] : memref<1x10xf32, #tpu.memory_space<vmem>>, vector<1x10xf32>
    %36 = vector.broadcast %35 : vector<1x10xf32> to vector<2x10xf32>
    %37 = arith.addf %34, %36 : vector<2x10xf32>
    %c0_32 = arith.constant 0 : index
    %c0_33 = arith.constant 0 : index
    %38 = vector.load %arg13[%c0_32, %c0_33] : memref<2x10xf32, #tpu.memory_space<vmem>>, vector<2x10xf32>
    tpu.vector_store %arg13[%c0_32, %c0_33], %37 {strides = array<i32>} : memref<2x10xf32, #tpu.memory_space<vmem>>, vector<2x10xf32>,
    return
  }
}

</mosaic_0001>

<bundles_post_ra>
// kernel: detailview_forward.2
= control target key start
LH: loop header
LB: loop body
LE: loop exit
PB: predicated region body
PF: predicated region fallthrough
CT: control target
= control target key end

     0   :  { %s2395_s9 = smov 0   ;;  %s2397_s10 = smov 0   ;;  %s2815_s0 = inlined_call_operand.vmem [shape: bf16[16,64,64], index: 0, kind: input, shape index: {}]   ;;  %s2816_s1 = inlined_call_operand.vmem [shape: bf16[64,512], index: 1, kind: input, shape index: {}]   ;;  %s2817_s2 = inlined_call_operand.vmem [shape: f32[16,512], index: 2, kind: output, shape index: {}]  }
   0x1   :  { %s2399_s11 = smov 0  }
   0x2 LB: > { %s24_s12 = sadd.s32 1, %s2373_s10  ;;  %p2152_p0 = scmp.ge.s32.totalorder %s2377_s11, 1  ;;  %s2377_s11 = sphi %s2399_s11, %s12_s11   ;;  %s2373_s10 = sphi %s2397_s10, %s2819_s10   ;;  %s2369_s9 = sphi %s2395_s9, %s2818_s9  }
   0x3   : > { %p26_p1 = scmp.ge.s32.totalorder %s24_s12, 2  ;;  %p133_p2 = scmp.lt.s32.totalorder %s2377_s11, 3 }
   0x5   : > { %s2821_s12 = smov (%p26_p1, %s24_s12), 0  ;;  %p134_p3 = pnand %p2152_p0, %p133_p2 }
   0x6   : > { %s2153_s15 = sshll.u32 (!%p134_p3), %s2369_s9, 3  ;;  %p172_p5 = scmp.lt.s32.totalorder (!%p134_p3), %s2369_s9, 1 }
   0x7   : > { %137 = sbr.rel (%p134_p3) target bundleno = 497 (0x1f1), region = 28  ;;  %p162_p4 = scmp.lt.s32.totalorder (!%p134_p3), %s2153_s15, 15 }
   0xc   : > { %v2299_v0 = vld [vmem:[%s2816_s1 + $0x64] ss:$16 sps:$4 sm:$0xff]   ;;  %v2301_v1 = vld [vmem:[%s2816_s1 + $0x6c] ss:$16 sps:$4 sm:$0xff]   ;;  %v2379_v2 = vmov 0   ;;  %s2823_s15 = smov (!%p162_p4, %s2153_s15), 15 }
   0xd   : > { %635 = vmatprep.mubr.bf16.mxu0 %v2379_v2  ;;  %988 = vmatprep.mubr.bf16.mxu1 %v2379_v2  ;;  %v2303_v3 = vld [vmem:[%s2816_s1 + $0x60] ss:$16 sps:$4 sm:$0xff]   ;;  %v2304_v4 = vld [vmem:[%s2816_s1 + $0x68] ss:$16 sps:$4 sm:$0xff]   ;;  %v2305_v5 = vld [vmem:[%s2816_s1 + $0x44] ss:$16 sps:$4 sm:$0xff]  }
   0xe   : > { %611 = vmatprep.subr.bf16.mxu0 %v2299_v0  ;;  %964 = vmatprep.subr.bf16.mxu1 %v2301_v1  ;;  %v2307_v6 = vld [vmem:[%s2816_s1 + $0x4c] ss:$16 sps:$4 sm:$0xff]   ;;  %v2309_v7 = vld [vmem:[%s2816_s1 + $0x40] ss:$16 sps:$4 sm:$0xff]   ;;  %v2310_v8 = vld [vmem:[%s2816_s1 + $0x48] ss:$16 sps:$4 sm:$0xff]  }
   0xf   : > { %612 = vmatpush1.bf16.msra.mxu0 %v2303_v3  ;;  %965 = vmatpush1.bf16.msra.mxu1 %v2304_v4  ;;  %v2311_v9 = vld [vmem:[%s2816_s1 + $0x24] ss:$16 sps:$4 sm:$0xff]   ;;  %s2272_s4 = sshll.u32 %s2823_s15, 5  ;;  %v2313_v10 = vld [vmem:[%s2816_s1 + $0x2c] ss:$16 sps:$4 sm:$0xff]   ;;  %vm506_vm0 = vcmask 523264  }
  0x10   : > { %613 = vmatprep.subr.bf16.mxu0 %v2305_v5  ;;  %966 = vmatprep.subr.bf16.mxu1 %v2307_v6  ;;  %v2315_v11 = vld [vmem:[%s2816_s1 + $0x20] ss:$16 sps:$4 sm:$0xff]   ;;  %v2316_v12 = vld [vmem:[%s2816_s1 + $0x28] ss:$16 sps:$4 sm:$0xff]   ;;  %v2317_v13 = vld [vmem:[%s2816_s1 + $0x4] ss:$16 sps:$4 sm:$0xff]   ;;  %s2463_s21 = scalar_lea.vmem %s2815_s0, %s2272_s4 }
  0x11   : > { %v2319_v14 = vld [vmem:[%s2816_s1 + $0xc] ss:$16 sps:$4 sm:$0xff]   ;;  %v2321_v15 = vld [vmem:[%s2816_s1] ss:$16 sps:$4 sm:$0xff]   ;;  %v2322_v16 = vld [vmem:[%s2816_s1 + $0x8] ss:$16 sps:$4 sm:$0xff]  }
  0x12   : > { %v2323_v17 = vld [vmem:[%s2463_s21] sm:$0xff]   ;;  %v2324_v18 = vld [vmem:[%s2463_s21 + $0x8] sm:$0xff]   ;;  %v2325_v19 = vld [vmem:[%s2463_s21 + $0x10] sm:$0xff]   ;;  %vm2017_vm1 = vcmask 1041409   ;;  %vm2019_vm2 = vcmask 1042434   ;;  %vm2021_vm3 = vcmask 1043459  }
  0x13   : > { %614 = vmatpush1.bf16.msra.mxu0 %v2309_v7  ;;  %967 = vmatpush1.bf16.msra.mxu1 %v2310_v8  ;;  %v2326_v20 = vld [vmem:[%s2463_s21 + $0x18] sm:$0xff]   ;;  %v2327_v21 = vld [vmem:[%s2463_s21 + $0x20] sm:$0xff]   ;;  %v2328_v22 = vld [vmem:[%s2463_s21 + $0x28] sm:$0xff]   ;;  %vm2023_vm4 = vcmask 1044484   ;;  %vm2025_vm5 = vcmask 1045509   ;;  %s2825_s9 = smov (!%p172_p5, %s2369_s9), 1 }
  0x14   : > { %615 = vmatprep.subr.bf16.mxu0 %v2311_v9  ;;  %968 = vmatprep.subr.bf16.mxu1 %v2313_v10  ;;  %v2329_v23 = vld [vmem:[%s2463_s21 + $0x30] sm:$0xff]   ;;  %v2330_v24 = vld [vmem:[%s2463_s21 + $0x38] sm:$0xff]   ;;  %v2331_v25 = vld [vmem:[%s2463_s21 + $0x40] sm:$0xff]   ;;  %vm2027_vm6 = vcmask 1046534   ;;  %s2273_s26 = sshll.u32 %s2825_s9, 5  ;;  %vm2029_vm7 = vcmask 1047559  }
  0x15   : > { %v2332_v26 = vld [vmem:[%s2463_s21 + $0x48] sm:$0xff]   ;;  %v2333_v27 = vld [vmem:[%s2463_s21 + $0x50] sm:$0xff]   ;;  %v2334_v28 = vld [vmem:[%s2463_s21 + $0x58] sm:$0xff]   ;;  %s176_s29 = scalar_lea.vmem %s2817_s2, %s2273_s26 }
  0x16   : > { %v2335_v29 = vld [vmem:[%s2463_s21 + $0x60] sm:$0xff]   ;;  %v2336_v30 = vld [vmem:[%s2463_s21 + $0x68] sm:$0xff]   ;;  %v2337_v31 = vld [vmem:[%s2463_s21 + $0x70] sm:$0xff]  }
  0x17   : > { %616 = vmatpush1.bf16.msra.mxu0 %v2315_v11  ;;  %969 = vmatpush1.bf16.msra.mxu1 %v2316_v12  ;;  %v2338_v32 = vld [vmem:[%s2463_s21 + $0x78] sm:$0xff]   ;;  %v2339_v33 = vld [vmem:[%s2463_s21 + $0x80] sm:$0xff]   ;;  %v2340_v34 = vld [vmem:[%s2463_s21 + $0x88] sm:$0xff]  }
  0x18   : > { %617 = vmatprep.subr.bf16.mxu0 %v2317_v13  ;;  %970 = vmatprep.subr.bf16.mxu1 %v2319_v14  ;;  %v2341_v35 = vld [vmem:[%s2463_s21 + $0x90] sm:$0xff]   ;;  %v2342_v36 = vld [vmem:[%s2463_s21 + $0x98] sm:$0xff]   ;;  %v2343_v37 = vld [vmem:[%s2463_s21 + $0xa0] sm:$0xff]  }
  0x19   : > { %v2344_v38 = vld [vmem:[%s2463_s21 + $0xa8] sm:$0xff]   ;;  %v2345_v39 = vld [vmem:[%s2463_s21 + $0xb0] sm:$0xff]   ;;  %v2346_v40 = vld [vmem:[%s2463_s21 + $0xb8] sm:$0xff]  }
  0x1a   : > { %v2347_v41 = vld [vmem:[%s2463_s21 + $0xc0] sm:$0xff]   ;;  %v2348_v48 = vld [vmem:[%s2463_s21 + $0xc8] sm:$0xff]   ;;  %v2349_v12 = vld [vmem:[%s2463_s21 + $0xd0] sm:$0xff]  }
  0x1b   : > { %618 = vmatpush1.bf16.msra.mxu0 %v2321_v15  ;;  %971 = vmatpush1.bf16.msra.mxu1 %v2322_v16 }
  0x1e   : > { %2206 = vmatmul.mubr.msk.bf16.vlgmr.msra.gmra.mxu0 %vm506_vm0, %v2323_v17  ;;  %2238 = vmatmul.mubr.msk.bf16.vlgmr.msra.gmra.mxu1 %vm506_vm0, %v2323_v17 }
  0x1f   : > { %645 = vmatprep.mubr.bf16.mxu0 %v2379_v2  ;;  %998 = vmatprep.mubr.bf16.mxu1 %v2379_v2 }
  0x26   : > { %2207 = vmatmul.mubr.msk.bf16.gmra.mxu0 %vm506_vm0, %v2324_v18  ;;  %2239 = vmatmul.mubr.msk.bf16.gmra.mxu1 %vm506_vm0, %v2324_v18 }
  0x27   : > { %655 = vmatprep.mubr.bf16.mxu0 %v2379_v2  ;;  %1008 = vmatprep.mubr.bf16.mxu1 %v2379_v2 }
  0x2e   : > { %2208 = vmatmul.mubr.msk.bf16.gmra.mxu0 %vm506_vm0, %v2325_v19  ;;  %2240 = vmatmul.mubr.msk.bf16.gmra.mxu1 %vm506_vm0, %v2325_v19 }
  0x2f   : > { %665 = vmatprep.mubr.bf16.mxu0 %v2379_v2  ;;  %1018 = vmatprep.mubr.bf16.mxu1 %v2379_v2 }
  0x36   : > { %2209 = vmatmul.mubr.msk.bf16.gmra.mxu0 %vm506_vm0, %v2326_v20  ;;  %2241 = vmatmul.mubr.msk.bf16.gmra.mxu1 %vm506_vm0, %v2326_v20 }
  0x37   : > { %675 = vmatprep.mubr.bf16.mxu0 %v2379_v2  ;;  %1028 = vmatprep.mubr.bf16.mxu1 %v2379_v2 }
  0x3e   : > { %2210 = vmatmul.mubr.msk.bf16.gmra.mxu0 %vm506_vm0, %v2327_v21  ;;  %2242 = vmatmul.mubr.msk.bf16.gmra.mxu1 %vm506_vm0, %v2327_v21 }
  0x3f   : > { %685 = vmatprep.mubr.bf16.mxu0 %v2379_v2  ;;  %1038 = vmatprep.mubr.bf16.mxu1 %v2379_v2 }
  0x46   : > { %2211 = vmatmul.mubr.msk.bf16.gmra.mxu0 %vm506_vm0, %v2328_v22  ;;  %2243 = vmatmul.mubr.msk.bf16.gmra.mxu1 %vm506_vm0, %v2328_v22 }
  0x47   : > { %695 = vmatprep.mubr.bf16.mxu0 %v2379_v2  ;;  %1048 = vmatprep.mubr.bf16.mxu1 %v2379_v2 }
  0x4e   : > { %2212 = vmatmul.mubr.msk.bf16.gmra.mxu0 %vm506_vm0, %v2329_v23  ;;  %2244 = vmatmul.mubr.msk.bf16.gmra.mxu1 %vm506_vm0, %v2329_v23 }
  0x4f   : > { %705 = vmatprep.mubr.bf16.mxu0 %v2379_v2  ;;  %1058 = vmatprep.mubr.bf16.mxu1 %v2379_v2 }
  0x56   : > { %2213 = vmatmul.mubr.msk.bf16.gmra.mxu0 %vm506_vm0, %v2330_v24  ;;  %2245 = vmatmul.mubr.msk.bf16.gmra.mxu1 %vm506_vm0, %v2330_v24 }
  0x57   : > { %715 = vmatprep.mubr.bf16.mxu0 %v2379_v2  ;;  %1068 = vmatprep.mubr.bf16.mxu1 %v2379_v2 }
  0x5e   : > { %2214 = vmatmul.mubr.msk.bf16.gmra.mxu0 %vm506_vm0, %v2331_v25  ;;  %2246 = vmatmul.mubr.msk.bf16.gmra.mxu1 %vm506_vm0, %v2331_v25 }
  0x5f   : > { %725 = vmatprep.mubr.bf16.mxu0 %v2379_v2  ;;  %1078 = vmatprep.mubr.bf16.mxu1 %v2379_v2 }
  0x66   : > { %2215 = vmatmul.mubr.msk.bf16.gmra.mxu0 %vm506_vm0, %v2332_v26  ;;  %2247 = vmatmul.mubr.msk.bf16.gmra.mxu1 %vm506_vm0, %v2332_v26 }
  0x67   : > { %735 = vmatprep.mubr.bf16.mxu0 %v2379_v2  ;;  %1088 = vmatprep.mubr.bf16.mxu1 %v2379_v2 }
  0x6e   : > { %2216 = vmatmul.mubr.msk.bf16.gmra.mxu0 %vm506_vm0, %v2333_v27  ;;  %2248 = vmatmul.mubr.msk.bf16.gmra.mxu1 %vm506_vm0, %v2333_v27 }
  0x6f   : > { %745 = vmatprep.mubr.bf16.mxu0 %v2379_v2  ;;  %1098 = vmatprep.mubr.bf16.mxu1 %v2379_v2 }
  0x76   : > { %2217 = vmatmul.mubr.msk.bf16.gmra.mxu0 %vm506_vm0, %v2334_v28  ;;  %2249 = vmatmul.mubr.msk.bf16.gmra.mxu1 %vm506_vm0, %v2334_v28 }
  0x77   : > { %755 = vmatprep.mubr.bf16.mxu0 %v2379_v2  ;;  %1108 = vmatprep.mubr.bf16.mxu1 %v2379_v2 }
  0x7e   : > { %2218 = vmatmul.mubr.msk.bf16.gmra.mxu0 %vm506_vm0, %v2335_v29  ;;  %2250 = vmatmul.mubr.msk.bf16.gmra.mxu1 %vm506_vm0, %v2335_v29 }
  0x7f   : > { %765 = vmatprep.mubr.bf16.mxu0 %v2379_v2  ;;  %1118 = vmatprep.mubr.bf16.mxu1 %v2379_v2 }
  0x86   : > { %2219 = vmatmul.mubr.msk.bf16.gmra.mxu0 %vm506_vm0, %v2336_v30  ;;  %2251 = vmatmul.mubr.msk.bf16.gmra.mxu1 %vm506_vm0, %v2336_v30 }
  0x87   : > { %775 = vmatprep.mubr.bf16.mxu0 %v2379_v2  ;;  %1128 = vmatprep.mubr.bf16.mxu1 %v2379_v2 }
  0x8e   : > { %2220 = vmatmul.mubr.msk.bf16.gmra.mxu0 %vm506_vm0, %v2337_v31  ;;  %2252 = vmatmul.mubr.msk.bf16.gmra.mxu1 %vm506_vm0, %v2337_v31 }
  0x8f   : > { %785 = vmatprep.mubr.bf16.mxu0 %v2379_v2  ;;  %1138 = vmatprep.mubr.bf16.mxu1 %v2379_v2 }
  0x96   : > { %2221 = vmatmul.mubr.msk.bf16.gmra.mxu0 %vm506_vm0, %v2338_v32  ;;  %2253 = vmatmul.mubr.msk.bf16.gmra.mxu1 %vm506_vm0, %v2338_v32 }
  0x97   : > { %795 = vmatprep.mubr.bf16.mxu0 %v2379_v2  ;;  %1148 = vmatprep.mubr.bf16.mxu1 %v2379_v2 }
  0x9e   : > { %2222 = vmatmul.mubr.msk.bf16.gmra.mxu0 %vm506_vm0, %v2339_v33  ;;  %2254 = vmatmul.mubr.msk.bf16.gmra.mxu1 %vm506_vm0, %v2339_v33 }
  0x9f   : > { %805 = vmatprep.mubr.bf16.mxu0 %v2379_v2  ;;  %1158 = vmatprep.mubr.bf16.mxu1 %v2379_v2 }
  0xa6   : > { %2223 = vmatmul.mubr.msk.bf16.gmra.mxu0 %vm506_vm0, %v2340_v34  ;;  %2255 = vmatmul.mubr.msk.bf16.gmra.mxu1 %vm506_vm0, %v2340_v34 }
  0xa7   : > { %815 = vmatprep.mubr.bf16.mxu0 %v2379_v2  ;;  %1168 = vmatprep.mubr.bf16.mxu1 %v2379_v2 }
  0xae   : > { %2224 = vmatmul.mubr.msk.bf16.gmra.mxu0 %vm506_vm0, %v2341_v35  ;;  %2256 = vmatmul.mubr.msk.bf16.gmra.mxu1 %vm506_vm0, %v2341_v35 }
  0xaf   : > { %825 = vmatprep.mubr.bf16.mxu0 %v2379_v2  ;;  %1178 = vmatprep.mubr.bf16.mxu1 %v2379_v2 }
  0xb6   : > { %2225 = vmatmul.mubr.msk.bf16.gmra.mxu0 %vm506_vm0, %v2342_v36  ;;  %2257 = vmatmul.mubr.msk.bf16.gmra.mxu1 %vm506_vm0, %v2342_v36 }
  0xb7   : > { %835 = vmatprep.mubr.bf16.mxu0 %v2379_v2  ;;  %1188 = vmatprep.mubr.bf16.mxu1 %v2379_v2 }
  0xbe   : > { %2226 = vmatmul.mubr.msk.bf16.gmra.mxu0 %vm506_vm0, %v2343_v37  ;;  %2258 = vmatmul.mubr.msk.bf16.gmra.mxu1 %vm506_vm0, %v2343_v37  ;;  %v2350_v37 = vld [vmem:[%s2463_s21 + $0xd8] sm:$0xff]  }
  0xbf   : > { %845 = vmatprep.mubr.bf16.mxu0 %v2379_v2  ;;  %1198 = vmatprep.mubr.bf16.mxu1 %v2379_v2 }
  0xc6   : > { %2227 = vmatmul.mubr.msk.bf16.gmra.mxu0 %vm506_vm0, %v2344_v38  ;;  %2259 = vmatmul.mubr.msk.bf16.gmra.mxu1 %vm506_vm0, %v2344_v38 }
  0xc7   : > { %855 = vmatprep.mubr.bf16.mxu0 %v2379_v2  ;;  %1208 = vmatprep.mubr.bf16.mxu1 %v2379_v2 }
  0xce   : > { %2228 = vmatmul.mubr.msk.bf16.gmra.mxu0 %vm506_vm0, %v2345_v39  ;;  %2260 = vmatmul.mubr.msk.bf16.gmra.mxu1 %vm506_vm0, %v2345_v39 }
  0xcf   : > { %865 = vmatprep.mubr.bf16.mxu0 %v2379_v2  ;;  %1218 = vmatprep.mubr.bf16.mxu1 %v2379_v2 }
  0xd6   : > { %2229 = vmatmul.mubr.msk.bf16.gmra.mxu0 %vm506_vm0, %v2346_v40  ;;  %2261 = vmatmul.mubr.msk.bf16.gmra.mxu1 %vm506_vm0, %v2346_v40 }
  0xd7   : > { %875 = vmatprep.mubr.bf16.mxu0 %v2379_v2  ;;  %1228 = vmatprep.mubr.bf16.mxu1 %v2379_v2 }
  0xde   : > { %v637_v42 = vpop.f32.mrf.mxu0  ;;  %2230 = vmatmul.mubr.msk.bf16.gmra.mxu0 %vm506_vm0, %v2347_v41  ;;  %v990_v43 = vpop.f32.mrf.mxu1  ;;  %2262 = vmatmul.mubr.msk.bf16.gmra.mxu1 %vm506_vm0, %v2347_v41 }
  0xdf   : > { %885 = vmatprep.mubr.bf16.mxu0 %v2379_v2  ;;  %1238 = vmatprep.mubr.bf16.mxu1 %v2379_v2  ;;  %v1309_v49 = vmax.f32 %v637_v42, 0.0  ;;  %v1311_v50 = vmax.f32 %v990_v43, 0.0 }
  0xe0   : > { %v639_v44 = vpop.f32.mrf.mxu0  ;;  %v992_v45 = vpop.f32.mrf.mxu1 }
  0xe1   : > { %v1310_v53 = vmax.f32 %v639_v44, 0.0  ;;  %v1312_v54 = vmax.f32 %v992_v45, 0.0 }
  0xe2   : > { %v641_v46 = vpop.f32.mrf.mxu0  ;;  %v994_v47 = vpop.f32.mrf.mxu1 }
  0xe3   : > { %v1313_v51 = vmax.f32 %v641_v46, 0.0  ;;  %v1315_v52 = vmax.f32 %v994_v47, 0.0 }
  0xe4   : > { %v643_v55 = vpop.f32.mrf.mxu0  ;;  %v996_v56 = vpop.f32.mrf.mxu1 }
  0xe5   : > { %v1569_v57 = vadd.f32 %v1313_v51, %v1309_v49  ;;  %v1595_v58 = vadd.f32 %v1315_v52, %v1311_v50  ;;  %v1314_v59 = vmax.f32 %v643_v55, 0.0  ;;  %v1316_v60 = vmax.f32 %v996_v56, 0.0 }
  0xe6   : > { %v647_v61 = vpop.f32.mrf.mxu0  ;;  %2231 = vmatmul.mubr.msk.bf16.gmra.mxu0 %vm506_vm0, %v2348_v48  ;;  %v1000_v62 = vpop.f32.mrf.mxu1  ;;  %2263 = vmatmul.mubr.msk.bf16.gmra.mxu1 %vm506_vm0, %v2348_v48 }
  0xe7   : > { %v1582_v63 = vadd.f32 %v1314_v59, %v1310_v53  ;;  %v1608_v0 = vadd.f32 %v1316_v60, %v1312_v54  ;;  %v1317_v1 = vmax.f32 %v647_v61, 0.0  ;;  %v1319_v3 = vmax.f32 %v1000_v62, 0.0  ;;  %895 = vmatprep.mubr.bf16.mxu0 %v2379_v2  ;;  %1248 = vmatprep.mubr.bf16.mxu1 %v2379_v2  ;;  %v2351_v62 = vld [vmem:[%s2463_s21 + $0xe0] sm:$0xff]  }
  0xe8   : > { %v649_v4 = vpop.f32.mrf.mxu0  ;;  %v1002_v5 = vpop.f32.mrf.mxu1 }
  0xe9   : > { %v1570_v6 = vadd.f32 %v1569_v57, %v1317_v1  ;;  %v1596_v7 = vadd.f32 %v1595_v58, %v1319_v3  ;;  %v1318_v8 = vmax.f32 %v649_v4, 0.0  ;;  %v1320_v9 = vmax.f32 %v1002_v5, 0.0 }
  0xea   : > { %v651_v10 = vpop.f32.mrf.mxu0  ;;  %v1004_v11 = vpop.f32.mrf.mxu1 }
  0xeb   : > { %v1583_v13 = vadd.f32 %v1582_v63, %v1318_v8  ;;  %v1609_v14 = vadd.f32 %v1608_v0, %v1320_v9  ;;  %v1321_v15 = vmax.f32 %v651_v10, 0.0  ;;  %v1323_v16 = vmax.f32 %v1004_v11, 0.0 }
  0xec   : > { %v653_v17 = vpop.f32.mrf.mxu0  ;;  %v1006_v18 = vpop.f32.mrf.mxu1 }
  0xed   : > { %v1571_v19 = vadd.f32 %v1570_v6, %v1321_v15  ;;  %v1597_v20 = vadd.f32 %v1596_v7, %v1323_v16  ;;  %v1322_v21 = vmax.f32 %v653_v17, 0.0  ;;  %v1324_v22 = vmax.f32 %v1006_v18, 0.0  ;;  %v2352_v18 = vld [vmem:[%s2463_s21 + $0xe8] sm:$0xff]  }
  0xee   : > { %v657_v23 = vpop.f32.mrf.mxu0  ;;  %2232 = vmatmul.mubr.msk.bf16.gmra.mxu0 %vm506_vm0, %v2349_v12  ;;  %v1010_v24 = vpop.f32.mrf.mxu1  ;;  %2264 = vmatmul.mubr.msk.bf16.gmra.mxu1 %vm506_vm0, %v2349_v12 }
  0xef   : > { %v1584_v25 = vadd.f32 %v1583_v13, %v1322_v21  ;;  %v1610_v26 = vadd.f32 %v1609_v14, %v1324_v22  ;;  %v1325_v27 = vmax.f32 %v657_v23, 0.0  ;;  %v1327_v28 = vmax.f32 %v1010_v24, 0.0  ;;  %905 = vmatprep.mubr.bf16.mxu0 %v2379_v2  ;;  %1258 = vmatprep.mubr.bf16.mxu1 %v2379_v2 }
  0xf0   : > { %v659_v29 = vpop.f32.mrf.mxu0  ;;  %v1012_v30 = vpop.f32.mrf.mxu1 }
  0xf1   : > { %v1572_v31 = vadd.f32 %v1571_v19, %v1325_v27  ;;  %v1598_v32 = vadd.f32 %v1597_v20, %v1327_v28  ;;  %v1326_v33 = vmax.f32 %v659_v29, 0.0  ;;  %v1328_v34 = vmax.f32 %v1012_v30, 0.0 }
  0xf2   : > { %v661_v35 = vpop.f32.mrf.mxu0  ;;  %v1014_v36 = vpop.f32.mrf.mxu1 }
  0xf3   : > { %v1585_v38 = vadd.f32 %v1584_v25, %v1326_v33  ;;  %v1611_v39 = vadd.f32 %v1610_v26, %v1328_v34  ;;  %v1329_v40 = vmax.f32 %v661_v35, 0.0  ;;  %v1331_v41 = vmax.f32 %v1014_v36, 0.0 }
  0xf4   : > { %v663_v42 = vpop.f32.mrf.mxu0  ;;  %v1016_v43 = vpop.f32.mrf.mxu1 }
  0xf5   : > { %v1573_v44 = vadd.f32 %v1572_v31, %v1329_v40  ;;  %v1599_v45 = vadd.f32 %v1598_v32, %v1331_v41  ;;  %v1330_v46 = vmax.f32 %v663_v42, 0.0  ;;  %v1332_v47 = vmax.f32 %v1016_v43, 0.0 }
  0xf6   : > { %v667_v48 = vpop.f32.mrf.mxu0  ;;  %2233 = vmatmul.mubr.msk.bf16.gmra.mxu0 %vm506_vm0, %v2350_v37  ;;  %v1020_v49 = vpop.f32.mrf.mxu1  ;;  %2265 = vmatmul.mubr.msk.bf16.gmra.mxu1 %vm506_vm0, %v2350_v37 }
  0xf7   : > { %v1586_v50 = vadd.f32 %v1585_v38, %v1330_v46  ;;  %v1612_v51 = vadd.f32 %v1611_v39, %v1332_v47  ;;  %v1333_v52 = vmax.f32 %v667_v48, 0.0  ;;  %v1335_v53 = vmax.f32 %v1020_v49, 0.0  ;;  %915 = vmatprep.mubr.bf16.mxu0 %v2379_v2  ;;  %1268 = vmatprep.mubr.bf16.mxu1 %v2379_v2 }
  0xf8   : > { %v669_v54 = vpop.f32.mrf.mxu0  ;;  %v1022_v55 = vpop.f32.mrf.mxu1 }
  0xf9   : > { %v1574_v56 = vadd.f32 %v1573_v44, %v1333_v52  ;;  %v1600_v57 = vadd.f32 %v1599_v45, %v1335_v53  ;;  %v1334_v58 = vmax.f32 %v669_v54, 0.0  ;;  %v1336_v59 = vmax.f32 %v1022_v55, 0.0  ;;  %v2353_v45 = vld [vmem:[%s2463_s21 + $0xf0] sm:$0xff]  }
  0xfa   : > { %v671_v60 = vpop.f32.mrf.mxu0  ;;  %v1024_v61 = vpop.f32.mrf.mxu1 }
  0xfb   : > { %v1587_v63 = vadd.f32 %v1586_v50, %v1334_v58  ;;  %v1613_v0 = vadd.f32 %v1612_v51, %v1336_v59  ;;  %v1337_v1 = vmax.f32 %v671_v60, 0.0  ;;  %v1339_v3 = vmax.f32 %v1024_v61, 0.0 }
  0xfc   : > { %v673_v4 = vpop.f32.mrf.mxu0  ;;  %v1026_v5 = vpop.f32.mrf.mxu1 }
  0xfd   : > { %v2612_v6 = vadd.f32 %v1574_v56, %v1337_v1  ;;  %v2614_v7 = vadd.f32 %v1600_v57, %v1339_v3  ;;  %v1338_v8 = vmax.f32 %v673_v4, 0.0  ;;  %v1340_v9 = vmax.f32 %v1026_v5, 0.0 }
  0xfe   : > { %v677_v10 = vpop.f32.mrf.mxu0  ;;  %2234 = vmatmul.mubr.msk.bf16.gmra.mxu0 %vm506_vm0, %v2351_v62  ;;  %v1030_v11 = vpop.f32.mrf.mxu1  ;;  %2266 = vmatmul.mubr.msk.bf16.gmra.mxu1 %vm506_vm0, %v2351_v62 }
  0xff   : > { %v2618_v12 = vadd.f32 %v1587_v63, %v1338_v8  ;;  %v2620_v13 = vadd.f32 %v1613_v0, %v1340_v9  ;;  %925 = vmatprep.mubr.bf16.mxu0 %v2379_v2  ;;  %1278 = vmatprep.mubr.bf16.mxu1 %v2379_v2  ;;  %v1341_v19 = vmax.f32 %v677_v10, 0.0  ;;  %v1343_v20 = vmax.f32 %v1030_v11, 0.0 }
 0x100   : > { %v679_v14 = vpop.f32.mrf.mxu0  ;;  %v1032_v15 = vpop.f32.mrf.mxu1  ;;  %v1576_v48 = vrot.slane %v2612_v6, 4  ;;  %v1602_v49 = vrot.slane %v2614_v7, 4 }
 0x101   : > { %v1342_v25 = vmax.f32 %v679_v14, 0.0  ;;  %v1344_v26 = vmax.f32 %v1032_v15, 0.0  ;;  %v1589_v58 = vrot.slane %v2618_v12, 4  ;;  %v1615_v59 = vrot.slane %v2620_v13, 4 }
 0x102   : > { %v681_v16 = vpop.f32.mrf.mxu0  ;;  %v1034_v17 = vpop.f32.mrf.mxu1  ;;  %v1577_v3 = vadd.f32 %v1576_v48, %v2612_v6  ;;  %v1603_v4 = vadd.f32 %v1602_v49, %v2614_v7 }
 0x103   : > { %v1345_v21 = vmax.f32 %v681_v16, 0.0  ;;  %v1347_v22 = vmax.f32 %v1034_v17, 0.0  ;;  %v1590_v15 = vadd.f32 %v1589_v58, %v2618_v12  ;;  %v1616_v16 = vadd.f32 %v1615_v59, %v2620_v13 }
 0x104   : > { %v683_v23 = vpop.f32.mrf.mxu0  ;;  %v1036_v24 = vpop.f32.mrf.mxu1  ;;  %v1578_v6 = vrot.slane %v1577_v3, 2 }
 0x105   : > { %v1621_v27 = vadd.f32 %v1345_v21, %v1341_v19  ;;  %v1647_v28 = vadd.f32 %v1347_v22, %v1343_v20  ;;  %v1346_v29 = vmax.f32 %v683_v23, 0.0  ;;  %v1348_v30 = vmax.f32 %v1036_v24, 0.0  ;;  %v2354_v19 = vld [vmem:[%s2463_s21 + $0xf8] sm:$0xff]  }
 0x106   : > { %v687_v31 = vpop.f32.mrf.mxu0  ;;  %2235 = vmatmul.mubr.msk.bf16.gmra.mxu0 %vm506_vm0, %v2352_v18  ;;  %v1040_v32 = vpop.f32.mrf.mxu1  ;;  %2267 = vmatmul.mubr.msk.bf16.gmra.mxu1 %vm506_vm0, %v2352_v18  ;;  %v1604_v23 = vrot.slane %v1603_v4, 2 }
 0x107   : > { %935 = vmatprep.mubr.bf16.mxu0 %v2379_v2  ;;  %1288 = vmatprep.mubr.bf16.mxu1 %v2379_v2  ;;  %v1634_v33 = vadd.f32 %v1346_v29, %v1342_v25  ;;  %v1660_v34 = vadd.f32 %v1348_v30, %v1344_v26  ;;  %v1349_v35 = vmax.f32 %v687_v31, 0.0  ;;  %v1351_v36 = vmax.f32 %v1040_v32, 0.0 }
 0x108   : > { %v689_v37 = vpop.f32.mrf.mxu0  ;;  %v1042_v38 = vpop.f32.mrf.mxu1  ;;  %v1591_v29 = vrot.slane %v1590_v15, 2  ;;  %v1617_v30 = vrot.slane %v1616_v16, 2 }
 0x109   : > { %v1622_v39 = vadd.f32 %v1621_v27, %v1349_v35  ;;  %v1648_v40 = vadd.f32 %v1647_v28, %v1351_v36  ;;  %v1350_v41 = vmax.f32 %v689_v37, 0.0  ;;  %v1352_v42 = vmax.f32 %v1042_v38, 0.0 }
 0x10a   : > { %v691_v43 = vpop.f32.mrf.mxu0  ;;  %v1044_v44 = vpop.f32.mrf.mxu1  ;;  %v1579_v35 = vadd.f32 %v1578_v6, %v1577_v3  ;;  %v1605_v36 = vadd.f32 %v1604_v23, %v1603_v4 }
 0x10b   : > { %v1353_v46 = vmax.f32 %v691_v43, 0.0  ;;  %v1355_v47 = vmax.f32 %v1044_v44, 0.0  ;;  %v1635_v50 = vadd.f32 %v1634_v33, %v1350_v41  ;;  %v1661_v51 = vadd.f32 %v1660_v34, %v1352_v42 }
 0x10c   : > { %v693_v52 = vpop.f32.mrf.mxu0  ;;  %v1046_v53 = vpop.f32.mrf.mxu1  ;;  %v1592_v43 = vadd.f32 %v1591_v29, %v1590_v15  ;;  %v1618_v44 = vadd.f32 %v1617_v30, %v1616_v16 }
 0x10d   : > { %v1623_v54 = vadd.f32 %v1622_v39, %v1353_v46  ;;  %v1649_v55 = vadd.f32 %v1648_v40, %v1355_v47  ;;  %v1354_v56 = vmax.f32 %v693_v52, 0.0  ;;  %v1356_v57 = vmax.f32 %v1046_v53, 0.0 }
 0x10e   : > { %v697_v60 = vpop.f32.mrf.mxu0  ;;  %2236 = vmatmul.mubr.msk.bf16.gmra.mxu0 %vm506_vm0, %v2353_v45  ;;  %v1050_v61 = vpop.f32.mrf.mxu1  ;;  %2268 = vmatmul.mubr.msk.bf16.gmra.mxu1 %vm506_vm0, %v2353_v45  ;;  %v1606_v52 = vrot.slane %v1605_v36, 1  ;;  %v1593_v59 = vrot.slane %v1592_v43, 1 }
 0x10f   : > { %v1636_v62 = vadd.f32 %v1635_v50, %v1354_v56  ;;  %v1662_v63 = vadd.f32 %v1661_v51, %v1356_v57  ;;  %v1357_v0 = vmax.f32 %v697_v60, 0.0  ;;  %v1359_v1 = vmax.f32 %v1050_v61, 0.0  ;;  %945 = vmatprep.mubr.bf16.mxu0 %v2379_v2  ;;  %1298 = vmatprep.mubr.bf16.mxu1 %v2379_v2 }
 0x110   : > { %v699_v5 = vpop.f32.mrf.mxu0  ;;  %v1052_v8 = vpop.f32.mrf.mxu1  ;;  %v1580_v51 = vrot.slane %v1579_v35, 1  ;;  %v1619_v60 = vrot.slane %v1618_v44, 1  ;;  %v1594_v16 = vadd.f32 %v1593_v59, %v1592_v43 }
 0x111   : > { %v1624_v9 = vadd.f32 %v1623_v54, %v1357_v0  ;;  %v1650_v10 = vadd.f32 %v1649_v55, %v1359_v1  ;;  %v1358_v11 = vmax.f32 %v699_v5, 0.0  ;;  %v1360_v14 = vmax.f32 %v1052_v8, 0.0 }
 0x112   : > { %v701_v17 = vpop.f32.mrf.mxu0  ;;  %v1054_v18 = vpop.f32.mrf.mxu1  ;;  %v1581_v4 = vadd.f32 %v1580_v51, %v1579_v35  ;;  %v1607_v5 = vadd.f32 %v1606_v52, %v1605_v36 }
 0x113   : > { %v1637_v20 = vadd.f32 %v1636_v62, %v1358_v11  ;;  %v1663_v21 = vadd.f32 %v1662_v63, %v1360_v14  ;;  %v1361_v2 = vmax.f32 %v701_v17, 0.0  ;;  %v1363_v22 = vmax.f32 %v1054_v18, 0.0 }
 0x114   : > { %v703_v7 = vpop.f32.mrf.mxu0  ;;  %v1056_v24 = vpop.f32.mrf.mxu1  ;;  %v1620_v17 = vadd.f32 %v1619_v60, %v1618_v44 }
 0x115   : > { %v1625_v25 = vadd.f32 %v1624_v9, %v1361_v2  ;;  %v1651_v26 = vadd.f32 %v1650_v10, %v1363_v22  ;;  %v1362_v27 = vmax.f32 %v703_v7, 0.0  ;;  %v1364_v28 = vmax.f32 %v1056_v24, 0.0 }
 0x116   : > { %v707_v12 = vpop.f32.mrf.mxu0  ;;  %2237 = vmatmul.mubr.msk.bf16.gmra.mxu0 %vm506_vm0, %v2354_v19  ;;  %v1060_v13 = vpop.f32.mrf.mxu1  ;;  %2269 = vmatmul.mubr.msk.bf16.gmra.mxu1 %vm506_vm0, %v2354_v19 }
 0x117   : > { %v1638_v31 = vadd.f32 %v1637_v20, %v1362_v27  ;;  %v1664_v32 = vadd.f32 %v1663_v21, %v1364_v28  ;;  %v1365_v33 = vmax.f32 %v707_v12, 0.0  ;;  %v1367_v34 = vmax.f32 %v1060_v13, 0.0 }
 0x118   : > { %v709_v37 = vpop.f32.mrf.mxu0  ;;  %v1062_v38 = vpop.f32.mrf.mxu1 }
 0x119   : > { %v1626_v39 = vadd.f32 %v1625_v25, %v1365_v33  ;;  %v1652_v40 = vadd.f32 %v1651_v26, %v1367_v34  ;;  %v1366_v41 = vmax.f32 %v709_v37, 0.0  ;;  %v1368_v42 = vmax.f32 %v1062_v38, 0.0 }
 0x11a   : > { %v711_v45 = vpop.f32.mrf.mxu0  ;;  %v1064_v46 = vpop.f32.mrf.mxu1 }
 0x11b   : > { %v1639_v47 = vadd.f32 %v1638_v31, %v1366_v41  ;;  %v1665_v48 = vadd.f32 %v1664_v32, %v1368_v42  ;;  %v1369_v49 = vmax.f32 %v711_v45, 0.0  ;;  %v1371_v50 = vmax.f32 %v1064_v46, 0.0 }
 0x11c   : > { %v713_v53 = vpop.f32.mrf.mxu0  ;;  %v1066_v54 = vpop.f32.mrf.mxu1 }
 0x11d   : > { %v1627_v55 = vadd.f32 %v1626_v39, %v1369_v49  ;;  %v1653_v56 = vadd.f32 %v1652_v40, %v1371_v50  ;;  %v1370_v57 = vmax.f32 %v713_v53, 0.0  ;;  %v1372_v58 = vmax.f32 %v1066_v54, 0.0 }
 0x11e   : > { %v717_v61 = vpop.f32.mrf.mxu0  ;;  %v1070_v62 = vpop.f32.mrf.mxu1 }
 0x11f   : > { %v1628_v63 = vrot.slane %v1627_v55, 4  ;;  %v1654_v0 = vrot.slane %v1653_v56, 4  ;;  %v1640_v1 = vadd.f32 %v1639_v47, %v1370_v57  ;;  %v1666_v3 = vadd.f32 %v1665_v48, %v1372_v58 }
 0x120   : > { %v719_v8 = vpop.f32.mrf.mxu0  ;;  %v1072_v9 = vpop.f32.mrf.mxu1  ;;  %v1373_v18 = vmax.f32 %v717_v61, 0.0  ;;  %v1375_v19 = vmax.f32 %v1070_v62, 0.0 }
 0x121   : > { %v1629_v10 = vadd.f32 %v1628_v63, %v1627_v55  ;;  %v1655_v11 = vadd.f32 %v1654_v0, %v1653_v56  ;;  %v1641_v14 = vrot.slane %v1640_v1, 4  ;;  %v1667_v15 = vrot.slane %v1666_v3, 4 }
 0x122   : > { %v721_v20 = vpop.f32.mrf.mxu0  ;;  %v1074_v21 = vpop.f32.mrf.mxu1  ;;  %v1374_v7 = vmax.f32 %v719_v8, 0.0  ;;  %v1376_v24 = vmax.f32 %v1072_v9, 0.0 }
 0x123   : > { %v1630_v2 = vrot.slane %v1629_v10, 2  ;;  %v1656_v22 = vrot.slane %v1655_v11, 2  ;;  %v1642_v6 = vadd.f32 %v1641_v14, %v1640_v1  ;;  %v1668_v23 = vadd.f32 %v1667_v15, %v1666_v3 }
 0x124   : > { %v1377_v25 = vmax.f32 %v721_v20, 0.0  ;;  %v1379_v26 = vmax.f32 %v1074_v21, 0.0  ;;  %v723_v27 = vpop.f32.mrf.mxu0  ;;  %v1076_v28 = vpop.f32.mrf.mxu1 }
 0x125   : > { %v1631_v29 = vadd.f32 %v1630_v2, %v1629_v10  ;;  %v1657_v30 = vadd.f32 %v1656_v22, %v1655_v11  ;;  %v1643_v12 = vrot.slane %v1642_v6, 2  ;;  %v1669_v13 = vrot.slane %v1668_v23, 2 }
 0x126   : > { %v1673_v31 = vadd.f32 %v1377_v25, %v1373_v18  ;;  %v1699_v32 = vadd.f32 %v1379_v26, %v1375_v19  ;;  %v1378_v33 = vmax.f32 %v723_v27, 0.0  ;;  %v1380_v34 = vmax.f32 %v1076_v28, 0.0  ;;  %v727_v35 = vpop.f32.mrf.mxu0  ;;  %v1080_v36 = vpop.f32.mrf.mxu1 }
 0x127   : > { %v1632_v37 = vrot.slane %v1631_v29, 1  ;;  %v1658_v38 = vrot.slane %v1657_v30, 1  ;;  %v1644_v39 = vadd.f32 %v1643_v12, %v1642_v6  ;;  %v1670_v40 = vadd.f32 %v1669_v13, %v1668_v23 }
 0x128   : > { %v1686_v41 = vadd.f32 %v1378_v33, %v1374_v7  ;;  %v1712_v42 = vadd.f32 %v1380_v34, %v1376_v24  ;;  %v1381_v43 = vmax.f32 %v727_v35, 0.0  ;;  %v1383_v44 = vmax.f32 %v1080_v36, 0.0  ;;  %v729_v45 = vpop.f32.mrf.mxu0  ;;  %v1082_v46 = vpop.f32.mrf.mxu1 }
 0x129   : > { %v1633_v47 = vadd.f32 %v1632_v37, %v1631_v29  ;;  %v1659_v48 = vadd.f32 %v1658_v38, %v1657_v30  ;;  %v1645_v49 = vrot.slane %v1644_v39, 1  ;;  %v1671_v50 = vrot.slane %v1670_v40, 1 }
 0x12a   : > { %v1674_v51 = vadd.f32 %v1673_v31, %v1381_v43  ;;  %v1700_v52 = vadd.f32 %v1699_v32, %v1383_v44  ;;  %v1382_v53 = vmax.f32 %v729_v45, 0.0  ;;  %v1384_v54 = vmax.f32 %v1082_v46, 0.0  ;;  %v731_v55 = vpop.f32.mrf.mxu0  ;;  %v1084_v56 = vpop.f32.mrf.mxu1 }
 0x12b   : > { %v2646_v57 = vsel %vm2017_vm1, %v1633_v47, %v1581_v4  ;;  %v2649_v58 = vsel %vm2017_vm1, %v1659_v48, %v1607_v5  ;;  %v1646_v59 = vadd.f32 %v1645_v49, %v1644_v39  ;;  %v1672_v60 = vadd.f32 %v1671_v50, %v1670_v40 }
 0x12c   : > { %v1687_v61 = vadd.f32 %v1686_v41, %v1382_v53  ;;  %v1713_v62 = vadd.f32 %v1712_v42, %v1384_v54  ;;  %v1385_v63 = vmax.f32 %v731_v55, 0.0  ;;  %v1387_v0 = vmax.f32 %v1084_v56, 0.0  ;;  %v733_v1 = vpop.f32.mrf.mxu0  ;;  %v1086_v3 = vpop.f32.mrf.mxu1 }
 0x12d   : > { %v2652_v8 = vsel %vm2017_vm1, %v1646_v59, %v1594_v16  ;;  %v2655_v9 = vsel %vm2017_vm1, %v1672_v60, %v1620_v17  ;;  %v1386_v10 = vmax.f32 %v733_v1, 0.0  ;;  %v1388_v4 = vmax.f32 %v1086_v3, 0.0 }
 0x12e   : > { %v1675_v11 = vadd.f32 %v1674_v51, %v1385_v63  ;;  %v1701_v14 = vadd.f32 %v1700_v52, %v1387_v0  ;;  %v737_v5 = vpop.f32.mrf.mxu0  ;;  %v1090_v15 = vpop.f32.mrf.mxu1 }
 0x12f   : > { %v1688_v18 = vadd.f32 %v1687_v61, %v1386_v10  ;;  %v1714_v19 = vadd.f32 %v1713_v62, %v1388_v4  ;;  %v1389_v20 = vmax.f32 %v737_v5, 0.0  ;;  %v1391_v21 = vmax.f32 %v1090_v15, 0.0 }
 0x130   : > { %v739_v2 = vpop.f32.mrf.mxu0  ;;  %v1092_v22 = vpop.f32.mrf.mxu1 }
 0x131   : > { %v1676_v6 = vadd.f32 %v1675_v11, %v1389_v20  ;;  %v1702_v23 = vadd.f32 %v1701_v14, %v1391_v21  ;;  %v1390_v7 = vmax.f32 %v739_v2, 0.0  ;;  %v1392_v16 = vmax.f32 %v1092_v22, 0.0 }
 0x132   : > { %v741_v24 = vpop.f32.mrf.mxu0  ;;  %v1094_v25 = vpop.f32.mrf.mxu1 }
 0x133   : > { %v1689_v17 = vadd.f32 %v1688_v18, %v1390_v7  ;;  %v1715_v26 = vadd.f32 %v1714_v19, %v1392_v16  ;;  %v1393_v27 = vmax.f32 %v741_v24, 0.0  ;;  %v1395_v28 = vmax.f32 %v1094_v25, 0.0 }
 0x134   : > { %v743_v29 = vpop.f32.mrf.mxu0  ;;  %v1096_v30 = vpop.f32.mrf.mxu1 }
 0x135   : > { %v1677_v12 = vadd.f32 %v1676_v6, %v1393_v27  ;;  %v1703_v13 = vadd.f32 %v1702_v23, %v1395_v28  ;;  %v1394_v31 = vmax.f32 %v743_v29, 0.0  ;;  %v1396_v32 = vmax.f32 %v1096_v30, 0.0 }
 0x136   : > { %v747_v33 = vpop.f32.mrf.mxu0  ;;  %v1100_v34 = vpop.f32.mrf.mxu1 }
 0x137   : > { %v1690_v35 = vadd.f32 %v1689_v17, %v1394_v31  ;;  %v1716_v36 = vadd.f32 %v1715_v26, %v1396_v32  ;;  %v1397_v37 = vmax.f32 %v747_v33, 0.0  ;;  %v1399_v38 = vmax.f32 %v1100_v34, 0.0 }
 0x138   : > { %v749_v39 = vpop.f32.mrf.mxu0  ;;  %v1102_v40 = vpop.f32.mrf.mxu1 }
 0x139   : > { %v1678_v41 = vadd.f32 %v1677_v12, %v1397_v37  ;;  %v1704_v42 = vadd.f32 %v1703_v13, %v1399_v38  ;;  %v1398_v43 = vmax.f32 %v749_v39, 0.0  ;;  %v1400_v44 = vmax.f32 %v1102_v40, 0.0 }
 0x13a   : > { %v751_v45 = vpop.f32.mrf.mxu0  ;;  %v1104_v46 = vpop.f32.mrf.mxu1 }
 0x13b   : > { %v1691_v47 = vadd.f32 %v1690_v35, %v1398_v43  ;;  %v1717_v48 = vadd.f32 %v1716_v36, %v1400_v44  ;;  %v1401_v49 = vmax.f32 %v751_v45, 0.0  ;;  %v1403_v50 = vmax.f32 %v1104_v46, 0.0 }
 0x13c   : > { %v753_v51 = vpop.f32.mrf.mxu0  ;;  %v1106_v52 = vpop.f32.mrf.mxu1 }
 0x13d   : > { %v1679_v53 = vadd.f32 %v1678_v41, %v1401_v49  ;;  %v1705_v54 = vadd.f32 %v1704_v42, %v1403_v50  ;;  %v1402_v55 = vmax.f32 %v753_v51, 0.0  ;;  %v1404_v56 = vmax.f32 %v1106_v52, 0.0 }
 0x13e   : > { %v757_v59 = vpop.f32.mrf.mxu0  ;;  %v1110_v60 = vpop.f32.mrf.mxu1 }
 0x13f   : > { %v1680_v61 = vrot.slane %v1679_v53, 4  ;;  %v1706_v62 = vrot.slane %v1705_v54, 4  ;;  %v1692_v63 = vadd.f32 %v1691_v47, %v1402_v55  ;;  %v1718_v0 = vadd.f32 %v1717_v48, %v1404_v56 }
 0x140   : > { %v759_v1 = vpop.f32.mrf.mxu0  ;;  %v1112_v3 = vpop.f32.mrf.mxu1  ;;  %v1405_v5 = vmax.f32 %v757_v59, 0.0  ;;  %v1407_v15 = vmax.f32 %v1110_v60, 0.0 }
 0x141   : > { %v1681_v10 = vadd.f32 %v1680_v61, %v1679_v53  ;;  %v1707_v4 = vadd.f32 %v1706_v62, %v1705_v54  ;;  %v1693_v11 = vrot.slane %v1692_v63, 4  ;;  %v1719_v14 = vrot.slane %v1718_v0, 4 }
 0x142   : > { %v761_v18 = vpop.f32.mrf.mxu0  ;;  %v1114_v19 = vpop.f32.mrf.mxu1  ;;  %v1406_v6 = vmax.f32 %v759_v1, 0.0  ;;  %v1408_v23 = vmax.f32 %v1112_v3, 0.0 }
 0x143   : > { %v1682_v20 = vrot.slane %v1681_v10, 2  ;;  %v1708_v21 = vrot.slane %v1707_v4, 2  ;;  %v1694_v2 = vadd.f32 %v1693_v11, %v1692_v63  ;;  %v1720_v22 = vadd.f32 %v1719_v14, %v1718_v0 }
 0x144   : > { %v1409_v7 = vmax.f32 %v761_v18, 0.0  ;;  %v1411_v16 = vmax.f32 %v1114_v19, 0.0  ;;  %v763_v24 = vpop.f32.mrf.mxu0  ;;  %v1116_v25 = vpop.f32.mrf.mxu1 }
 0x145   : > { %v1683_v17 = vadd.f32 %v1682_v20, %v1681_v10  ;;  %v1709_v26 = vadd.f32 %v1708_v21, %v1707_v4  ;;  %v1695_v27 = vrot.slane %v1694_v2, 2  ;;  %v1721_v28 = vrot.slane %v1720_v22, 2 }
 0x146   : > { %v1725_v29 = vadd.f32 %v1409_v7, %v1405_v5  ;;  %v1751_v30 = vadd.f32 %v1411_v16, %v1407_v15  ;;  %v1410_v12 = vmax.f32 %v763_v24, 0.0  ;;  %v1412_v13 = vmax.f32 %v1116_v25, 0.0  ;;  %v767_v31 = vpop.f32.mrf.mxu0  ;;  %v1120_v32 = vpop.f32.mrf.mxu1 }
 0x147   : > { %v1684_v33 = vrot.slane %v1683_v17, 1  ;;  %v1710_v34 = vrot.slane %v1709_v26, 1  ;;  %v1696_v35 = vadd.f32 %v1695_v27, %v1694_v2  ;;  %v1722_v36 = vadd.f32 %v1721_v28, %v1720_v22 }
 0x148   : > { %v1738_v37 = vadd.f32 %v1410_v12, %v1406_v6  ;;  %v1764_v38 = vadd.f32 %v1412_v13, %v1408_v23  ;;  %v1413_v39 = vmax.f32 %v767_v31, 0.0  ;;  %v1415_v40 = vmax.f32 %v1120_v32, 0.0  ;;  %v769_v41 = vpop.f32.mrf.mxu0  ;;  %v1122_v42 = vpop.f32.mrf.mxu1 }
 0x149   : > { %v1685_v43 = vadd.f32 %v1684_v33, %v1683_v17  ;;  %v1711_v44 = vadd.f32 %v1710_v34, %v1709_v26  ;;  %v1697_v45 = vrot.slane %v1696_v35, 1  ;;  %v1723_v46 = vrot.slane %v1722_v36, 1 }
 0x14a   : > { %v1726_v47 = vadd.f32 %v1725_v29, %v1413_v39  ;;  %v1752_v48 = vadd.f32 %v1751_v30, %v1415_v40  ;;  %v1414_v49 = vmax.f32 %v769_v41, 0.0  ;;  %v1416_v50 = vmax.f32 %v1122_v42, 0.0  ;;  %v771_v51 = vpop.f32.mrf.mxu0  ;;  %v1124_v52 = vpop.f32.mrf.mxu1 }
 0x14b   : > { %v2659_v53 = vsel %vm2019_vm2, %v1685_v43, %v2646_v57  ;;  %v2663_v54 = vsel %vm2019_vm2, %v1711_v44, %v2649_v58  ;;  %v1698_v55 = vadd.f32 %v1697_v45, %v1696_v35  ;;  %v1724_v56 = vadd.f32 %v1723_v46, %v1722_v36 }
 0x14c   : > { %v1739_v59 = vadd.f32 %v1738_v37, %v1414_v49  ;;  %v1765_v60 = vadd.f32 %v1764_v38, %v1416_v50  ;;  %v1417_v61 = vmax.f32 %v771_v51, 0.0  ;;  %v1419_v62 = vmax.f32 %v1124_v52, 0.0  ;;  %v773_v63 = vpop.f32.mrf.mxu0  ;;  %v1126_v0 = vpop.f32.mrf.mxu1 }
 0x14d   : > { %v2667_v1 = vsel %vm2019_vm2, %v1698_v55, %v2652_v8  ;;  %v2671_v57 = vsel %vm2019_vm2, %v1724_v56, %v2655_v9  ;;  %v1418_v3 = vmax.f32 %v773_v63, 0.0  ;;  %v1420_v10 = vmax.f32 %v1126_v0, 0.0 }
 0x14e   : > { %v1727_v58 = vadd.f32 %v1726_v47, %v1417_v61  ;;  %v1753_v4 = vadd.f32 %v1752_v48, %v1419_v62  ;;  %v777_v11 = vpop.f32.mrf.mxu0  ;;  %v1130_v14 = vpop.f32.mrf.mxu1 }
 0x14f   : > { %v1740_v5 = vadd.f32 %v1739_v59, %v1418_v3  ;;  %v1766_v15 = vadd.f32 %v1765_v60, %v1420_v10  ;;  %v1421_v18 = vmax.f32 %v777_v11, 0.0  ;;  %v1423_v19 = vmax.f32 %v1130_v14, 0.0 }
 0x150   : > { %v779_v20 = vpop.f32.mrf.mxu0  ;;  %v1132_v21 = vpop.f32.mrf.mxu1 }
 0x151   : > { %v1728_v2 = vadd.f32 %v1727_v58, %v1421_v18  ;;  %v1754_v22 = vadd.f32 %v1753_v4, %v1423_v19  ;;  %v1422_v8 = vmax.f32 %v779_v20, 0.0  ;;  %v1424_v6 = vmax.f32 %v1132_v21, 0.0 }
 0x152   : > { %v781_v23 = vpop.f32.mrf.mxu0  ;;  %v1134_v7 = vpop.f32.mrf.mxu1 }
 0x153   : > { %v1741_v9 = vadd.f32 %v1740_v5, %v1422_v8  ;;  %v1767_v16 = vadd.f32 %v1766_v15, %v1424_v6  ;;  %v1425_v24 = vmax.f32 %v781_v23, 0.0  ;;  %v1427_v25 = vmax.f32 %v1134_v7, 0.0 }
 0x154   : > { %v783_v17 = vpop.f32.mrf.mxu0  ;;  %v1136_v26 = vpop.f32.mrf.mxu1 }
 0x155   : > { %v1729_v27 = vadd.f32 %v1728_v2, %v1425_v24  ;;  %v1755_v28 = vadd.f32 %v1754_v22, %v1427_v25  ;;  %v1426_v29 = vmax.f32 %v783_v17, 0.0  ;;  %v1428_v30 = vmax.f32 %v1136_v26, 0.0 }
 0x156   : > { %v787_v12 = vpop.f32.mrf.mxu0  ;;  %v1140_v13 = vpop.f32.mrf.mxu1 }
 0x157   : > { %v1742_v31 = vadd.f32 %v1741_v9, %v1426_v29  ;;  %v1768_v32 = vadd.f32 %v1767_v16, %v1428_v30  ;;  %v1429_v33 = vmax.f32 %v787_v12, 0.0  ;;  %v1431_v34 = vmax.f32 %v1140_v13, 0.0 }
 0x158   : > { %v789_v35 = vpop.f32.mrf.mxu0  ;;  %v1142_v36 = vpop.f32.mrf.mxu1 }
 0x159   : > { %v1730_v37 = vadd.f32 %v1729_v27, %v1429_v33  ;;  %v1756_v38 = vadd.f32 %v1755_v28, %v1431_v34  ;;  %v1430_v39 = vmax.f32 %v789_v35, 0.0  ;;  %v1432_v40 = vmax.f32 %v1142_v36, 0.0 }
 0x15a   : > { %v791_v41 = vpop.f32.mrf.mxu0  ;;  %v1144_v42 = vpop.f32.mrf.mxu1 }
 0x15b   : > { %v1743_v43 = vadd.f32 %v1742_v31, %v1430_v39  ;;  %v1769_v44 = vadd.f32 %v1768_v32, %v1432_v40  ;;  %v1433_v45 = vmax.f32 %v791_v41, 0.0  ;;  %v1435_v46 = vmax.f32 %v1144_v42, 0.0 }
 0x15c   : > { %v793_v47 = vpop.f32.mrf.mxu0  ;;  %v1146_v48 = vpop.f32.mrf.mxu1 }
 0x15d   : > { %v1731_v49 = vadd.f32 %v1730_v37, %v1433_v45  ;;  %v1757_v50 = vadd.f32 %v1756_v38, %v1435_v46  ;;  %v1434_v51 = vmax.f32 %v793_v47, 0.0  ;;  %v1436_v52 = vmax.f32 %v1146_v48, 0.0 }
 0x15e   : > { %v797_v55 = vpop.f32.mrf.mxu0  ;;  %v1150_v56 = vpop.f32.mrf.mxu1 }
 0x15f   : > { %v1732_v59 = vrot.slane %v1731_v49, 4  ;;  %v1758_v60 = vrot.slane %v1757_v50, 4  ;;  %v1744_v61 = vadd.f32 %v1743_v43, %v1434_v51  ;;  %v1770_v62 = vadd.f32 %v1769_v44, %v1436_v52 }
 0x160   : > { %v799_v63 = vpop.f32.mrf.mxu0  ;;  %v1152_v0 = vpop.f32.mrf.mxu1  ;;  %v1437_v11 = vmax.f32 %v797_v55, 0.0  ;;  %v1439_v14 = vmax.f32 %v1150_v56, 0.0 }
 0x161   : > { %v1733_v3 = vadd.f32 %v1732_v59, %v1731_v49  ;;  %v1759_v10 = vadd.f32 %v1758_v60, %v1757_v50  ;;  %v1745_v58 = vrot.slane %v1744_v61, 4  ;;  %v1771_v4 = vrot.slane %v1770_v62, 4 }
 0x162   : > { %v801_v5 = vpop.f32.mrf.mxu0  ;;  %v1154_v15 = vpop.f32.mrf.mxu1  ;;  %v1438_v2 = vmax.f32 %v799_v63, 0.0  ;;  %v1440_v22 = vmax.f32 %v1152_v0, 0.0 }
 0x163   : > { %v1734_v18 = vrot.slane %v1733_v3, 2  ;;  %v1760_v19 = vrot.slane %v1759_v10, 2  ;;  %v1746_v20 = vadd.f32 %v1745_v58, %v1744_v61  ;;  %v1772_v21 = vadd.f32 %v1771_v4, %v1770_v62 }
 0x164   : > { %v1441_v8 = vmax.f32 %v801_v5, 0.0  ;;  %v1443_v6 = vmax.f32 %v1154_v15, 0.0  ;;  %v803_v23 = vpop.f32.mrf.mxu0  ;;  %v1156_v7 = vpop.f32.mrf.mxu1 }
 0x165   : > { %v1735_v9 = vadd.f32 %v1734_v18, %v1733_v3  ;;  %v1761_v16 = vadd.f32 %v1760_v19, %v1759_v10  ;;  %v1747_v24 = vrot.slane %v1746_v20, 2  ;;  %v1773_v25 = vrot.slane %v1772_v21, 2 }
 0x166   : > { %v1777_v17 = vadd.f32 %v1441_v8, %v1437_v11  ;;  %v1803_v26 = vadd.f32 %v1443_v6, %v1439_v14  ;;  %v1442_v27 = vmax.f32 %v803_v23, 0.0  ;;  %v1444_v28 = vmax.f32 %v1156_v7, 0.0  ;;  %v807_v29 = vpop.f32.mrf.mxu0  ;;  %v1160_v30 = vpop.f32.mrf.mxu1 }
 0x167   : > { %v1736_v12 = vrot.slane %v1735_v9, 1  ;;  %v1762_v13 = vrot.slane %v1761_v16, 1  ;;  %v1748_v31 = vadd.f32 %v1747_v24, %v1746_v20  ;;  %v1774_v32 = vadd.f32 %v1773_v25, %v1772_v21 }
 0x168   : > { %v1790_v33 = vadd.f32 %v1442_v27, %v1438_v2  ;;  %v1816_v34 = vadd.f32 %v1444_v28, %v1440_v22  ;;  %v1445_v35 = vmax.f32 %v807_v29, 0.0  ;;  %v1447_v36 = vmax.f32 %v1160_v30, 0.0  ;;  %v809_v37 = vpop.f32.mrf.mxu0  ;;  %v1162_v38 = vpop.f32.mrf.mxu1 }
 0x169   : > { %v1737_v39 = vadd.f32 %v1736_v12, %v1735_v9  ;;  %v1763_v40 = vadd.f32 %v1762_v13, %v1761_v16  ;;  %v1749_v41 = vrot.slane %v1748_v31, 1  ;;  %v1775_v42 = vrot.slane %v1774_v32, 1 }
 0x16a   : > { %v1778_v43 = vadd.f32 %v1777_v17, %v1445_v35  ;;  %v1804_v44 = vadd.f32 %v1803_v26, %v1447_v36  ;;  %v1446_v45 = vmax.f32 %v809_v37, 0.0  ;;  %v1448_v46 = vmax.f32 %v1162_v38, 0.0  ;;  %v811_v47 = vpop.f32.mrf.mxu0  ;;  %v1164_v48 = vpop.f32.mrf.mxu1 }
 0x16b   : > { %v2675_v49 = vsel %vm2021_vm3, %v1737_v39, %v2659_v53  ;;  %v2679_v50 = vsel %vm2021_vm3, %v1763_v40, %v2663_v54  ;;  %v1750_v51 = vadd.f32 %v1749_v41, %v1748_v31  ;;  %v1776_v52 = vadd.f32 %v1775_v42, %v1774_v32 }
 0x16c   : > { %v1791_v55 = vadd.f32 %v1790_v33, %v1446_v45  ;;  %v1817_v56 = vadd.f32 %v1816_v34, %v1448_v46  ;;  %v1449_v59 = vmax.f32 %v811_v47, 0.0  ;;  %v1451_v60 = vmax.f32 %v1164_v48, 0.0  ;;  %v813_v61 = vpop.f32.mrf.mxu0  ;;  %v1166_v62 = vpop.f32.mrf.mxu1 }
 0x16d   : > { %v2683_v63 = vsel %vm2021_vm3, %v1750_v51, %v2667_v1  ;;  %v2687_v53 = vsel %vm2021_vm3, %v1776_v52, %v2671_v57  ;;  %v1450_v0 = vmax.f32 %v813_v61, 0.0  ;;  %v1452_v3 = vmax.f32 %v1166_v62, 0.0 }
 0x16e   : > { %v1779_v54 = vadd.f32 %v1778_v43, %v1449_v59  ;;  %v1805_v10 = vadd.f32 %v1804_v44, %v1451_v60  ;;  %v817_v58 = vpop.f32.mrf.mxu0  ;;  %v1170_v4 = vpop.f32.mrf.mxu1 }
 0x16f   : > { %v1792_v11 = vadd.f32 %v1791_v55, %v1450_v0  ;;  %v1818_v14 = vadd.f32 %v1817_v56, %v1452_v3  ;;  %v1453_v5 = vmax.f32 %v817_v58, 0.0  ;;  %v1455_v15 = vmax.f32 %v1170_v4, 0.0 }
 0x170   : > { %v819_v18 = vpop.f32.mrf.mxu0  ;;  %v1172_v19 = vpop.f32.mrf.mxu1 }
 0x171   : > { %v1780_v20 = vadd.f32 %v1779_v54, %v1453_v5  ;;  %v1806_v21 = vadd.f32 %v1805_v10, %v1455_v15  ;;  %v1454_v1 = vmax.f32 %v819_v18, 0.0  ;;  %v1456_v2 = vmax.f32 %v1172_v19, 0.0 }
 0x172   : > { %v821_v22 = vpop.f32.mrf.mxu0  ;;  %v1174_v8 = vpop.f32.mrf.mxu1 }
 0x173   : > { %v1793_v57 = vadd.f32 %v1792_v11, %v1454_v1  ;;  %v1819_v6 = vadd.f32 %v1818_v14, %v1456_v2  ;;  %v1457_v23 = vmax.f32 %v821_v22, 0.0  ;;  %v1459_v7 = vmax.f32 %v1174_v8, 0.0 }
 0x174   : > { %v823_v9 = vpop.f32.mrf.mxu0  ;;  %v1176_v16 = vpop.f32.mrf.mxu1 }
 0x175   : > { %v1781_v24 = vadd.f32 %v1780_v20, %v1457_v23  ;;  %v1807_v25 = vadd.f32 %v1806_v21, %v1459_v7  ;;  %v1458_v17 = vmax.f32 %v823_v9, 0.0  ;;  %v1460_v26 = vmax.f32 %v1176_v16, 0.0 }
 0x176   : > { %v827_v27 = vpop.f32.mrf.mxu0  ;;  %v1180_v28 = vpop.f32.mrf.mxu1 }
 0x177   : > { %v1794_v29 = vadd.f32 %v1793_v57, %v1458_v17  ;;  %v1820_v30 = vadd.f32 %v1819_v6, %v1460_v26  ;;  %v1461_v12 = vmax.f32 %v827_v27, 0.0  ;;  %v1463_v13 = vmax.f32 %v1180_v28, 0.0 }
 0x178   : > { %v829_v31 = vpop.f32.mrf.mxu0  ;;  %v1182_v32 = vpop.f32.mrf.mxu1 }
 0x179   : > { %v1782_v33 = vadd.f32 %v1781_v24, %v1461_v12  ;;  %v1808_v34 = vadd.f32 %v1807_v25, %v1463_v13  ;;  %v1462_v35 = vmax.f32 %v829_v31, 0.0  ;;  %v1464_v36 = vmax.f32 %v1182_v32, 0.0 }
 0x17a   : > { %v831_v37 = vpop.f32.mrf.mxu0  ;;  %v1184_v38 = vpop.f32.mrf.mxu1 }
 0x17b   : > { %v1795_v39 = vadd.f32 %v1794_v29, %v1462_v35  ;;  %v1821_v40 = vadd.f32 %v1820_v30, %v1464_v36  ;;  %v1465_v41 = vmax.f32 %v831_v37, 0.0  ;;  %v1467_v42 = vmax.f32 %v1184_v38, 0.0 }
 0x17c   : > { %v833_v43 = vpop.f32.mrf.mxu0  ;;  %v1186_v44 = vpop.f32.mrf.mxu1 }
 0x17d   : > { %v1783_v45 = vadd.f32 %v1782_v33, %v1465_v41  ;;  %v1809_v46 = vadd.f32 %v1808_v34, %v1467_v42  ;;  %v1466_v47 = vmax.f32 %v833_v43, 0.0  ;;  %v1468_v48 = vmax.f32 %v1186_v44, 0.0 }
 0x17e   : > { %v837_v51 = vpop.f32.mrf.mxu0  ;;  %v1190_v52 = vpop.f32.mrf.mxu1 }
 0x17f   : > { %v1784_v55 = vrot.slane %v1783_v45, 4  ;;  %v1810_v56 = vrot.slane %v1809_v46, 4  ;;  %v1796_v59 = vadd.f32 %v1795_v39, %v1466_v47  ;;  %v1822_v60 = vadd.f32 %v1821_v40, %v1468_v48 }
 0x180   : > { %v839_v61 = vpop.f32.mrf.mxu0  ;;  %v1192_v62 = vpop.f32.mrf.mxu1  ;;  %v1469_v58 = vmax.f32 %v837_v51, 0.0  ;;  %v1471_v4 = vmax.f32 %v1190_v52, 0.0 }
 0x181   : > { %v1785_v0 = vadd.f32 %v1784_v55, %v1783_v45  ;;  %v1811_v3 = vadd.f32 %v1810_v56, %v1809_v46  ;;  %v1797_v54 = vrot.slane %v1796_v59, 4  ;;  %v1823_v10 = vrot.slane %v1822_v60, 4 }
 0x182   : > { %v841_v11 = vpop.f32.mrf.mxu0  ;;  %v1194_v14 = vpop.f32.mrf.mxu1  ;;  %v1470_v20 = vmax.f32 %v839_v61, 0.0  ;;  %v1472_v21 = vmax.f32 %v1192_v62, 0.0 }
 0x183   : > { %v1786_v5 = vrot.slane %v1785_v0, 2  ;;  %v1812_v15 = vrot.slane %v1811_v3, 2  ;;  %v1798_v18 = vadd.f32 %v1797_v54, %v1796_v59  ;;  %v1824_v19 = vadd.f32 %v1823_v10, %v1822_v60 }
 0x184   : > { %v1473_v1 = vmax.f32 %v841_v11, 0.0  ;;  %v1475_v2 = vmax.f32 %v1194_v14, 0.0  ;;  %v843_v22 = vpop.f32.mrf.mxu0  ;;  %v1196_v8 = vpop.f32.mrf.mxu1 }
 0x185   : > { %v1787_v57 = vadd.f32 %v1786_v5, %v1785_v0  ;;  %v1813_v6 = vadd.f32 %v1812_v15, %v1811_v3  ;;  %v1799_v23 = vrot.slane %v1798_v18, 2  ;;  %v1825_v7 = vrot.slane %v1824_v19, 2 }
 0x186   : > { %v1829_v9 = vadd.f32 %v1473_v1, %v1469_v58  ;;  %v1855_v16 = vadd.f32 %v1475_v2, %v1471_v4  ;;  %v1474_v24 = vmax.f32 %v843_v22, 0.0  ;;  %v1476_v25 = vmax.f32 %v1196_v8, 0.0  ;;  %v847_v17 = vpop.f32.mrf.mxu0  ;;  %v1200_v26 = vpop.f32.mrf.mxu1 }
 0x187   : > { %v1788_v27 = vrot.slane %v1787_v57, 1  ;;  %v1814_v28 = vrot.slane %v1813_v6, 1  ;;  %v1800_v29 = vadd.f32 %v1799_v23, %v1798_v18  ;;  %v1826_v30 = vadd.f32 %v1825_v7, %v1824_v19 }
 0x188   : > { %v1842_v12 = vadd.f32 %v1474_v24, %v1470_v20  ;;  %v1868_v13 = vadd.f32 %v1476_v25, %v1472_v21  ;;  %v1477_v31 = vmax.f32 %v847_v17, 0.0  ;;  %v1479_v32 = vmax.f32 %v1200_v26, 0.0  ;;  %v849_v33 = vpop.f32.mrf.mxu0  ;;  %v1202_v34 = vpop.f32.mrf.mxu1 }
 0x189   : > { %v1789_v35 = vadd.f32 %v1788_v27, %v1787_v57  ;;  %v1815_v36 = vadd.f32 %v1814_v28, %v1813_v6  ;;  %v1801_v37 = vrot.slane %v1800_v29, 1  ;;  %v1827_v38 = vrot.slane %v1826_v30, 1 }
 0x18a   : > { %v1830_v39 = vadd.f32 %v1829_v9, %v1477_v31  ;;  %v1856_v40 = vadd.f32 %v1855_v16, %v1479_v32  ;;  %v1478_v41 = vmax.f32 %v849_v33, 0.0  ;;  %v1480_v42 = vmax.f32 %v1202_v34, 0.0  ;;  %v851_v43 = vpop.f32.mrf.mxu0  ;;  %v1204_v44 = vpop.f32.mrf.mxu1 }
 0x18b   : > { %v2691_v45 = vsel %vm2023_vm4, %v1789_v35, %v2675_v49  ;;  %v2695_v46 = vsel %vm2023_vm4, %v1815_v36, %v2679_v50  ;;  %v1802_v47 = vadd.f32 %v1801_v37, %v1800_v29  ;;  %v1828_v48 = vadd.f32 %v1827_v38, %v1826_v30 }
 0x18c   : > { %v1843_v51 = vadd.f32 %v1842_v12, %v1478_v41  ;;  %v1869_v52 = vadd.f32 %v1868_v13, %v1480_v42  ;;  %v1481_v55 = vmax.f32 %v851_v43, 0.0  ;;  %v1483_v56 = vmax.f32 %v1204_v44, 0.0  ;;  %v853_v59 = vpop.f32.mrf.mxu0  ;;  %v1206_v60 = vpop.f32.mrf.mxu1 }
 0x18d   : > { %v2699_v61 = vsel %vm2023_vm4, %v1802_v47, %v2683_v63  ;;  %v2703_v49 = vsel %vm2023_vm4, %v1828_v48, %v2687_v53  ;;  %v1482_v62 = vmax.f32 %v853_v59, 0.0  ;;  %v1484_v0 = vmax.f32 %v1206_v60, 0.0 }
 0x18e   : > { %v1831_v50 = vadd.f32 %v1830_v39, %v1481_v55  ;;  %v1857_v3 = vadd.f32 %v1856_v40, %v1483_v56  ;;  %v857_v54 = vpop.f32.mrf.mxu0  ;;  %v1210_v10 = vpop.f32.mrf.mxu1 }
 0x18f   : > { %v1844_v58 = vadd.f32 %v1843_v51, %v1482_v62  ;;  %v1870_v4 = vadd.f32 %v1869_v52, %v1484_v0  ;;  %v1485_v11 = vmax.f32 %v857_v54, 0.0  ;;  %v1487_v14 = vmax.f32 %v1210_v10, 0.0 }
 0x190   : > { %v859_v5 = vpop.f32.mrf.mxu0  ;;  %v1212_v15 = vpop.f32.mrf.mxu1 }
 0x191   : > { %v1832_v18 = vadd.f32 %v1831_v50, %v1485_v11  ;;  %v1858_v19 = vadd.f32 %v1857_v3, %v1487_v14  ;;  %v1486_v63 = vmax.f32 %v859_v5, 0.0  ;;  %v1488_v20 = vmax.f32 %v1212_v15, 0.0 }
 0x192   : > { %v861_v21 = vpop.f32.mrf.mxu0  ;;  %v1214_v1 = vpop.f32.mrf.mxu1 }
 0x193   : > { %v1845_v53 = vadd.f32 %v1844_v58, %v1486_v63  ;;  %v1871_v2 = vadd.f32 %v1870_v4, %v1488_v20  ;;  %v1489_v22 = vmax.f32 %v861_v21, 0.0  ;;  %v1491_v8 = vmax.f32 %v1214_v1, 0.0 }
 0x194   : > { %v863_v57 = vpop.f32.mrf.mxu0  ;;  %v1216_v6 = vpop.f32.mrf.mxu1 }
 0x195   : > { %v1833_v23 = vadd.f32 %v1832_v18, %v1489_v22  ;;  %v1859_v7 = vadd.f32 %v1858_v19, %v1491_v8  ;;  %v1490_v9 = vmax.f32 %v863_v57, 0.0  ;;  %v1492_v16 = vmax.f32 %v1216_v6, 0.0 }
 0x196   : > { %v867_v24 = vpop.f32.mrf.mxu0  ;;  %v1220_v25 = vpop.f32.mrf.mxu1 }
 0x197   : > { %v1846_v17 = vadd.f32 %v1845_v53, %v1490_v9  ;;  %v1872_v26 = vadd.f32 %v1871_v2, %v1492_v16  ;;  %v1493_v27 = vmax.f32 %v867_v24, 0.0  ;;  %v1495_v28 = vmax.f32 %v1220_v25, 0.0 }
 0x198   : > { %v869_v29 = vpop.f32.mrf.mxu0  ;;  %v1222_v30 = vpop.f32.mrf.mxu1 }
 0x199   : > { %v1834_v12 = vadd.f32 %v1833_v23, %v1493_v27  ;;  %v1860_v13 = vadd.f32 %v1859_v7, %v1495_v28  ;;  %v1494_v31 = vmax.f32 %v869_v29, 0.0  ;;  %v1496_v32 = vmax.f32 %v1222_v30, 0.0 }
 0x19a   : > { %v871_v33 = vpop.f32.mrf.mxu0  ;;  %v1224_v34 = vpop.f32.mrf.mxu1 }
 0x19b   : > { %v1847_v35 = vadd.f32 %v1846_v17, %v1494_v31  ;;  %v1873_v36 = vadd.f32 %v1872_v26, %v1496_v32  ;;  %v1497_v37 = vmax.f32 %v871_v33, 0.0  ;;  %v1499_v38 = vmax.f32 %v1224_v34, 0.0 }
 0x19c   : > { %v873_v39 = vpop.f32.mrf.mxu0  ;;  %v1226_v40 = vpop.f32.mrf.mxu1 }
 0x19d   : > { %v1835_v41 = vadd.f32 %v1834_v12, %v1497_v37  ;;  %v1861_v42 = vadd.f32 %v1860_v13, %v1499_v38  ;;  %v1498_v43 = vmax.f32 %v873_v39, 0.0  ;;  %v1500_v44 = vmax.f32 %v1226_v40, 0.0 }
 0x19e   : > { %v2705_v47 = vpop.f32.mrf.mxu0  ;;  %v2707_v48 = vpop.f32.mrf.mxu1 }
 0x19f   : > { %v1836_v51 = vrot.slane %v1835_v41, 4  ;;  %v1862_v52 = vrot.slane %v1861_v42, 4  ;;  %v1848_v55 = vadd.f32 %v1847_v35, %v1498_v43  ;;  %v1874_v56 = vadd.f32 %v1873_v36, %v1500_v44 }
 0x1a0   : > { %v2709_v59 = vpop.f32.mrf.mxu0  ;;  %v2711_v60 = vpop.f32.mrf.mxu1  ;;  %v1501_v40 = vmax.f32 %v2705_v47, 0.0 }
 0x1a1   : > { %v1837_v62 = vadd.f32 %v1836_v51, %v1835_v41  ;;  %v1863_v0 = vadd.f32 %v1862_v52, %v1861_v42  ;;  %v1849_v50 = vrot.slane %v1848_v55, 4  ;;  %v1875_v3 = vrot.slane %v1874_v56, 4 }
 0x1a2   : > { %v881_v54 = vpop.f32.mrf.mxu0  ;;  %v1234_v10 = vpop.f32.mrf.mxu1 }
 0x1a3   : > { %v1838_v58 = vrot.slane %v1837_v62, 2  ;;  %v1864_v4 = vrot.slane %v1863_v0, 2  ;;  %v1850_v11 = vadd.f32 %v1849_v50, %v1848_v55  ;;  %v1876_v14 = vadd.f32 %v1875_v3, %v1874_v56 }
 0x1a4   : > { %v2713_v5 = vpop.f32.mrf.mxu0  ;;  %v2715_v15 = vpop.f32.mrf.mxu1  ;;  %v1505_v37 = vmax.f32 %v881_v54, 0.0  ;;  %v1507_v38 = vmax.f32 %v1234_v10, 0.0 }
 0x1a5   : > { %v1839_v18 = vadd.f32 %v1838_v58, %v1837_v62  ;;  %v1865_v19 = vadd.f32 %v1864_v4, %v1863_v0  ;;  %v1851_v63 = vrot.slane %v1850_v11, 2  ;;  %v1877_v20 = vrot.slane %v1876_v14, 2 }
 0x1a6   : > { %v887_v21 = vpop.f32.mrf.mxu0  ;;  %v1240_v1 = vpop.f32.mrf.mxu1  ;;  %v1881_v51 = vadd.f32 %v1505_v37, %v1501_v40  ;;  %v1506_v50 = vmax.f32 %v2713_v5, 0.0  ;;  %v1508_v3 = vmax.f32 %v2715_v15, 0.0 }
 0x1a7   : > { %v1840_v53 = vrot.slane %v1839_v18, 1  ;;  %v1866_v2 = vrot.slane %v1865_v19, 1  ;;  %v1852_v22 = vadd.f32 %v1851_v63, %v1850_v11  ;;  %v1878_v8 = vadd.f32 %v1877_v20, %v1876_v14 }
 0x1a8   : > { %v2717_v57 = vpop.f32.mrf.mxu0  ;;  %v2719_v6 = vpop.f32.mrf.mxu1  ;;  %v1509_v41 = vmax.f32 %v887_v21, 0.0  ;;  %v1511_v42 = vmax.f32 %v1240_v1, 0.0  ;;  %v1502_v11 = vmax.f32 %v2709_v59, 0.0  ;;  %v1504_v14 = vmax.f32 %v2711_v60, 0.0 }
 0x1a9   : > { %v1841_v23 = vadd.f32 %v1840_v53, %v1839_v18  ;;  %v1867_v7 = vadd.f32 %v1866_v2, %v1865_v19  ;;  %v1853_v9 = vrot.slane %v1852_v22, 1  ;;  %v1879_v16 = vrot.slane %v1878_v8, 1 }
 0x1aa   : > { %v891_v24 = vpop.f32.mrf.mxu0  ;;  %v1244_v25 = vpop.f32.mrf.mxu1  ;;  %v1882_v54 = vadd.f32 %v1881_v51, %v1509_v41  ;;  %v1510_v18 = vmax.f32 %v2717_v57, 0.0  ;;  %v1512_v19 = vmax.f32 %v2719_v6, 0.0  ;;  %v1894_v53 = vadd.f32 %v1506_v50, %v1502_v11 }
 0x1ab   : > { %v2723_v17 = vsel %vm2025_vm5, %v1841_v23, %v2691_v45  ;;  %v2727_v26 = vsel %vm2025_vm5, %v1867_v7, %v2695_v46  ;;  %v1854_v27 = vadd.f32 %v1853_v9, %v1852_v22  ;;  %v1880_v28 = vadd.f32 %v1879_v16, %v1878_v8 }
 0x1ac   : > { %v2729_v29 = vpop.f32.mrf.mxu0  ;;  %v2731_v30 = vpop.f32.mrf.mxu1  ;;  %v1513_v55 = vmax.f32 %v891_v24, 0.0  ;;  %v1515_v56 = vmax.f32 %v1244_v25, 0.0  ;;  %v1920_v2 = vadd.f32 %v1508_v3, %v1504_v14  ;;  %v1895_v9 = vadd.f32 %v1894_v53, %v1510_v18 }
 0x1ad   : > { %v2735_v12 = vsel %vm2025_vm5, %v1854_v27, %v2699_v61  ;;  %v2739_v13 = vsel %vm2025_vm5, %v1880_v28, %v2703_v49  ;;  %v1503_v49 = vmax.f32 %v2707_v48, 0.0  ;;  %v1514_v22 = vmax.f32 %v2729_v29, 0.0 }
 0x1ae   : > { %v897_v45 = vpop.f32.mrf.mxu0  ;;  %v1250_v31 = vpop.f32.mrf.mxu1  ;;  %v1883_v63 = vadd.f32 %v1882_v54, %v1513_v55  ;;  %v1516_v59 = vmax.f32 %v2731_v30, 0.0  ;;  %v1921_v16 = vadd.f32 %v1920_v2, %v1512_v19 }
 0x1af   : > { %v1907_v52 = vadd.f32 %v1507_v38, %v1503_v49  ;;  %v1517_v10 = vmax.f32 %v897_v45, 0.0  ;;  %v1519_v48 = vmax.f32 %v1250_v31, 0.0 }
 0x1b0   : > { %v2741_v32 = vpop.f32.mrf.mxu0  ;;  %v2743_v46 = vpop.f32.mrf.mxu1 }
 0x1b1   : > { %v1908_v47 = vadd.f32 %v1907_v52, %v1511_v42  ;;  %v1884_v8 = vadd.f32 %v1883_v63, %v1517_v10  ;;  %v1518_v24 = vmax.f32 %v2741_v32, 0.0  ;;  %v1520_v25 = vmax.f32 %v2743_v46, 0.0 }
 0x1b2   : > { %v901_v33 = vpop.f32.mrf.mxu0  ;;  %v1254_v34 = vpop.f32.mrf.mxu1 }
 0x1b3   : > { %v1909_v20 = vadd.f32 %v1908_v47, %v1515_v56  ;;  %v1521_v21 = vmax.f32 %v901_v33, 0.0  ;;  %v1523_v5 = vmax.f32 %v1254_v34, 0.0  ;;  %v1896_v33 = vadd.f32 %v1895_v9, %v1514_v22 }
 0x1b4   : > { %v2745_v35 = vpop.f32.mrf.mxu0  ;;  %v2747_v36 = vpop.f32.mrf.mxu1  ;;  %v1922_v34 = vadd.f32 %v1921_v16, %v1516_v59 }
 0x1b5   : > { %v1910_v60 = vadd.f32 %v1909_v20, %v1519_v48  ;;  %v1885_v27 = vadd.f32 %v1884_v8, %v1521_v21  ;;  %v1522_v37 = vmax.f32 %v2745_v35, 0.0  ;;  %v1524_v38 = vmax.f32 %v2747_v36, 0.0 }
 0x1b6   : > { %v907_v61 = vpop.f32.mrf.mxu0  ;;  %v1260_v39 = vpop.f32.mrf.mxu1  ;;  %v1897_v41 = vadd.f32 %v1896_v33, %v1518_v24  ;;  %v1923_v32 = vadd.f32 %v1922_v34, %v1520_v25 }
 0x1b7   : > { %v1525_v23 = vmax.f32 %v907_v61, 0.0  ;;  %v1527_v57 = vmax.f32 %v1260_v39, 0.0  ;;  %v1911_v28 = vadd.f32 %v1910_v60, %v1523_v5 }
 0x1b8   : > { %v2751_v43 = vpop.f32.mrf.mxu0  ;;  %v2753_v44 = vpop.f32.mrf.mxu1 }
 0x1b9   : > { %v1886_v61 = vadd.f32 %v1885_v27, %v1525_v23  ;;  %v1912_v39 = vadd.f32 %v1911_v28, %v1527_v57  ;;  %v1526_v46 = vmax.f32 %v2751_v43, 0.0  ;;  %v1528_v42 = vmax.f32 %v2753_v44, 0.0 }
 0x1ba   : > { %v911_v62 = vpop.f32.mrf.mxu0  ;;  %v1264_v0 = vpop.f32.mrf.mxu1 }
 0x1bb   : > { %v1529_v45 = vmax.f32 %v911_v62, 0.0  ;;  %v1531_v29 = vmax.f32 %v1264_v0, 0.0  ;;  %v1898_v62 = vadd.f32 %v1897_v41, %v1522_v37  ;;  %v1924_v0 = vadd.f32 %v1923_v32, %v1524_v38 }
 0x1bc   : > { %v913_v58 = vpop.f32.mrf.mxu0  ;;  %v1266_v4 = vpop.f32.mrf.mxu1 }
 0x1bd   : > { %v1887_v51 = vadd.f32 %v1886_v61, %v1529_v45  ;;  %v1913_v52 = vadd.f32 %v1912_v39, %v1531_v29  ;;  %v1530_v50 = vmax.f32 %v913_v58, 0.0  ;;  %v1532_v35 = vmax.f32 %v1266_v4, 0.0 }
 0x1be   : > { %v2761_v1 = vpop.f32.mrf.mxu0  ;;  %v2763_v15 = vpop.f32.mrf.mxu1  ;;  %v1899_v54 = vadd.f32 %v1898_v62, %v1526_v46  ;;  %v1925_v47 = vadd.f32 %v1924_v0, %v1528_v42 }
 0x1bf   : > { %v1888_v10 = vrot.slane %v1887_v51, 4  ;;  %v1914_v48 = vrot.slane %v1913_v52, 4  ;;  %v1533_v63 = vmax.f32 %v2761_v1, 0.0  ;;  %v1535_v20 = vmax.f32 %v2763_v15, 0.0 }
 0x1c0   : > { %v2767_v7 = vpop.f32.mrf.mxu0  ;;  %v2769_v6 = vpop.f32.mrf.mxu1  ;;  %v1900_v18 = vadd.f32 %v1899_v54, %v1530_v50  ;;  %v1926_v43 = vadd.f32 %v1925_v47, %v1532_v35 }
 0x1c1   : > { %v2779_v58 = vadd.f32 %v1888_v10, %v1887_v51  ;;  %v2781_v4 = vadd.f32 %v1914_v48, %v1913_v52  ;;  %v1534_v9 = vmax.f32 %v2767_v7, 0.0  ;;  %v1536_v1 = vmax.f32 %v2769_v6, 0.0 }
 0x1c2   : > { %v921_v31 = vpop.f32.mrf.mxu0  ;;  %v1274_v30 = vpop.f32.mrf.mxu1  ;;  %v1901_v8 = vrot.slane %v1900_v18, 4  ;;  %v1927_v60 = vrot.slane %v1926_v43, 4 }
 0x1c3   : > { %v1537_v21 = vmax.f32 %v921_v31, 0.0  ;;  %v1539_v5 = vmax.f32 %v1274_v30, 0.0 }
 0x1c4   : > { %v923_v40 = vpop.f32.mrf.mxu0  ;;  %v1276_v49 = vpop.f32.mrf.mxu1 }
 0x1c5   : > { %v1538_v53 = vmax.f32 %v923_v40, 0.0  ;;  %v1540_v2 = vmax.f32 %v1276_v49, 0.0  ;;  %v1933_v27 = vadd.f32 %v1537_v21, %v1533_v63  ;;  %v1959_v28 = vadd.f32 %v1539_v5, %v1535_v20 }
 0x1c6   : > { %v927_v55 = vpop.f32.mrf.mxu0  ;;  %v1280_v56 = vpop.f32.mrf.mxu1 }
 0x1c7   : > { %v1541_v23 = vmax.f32 %v927_v55, 0.0  ;;  %v1543_v57 = vmax.f32 %v1280_v56, 0.0  ;;  %v1946_v31 = vadd.f32 %v1538_v53, %v1534_v9  ;;  %v1972_v30 = vadd.f32 %v1540_v2, %v1536_v1 }
 0x1c8   : > { %v929_v3 = vpop.f32.mrf.mxu0  ;;  %v1282_v36 = vpop.f32.mrf.mxu1 }
 0x1c9   : > { %v1542_v16 = vmax.f32 %v929_v3, 0.0  ;;  %v1544_v15 = vmax.f32 %v1282_v36, 0.0  ;;  %v1934_v61 = vadd.f32 %v1933_v27, %v1541_v23  ;;  %v1960_v39 = vadd.f32 %v1959_v28, %v1543_v57 }
 0x1ca   : > { %v931_v11 = vpop.f32.mrf.mxu0  ;;  %v1284_v14 = vpop.f32.mrf.mxu1 }
 0x1cb   : > { %v1545_v45 = vmax.f32 %v931_v11, 0.0  ;;  %v1547_v29 = vmax.f32 %v1284_v14, 0.0  ;;  %v1947_v49 = vadd.f32 %v1946_v31, %v1542_v16  ;;  %v1973_v6 = vadd.f32 %v1972_v30, %v1544_v15 }
 0x1cc   : > { %v933_v19 = vpop.f32.mrf.mxu0  ;;  %v1286_v44 = vpop.f32.mrf.mxu1  ;;  %v1902_v11 = vadd.f32 %v1901_v8, %v1900_v18  ;;  %v1928_v14 = vadd.f32 %v1927_v60, %v1926_v43 }
 0x1cd   : > { %v1546_v33 = vmax.f32 %v933_v19, 0.0  ;;  %v1548_v34 = vmax.f32 %v1286_v44, 0.0  ;;  %v1935_v51 = vadd.f32 %v1934_v61, %v1545_v45  ;;  %v1961_v52 = vadd.f32 %v1960_v39, %v1547_v29 }
 0x1ce   : > { %v937_v22 = vpop.f32.mrf.mxu0  ;;  %v1290_v59 = vpop.f32.mrf.mxu1  ;;  %v1903_v8 = vrot.slane %v1902_v11, 2  ;;  %v1929_v60 = vrot.slane %v1928_v14, 2 }
 0x1cf   : > { %v1549_v40 = vmax.f32 %v937_v22, 0.0  ;;  %v1551_v7 = vmax.f32 %v1290_v59, 0.0  ;;  %v1948_v62 = vadd.f32 %v1947_v49, %v1546_v33  ;;  %v1974_v0 = vadd.f32 %v1973_v6, %v1548_v34 }
 0x1d0   : > { %v939_v24 = vpop.f32.mrf.mxu0  ;;  %v1292_v25 = vpop.f32.mrf.mxu1  ;;  %v1890_v22 = vrot.slane %v2779_v58, 2  ;;  %v1916_v59 = vrot.slane %v2781_v4, 2 }
 0x1d1   : > { %v1550_v41 = vmax.f32 %v939_v24, 0.0  ;;  %v1552_v32 = vmax.f32 %v1292_v25, 0.0  ;;  %v1936_v54 = vadd.f32 %v1935_v51, %v1549_v40  ;;  %v1962_v47 = vadd.f32 %v1961_v52, %v1551_v7 }
 0x1d2   : > { %v941_v37 = vpop.f32.mrf.mxu0  ;;  %v1294_v38 = vpop.f32.mrf.mxu1  ;;  %v1891_v33 = vadd.f32 %v1890_v22, %v2779_v58  ;;  %v1917_v34 = vadd.f32 %v1916_v59, %v2781_v4  ;;  %v1904_v40 = vadd.f32 %v1903_v8, %v1902_v11  ;;  %v1930_v7 = vadd.f32 %v1929_v60, %v1928_v14 }
 0x1d3   : > { %v1553_v55 = vmax.f32 %v941_v37, 0.0  ;;  %v1555_v56 = vmax.f32 %v1294_v38, 0.0  ;;  %v1949_v19 = vadd.f32 %v1948_v62, %v1550_v41  ;;  %v1975_v44 = vadd.f32 %v1974_v0, %v1552_v32 }
 0x1d4   : > { %v943_v46 = vpop.f32.mrf.mxu0  ;;  %v1296_v42 = vpop.f32.mrf.mxu1  ;;  %v1931_v4 = vrot.slane %v1930_v7, 1 }
 0x1d5   : > { %v1554_v50 = vmax.f32 %v943_v46, 0.0  ;;  %v1556_v35 = vmax.f32 %v1296_v42, 0.0  ;;  %v1937_v21 = vadd.f32 %v1936_v54, %v1553_v55  ;;  %v1963_v5 = vadd.f32 %v1962_v47, %v1555_v56 }
 0x1d6   : > { %v947_v3 = vpop.f32.mrf.mxu0  ;;  %v1300_v36 = vpop.f32.mrf.mxu1  ;;  %v1892_v46 = vrot.slane %v1891_v33, 1  ;;  %v1918_v42 = vrot.slane %v1917_v34, 1  ;;  %v1905_v56 = vrot.slane %v1904_v40, 1  ;;  %v1932_v14 = vadd.f32 %v1931_v4, %v1930_v7 }
 0x1d7   : > { %v1557_v10 = vmax.f32 %v947_v3, 0.0  ;;  %v1559_v48 = vmax.f32 %v1300_v36, 0.0  ;;  %v1950_v23 = vadd.f32 %v1949_v19, %v1554_v50  ;;  %v1976_v57 = vadd.f32 %v1975_v44, %v1556_v35 }
 0x1d8   : > { %v949_v63 = vpop.f32.mrf.mxu0  ;;  %v1302_v20 = vpop.f32.mrf.mxu1  ;;  %v1893_v3 = vadd.f32 %v1892_v46, %v1891_v33  ;;  %v1919_v36 = vadd.f32 %v1918_v42, %v1917_v34  ;;  %v1906_v11 = vadd.f32 %v1905_v56, %v1904_v40 }
 0x1d9   : > { %v1558_v53 = vmax.f32 %v949_v63, 0.0  ;;  %v1560_v2 = vmax.f32 %v1302_v20, 0.0  ;;  %v1938_v16 = vadd.f32 %v1937_v21, %v1557_v10  ;;  %v1964_v15 = vadd.f32 %v1963_v5, %v1559_v48 }
 0x1da   : > { %v951_v9 = vpop.f32.mrf.mxu0  ;;  %v1304_v1 = vpop.f32.mrf.mxu1  ;;  %v2028_v21 = vsel %vm2027_vm6, %v1893_v3, %v2723_v17  ;;  %v2043_v5 = vsel %vm2027_vm6, %v1919_v36, %v2727_v26 }
 0x1db   : > { %v1561_v18 = vmax.f32 %v951_v9, 0.0  ;;  %v1563_v43 = vmax.f32 %v1304_v1, 0.0  ;;  %v1951_v24 = vadd.f32 %v1950_v23, %v1558_v53  ;;  %v1977_v25 = vadd.f32 %v1976_v57, %v1560_v2 }
 0x1dc   : > { %v953_v27 = vpop.f32.mrf.mxu0  ;;  %v1306_v28 = vpop.f32.mrf.mxu1  ;;  %v2036_v23 = vsel %vm2027_vm6, %v1906_v11, %v2735_v12  ;;  %v2050_v57 = vsel %vm2027_vm6, %v1932_v14, %v2739_v13 }
 0x1dd   : > { %v1939_v45 = vadd.f32 %v1938_v16, %v1561_v18  ;;  %v1965_v29 = vadd.f32 %v1964_v15, %v1563_v43  ;;  %v1562_v31 = vmax.f32 %v953_v27, 0.0  ;;  %v1564_v30 = vmax.f32 %v1306_v28, 0.0 }
 0x1df   : > { %v1940_v37 = vrot.slane %v1939_v45, 4  ;;  %v1966_v38 = vrot.slane %v1965_v29, 4  ;;  %v1952_v61 = vadd.f32 %v1951_v24, %v1562_v31  ;;  %v1978_v39 = vadd.f32 %v1977_v25, %v1564_v30 }
 0x1e1   : > { %v1941_v49 = vadd.f32 %v1940_v37, %v1939_v45  ;;  %v1967_v6 = vadd.f32 %v1966_v38, %v1965_v29  ;;  %v1953_v41 = vrot.slane %v1952_v61, 4  ;;  %v1979_v32 = vrot.slane %v1978_v39, 4 }
 0x1e3   : > { %v1942_v51 = vrot.slane %v1941_v49, 2  ;;  %v1968_v52 = vrot.slane %v1967_v6, 2  ;;  %v1954_v55 = vadd.f32 %v1953_v41, %v1952_v61  ;;  %v1980_v58 = vadd.f32 %v1979_v32, %v1978_v39 }
 0x1e5   : > { %v1943_v62 = vadd.f32 %v1942_v51, %v1941_v49  ;;  %v1969_v0 = vadd.f32 %v1968_v52, %v1967_v6  ;;  %v1955_v50 = vrot.slane %v1954_v55, 2  ;;  %v1981_v35 = vrot.slane %v1980_v58, 2 }
 0x1e7   : > { %v1944_v54 = vrot.slane %v1943_v62, 1  ;;  %v1970_v47 = vrot.slane %v1969_v0, 1  ;;  %v1956_v10 = vadd.f32 %v1955_v50, %v1954_v55  ;;  %v1982_v48 = vadd.f32 %v1981_v35, %v1980_v58 }
 0x1e9   : > { %v1945_v19 = vadd.f32 %v1944_v54, %v1943_v62  ;;  %v1971_v44 = vadd.f32 %v1970_v47, %v1969_v0  ;;  %v1957_v63 = vrot.slane %v1956_v10, 1  ;;  %v1983_v20 = vrot.slane %v1982_v48, 1 }
 0x1eb   : > { %v2030_v53 = vsel %vm2029_vm7, %v1945_v19, %v2028_v21  ;;  %v2044_v2 = vsel %vm2029_vm7, %v1971_v44, %v2043_v5  ;;  %v1958_v22 = vadd.f32 %v1957_v63, %v1956_v10  ;;  %v1984_v59 = vadd.f32 %v1983_v20, %v1982_v48 }
 0x1ec   : > { %v2071_v17 = vmul.f32 0.015625, %v2030_v53  ;;  %v2073_v9 = vmul.f32 0.015625, %v2044_v2 }
 0x1ed   : > { %v2037_v26 = vsel %vm2029_vm7, %v1958_v22, %v2036_v23  ;;  %v2051_v1 = vsel %vm2029_vm7, %v1984_v59, %v2050_v57 }
 0x1ee   : > { %2075 = vst [vmem:[%s176_s29] sm:$0xff] %v2071_v17  ;;  %2077 = vst [vmem:[%s176_s29 + $0x10] sm:$0xff] %v2073_v9  ;;  %v2072_v16 = vmul.f32 0.015625, %v2037_v26  ;;  %v2074_v15 = vmul.f32 0.015625, %v2051_v1 }
 0x1f0   : > { %2076 = vst [vmem:[%s176_s29 + $0x8] sm:$0xff] %v2072_v16  ;;  %2078 = vst [vmem:[%s176_s29 + $0x18] sm:$0xff] %v2074_v15 }
 0x1f1 PF: > { %s12_s11 = sadd.s32 1, %s2377_s11   ;;  %s2818_s9 = smov %s2373_s10 }
 0x1f2   : > { %p9_p6 = scmp.ge.s32.totalorder %s12_s11, 4   ;;  %s2819_s10 = smov %s2821_s12 }
 0x1f4   :  { %11 = sbr.rel (!%p9_p6) target bundleno = 2 (0x2), region = 66 }

// kernel: detailview_forward.3
= control target key start
LH: loop header
LB: loop body
LE: loop exit
PB: predicated region body
PF: predicated region fallthrough
CT: control target
= control target key end

     0   :  { %v4060_v3 = vmov 0   ;;  %s9405_s0 = inlined_call_operand.vmem [shape: f32[2,4096], index: 0, kind: input, shape index: {}]   ;;  %s9406_s1 = inlined_call_operand.vmem [shape: f32[2,1], index: 1, kind: input, shape index: {}]   ;;  %s9407_s2 = inlined_call_operand.vmem [shape: f32[1,512], index: 2, kind: input, shape index: {}]   ;;  %s9408_s3 = inlined_call_operand.vmem [shape: f32[1,512], index: 3, kind: input, shape index: {}]   ;;  %s9409_s4 = inlined_call_operand.vmem [shape: f32[512,512], index: 4, kind: input, shape index: {}]   ;;  %s9410_s5 = inlined_call_operand.vmem [shape: f32[1,512], index: 5, kind: input, shape index: {}]   ;;  %s9411_s6 = inlined_call_operand.vmem [shape: f32[512,512], index: 6, kind: input, shape index: {}]   ;;  %s9412_s7 = inlined_call_operand.vmem [shape: f32[1,512], index: 7, kind: input, shape index: {}]   ;;  %s9413_s8 = inlined_call_operand.vmem [shape: f32[4096,256], index: 8, kind: input, shape index: {}]   ;;  %s9414_s9 = inlined_call_operand.vmem [shape: f32[512,256], index: 9, kind: input, shape index: {}]   ;;  %s9415_s10 = inlined_call_operand.vmem [shape: f32[1,256], index: 10, kind: input, shape index: {}]   ;;  %s9416_s11 = inlined_call_operand.vmem [shape: f32[256,10], index: 11, kind: input, shape index: {}]   ;;  %s9417_s12 = inlined_call_operand.vmem [shape: f32[1,10], index: 12, kind: input, shape index: {}]   ;;  %s9418_s13 = inlined_call_operand.hbm [shape: f32[2,10], index: 13, kind: output, shape index: {}]  }
   0x1   :  { %v45_v0 = vld [vmem:[%s9406_s1] sm:$0x3]  ;;  %v168_v1 = vld [vmem:[%s9409_s4 + $0x1e8] sm:$0xff]  ;;  %4029 = vset.pattern.permute.xlu0 %v4060_v3 }
   0x2   :  { %v296_v2 = vld [vmem:[%s9409_s4 + $0x5e8] sm:$0xff]  ;;  %385 = vmatprep.subr.mxu0 %v168_v1  ;;  %v167_v4 = vld [vmem:[%s9409_s4 + $0x1e0] sm:$0xff]  ;;  %49 = vperm.xlu0 %4029, %v45_v0  }
   0x3   :  { %v295_v5 = vld [vmem:[%s9409_s4 + $0x5e0] sm:$0xff]  ;;  %v164_v6 = vld [vmem:[%s9409_s4 + $0x1c8] sm:$0xff]  ;;  %456 = vmatprep.subr.mxu1 %v296_v2  ;;  %386 = vmatpush1.msra.mxu0 %v167_v4 }
   0x4   :  { %v292_v7 = vld [vmem:[%s9409_s4 + $0x5c8] sm:$0xff]  ;;  %v163_v8 = vld [vmem:[%s9409_s4 + $0x1c0] sm:$0xff]  ;;  %457 = vmatpush1.msra.mxu1 %v295_v5  ;;  %387 = vmatprep.subr.mxu0 %v164_v6 }
   0x5   :  { %v291_v9 = vld [vmem:[%s9409_s4 + $0x5c0] sm:$0xff]  ;;  %v160_v10 = vld [vmem:[%s9409_s4 + $0x1a8] sm:$0xff]  ;;  %458 = vmatprep.subr.mxu1 %v292_v7  ;;  %388 = vmatpush1.msra.mxu0 %v163_v8 }
   0x6   :  { %v288_v11 = vld [vmem:[%s9409_s4 + $0x5a8] sm:$0xff]  ;;  %v159_v12 = vld [vmem:[%s9409_s4 + $0x1a0] sm:$0xff]  ;;  %459 = vmatpush1.msra.mxu1 %v291_v9  ;;  %389 = vmatprep.subr.mxu0 %v160_v10 }
   0x7   :  { %v287_v13 = vld [vmem:[%s9409_s4 + $0x5a0] sm:$0xff]  ;;  %v156_v14 = vld [vmem:[%s9409_s4 + $0x188] sm:$0xff]  ;;  %460 = vmatprep.subr.mxu1 %v288_v11  ;;  %390 = vmatpush1.msra.mxu0 %v159_v12 }
   0x8   :  { %v284_v15 = vld [vmem:[%s9409_s4 + $0x588] sm:$0xff]  ;;  %v155_v16 = vld [vmem:[%s9409_s4 + $0x180] sm:$0xff]  ;;  %461 = vmatpush1.msra.mxu1 %v287_v13  ;;  %391 = vmatprep.subr.mxu0 %v156_v14 }
   0x9   :  { %v283_v17 = vld [vmem:[%s9409_s4 + $0x580] sm:$0xff]  ;;  %v152_v18 = vld [vmem:[%s9409_s4 + $0x168] sm:$0xff]  ;;  %462 = vmatprep.subr.mxu1 %v284_v15  ;;  %392 = vmatpush1.msra.mxu0 %v155_v16 }
   0xa   :  { %v280_v19 = vld [vmem:[%s9409_s4 + $0x568] sm:$0xff]  ;;  %v151_v20 = vld [vmem:[%s9409_s4 + $0x160] sm:$0xff]  ;;  %463 = vmatpush1.msra.mxu1 %v283_v17  ;;  %393 = vmatprep.subr.mxu0 %v152_v18 }
   0xb   :  { %v279_v21 = vld [vmem:[%s9409_s4 + $0x560] sm:$0xff]  ;;  %v148_v22 = vld [vmem:[%s9409_s4 + $0x148] sm:$0xff]  ;;  %464 = vmatprep.subr.mxu1 %v280_v19  ;;  %394 = vmatpush1.msra.mxu0 %v151_v20 }
   0xc   :  { %v276_v23 = vld [vmem:[%s9409_s4 + $0x548] sm:$0xff]  ;;  %v147_v24 = vld [vmem:[%s9409_s4 + $0x140] sm:$0xff]  ;;  %465 = vmatpush1.msra.mxu1 %v279_v21  ;;  %395 = vmatprep.subr.mxu0 %v148_v22 }
   0xd   :  { %v275_v25 = vld [vmem:[%s9409_s4 + $0x540] sm:$0xff]  ;;  %v144_v26 = vld [vmem:[%s9409_s4 + $0x128] sm:$0xff]  ;;  %466 = vmatprep.subr.mxu1 %v276_v23  ;;  %396 = vmatpush1.msra.mxu0 %v147_v24 }
   0xe   :  { %v272_v27 = vld [vmem:[%s9409_s4 + $0x528] sm:$0xff]  ;;  %v143_v28 = vld [vmem:[%s9409_s4 + $0x120] sm:$0xff]  ;;  %467 = vmatpush1.msra.mxu1 %v275_v25  ;;  %397 = vmatprep.subr.mxu0 %v144_v26 }
   0xf   :  { %v271_v29 = vld [vmem:[%s9409_s4 + $0x520] sm:$0xff]  ;;  %v140_v30 = vld [vmem:[%s9409_s4 + $0x108] sm:$0xff]  ;;  %468 = vmatprep.subr.mxu1 %v272_v27  ;;  %398 = vmatpush1.msra.mxu0 %v143_v28 }
  0x10   :  { %v268_v31 = vld [vmem:[%s9409_s4 + $0x508] sm:$0xff]  ;;  %v139_v32 = vld [vmem:[%s9409_s4 + $0x100] sm:$0xff]  ;;  %469 = vmatpush1.msra.mxu1 %v271_v29  ;;  %399 = vmatprep.subr.mxu0 %v140_v30 }
  0x11   :  { %v267_v33 = vld [vmem:[%s9409_s4 + $0x500] sm:$0xff]  ;;  %v136_v34 = vld [vmem:[%s9409_s4 + $0xe8] sm:$0xff]  ;;  %470 = vmatprep.subr.mxu1 %v268_v31  ;;  %400 = vmatpush1.msra.mxu0 %v139_v32 }
  0x12   :  { %v264_v35 = vld [vmem:[%s9409_s4 + $0x4e8] sm:$0xff]  ;;  %v135_v36 = vld [vmem:[%s9409_s4 + $0xe0] sm:$0xff]  ;;  %471 = vmatpush1.msra.mxu1 %v267_v33  ;;  %401 = vmatprep.subr.mxu0 %v136_v34 }
  0x13   :  { %v263_v37 = vld [vmem:[%s9409_s4 + $0x4e0] sm:$0xff]  ;;  %v132_v38 = vld [vmem:[%s9409_s4 + $0xc8] sm:$0xff]  ;;  %472 = vmatprep.subr.mxu1 %v264_v35  ;;  %402 = vmatpush1.msra.mxu0 %v135_v36 }
  0x14   :  { %v260_v39 = vld [vmem:[%s9409_s4 + $0x4c8] sm:$0xff]  ;;  %v131_v40 = vld [vmem:[%s9409_s4 + $0xc0] sm:$0xff]  ;;  %473 = vmatpush1.msra.mxu1 %v263_v37  ;;  %403 = vmatprep.subr.mxu0 %v132_v38 }
  0x15   :  { %v259_v41 = vld [vmem:[%s9409_s4 + $0x4c0] sm:$0xff]  ;;  %v128_v42 = vld [vmem:[%s9409_s4 + $0xa8] sm:$0xff]  ;;  %474 = vmatprep.subr.mxu1 %v260_v39  ;;  %404 = vmatpush1.msra.mxu0 %v131_v40 }
  0x16   :  { %v256_v43 = vld [vmem:[%s9409_s4 + $0x4a8] sm:$0xff]  ;;  %v127_v44 = vld [vmem:[%s9409_s4 + $0xa0] sm:$0xff]  ;;  %475 = vmatpush1.msra.mxu1 %v259_v41  ;;  %405 = vmatprep.subr.mxu0 %v128_v42 }
  0x17   :  { %v255_v45 = vld [vmem:[%s9409_s4 + $0x4a0] sm:$0xff]  ;;  %v124_v46 = vld [vmem:[%s9409_s4 + $0x88] sm:$0xff]  ;;  %476 = vmatprep.subr.mxu1 %v256_v43  ;;  %406 = vmatpush1.msra.mxu0 %v127_v44 }
  0x18   :  { %v252_v47 = vld [vmem:[%s9409_s4 + $0x488] sm:$0xff]  ;;  %v123_v48 = vld [vmem:[%s9409_s4 + $0x80] sm:$0xff]  ;;  %477 = vmatpush1.msra.mxu1 %v255_v45  ;;  %407 = vmatprep.subr.mxu0 %v124_v46 }
  0x19   :  { %v251_v49 = vld [vmem:[%s9409_s4 + $0x480] sm:$0xff]  ;;  %v120_v50 = vld [vmem:[%s9409_s4 + $0x68] sm:$0xff]  ;;  %478 = vmatprep.subr.mxu1 %v252_v47  ;;  %408 = vmatpush1.msra.mxu0 %v123_v48 }
  0x1a   :  { %v248_v51 = vld [vmem:[%s9409_s4 + $0x468] sm:$0xff]  ;;  %v119_v52 = vld [vmem:[%s9409_s4 + $0x60] sm:$0xff]  ;;  %479 = vmatpush1.msra.mxu1 %v251_v49  ;;  %409 = vmatprep.subr.mxu0 %v120_v50 }
  0x1b   :  { %v247_v53 = vld [vmem:[%s9409_s4 + $0x460] sm:$0xff]  ;;  %v116_v54 = vld [vmem:[%s9409_s4 + $0x48] sm:$0xff]  ;;  %480 = vmatprep.subr.mxu1 %v248_v51  ;;  %410 = vmatpush1.msra.mxu0 %v119_v52 }
  0x1c   :  { %v244_v55 = vld [vmem:[%s9409_s4 + $0x448] sm:$0xff]  ;;  %v115_v56 = vld [vmem:[%s9409_s4 + $0x40] sm:$0xff]  ;;  %481 = vmatpush1.msra.mxu1 %v247_v53  ;;  %411 = vmatprep.subr.mxu0 %v116_v54 }
  0x1d   :  { %v243_v57 = vld [vmem:[%s9409_s4 + $0x440] sm:$0xff]  ;;  %v112_v58 = vld [vmem:[%s9409_s4 + $0x28] sm:$0xff]  ;;  %482 = vmatprep.subr.mxu1 %v244_v55  ;;  %412 = vmatpush1.msra.mxu0 %v115_v56 }
  0x1e   :  { %v240_v59 = vld [vmem:[%s9409_s4 + $0x428] sm:$0xff]  ;;  %v111_v60 = vld [vmem:[%s9409_s4 + $0x20] sm:$0xff]  ;;  %483 = vmatpush1.msra.mxu1 %v243_v57  ;;  %413 = vmatprep.subr.mxu0 %v112_v58 }
  0x1f   :  { %v239_v61 = vld [vmem:[%s9409_s4 + $0x420] sm:$0xff]  ;;  %v108_v62 = vld [vmem:[%s9409_s4 + $0x8] sm:$0xff]  ;;  %484 = vmatprep.subr.mxu1 %v240_v59  ;;  %414 = vmatpush1.msra.mxu0 %v111_v60 }
  0x20   :  { %v236_v63 = vld [vmem:[%s9409_s4 + $0x408] sm:$0xff]  ;;  %v107_v0 = vld [vmem:[%s9409_s4] sm:$0xff]  ;;  %485 = vmatpush1.msra.mxu1 %v239_v61  ;;  %415 = vmatprep.subr.mxu0 %v108_v62 }
  0x21   :  { %v235_v1 = vld [vmem:[%s9409_s4 + $0x400] sm:$0xff]  ;;  %v232_v2 = vld [vmem:[%s9409_s4 + $0x3e8] sm:$0xff]  ;;  %486 = vmatprep.subr.mxu1 %v236_v63  ;;  %416 = vmatpush1.msra.mxu0 %v107_v0 }
  0x22   :  { %v360_v3 = vld [vmem:[%s9409_s4 + $0x7e8] sm:$0xff]  ;;  %v231_v4 = vld [vmem:[%s9409_s4 + $0x3e0] sm:$0xff]  ;;  %487 = vmatpush1.msra.mxu1 %v235_v1  ;;  %417 = vmatprep.subr.mxu0 %v232_v2  ;;  %v170_v2 = vld [vmem:[%s9409_s4 + $0x1f8] sm:$0xff] }
  0x23   :  { %v359_v5 = vld [vmem:[%s9409_s4 + $0x7e0] sm:$0xff]  ;;  %v228_v6 = vld [vmem:[%s9409_s4 + $0x3c8] sm:$0xff]  ;;  %488 = vmatprep.subr.mxu1 %v360_v3  ;;  %418 = vmatpush2.msra.mxu0 %v231_v4  ;;  %v298_v3 = vld [vmem:[%s9409_s4 + $0x5f8] sm:$0xff] }
  0x24   :  { %v356_v7 = vld [vmem:[%s9409_s4 + $0x7c8] sm:$0xff]  ;;  %v227_v8 = vld [vmem:[%s9409_s4 + $0x3c0] sm:$0xff]  ;;  %489 = vmatpush2.msra.mxu1 %v359_v5  ;;  %419 = vmatprep.subr.mxu0 %v228_v6 }
  0x25   :  { %v355_v9 = vld [vmem:[%s9409_s4 + $0x7c0] sm:$0xff]  ;;  %v224_v10 = vld [vmem:[%s9409_s4 + $0x3a8] sm:$0xff]  ;;  %490 = vmatprep.subr.mxu1 %v356_v7  ;;  %420 = vmatpush2.msra.mxu0 %v227_v8 }
  0x26   :  { %v352_v11 = vld [vmem:[%s9409_s4 + $0x7a8] sm:$0xff]  ;;  %v223_v12 = vld [vmem:[%s9409_s4 + $0x3a0] sm:$0xff]  ;;  %491 = vmatpush2.msra.mxu1 %v355_v9  ;;  %421 = vmatprep.subr.mxu0 %v224_v10 }
  0x27   :  { %v351_v13 = vld [vmem:[%s9409_s4 + $0x7a0] sm:$0xff]  ;;  %v220_v14 = vld [vmem:[%s9409_s4 + $0x388] sm:$0xff]  ;;  %492 = vmatprep.subr.mxu1 %v352_v11  ;;  %422 = vmatpush2.msra.mxu0 %v223_v12 }
  0x28   :  { %v348_v15 = vld [vmem:[%s9409_s4 + $0x788] sm:$0xff]  ;;  %v219_v16 = vld [vmem:[%s9409_s4 + $0x380] sm:$0xff]  ;;  %493 = vmatpush2.msra.mxu1 %v351_v13  ;;  %423 = vmatprep.subr.mxu0 %v220_v14 }
  0x29   :  { %v347_v17 = vld [vmem:[%s9409_s4 + $0x780] sm:$0xff]  ;;  %v216_v18 = vld [vmem:[%s9409_s4 + $0x368] sm:$0xff]  ;;  %494 = vmatprep.subr.mxu1 %v348_v15  ;;  %424 = vmatpush2.msra.mxu0 %v219_v16 }
  0x2a   :  { %v344_v19 = vld [vmem:[%s9409_s4 + $0x768] sm:$0xff]  ;;  %v215_v20 = vld [vmem:[%s9409_s4 + $0x360] sm:$0xff]  ;;  %495 = vmatpush2.msra.mxu1 %v347_v17  ;;  %425 = vmatprep.subr.mxu0 %v216_v18 }
  0x2b   :  { %v343_v21 = vld [vmem:[%s9409_s4 + $0x760] sm:$0xff]  ;;  %v212_v22 = vld [vmem:[%s9409_s4 + $0x348] sm:$0xff]  ;;  %496 = vmatprep.subr.mxu1 %v344_v19  ;;  %426 = vmatpush2.msra.mxu0 %v215_v20 }
  0x2c   :  { %v340_v23 = vld [vmem:[%s9409_s4 + $0x748] sm:$0xff]  ;;  %v211_v24 = vld [vmem:[%s9409_s4 + $0x340] sm:$0xff]  ;;  %497 = vmatpush2.msra.mxu1 %v343_v21  ;;  %427 = vmatprep.subr.mxu0 %v212_v22 }
  0x2d   :  { %v339_v25 = vld [vmem:[%s9409_s4 + $0x740] sm:$0xff]  ;;  %v208_v26 = vld [vmem:[%s9409_s4 + $0x328] sm:$0xff]  ;;  %498 = vmatprep.subr.mxu1 %v340_v23  ;;  %428 = vmatpush2.msra.mxu0 %v211_v24 }
  0x2e   :  { %v336_v27 = vld [vmem:[%s9409_s4 + $0x728] sm:$0xff]  ;;  %v207_v28 = vld [vmem:[%s9409_s4 + $0x320] sm:$0xff]  ;;  %499 = vmatpush2.msra.mxu1 %v339_v25  ;;  %429 = vmatprep.subr.mxu0 %v208_v26 }
  0x2f   :  { %v335_v29 = vld [vmem:[%s9409_s4 + $0x720] sm:$0xff]  ;;  %v204_v30 = vld [vmem:[%s9409_s4 + $0x308] sm:$0xff]  ;;  %500 = vmatprep.subr.mxu1 %v336_v27  ;;  %430 = vmatpush2.msra.mxu0 %v207_v28 }
  0x30   :  { %v332_v31 = vld [vmem:[%s9409_s4 + $0x708] sm:$0xff]  ;;  %v203_v32 = vld [vmem:[%s9409_s4 + $0x300] sm:$0xff]  ;;  %501 = vmatpush2.msra.mxu1 %v335_v29  ;;  %431 = vmatprep.subr.mxu0 %v204_v30 }
  0x31   :  { %v331_v33 = vld [vmem:[%s9409_s4 + $0x700] sm:$0xff]  ;;  %v200_v34 = vld [vmem:[%s9409_s4 + $0x2e8] sm:$0xff]  ;;  %502 = vmatprep.subr.mxu1 %v332_v31  ;;  %432 = vmatpush2.msra.mxu0 %v203_v32 }
  0x32   :  { %v328_v35 = vld [vmem:[%s9409_s4 + $0x6e8] sm:$0xff]  ;;  %v199_v36 = vld [vmem:[%s9409_s4 + $0x2e0] sm:$0xff]  ;;  %503 = vmatpush2.msra.mxu1 %v331_v33  ;;  %433 = vmatprep.subr.mxu0 %v200_v34 }
  0x33   :  { %v327_v37 = vld [vmem:[%s9409_s4 + $0x6e0] sm:$0xff]  ;;  %v196_v38 = vld [vmem:[%s9409_s4 + $0x2c8] sm:$0xff]  ;;  %504 = vmatprep.subr.mxu1 %v328_v35  ;;  %434 = vmatpush2.msra.mxu0 %v199_v36 }
  0x34   :  { %v324_v39 = vld [vmem:[%s9409_s4 + $0x6c8] sm:$0xff]  ;;  %v195_v40 = vld [vmem:[%s9409_s4 + $0x2c0] sm:$0xff]  ;;  %505 = vmatpush2.msra.mxu1 %v327_v37  ;;  %435 = vmatprep.subr.mxu0 %v196_v38 }
  0x35   :  { %v323_v41 = vld [vmem:[%s9409_s4 + $0x6c0] sm:$0xff]  ;;  %v192_v42 = vld [vmem:[%s9409_s4 + $0x2a8] sm:$0xff]  ;;  %506 = vmatprep.subr.mxu1 %v324_v39  ;;  %436 = vmatpush2.msra.mxu0 %v195_v40 }
  0x36   :  { %v320_v43 = vld [vmem:[%s9409_s4 + $0x6a8] sm:$0xff]  ;;  %v191_v44 = vld [vmem:[%s9409_s4 + $0x2a0] sm:$0xff]  ;;  %507 = vmatpush2.msra.mxu1 %v323_v41  ;;  %437 = vmatprep.subr.mxu0 %v192_v42 }
  0x37   :  { %v319_v45 = vld [vmem:[%s9409_s4 + $0x6a0] sm:$0xff]  ;;  %v188_v46 = vld [vmem:[%s9409_s4 + $0x288] sm:$0xff]  ;;  %508 = vmatprep.subr.mxu1 %v320_v43  ;;  %438 = vmatpush2.msra.mxu0 %v191_v44 }
  0x38   :  { %v316_v47 = vld [vmem:[%s9409_s4 + $0x688] sm:$0xff]  ;;  %v187_v48 = vld [vmem:[%s9409_s4 + $0x280] sm:$0xff]  ;;  %509 = vmatpush2.msra.mxu1 %v319_v45  ;;  %439 = vmatprep.subr.mxu0 %v188_v46 }
  0x39   :  { %v315_v49 = vld [vmem:[%s9409_s4 + $0x680] sm:$0xff]  ;;  %v184_v50 = vld [vmem:[%s9409_s4 + $0x268] sm:$0xff]  ;;  %510 = vmatprep.subr.mxu1 %v316_v47  ;;  %440 = vmatpush2.msra.mxu0 %v187_v48 }
  0x3a   :  { %v312_v51 = vld [vmem:[%s9409_s4 + $0x668] sm:$0xff]  ;;  %v183_v52 = vld [vmem:[%s9409_s4 + $0x260] sm:$0xff]  ;;  %511 = vmatpush2.msra.mxu1 %v315_v49  ;;  %441 = vmatprep.subr.mxu0 %v184_v50 }
  0x3b   :  { %v311_v53 = vld [vmem:[%s9409_s4 + $0x660] sm:$0xff]  ;;  %v180_v54 = vld [vmem:[%s9409_s4 + $0x248] sm:$0xff]  ;;  %512 = vmatprep.subr.mxu1 %v312_v51  ;;  %442 = vmatpush2.msra.mxu0 %v183_v52 }
  0x3c   :  { %v308_v55 = vld [vmem:[%s9409_s4 + $0x648] sm:$0xff]  ;;  %v179_v56 = vld [vmem:[%s9409_s4 + $0x240] sm:$0xff]  ;;  %513 = vmatpush2.msra.mxu1 %v311_v53  ;;  %443 = vmatprep.subr.mxu0 %v180_v54 }
  0x3d   :  { %v307_v57 = vld [vmem:[%s9409_s4 + $0x640] sm:$0xff]  ;;  %v176_v58 = vld [vmem:[%s9409_s4 + $0x228] sm:$0xff]  ;;  %514 = vmatprep.subr.mxu1 %v308_v55  ;;  %444 = vmatpush2.msra.mxu0 %v179_v56 }
  0x3e   :  { %v304_v59 = vld [vmem:[%s9409_s4 + $0x628] sm:$0xff]  ;;  %v175_v60 = vld [vmem:[%s9409_s4 + $0x220] sm:$0xff]  ;;  %515 = vmatpush2.msra.mxu1 %v307_v57  ;;  %445 = vmatprep.subr.mxu0 %v176_v58 }
  0x3f   :  { %v303_v61 = vld [vmem:[%s9409_s4 + $0x620] sm:$0xff]  ;;  %v172_v62 = vld [vmem:[%s9409_s4 + $0x208] sm:$0xff]  ;;  %516 = vmatprep.subr.mxu1 %v304_v59  ;;  %446 = vmatpush2.msra.mxu0 %v175_v60 }
  0x40   :  { %v300_v63 = vld [vmem:[%s9409_s4 + $0x608] sm:$0xff]  ;;  %v171_v0 = vld [vmem:[%s9409_s4 + $0x200] sm:$0xff]  ;;  %517 = vmatpush2.msra.mxu1 %v303_v61  ;;  %447 = vmatprep.subr.mxu0 %v172_v62 }
  0x41   :  { %v299_v1 = vld [vmem:[%s9409_s4 + $0x600] sm:$0xff]  ;;  %518 = vmatprep.subr.mxu1 %v300_v63  ;;  %448 = vmatpush2.msra.mxu0 %v171_v0 }
  0x42   :  { %519 = vmatpush2.msra.mxu1 %v299_v1  ;;  %527 = vmatprep.subr.mxu0 %v170_v2 }
  0x43   :  { %598 = vmatprep.subr.mxu1 %v298_v3 }
  0x44   :  { %18 = vsyncpa [#allocation3], 0  ;;  %v53_v4 = vlaneseq  ;;  %v46_v10 = vld [vmem:[%s9407_s2] sm:$0xf]  ;;  %v169_v33 = vld [vmem:[%s9409_s4 + $0x1f0] sm:$0xff]  ;;  %s4062_s16 = smov [#allocation2]  }
  0x45   :  { %v77_v11 = vld [vmem:[%s9408_s3] sm:$0xf]  ;;  %v297_v34 = vld [vmem:[%s9409_s4 + $0x5f0] sm:$0xff]  ;;  %v166_v35 = vld [vmem:[%s9409_s4 + $0x1d8] sm:$0xff]  ;;  %s3982_s17 = sshll.u32 %s4062_s16, 4  ;;  %vm3974_vm0 = vcmask 74752   ;;  %s3983_s17 = int_to_ptr.vmem [resolvable:$true] %s3982_s17 }
  0x46   :  { %v4526_v5 = vshrl.u32 %v53_v4, 7  ;;  %v294_v36 = vld [vmem:[%s9409_s4 + $0x5d8] sm:$0xff]  ;;  %v165_v37 = vld [vmem:[%s9409_s4 + $0x1d0] sm:$0xff]  ;;  %p4043_p1 = scmp.lt.s32.totalorder %s3983_s17, %s3983_s17 }
  0x47   :  { %v293_v38 = vld [vmem:[%s9409_s4 + $0x5d0] sm:$0xff]  ;;  %v162_v39 = vld [vmem:[%s9409_s4 + $0x1b8] sm:$0xff] }
  0x48   :  { %v4529_v6 = vsub.s32 0, %v4526_v5  ;;  %v4532_v7 = vsub.s32 1, %v4526_v5  ;;  %v4535_v8 = vsub.s32 2, %v4526_v5  ;;  %v4538_v9 = vsub.s32 3, %v4526_v5  ;;  %v290_v40 = vld [vmem:[%s9409_s4 + $0x5b8] sm:$0xff]  ;;  %v161_v41 = vld [vmem:[%s9409_s4 + $0x1b0] sm:$0xff] }
  0x49   :  { %v289_v42 = vld [vmem:[%s9409_s4 + $0x5b0] sm:$0xff]  ;;  %v158_v43 = vld [vmem:[%s9409_s4 + $0x198] sm:$0xff] }
  0x4a   :  { %v56_v12 = vrot.slane %v46_v10, %v4529_v6  ;;  %v60_v13 = vrot.slane %v46_v10, %v4532_v7  ;;  %v64_v14 = vrot.slane %v46_v10, %v4535_v8  ;;  %v68_v15 = vrot.slane %v46_v10, %v4538_v9  ;;  %v286_v44 = vld [vmem:[%s9409_s4 + $0x598] sm:$0xff]  ;;  %v157_v45 = vld [vmem:[%s9409_s4 + $0x190] sm:$0xff] }
  0x4b   :  { %v86_v16 = vrot.slane %v77_v11, %v4532_v7  ;;  %v94_v17 = vrot.slane %v77_v11, %v4538_v9  ;;  %v82_v18 = vrot.slane %v77_v11, %v4529_v6  ;;  %v90_v19 = vrot.slane %v77_v11, %v4535_v8  ;;  %v285_v46 = vld [vmem:[%s9409_s4 + $0x590] sm:$0xff]  ;;  %v154_v47 = vld [vmem:[%s9409_s4 + $0x178] sm:$0xff] }
  0x4c   :  { %v282_v48 = vld [vmem:[%s9409_s4 + $0x578] sm:$0xff]  ;;  %v153_v49 = vld [vmem:[%s9409_s4 + $0x170] sm:$0xff] }
  0x4d   :  { %v281_v50 = vld [vmem:[%s9409_s4 + $0x570] sm:$0xff]  ;;  %v150_v51 = vld [vmem:[%s9409_s4 + $0x158] sm:$0xff] }
  0x4e   :  { %v278_v52 = vld [vmem:[%s9409_s4 + $0x558] sm:$0xff]  ;;  %v149_v53 = vld [vmem:[%s9409_s4 + $0x150] sm:$0xff] }
  0x4f   :  { %v277_v54 = vld [vmem:[%s9409_s4 + $0x550] sm:$0xff]  ;;  %v146_v55 = vld [vmem:[%s9409_s4 + $0x138] sm:$0xff] }
  0x50   :  { %v274_v56 = vld [vmem:[%s9409_s4 + $0x538] sm:$0xff]  ;;  %v145_v57 = vld [vmem:[%s9409_s4 + $0x130] sm:$0xff] }
  0x51   :  { %v273_v58 = vld [vmem:[%s9409_s4 + $0x530] sm:$0xff]  ;;  %v142_v59 = vld [vmem:[%s9409_s4 + $0x118] sm:$0xff] }
  0x52   :  { %v270_v60 = vld [vmem:[%s9409_s4 + $0x518] sm:$0xff]  ;;  %v141_v61 = vld [vmem:[%s9409_s4 + $0x110] sm:$0xff] }
  0x53   :  { %v269_v62 = vld [vmem:[%s9409_s4 + $0x510] sm:$0xff]  ;;  %v138_v63 = vld [vmem:[%s9409_s4 + $0xf8] sm:$0xff] }
  0x54   :  { %v266_v0 = vld [vmem:[%s9409_s4 + $0x4f8] sm:$0xff]  ;;  %v137_v1 = vld [vmem:[%s9409_s4 + $0xf0] sm:$0xff] }
  0x55   :  { %v265_v2 = vld [vmem:[%s9409_s4 + $0x4f0] sm:$0xff]  ;;  %v134_v3 = vld [vmem:[%s9409_s4 + $0xd8] sm:$0xff] }
  0x56   :  { %v262_v4 = vld [vmem:[%s9409_s4 + $0x4d8] sm:$0xff]  ;;  %v133_v10 = vld [vmem:[%s9409_s4 + $0xd0] sm:$0xff] }
  0x57   :  { %v261_v11 = vld [vmem:[%s9409_s4 + $0x4d0] sm:$0xff] }
  0x7d   :  { %v50_v20 = vpop.permute.xlu0 %49 }
  0x7e   :  { %v73_v21 = vmul.f32 %v56_v12, %v50_v20  ;;  %v74_v22 = vmul.f32 %v60_v13, %v50_v20  ;;  %v75_v23 = vmul.f32 %v64_v14, %v50_v20  ;;  %v76_v24 = vmul.f32 %v68_v15, %v50_v20  ;;  %v130_v12 = vld [vmem:[%s9409_s4 + $0xb8] sm:$0xff]  ;;  %v129_v14 = vld [vmem:[%s9409_s4 + $0xb0] sm:$0xff] }
  0x7f   :  { %v258_v13 = vld [vmem:[%s9409_s4 + $0x4b8] sm:$0xff]  ;;  %v257_v15 = vld [vmem:[%s9409_s4 + $0x4b0] sm:$0xff] }
  0x80   :  { %v100_v25 = vadd.f32 %v86_v16, %v74_v22  ;;  %v102_v26 = vadd.f32 %v94_v17, %v76_v24  ;;  %v4554_v27 = vadd.f32 %v82_v18, %v73_v21  ;;  %v4556_v28 = vadd.f32 %v90_v19, %v75_v23  ;;  %v126_v16 = vld [vmem:[%s9409_s4 + $0x98] sm:$0xff]  ;;  %v125_v18 = vld [vmem:[%s9409_s4 + $0x90] sm:$0xff] }
  0x81   :  { %v254_v17 = vld [vmem:[%s9409_s4 + $0x498] sm:$0xff]  ;;  %v253_v19 = vld [vmem:[%s9409_s4 + $0x490] sm:$0xff] }
  0x82   :  { %v104_v29 = vmax.f32 %v100_v25, 0.0  ;;  %v106_v30 = vmax.f32 %v102_v26, 0.0  ;;  %v103_v31 = vmax.f32 %v4554_v27, 0.0  ;;  %v105_v32 = vmax.f32 %v4556_v28, 0.0  ;;  %v122_v20 = vld [vmem:[%s9409_s4 + $0x78] sm:$0xff]  ;;  %v121_v22 = vld [vmem:[%s9409_s4 + $0x70] sm:$0xff] }
  0x83   :  { %v250_v21 = vld [vmem:[%s9409_s4 + $0x478] sm:$0xff]  ;;  %v249_v23 = vld [vmem:[%s9409_s4 + $0x470] sm:$0xff]  ;;  %v725_v27 = vld [vmem:[%s9411_s6 + $0x1a0] sm:$0xff] }
  0x84   :  { %449 = vmatprep.mubr.f32.mxu0 %v104_v29  ;;  %520 = vmatprep.mubr.f32.mxu1 %v106_v30  ;;  %v118_v24 = vld [vmem:[%s9409_s4 + $0x58] sm:$0xff]  ;;  %v117_v26 = vld [vmem:[%s9409_s4 + $0x50] sm:$0xff]  ;;  %v722_v28 = vld [vmem:[%s9411_s6 + $0x188] sm:$0xff] }
  0x85   :  { %450 = vmatmul.mubr.f32.vlgmr.msra.gmra.mxu0 %v103_v31  ;;  %521 = vmatmul.mubr.f32.vlgmr.msra.gmra.mxu1 %v105_v32  ;;  %v246_v25 = vld [vmem:[%s9409_s4 + $0x458] sm:$0xff] }
  0x86   :  { %528 = vmatpush1.msra.mxu0 %v169_v33  ;;  %599 = vmatpush1.msra.mxu1 %v297_v34  ;;  %v242_v33 = vld [vmem:[%s9409_s4 + $0x438] sm:$0xff]  ;;  %v113_v34 = vld [vmem:[%s9409_s4 + $0x30] sm:$0xff] }
  0x87   :  { %529 = vmatprep.subr.mxu0 %v166_v35  ;;  %591 = vmatprep.mubr.f32.mxu0 %v104_v29  ;;  %v245_v29 = vld [vmem:[%s9409_s4 + $0x450] sm:$0xff] }
  0x88   :  { %600 = vmatprep.subr.mxu1 %v294_v36  ;;  %662 = vmatprep.mubr.f32.mxu1 %v106_v30  ;;  %v114_v30 = vld [vmem:[%s9409_s4 + $0x38] sm:$0xff]  ;;  %v241_v35 = vld [vmem:[%s9409_s4 + $0x430] sm:$0xff] }
  0x89   :  { %530 = vmatpush1.msra.mxu0 %v165_v37  ;;  %601 = vmatpush1.msra.mxu1 %v293_v38  ;;  %v110_v36 = vld [vmem:[%s9409_s4 + $0x18] sm:$0xff]  ;;  %v109_v38 = vld [vmem:[%s9409_s4 + $0x10] sm:$0xff] }
  0x8a   :  { %531 = vmatprep.subr.mxu0 %v162_v39  ;;  %602 = vmatprep.subr.mxu1 %v290_v40  ;;  %v238_v37 = vld [vmem:[%s9409_s4 + $0x418] sm:$0xff]  ;;  %v237_v39 = vld [vmem:[%s9409_s4 + $0x410] sm:$0xff] }
  0x8b   :  { %532 = vmatpush1.msra.mxu0 %v161_v41  ;;  %603 = vmatpush1.msra.mxu1 %v289_v42  ;;  %v234_v40 = vld [vmem:[%s9409_s4 + $0x3f8] sm:$0xff]  ;;  %v233_v42 = vld [vmem:[%s9409_s4 + $0x3f0] sm:$0xff] }
  0x8c   :  { %533 = vmatprep.subr.mxu0 %v158_v43  ;;  %604 = vmatprep.subr.mxu1 %v286_v44  ;;  %v362_v41 = vld [vmem:[%s9409_s4 + $0x7f8] sm:$0xff]  ;;  %v361_v43 = vld [vmem:[%s9409_s4 + $0x7f0] sm:$0xff] }
  0x8d   :  { %534 = vmatpush1.msra.mxu0 %v157_v45  ;;  %605 = vmatpush1.msra.mxu1 %v285_v46  ;;  %v230_v44 = vld [vmem:[%s9409_s4 + $0x3d8] sm:$0xff]  ;;  %v229_v46 = vld [vmem:[%s9409_s4 + $0x3d0] sm:$0xff] }
  0x8e   :  { %535 = vmatprep.subr.mxu0 %v154_v47  ;;  %606 = vmatprep.subr.mxu1 %v282_v48  ;;  %v358_v45 = vld [vmem:[%s9409_s4 + $0x7d8] sm:$0xff]  ;;  %v357_v47 = vld [vmem:[%s9409_s4 + $0x7d0] sm:$0xff] }
  0x8f   :  { %536 = vmatpush1.msra.mxu0 %v153_v49  ;;  %607 = vmatpush1.msra.mxu1 %v281_v50  ;;  %v226_v48 = vld [vmem:[%s9409_s4 + $0x3b8] sm:$0xff]  ;;  %v225_v50 = vld [vmem:[%s9409_s4 + $0x3b0] sm:$0xff] }
  0x90   :  { %537 = vmatprep.subr.mxu0 %v150_v51  ;;  %608 = vmatprep.subr.mxu1 %v278_v52  ;;  %v354_v49 = vld [vmem:[%s9409_s4 + $0x7b8] sm:$0xff]  ;;  %v353_v51 = vld [vmem:[%s9409_s4 + $0x7b0] sm:$0xff] }
  0x91   :  { %538 = vmatpush1.msra.mxu0 %v149_v53  ;;  %609 = vmatpush1.msra.mxu1 %v277_v54  ;;  %v222_v52 = vld [vmem:[%s9409_s4 + $0x398] sm:$0xff]  ;;  %v221_v54 = vld [vmem:[%s9409_s4 + $0x390] sm:$0xff] }
  0x92   :  { %539 = vmatprep.subr.mxu0 %v146_v55  ;;  %610 = vmatprep.subr.mxu1 %v274_v56  ;;  %v350_v53 = vld [vmem:[%s9409_s4 + $0x798] sm:$0xff]  ;;  %v349_v55 = vld [vmem:[%s9409_s4 + $0x790] sm:$0xff] }
  0x93   :  { %540 = vmatpush1.msra.mxu0 %v145_v57  ;;  %611 = vmatpush1.msra.mxu1 %v273_v58  ;;  %v218_v56 = vld [vmem:[%s9409_s4 + $0x378] sm:$0xff]  ;;  %v217_v58 = vld [vmem:[%s9409_s4 + $0x370] sm:$0xff] }
  0x94   :  { %541 = vmatprep.subr.mxu0 %v142_v59  ;;  %612 = vmatprep.subr.mxu1 %v270_v60  ;;  %v346_v57 = vld [vmem:[%s9409_s4 + $0x778] sm:$0xff]  ;;  %v345_v59 = vld [vmem:[%s9409_s4 + $0x770] sm:$0xff] }
  0x95   :  { %542 = vmatpush1.msra.mxu0 %v141_v61  ;;  %613 = vmatpush1.msra.mxu1 %v269_v62  ;;  %v214_v60 = vld [vmem:[%s9409_s4 + $0x358] sm:$0xff]  ;;  %v213_v62 = vld [vmem:[%s9409_s4 + $0x350] sm:$0xff] }
  0x96   :  { %543 = vmatprep.subr.mxu0 %v138_v63  ;;  %614 = vmatprep.subr.mxu1 %v266_v0  ;;  %v342_v61 = vld [vmem:[%s9409_s4 + $0x758] sm:$0xff]  ;;  %v341_v63 = vld [vmem:[%s9409_s4 + $0x750] sm:$0xff] }
  0x97   :  { %544 = vmatpush1.msra.mxu0 %v137_v1  ;;  %615 = vmatpush1.msra.mxu1 %v265_v2  ;;  %v210_v0 = vld [vmem:[%s9409_s4 + $0x338] sm:$0xff]  ;;  %v209_v2 = vld [vmem:[%s9409_s4 + $0x330] sm:$0xff] }
  0x98   :  { %545 = vmatprep.subr.mxu0 %v134_v3  ;;  %616 = vmatprep.subr.mxu1 %v262_v4  ;;  %v338_v1 = vld [vmem:[%s9409_s4 + $0x738] sm:$0xff]  ;;  %v337_v3 = vld [vmem:[%s9409_s4 + $0x730] sm:$0xff] }
  0x99   :  { %546 = vmatpush1.msra.mxu0 %v133_v10  ;;  %617 = vmatpush1.msra.mxu1 %v261_v11  ;;  %v206_v4 = vld [vmem:[%s9409_s4 + $0x318] sm:$0xff]  ;;  %v205_v11 = vld [vmem:[%s9409_s4 + $0x310] sm:$0xff] }
  0x9a   :  { %547 = vmatprep.subr.mxu0 %v130_v12  ;;  %618 = vmatprep.subr.mxu1 %v258_v13  ;;  %v334_v10 = vld [vmem:[%s9409_s4 + $0x718] sm:$0xff]  ;;  %v333_v12 = vld [vmem:[%s9409_s4 + $0x710] sm:$0xff] }
  0x9b   :  { %548 = vmatpush1.msra.mxu0 %v129_v14  ;;  %619 = vmatpush1.msra.mxu1 %v257_v15  ;;  %v202_v13 = vld [vmem:[%s9409_s4 + $0x2f8] sm:$0xff]  ;;  %v201_v15 = vld [vmem:[%s9409_s4 + $0x2f0] sm:$0xff] }
  0x9c   :  { %549 = vmatprep.subr.mxu0 %v126_v16  ;;  %620 = vmatprep.subr.mxu1 %v254_v17  ;;  %v330_v14 = vld [vmem:[%s9409_s4 + $0x6f8] sm:$0xff]  ;;  %v329_v16 = vld [vmem:[%s9409_s4 + $0x6f0] sm:$0xff] }
  0x9d   :  { %550 = vmatpush1.msra.mxu0 %v125_v18  ;;  %621 = vmatpush1.msra.mxu1 %v253_v19  ;;  %v198_v17 = vld [vmem:[%s9409_s4 + $0x2d8] sm:$0xff]  ;;  %v197_v19 = vld [vmem:[%s9409_s4 + $0x2d0] sm:$0xff] }
  0x9e   :  { %551 = vmatprep.subr.mxu0 %v122_v20  ;;  %622 = vmatprep.subr.mxu1 %v250_v21  ;;  %v326_v18 = vld [vmem:[%s9409_s4 + $0x6d8] sm:$0xff]  ;;  %v325_v20 = vld [vmem:[%s9409_s4 + $0x6d0] sm:$0xff] }
  0x9f   :  { %552 = vmatpush1.msra.mxu0 %v121_v22  ;;  %623 = vmatpush1.msra.mxu1 %v249_v23  ;;  %v194_v21 = vld [vmem:[%s9409_s4 + $0x2b8] sm:$0xff]  ;;  %v193_v23 = vld [vmem:[%s9409_s4 + $0x2b0] sm:$0xff] }
  0xa0   :  { %553 = vmatprep.subr.mxu0 %v118_v24  ;;  %624 = vmatprep.subr.mxu1 %v246_v25  ;;  %v322_v22 = vld [vmem:[%s9409_s4 + $0x6b8] sm:$0xff]  ;;  %v321_v24 = vld [vmem:[%s9409_s4 + $0x6b0] sm:$0xff] }
  0xa1   :  { %554 = vmatpush1.msra.mxu0 %v117_v26  ;;  %625 = vmatpush1.msra.mxu1 %v245_v29  ;;  %v190_v25 = vld [vmem:[%s9409_s4 + $0x298] sm:$0xff]  ;;  %v189_v29 = vld [vmem:[%s9409_s4 + $0x290] sm:$0xff] }
  0xa2   :  { %555 = vmatprep.subr.mxu0 %v114_v30  ;;  %626 = vmatprep.subr.mxu1 %v242_v33  ;;  %v318_v26 = vld [vmem:[%s9409_s4 + $0x698] sm:$0xff]  ;;  %v317_v30 = vld [vmem:[%s9409_s4 + $0x690] sm:$0xff] }
  0xa3   :  { %556 = vmatpush1.msra.mxu0 %v113_v34  ;;  %627 = vmatpush1.msra.mxu1 %v241_v35  ;;  %v186_v33 = vld [vmem:[%s9409_s4 + $0x278] sm:$0xff]  ;;  %v185_v35 = vld [vmem:[%s9409_s4 + $0x270] sm:$0xff] }
  0xa4   :  { %557 = vmatprep.subr.mxu0 %v110_v36  ;;  %628 = vmatprep.subr.mxu1 %v238_v37  ;;  %v314_v34 = vld [vmem:[%s9409_s4 + $0x678] sm:$0xff]  ;;  %v313_v36 = vld [vmem:[%s9409_s4 + $0x670] sm:$0xff] }
  0xa5   :  { %558 = vmatpush1.msra.mxu0 %v109_v38  ;;  %629 = vmatpush1.msra.mxu1 %v237_v39  ;;  %v182_v37 = vld [vmem:[%s9409_s4 + $0x258] sm:$0xff]  ;;  %v181_v39 = vld [vmem:[%s9409_s4 + $0x250] sm:$0xff] }
  0xa6   :  { %559 = vmatprep.subr.mxu0 %v234_v40  ;;  %630 = vmatprep.subr.mxu1 %v362_v41  ;;  %v310_v38 = vld [vmem:[%s9409_s4 + $0x658] sm:$0xff]  ;;  %v309_v40 = vld [vmem:[%s9409_s4 + $0x650] sm:$0xff] }
  0xa7   :  { %560 = vmatpush2.msra.mxu0 %v233_v42  ;;  %631 = vmatpush2.msra.mxu1 %v361_v43  ;;  %v178_v41 = vld [vmem:[%s9409_s4 + $0x238] sm:$0xff]  ;;  %v177_v43 = vld [vmem:[%s9409_s4 + $0x230] sm:$0xff] }
  0xa8   :  { %561 = vmatprep.subr.mxu0 %v230_v44  ;;  %632 = vmatprep.subr.mxu1 %v358_v45  ;;  %v306_v42 = vld [vmem:[%s9409_s4 + $0x638] sm:$0xff]  ;;  %v305_v44 = vld [vmem:[%s9409_s4 + $0x630] sm:$0xff] }
  0xa9   :  { %562 = vmatpush2.msra.mxu0 %v229_v46  ;;  %633 = vmatpush2.msra.mxu1 %v357_v47  ;;  %v174_v45 = vld [vmem:[%s9409_s4 + $0x218] sm:$0xff]  ;;  %v173_v47 = vld [vmem:[%s9409_s4 + $0x210] sm:$0xff] }
  0xaa   :  { %563 = vmatprep.subr.mxu0 %v226_v48  ;;  %634 = vmatprep.subr.mxu1 %v354_v49  ;;  %v302_v46 = vld [vmem:[%s9409_s4 + $0x618] sm:$0xff]  ;;  %v301_v48 = vld [vmem:[%s9409_s4 + $0x610] sm:$0xff]  ;;  %v734_v49 = vld [vmem:[%s9411_s6 + $0x1e8] sm:$0xff]  ;;  %s4038_s4 = scalar_lea.vmem %s3983_s17, 32 }
  0xab   :  { %564 = vmatpush2.msra.mxu0 %v225_v50  ;;  %635 = vmatpush2.msra.mxu1 %v353_v51  ;;  %v733_v50 = vld [vmem:[%s9411_s6 + $0x1e0] sm:$0xff]  ;;  %v730_v51 = vld [vmem:[%s9411_s6 + $0x1c8] sm:$0xff]  ;;  %p4039_p0 = scmp.ne.s32.totalorder %s3983_s17, %s4038_s4  ;;  %p4044_p2 = scmp.lt.s32.totalorder %s4038_s4, %s4038_s4 }
  0xac   :  { %565 = vmatprep.subr.mxu0 %v222_v52  ;;  %636 = vmatprep.subr.mxu1 %v350_v53  ;;  %v729_v52 = vld [vmem:[%s9411_s6 + $0x1c0] sm:$0xff]  ;;  %v726_v53 = vld [vmem:[%s9411_s6 + $0x1a8] sm:$0xff] }
  0xad   :  { %566 = vmatpush2.msra.mxu0 %v221_v54  ;;  %637 = vmatpush2.msra.mxu1 %v349_v55  ;;  %v717_v54 = vld [vmem:[%s9411_s6 + $0x160] sm:$0xff]  ;;  %v862_v55 = vld [vmem:[%s9411_s6 + $0x5e8] sm:$0xff]  ;;  %p4045_p3 = por %p4044_p2, %p4043_p1 }
  0xae   :  { %567 = vmatprep.subr.mxu0 %v218_v56  ;;  %638 = vmatprep.subr.mxu1 %v346_v57  ;;  %v714_v56 = vld [vmem:[%s9411_s6 + $0x148] sm:$0xff]  ;;  %v861_v57 = vld [vmem:[%s9411_s6 + $0x5e0] sm:$0xff] }
  0xaf   :  { %568 = vmatpush2.msra.mxu0 %v217_v58  ;;  %639 = vmatpush2.msra.mxu1 %v345_v59  ;;  %v713_v58 = vld [vmem:[%s9411_s6 + $0x140] sm:$0xff]  ;;  %v858_v59 = vld [vmem:[%s9411_s6 + $0x5c8] sm:$0xff]  ;;  %p4046_p4 = pnand %p4045_p3, %p4039_p0 }
  0xb0   :  { %569 = vmatprep.subr.mxu0 %v214_v60  ;;  %640 = vmatprep.subr.mxu1 %v342_v61  ;;  %v710_v60 = vld [vmem:[%s9411_s6 + $0x128] sm:$0xff]  ;;  %v857_v61 = vld [vmem:[%s9411_s6 + $0x5c0] sm:$0xff] }
  0xb1   :  { %570 = vmatpush2.msra.mxu0 %v213_v62  ;;  %641 = vmatpush2.msra.mxu1 %v341_v63  ;;  %v709_v62 = vld [vmem:[%s9411_s6 + $0x120] sm:$0xff]  ;;  %v854_v63 = vld [vmem:[%s9411_s6 + $0x5a8] sm:$0xff] }
  0xb2   :  { %571 = vmatprep.subr.mxu0 %v210_v0  ;;  %642 = vmatprep.subr.mxu1 %v338_v1  ;;  %v706_v0 = vld [vmem:[%s9411_s6 + $0x108] sm:$0xff]  ;;  %v853_v1 = vld [vmem:[%s9411_s6 + $0x5a0] sm:$0xff] }
  0xb3   :  { %572 = vmatpush2.msra.mxu0 %v209_v2  ;;  %643 = vmatpush2.msra.mxu1 %v337_v3  ;;  %v705_v2 = vld [vmem:[%s9411_s6 + $0x100] sm:$0xff]  ;;  %v850_v3 = vld [vmem:[%s9411_s6 + $0x588] sm:$0xff] }
  0xb4   :  { %573 = vmatprep.subr.mxu0 %v206_v4  ;;  %644 = vmatprep.subr.mxu1 %v334_v10  ;;  %v702_v4 = vld [vmem:[%s9411_s6 + $0xe8] sm:$0xff]  ;;  %v849_v10 = vld [vmem:[%s9411_s6 + $0x580] sm:$0xff] }
  0xb5   :  { %574 = vmatpush2.msra.mxu0 %v205_v11  ;;  %645 = vmatpush2.msra.mxu1 %v333_v12  ;;  %v701_v11 = vld [vmem:[%s9411_s6 + $0xe0] sm:$0xff]  ;;  %v846_v12 = vld [vmem:[%s9411_s6 + $0x568] sm:$0xff] }
  0xb6   :  { %575 = vmatprep.subr.mxu0 %v202_v13  ;;  %646 = vmatprep.subr.mxu1 %v330_v14  ;;  %v698_v13 = vld [vmem:[%s9411_s6 + $0xc8] sm:$0xff]  ;;  %v845_v14 = vld [vmem:[%s9411_s6 + $0x560] sm:$0xff] }
  0xb7   :  { %576 = vmatpush2.msra.mxu0 %v201_v15  ;;  %647 = vmatpush2.msra.mxu1 %v329_v16  ;;  %v697_v15 = vld [vmem:[%s9411_s6 + $0xc0] sm:$0xff]  ;;  %v842_v16 = vld [vmem:[%s9411_s6 + $0x548] sm:$0xff] }
  0xb8   :  { %577 = vmatprep.subr.mxu0 %v198_v17  ;;  %648 = vmatprep.subr.mxu1 %v326_v18  ;;  %v694_v17 = vld [vmem:[%s9411_s6 + $0xa8] sm:$0xff]  ;;  %v841_v18 = vld [vmem:[%s9411_s6 + $0x540] sm:$0xff] }
  0xb9   :  { %578 = vmatpush2.msra.mxu0 %v197_v19  ;;  %649 = vmatpush2.msra.mxu1 %v325_v20  ;;  %v693_v19 = vld [vmem:[%s9411_s6 + $0xa0] sm:$0xff]  ;;  %v838_v20 = vld [vmem:[%s9411_s6 + $0x528] sm:$0xff] }
  0xba   :  { %579 = vmatprep.subr.mxu0 %v194_v21  ;;  %650 = vmatprep.subr.mxu1 %v322_v22  ;;  %v690_v21 = vld [vmem:[%s9411_s6 + $0x88] sm:$0xff]  ;;  %v837_v22 = vld [vmem:[%s9411_s6 + $0x520] sm:$0xff] }
  0xbb   :  { %580 = vmatpush2.msra.mxu0 %v193_v23  ;;  %651 = vmatpush2.msra.mxu1 %v321_v24  ;;  %v689_v23 = vld [vmem:[%s9411_s6 + $0x80] sm:$0xff]  ;;  %v834_v24 = vld [vmem:[%s9411_s6 + $0x508] sm:$0xff] }
  0xbc   :  { %581 = vmatprep.subr.mxu0 %v190_v25  ;;  %652 = vmatprep.subr.mxu1 %v318_v26  ;;  %v686_v25 = vld [vmem:[%s9411_s6 + $0x68] sm:$0xff]  ;;  %v833_v26 = vld [vmem:[%s9411_s6 + $0x500] sm:$0xff] }
  0xbd   :  { %582 = vmatpush2.msra.mxu0 %v189_v29  ;;  %653 = vmatpush2.msra.mxu1 %v317_v30  ;;  %v685_v29 = vld [vmem:[%s9411_s6 + $0x60] sm:$0xff]  ;;  %v830_v30 = vld [vmem:[%s9411_s6 + $0x4e8] sm:$0xff] }
  0xbe   :  { %583 = vmatprep.subr.mxu0 %v186_v33  ;;  %654 = vmatprep.subr.mxu1 %v314_v34  ;;  %v682_v33 = vld [vmem:[%s9411_s6 + $0x48] sm:$0xff]  ;;  %v829_v34 = vld [vmem:[%s9411_s6 + $0x4e0] sm:$0xff] }
  0xbf   :  { %584 = vmatpush2.msra.mxu0 %v185_v35  ;;  %655 = vmatpush2.msra.mxu1 %v313_v36  ;;  %v681_v35 = vld [vmem:[%s9411_s6 + $0x40] sm:$0xff]  ;;  %v826_v36 = vld [vmem:[%s9411_s6 + $0x4c8] sm:$0xff] }
  0xc0   :  { %585 = vmatprep.subr.mxu0 %v182_v37  ;;  %656 = vmatprep.subr.mxu1 %v310_v38  ;;  %v678_v37 = vld [vmem:[%s9411_s6 + $0x28] sm:$0xff]  ;;  %v825_v38 = vld [vmem:[%s9411_s6 + $0x4c0] sm:$0xff] }
  0xc1   :  { %586 = vmatpush2.msra.mxu0 %v181_v39  ;;  %657 = vmatpush2.msra.mxu1 %v309_v40  ;;  %v677_v39 = vld [vmem:[%s9411_s6 + $0x20] sm:$0xff]  ;;  %v822_v40 = vld [vmem:[%s9411_s6 + $0x4a8] sm:$0xff] }
  0xc2   :  { %587 = vmatprep.subr.mxu0 %v178_v41  ;;  %658 = vmatprep.subr.mxu1 %v306_v42  ;;  %v674_v41 = vld [vmem:[%s9411_s6 + $0x8] sm:$0xff]  ;;  %v821_v42 = vld [vmem:[%s9411_s6 + $0x4a0] sm:$0xff] }
  0xc3   :  { %588 = vmatpush2.msra.mxu0 %v177_v43  ;;  %659 = vmatpush2.msra.mxu1 %v305_v44  ;;  %v673_v43 = vld [vmem:[%s9411_s6] sm:$0xff]  ;;  %v818_v44 = vld [vmem:[%s9411_s6 + $0x488] sm:$0xff] }
  0xc4   :  { %589 = vmatprep.subr.mxu0 %v174_v45  ;;  %660 = vmatprep.subr.mxu1 %v302_v46  ;;  %v798_v45 = vld [vmem:[%s9411_s6 + $0x3e8] sm:$0xff]  ;;  %v817_v46 = vld [vmem:[%s9411_s6 + $0x480] sm:$0xff] }
  0xc5   :  { %590 = vmatpush2.msra.mxu0 %v173_v47  ;;  %661 = vmatpush2.msra.mxu1 %v301_v48  ;;  %v797_v47 = vld [vmem:[%s9411_s6 + $0x3e0] sm:$0xff]  ;;  %v814_v48 = vld [vmem:[%s9411_s6 + $0x468] sm:$0xff] }
  0xc6   :  { %592 = vmatmul.mubr.f32.vlgmr.msra.gmra.mxu0 %v103_v31  ;;  %663 = vmatmul.mubr.f32.vlgmr.msra.gmra.mxu1 %v105_v32  ;;  %v721_v31 = vld [vmem:[%s9411_s6 + $0x180] sm:$0xff]  ;;  %v718_v32 = vld [vmem:[%s9411_s6 + $0x168] sm:$0xff] }
  0xc7   :  { %951 = vmatprep.subr.mxu0 %v734_v49  ;;  %1022 = vmatprep.subr.mxu1 %v862_v55  ;;  %v794_v49 = vld [vmem:[%s9411_s6 + $0x3c8] sm:$0xff]  ;;  %v785_v55 = vld [vmem:[%s9411_s6 + $0x380] sm:$0xff] }
  0xc8   :  { %952 = vmatpush1.msra.mxu0 %v733_v50  ;;  %1023 = vmatpush1.msra.mxu1 %v861_v57  ;;  %v813_v50 = vld [vmem:[%s9411_s6 + $0x460] sm:$0xff]  ;;  %v782_v57 = vld [vmem:[%s9411_s6 + $0x368] sm:$0xff] }
  0xc9   :  { %953 = vmatprep.subr.mxu0 %v730_v51  ;;  %1024 = vmatprep.subr.mxu1 %v858_v59  ;;  %v793_v51 = vld [vmem:[%s9411_s6 + $0x3c0] sm:$0xff] }
  0xca   :  { %954 = vmatpush1.msra.mxu0 %v729_v52  ;;  %1025 = vmatpush1.msra.mxu1 %v857_v61  ;;  %v810_v52 = vld [vmem:[%s9411_s6 + $0x448] sm:$0xff]  ;;  %v781_v59 = vld [vmem:[%s9411_s6 + $0x360] sm:$0xff] }
  0xcb   :  { %955 = vmatprep.subr.mxu0 %v726_v53  ;;  %1026 = vmatprep.subr.mxu1 %v854_v63  ;;  %v790_v53 = vld [vmem:[%s9411_s6 + $0x3a8] sm:$0xff]  ;;  %v777_v63 = vld [vmem:[%s9411_s6 + $0x340] sm:$0xff] }
  0xcc   :  { %956 = vmatpush1.msra.mxu0 %v725_v27  ;;  %1027 = vmatpush1.msra.mxu1 %v853_v1  ;;  %v809_v27 = vld [vmem:[%s9411_s6 + $0x440] sm:$0xff]  ;;  %v778_v61 = vld [vmem:[%s9411_s6 + $0x348] sm:$0xff] }
  0xcd   :  { %957 = vmatprep.subr.mxu0 %v722_v28  ;;  %1028 = vmatprep.subr.mxu1 %v850_v3  ;;  %v789_v28 = vld [vmem:[%s9411_s6 + $0x3a0] sm:$0xff]  ;;  %v774_v1 = vld [vmem:[%s9411_s6 + $0x328] sm:$0xff] }
  0xce   :  { %958 = vmatpush1.msra.mxu0 %v721_v31  ;;  %1029 = vmatpush1.msra.mxu1 %v849_v10  ;;  %v806_v31 = vld [vmem:[%s9411_s6 + $0x428] sm:$0xff]  ;;  %v773_v3 = vld [vmem:[%s9411_s6 + $0x320] sm:$0xff] }
  0xcf   :  { %959 = vmatprep.subr.mxu0 %v718_v32  ;;  %1030 = vmatprep.subr.mxu1 %v846_v12  ;;  %v786_v32 = vld [vmem:[%s9411_s6 + $0x388] sm:$0xff]  ;;  %v769_v12 = vld [vmem:[%s9411_s6 + $0x300] sm:$0xff] }
  0xd0   :  { %960 = vmatpush1.msra.mxu0 %v717_v54  ;;  %1031 = vmatpush1.msra.mxu1 %v845_v14  ;;  %v805_v54 = vld [vmem:[%s9411_s6 + $0x420] sm:$0xff]  ;;  %v770_v10 = vld [vmem:[%s9411_s6 + $0x308] sm:$0xff] }
  0xd1   :  { %961 = vmatprep.subr.mxu0 %v714_v56  ;;  %1032 = vmatprep.subr.mxu1 %v842_v16  ;;  %v802_v56 = vld [vmem:[%s9411_s6 + $0x408] sm:$0xff]  ;;  %v765_v16 = vld [vmem:[%s9411_s6 + $0x2e0] sm:$0xff] }
  0xd2   :  { %962 = vmatpush1.msra.mxu0 %v713_v58  ;;  %1033 = vmatpush1.msra.mxu1 %v841_v18  ;;  %v801_v58 = vld [vmem:[%s9411_s6 + $0x400] sm:$0xff]  ;;  %v766_v14 = vld [vmem:[%s9411_s6 + $0x2e8] sm:$0xff] }
  0xd3   :  { %963 = vmatprep.subr.mxu0 %v710_v60  ;;  %1034 = vmatprep.subr.mxu1 %v838_v20  ;;  %v926_v60 = vld [vmem:[%s9411_s6 + $0x7e8] sm:$0xff]  ;;  %v761_v20 = vld [vmem:[%s9411_s6 + $0x2c0] sm:$0xff] }
  0xd4   :  { %964 = vmatpush1.msra.mxu0 %v709_v62  ;;  %1035 = vmatpush1.msra.mxu1 %v837_v22  ;;  %v925_v62 = vld [vmem:[%s9411_s6 + $0x7e0] sm:$0xff]  ;;  %v762_v18 = vld [vmem:[%s9411_s6 + $0x2c8] sm:$0xff] }
  0xd5   :  { %965 = vmatprep.subr.mxu0 %v706_v0  ;;  %1036 = vmatprep.subr.mxu1 %v834_v24  ;;  %v922_v0 = vld [vmem:[%s9411_s6 + $0x7c8] sm:$0xff]  ;;  %v757_v24 = vld [vmem:[%s9411_s6 + $0x2a0] sm:$0xff] }
  0xd6   :  { %966 = vmatpush1.msra.mxu0 %v705_v2  ;;  %1037 = vmatpush1.msra.mxu1 %v833_v26  ;;  %v921_v2 = vld [vmem:[%s9411_s6 + $0x7c0] sm:$0xff]  ;;  %v758_v22 = vld [vmem:[%s9411_s6 + $0x2a8] sm:$0xff] }
  0xd7   :  { %967 = vmatprep.subr.mxu0 %v702_v4  ;;  %1038 = vmatprep.subr.mxu1 %v830_v30  ;;  %v918_v4 = vld [vmem:[%s9411_s6 + $0x7a8] sm:$0xff]  ;;  %v753_v30 = vld [vmem:[%s9411_s6 + $0x280] sm:$0xff] }
  0xd8   :  { %968 = vmatpush1.msra.mxu0 %v701_v11  ;;  %1039 = vmatpush1.msra.mxu1 %v829_v34  ;;  %v917_v11 = vld [vmem:[%s9411_s6 + $0x7a0] sm:$0xff]  ;;  %v754_v26 = vld [vmem:[%s9411_s6 + $0x288] sm:$0xff] }
  0xd9   :  { %969 = vmatprep.subr.mxu0 %v698_v13  ;;  %1040 = vmatprep.subr.mxu1 %v826_v36  ;;  %v914_v13 = vld [vmem:[%s9411_s6 + $0x788] sm:$0xff]  ;;  %v749_v36 = vld [vmem:[%s9411_s6 + $0x260] sm:$0xff] }
  0xda   :  { %970 = vmatpush1.msra.mxu0 %v697_v15  ;;  %1041 = vmatpush1.msra.mxu1 %v825_v38  ;;  %v913_v15 = vld [vmem:[%s9411_s6 + $0x780] sm:$0xff]  ;;  %v750_v34 = vld [vmem:[%s9411_s6 + $0x268] sm:$0xff] }
  0xdb   :  { %971 = vmatprep.subr.mxu0 %v694_v17  ;;  %1042 = vmatprep.subr.mxu1 %v822_v40  ;;  %v910_v17 = vld [vmem:[%s9411_s6 + $0x768] sm:$0xff]  ;;  %v745_v40 = vld [vmem:[%s9411_s6 + $0x240] sm:$0xff] }
  0xdc   :  { %972 = vmatpush1.msra.mxu0 %v693_v19  ;;  %1043 = vmatpush1.msra.mxu1 %v821_v42  ;;  %v909_v19 = vld [vmem:[%s9411_s6 + $0x760] sm:$0xff]  ;;  %v746_v38 = vld [vmem:[%s9411_s6 + $0x248] sm:$0xff] }
  0xdd   :  { %973 = vmatprep.subr.mxu0 %v690_v21  ;;  %1044 = vmatprep.subr.mxu1 %v818_v44  ;;  %v906_v21 = vld [vmem:[%s9411_s6 + $0x748] sm:$0xff]  ;;  %v741_v44 = vld [vmem:[%s9411_s6 + $0x220] sm:$0xff] }
  0xde   :  { %974 = vmatpush1.msra.mxu0 %v689_v23  ;;  %1045 = vmatpush1.msra.mxu1 %v817_v46  ;;  %v905_v23 = vld [vmem:[%s9411_s6 + $0x740] sm:$0xff]  ;;  %v742_v42 = vld [vmem:[%s9411_s6 + $0x228] sm:$0xff] }
  0xdf   :  { %975 = vmatprep.subr.mxu0 %v686_v25  ;;  %1046 = vmatprep.subr.mxu1 %v814_v48  ;;  %v902_v25 = vld [vmem:[%s9411_s6 + $0x728] sm:$0xff]  ;;  %v737_v48 = vld [vmem:[%s9411_s6 + $0x200] sm:$0xff] }
  0xe0   :  { %976 = vmatpush1.msra.mxu0 %v685_v29  ;;  %1047 = vmatpush1.msra.mxu1 %v813_v50  ;;  %v901_v29 = vld [vmem:[%s9411_s6 + $0x720] sm:$0xff]  ;;  %v738_v46 = vld [vmem:[%s9411_s6 + $0x208] sm:$0xff]  ;;  %v736_v50 = vld [vmem:[%s9411_s6 + $0x1f8] sm:$0xff] }
  0xe1   :  { %977 = vmatprep.subr.mxu0 %v682_v33  ;;  %1048 = vmatprep.subr.mxu1 %v810_v52  ;;  %v898_v33 = vld [vmem:[%s9411_s6 + $0x708] sm:$0xff] }
  0xe2   :  { %978 = vmatpush1.msra.mxu0 %v681_v35  ;;  %1049 = vmatpush1.msra.mxu1 %v809_v27  ;;  %v897_v35 = vld [vmem:[%s9411_s6 + $0x700] sm:$0xff]  ;;  %v878_v52 = vld [vmem:[%s9411_s6 + $0x668] sm:$0xff] }
  0xe3   :  { %979 = vmatprep.subr.mxu0 %v678_v37  ;;  %1050 = vmatprep.subr.mxu1 %v806_v31  ;;  %v894_v37 = vld [vmem:[%s9411_s6 + $0x6e8] sm:$0xff] }
  0xe4   :  { %980 = vmatpush1.msra.mxu0 %v677_v39  ;;  %1051 = vmatpush1.msra.mxu1 %v805_v54  ;;  %v893_v39 = vld [vmem:[%s9411_s6 + $0x6e0] sm:$0xff]  ;;  %v874_v27 = vld [vmem:[%s9411_s6 + $0x648] sm:$0xff] }
  0xe5   :  { %981 = vmatprep.subr.mxu0 %v674_v41  ;;  %1052 = vmatprep.subr.mxu1 %v802_v56  ;;  %v890_v41 = vld [vmem:[%s9411_s6 + $0x6c8] sm:$0xff]  ;;  %v864_v56 = vld [vmem:[%s9411_s6 + $0x5f8] sm:$0xff] }
  0xe6   :  { %982 = vmatpush1.msra.mxu0 %v673_v43  ;;  %1053 = vmatpush1.msra.mxu1 %v801_v58  ;;  %v889_v43 = vld [vmem:[%s9411_s6 + $0x6c0] sm:$0xff]  ;;  %v870_v31 = vld [vmem:[%s9411_s6 + $0x628] sm:$0xff] }
  0xe7   :  { %983 = vmatprep.subr.mxu0 %v798_v45  ;;  %1054 = vmatprep.subr.mxu1 %v926_v60  ;;  %v886_v45 = vld [vmem:[%s9411_s6 + $0x6a8] sm:$0xff] }
  0xe8   :  { %984 = vmatpush2.msra.mxu0 %v797_v47  ;;  %1055 = vmatpush2.msra.mxu1 %v925_v62  ;;  %v885_v47 = vld [vmem:[%s9411_s6 + $0x6a0] sm:$0xff]  ;;  %v866_v54 = vld [vmem:[%s9411_s6 + $0x608] sm:$0xff] }
  0xe9   :  { %985 = vmatprep.subr.mxu0 %v794_v49  ;;  %1056 = vmatprep.subr.mxu1 %v922_v0  ;;  %v882_v49 = vld [vmem:[%s9411_s6 + $0x688] sm:$0xff] }
  0xea   :  { %986 = vmatpush2.msra.mxu0 %v793_v51  ;;  %1057 = vmatpush2.msra.mxu1 %v921_v2  ;;  %v881_v51 = vld [vmem:[%s9411_s6 + $0x680] sm:$0xff] }
  0xeb   :  { %987 = vmatprep.subr.mxu0 %v790_v53  ;;  %1058 = vmatprep.subr.mxu1 %v918_v4  ;;  %v877_v53 = vld [vmem:[%s9411_s6 + $0x660] sm:$0xff] }
  0xec   :  { %988 = vmatpush2.msra.mxu0 %v789_v28  ;;  %1059 = vmatpush2.msra.mxu1 %v917_v11  ;;  %v873_v28 = vld [vmem:[%s9411_s6 + $0x640] sm:$0xff]  ;;  %v735_v11 = vld [vmem:[%s9411_s6 + $0x1f0] sm:$0xff] }
  0xed   :  { %989 = vmatprep.subr.mxu0 %v786_v32  ;;  %1060 = vmatprep.subr.mxu1 %v914_v13  ;;  %v869_v32 = vld [vmem:[%s9411_s6 + $0x620] sm:$0xff]  ;;  %v731_v13 = vld [vmem:[%s9411_s6 + $0x1d0] sm:$0xff] }
  0xee   :  { %990 = vmatpush2.msra.mxu0 %v785_v55  ;;  %1061 = vmatpush2.msra.mxu1 %v913_v15  ;;  %v865_v55 = vld [vmem:[%s9411_s6 + $0x600] sm:$0xff]  ;;  %v727_v15 = vld [vmem:[%s9411_s6 + $0x1b0] sm:$0xff] }
  0xef   :  { %991 = vmatprep.subr.mxu0 %v782_v57  ;;  %1062 = vmatprep.subr.mxu1 %v910_v17  ;;  %v5339_v57 = vld [vmem:[%s9410_s5] sm:$0xf]  ;;  %v723_v17 = vld [vmem:[%s9411_s6 + $0x190] sm:$0xff] }
  0xf0   :  { %992 = vmatpush2.msra.mxu0 %v781_v59  ;;  %1063 = vmatpush2.msra.mxu1 %v909_v19  ;;  %v368_v58 = vrot.slane %v5339_v57, %v4529_v6  ;;  %v372_v59 = vrot.slane %v5339_v57, %v4532_v7  ;;  %v719_v19 = vld [vmem:[%s9411_s6 + $0x170] sm:$0xff] }
  0xf1   :  { %993 = vmatprep.subr.mxu0 %v778_v61  ;;  %1064 = vmatprep.subr.mxu1 %v906_v21  ;;  %v715_v21 = vld [vmem:[%s9411_s6 + $0x150] sm:$0xff] }
  0xf2   :  { %994 = vmatpush2.msra.mxu0 %v777_v63  ;;  %1065 = vmatpush2.msra.mxu1 %v905_v23  ;;  %v711_v23 = vld [vmem:[%s9411_s6 + $0x130] sm:$0xff] }
  0xf3   :  { %995 = vmatprep.subr.mxu0 %v774_v1  ;;  %1066 = vmatprep.subr.mxu1 %v902_v25  ;;  %v707_v25 = vld [vmem:[%s9411_s6 + $0x110] sm:$0xff] }
  0xf4   :  { %996 = vmatpush2.msra.mxu0 %v773_v3  ;;  %1067 = vmatpush2.msra.mxu1 %v901_v29  ;;  %v703_v29 = vld [vmem:[%s9411_s6 + $0xf0] sm:$0xff] }
  0xf5   :  { %997 = vmatprep.subr.mxu0 %v770_v10  ;;  %1068 = vmatprep.subr.mxu1 %v898_v33  ;;  %v699_v33 = vld [vmem:[%s9411_s6 + $0xd0] sm:$0xff] }
  0xf6   :  { %998 = vmatpush2.msra.mxu0 %v769_v12  ;;  %1069 = vmatpush2.msra.mxu1 %v897_v35  ;;  %v732_v12 = vld [vmem:[%s9411_s6 + $0x1d8] sm:$0xff]  ;;  %v695_v35 = vld [vmem:[%s9411_s6 + $0xb0] sm:$0xff] }
  0xf7   :  { %999 = vmatprep.subr.mxu0 %v766_v14  ;;  %1070 = vmatprep.subr.mxu1 %v894_v37  ;;  %v728_v14 = vld [vmem:[%s9411_s6 + $0x1b8] sm:$0xff]  ;;  %v691_v37 = vld [vmem:[%s9411_s6 + $0x90] sm:$0xff] }
  0xf8   :  { %1000 = vmatpush2.msra.mxu0 %v765_v16  ;;  %1071 = vmatpush2.msra.mxu1 %v893_v39  ;;  %v724_v16 = vld [vmem:[%s9411_s6 + $0x198] sm:$0xff]  ;;  %v687_v39 = vld [vmem:[%s9411_s6 + $0x70] sm:$0xff] }
  0xf9   :  { %1001 = vmatprep.subr.mxu0 %v762_v18  ;;  %1072 = vmatprep.subr.mxu1 %v890_v41  ;;  %v720_v18 = vld [vmem:[%s9411_s6 + $0x178] sm:$0xff]  ;;  %v683_v41 = vld [vmem:[%s9411_s6 + $0x50] sm:$0xff] }
  0xfa   :  { %1002 = vmatpush2.msra.mxu0 %v761_v20  ;;  %1073 = vmatpush2.msra.mxu1 %v889_v43  ;;  %v716_v20 = vld [vmem:[%s9411_s6 + $0x158] sm:$0xff]  ;;  %v679_v43 = vld [vmem:[%s9411_s6 + $0x30] sm:$0xff] }
  0xfb   :  { %1003 = vmatprep.subr.mxu0 %v758_v22  ;;  %1074 = vmatprep.subr.mxu1 %v886_v45  ;;  %v712_v22 = vld [vmem:[%s9411_s6 + $0x138] sm:$0xff]  ;;  %v675_v45 = vld [vmem:[%s9411_s6 + $0x10] sm:$0xff] }
  0xfc   :  { %1004 = vmatpush2.msra.mxu0 %v757_v24  ;;  %1075 = vmatpush2.msra.mxu1 %v885_v47  ;;  %v708_v24 = vld [vmem:[%s9411_s6 + $0x118] sm:$0xff]  ;;  %v799_v47 = vld [vmem:[%s9411_s6 + $0x3f0] sm:$0xff] }
  0xfd   :  { %1005 = vmatprep.subr.mxu0 %v754_v26  ;;  %1076 = vmatprep.subr.mxu1 %v882_v49  ;;  %v704_v26 = vld [vmem:[%s9411_s6 + $0xf8] sm:$0xff]  ;;  %v795_v49 = vld [vmem:[%s9411_s6 + $0x3d0] sm:$0xff] }
  0xfe   :  { %1006 = vmatpush2.msra.mxu0 %v753_v30  ;;  %1077 = vmatpush2.msra.mxu1 %v881_v51  ;;  %v700_v30 = vld [vmem:[%s9411_s6 + $0xd8] sm:$0xff]  ;;  %v791_v51 = vld [vmem:[%s9411_s6 + $0x3b0] sm:$0xff] }
  0xff   :  { %1007 = vmatprep.subr.mxu0 %v750_v34  ;;  %1078 = vmatprep.subr.mxu1 %v878_v52  ;;  %v696_v34 = vld [vmem:[%s9411_s6 + $0xb8] sm:$0xff] }
 0x100   :  { %1008 = vmatpush2.msra.mxu0 %v749_v36  ;;  %1079 = vmatpush2.msra.mxu1 %v877_v53  ;;  %v692_v36 = vld [vmem:[%s9411_s6 + $0x98] sm:$0xff]  ;;  %v787_v53 = vld [vmem:[%s9411_s6 + $0x390] sm:$0xff] }
 0x101   :  { %1009 = vmatprep.subr.mxu0 %v746_v38  ;;  %1080 = vmatprep.subr.mxu1 %v874_v27  ;;  %v688_v38 = vld [vmem:[%s9411_s6 + $0x78] sm:$0xff] }
 0x102   :  { %1010 = vmatpush2.msra.mxu0 %v745_v40  ;;  %1081 = vmatpush2.msra.mxu1 %v873_v28  ;;  %v684_v40 = vld [vmem:[%s9411_s6 + $0x58] sm:$0xff]  ;;  %v783_v28 = vld [vmem:[%s9411_s6 + $0x370] sm:$0xff] }
 0x103   :  { %1011 = vmatprep.subr.mxu0 %v742_v42  ;;  %1082 = vmatprep.subr.mxu1 %v870_v31  ;;  %v680_v42 = vld [vmem:[%s9411_s6 + $0x38] sm:$0xff] }
 0x104   :  { %1012 = vmatpush2.msra.mxu0 %v741_v44  ;;  %1083 = vmatpush2.msra.mxu1 %v869_v32  ;;  %v676_v44 = vld [vmem:[%s9411_s6 + $0x18] sm:$0xff]  ;;  %v779_v32 = vld [vmem:[%s9411_s6 + $0x350] sm:$0xff] }
 0x105   :  { %1013 = vmatprep.subr.mxu0 %v738_v46  ;;  %1084 = vmatprep.subr.mxu1 %v866_v54  ;;  %v800_v46 = vld [vmem:[%s9411_s6 + $0x3f8] sm:$0xff] }
 0x106   :  { %1014 = vmatpush2.msra.mxu0 %v737_v48  ;;  %1085 = vmatpush2.msra.mxu1 %v865_v55  ;;  %v796_v48 = vld [vmem:[%s9411_s6 + $0x3d8] sm:$0xff]  ;;  %v775_v55 = vld [vmem:[%s9411_s6 + $0x330] sm:$0xff] }
 0x107   :  { %1093 = vmatprep.subr.mxu0 %v736_v50  ;;  %1164 = vmatprep.subr.mxu1 %v864_v56  ;;  %v792_v50 = vld [vmem:[%s9411_s6 + $0x3b8] sm:$0xff] }
 0x108   :  { %v788_v52 = vld [vmem:[%s9411_s6 + $0x398] sm:$0xff] }
 0x109   :  { %v784_v27 = vld [vmem:[%s9411_s6 + $0x378] sm:$0xff] }
 0x10a   :  { %v780_v31 = vld [vmem:[%s9411_s6 + $0x358] sm:$0xff] }
 0x10b   :  { %v776_v54 = vld [vmem:[%s9411_s6 + $0x338] sm:$0xff] }
 0x10c   :  { %v772_v56 = vld [vmem:[%s9411_s6 + $0x318] sm:$0xff] }
 0x145   :  { %v451_v60 = vpop.f32.mrf.mxu0  ;;  %v522_v61 = vpop.f32.mrf.mxu1 }
 0x146   :  { %v452_v62 = vadd.f32 %v451_v60, %v368_v58  ;;  %v771_v58 = vld [vmem:[%s9411_s6 + $0x310] sm:$0xff] }
 0x147   :  { %v453_v63 = vpop.f32.mrf.mxu0  ;;  %v524_v2 = vpop.f32.mrf.mxu1  ;;  %v767_v60 = vld [vmem:[%s9411_s6 + $0x2f0] sm:$0xff] }
 0x148   :  { %v454_v0 = vadd.f32 %v453_v63, %v372_v59  ;;  %v5345_v1 = vadd.f32 %v522_v61, %v452_v62  ;;  %v768_v59 = vld [vmem:[%s9411_s6 + $0x2f8] sm:$0xff]  ;;  %v763_v62 = vld [vmem:[%s9411_s6 + $0x2d0] sm:$0xff] }
 0x149   :  { %v764_v61 = vld [vmem:[%s9411_s6 + $0x2d8] sm:$0xff] }
 0x14a   :  { %v525_v3 = vadd.f32 %v524_v2, %v454_v0  ;;  %v669_v10 = vmax.f32 %v5345_v1, 0.0  ;;  %v760_v63 = vld [vmem:[%s9411_s6 + $0x2b8] sm:$0xff]  ;;  %v759_v0 = vld [vmem:[%s9411_s6 + $0x2b0] sm:$0xff] }
 0x14b   :  { %v756_v2 = vld [vmem:[%s9411_s6 + $0x298] sm:$0xff]  ;;  %v855_v1 = vld [vmem:[%s9411_s6 + $0x5b0] sm:$0xff] }
 0x14c   :  { %v670_v4 = vmax.f32 %v525_v3, 0.0  ;;  %v376_v3 = vrot.slane %v5339_v57, %v4535_v8 }
 0x14e   :  { %1015 = vmatprep.mubr.f32.mxu0 %v670_v4 }
 0x14f   :  { %1016 = vmatmul.mubr.f32.vlgmr.msra.gmra.mxu0 %v669_v10 }
 0x150   :  { %1094 = vmatpush1.msra.mxu0 %v735_v11  ;;  %1157 = vmatprep.mubr.f32.mxu0 %v670_v4  ;;  %v755_v4 = vld [vmem:[%s9411_s6 + $0x290] sm:$0xff]  ;;  %v752_v11 = vld [vmem:[%s9411_s6 + $0x278] sm:$0xff] }
 0x151   :  { %1095 = vmatprep.subr.mxu0 %v732_v12  ;;  %v380_v12 = vrot.slane %v5339_v57, %v4538_v9  ;;  %v744_v57 = vld [vmem:[%s9411_s6 + $0x238] sm:$0xff] }
 0x152   :  { %1096 = vmatpush1.msra.mxu0 %v731_v13  ;;  %v751_v13 = vld [vmem:[%s9411_s6 + $0x270] sm:$0xff] }
 0x153   :  { %1097 = vmatprep.subr.mxu0 %v728_v14 }
 0x154   :  { %1098 = vmatpush1.msra.mxu0 %v727_v15 }
 0x155   :  { %1099 = vmatprep.subr.mxu0 %v724_v16  ;;  %v748_v16 = vld [vmem:[%s9411_s6 + $0x258] sm:$0xff] }
 0x156   :  { %1100 = vmatpush1.msra.mxu0 %v723_v17 }
 0x157   :  { %1101 = vmatprep.subr.mxu0 %v720_v18  ;;  %v747_v18 = vld [vmem:[%s9411_s6 + $0x250] sm:$0xff] }
 0x158   :  { %1102 = vmatpush1.msra.mxu0 %v719_v19 }
 0x159   :  { %1103 = vmatprep.subr.mxu0 %v716_v20 }
 0x15a   :  { %1104 = vmatpush1.msra.mxu0 %v715_v21  ;;  %v743_v21 = vld [vmem:[%s9411_s6 + $0x230] sm:$0xff] }
 0x15b   :  { %1105 = vmatprep.subr.mxu0 %v712_v22 }
 0x15c   :  { %1106 = vmatpush1.msra.mxu0 %v711_v23 }
 0x15d   :  { %1107 = vmatprep.subr.mxu0 %v708_v24  ;;  %v740_v24 = vld [vmem:[%s9411_s6 + $0x218] sm:$0xff] }
 0x15e   :  { %1108 = vmatpush1.msra.mxu0 %v707_v25 }
 0x15f   :  { %1109 = vmatprep.subr.mxu0 %v704_v26  ;;  %v739_v26 = vld [vmem:[%s9411_s6 + $0x210] sm:$0xff] }
 0x160   :  { %1110 = vmatpush1.msra.mxu0 %v703_v29 }
 0x161   :  { %1111 = vmatprep.subr.mxu0 %v700_v30 }
 0x162   :  { %1112 = vmatpush1.msra.mxu0 %v699_v33  ;;  %v863_v33 = vld [vmem:[%s9411_s6 + $0x5f0] sm:$0xff] }
 0x163   :  { %1113 = vmatprep.subr.mxu0 %v696_v34  ;;  %v860_v34 = vld [vmem:[%s9411_s6 + $0x5d8] sm:$0xff] }
 0x164   :  { %1114 = vmatpush1.msra.mxu0 %v695_v35  ;;  %v859_v35 = vld [vmem:[%s9411_s6 + $0x5d0] sm:$0xff] }
 0x165   :  { %1115 = vmatprep.subr.mxu0 %v692_v36  ;;  %v856_v36 = vld [vmem:[%s9411_s6 + $0x5b8] sm:$0xff] }
 0x166   :  { %1116 = vmatpush1.msra.mxu0 %v691_v37  ;;  %v2297_v37 = vld [vmem:[%s9414_s9 + $0xf0] sm:$0xff] }
 0x167   :  { %1117 = vmatprep.subr.mxu0 %v688_v38  ;;  %v2296_v38 = vld [vmem:[%s9414_s9 + $0xe8] sm:$0xff] }
 0x168   :  { %1118 = vmatpush1.msra.mxu0 %v687_v39  ;;  %v852_v39 = vld [vmem:[%s9411_s6 + $0x598] sm:$0xff] }
 0x169   :  { %1119 = vmatprep.subr.mxu0 %v684_v40  ;;  %v2295_v40 = vld [vmem:[%s9414_s9 + $0xe0] sm:$0xff] }
 0x16a   :  { %1120 = vmatpush1.msra.mxu0 %v683_v41  ;;  %v851_v41 = vld [vmem:[%s9411_s6 + $0x590] sm:$0xff] }
 0x16b   :  { %1121 = vmatprep.subr.mxu0 %v680_v42  ;;  %v2294_v42 = vld [vmem:[%s9414_s9 + $0xd8] sm:$0xff] }
 0x16c   :  { %1122 = vmatpush1.msra.mxu0 %v679_v43  ;;  %v848_v43 = vld [vmem:[%s9411_s6 + $0x578] sm:$0xff] }
 0x16d   :  { %1123 = vmatprep.subr.mxu0 %v676_v44  ;;  %v2293_v44 = vld [vmem:[%s9414_s9 + $0xd0] sm:$0xff] }
 0x16e   :  { %1124 = vmatpush1.msra.mxu0 %v675_v45  ;;  %v847_v45 = vld [vmem:[%s9411_s6 + $0x570] sm:$0xff] }
 0x16f   :  { %1125 = vmatprep.subr.mxu0 %v800_v46  ;;  %v2292_v46 = vld [vmem:[%s9414_s9 + $0xc8] sm:$0xff] }
 0x170   :  { %1126 = vmatpush2.msra.mxu0 %v799_v47  ;;  %v844_v47 = vld [vmem:[%s9411_s6 + $0x558] sm:$0xff] }
 0x171   :  { %1127 = vmatprep.subr.mxu0 %v796_v48  ;;  %v2291_v48 = vld [vmem:[%s9414_s9 + $0xc0] sm:$0xff] }
 0x172   :  { %1128 = vmatpush2.msra.mxu0 %v795_v49  ;;  %v843_v49 = vld [vmem:[%s9411_s6 + $0x550] sm:$0xff] }
 0x173   :  { %1129 = vmatprep.subr.mxu0 %v792_v50  ;;  %v2290_v50 = vld [vmem:[%s9414_s9 + $0xb8] sm:$0xff] }
 0x174   :  { %1130 = vmatpush2.msra.mxu0 %v791_v51  ;;  %v840_v51 = vld [vmem:[%s9411_s6 + $0x538] sm:$0xff] }
 0x175   :  { %1131 = vmatprep.subr.mxu0 %v788_v52  ;;  %v2289_v52 = vld [vmem:[%s9414_s9 + $0xb0] sm:$0xff] }
 0x176   :  { %1132 = vmatpush2.msra.mxu0 %v787_v53  ;;  %v839_v53 = vld [vmem:[%s9411_s6 + $0x530] sm:$0xff] }
 0x177   :  { %1133 = vmatprep.subr.mxu0 %v784_v27  ;;  %v2288_v27 = vld [vmem:[%s9414_s9 + $0xa8] sm:$0xff] }
 0x178   :  { %1134 = vmatpush2.msra.mxu0 %v783_v28  ;;  %v836_v28 = vld [vmem:[%s9411_s6 + $0x518] sm:$0xff] }
 0x179   :  { %1135 = vmatprep.subr.mxu0 %v780_v31  ;;  %v2287_v31 = vld [vmem:[%s9414_s9 + $0xa0] sm:$0xff] }
 0x17a   :  { %1136 = vmatpush2.msra.mxu0 %v779_v32  ;;  %v835_v32 = vld [vmem:[%s9411_s6 + $0x510] sm:$0xff] }
 0x17b   :  { %1137 = vmatprep.subr.mxu0 %v776_v54  ;;  %v2286_v54 = vld [vmem:[%s9414_s9 + $0x98] sm:$0xff] }
 0x17c   :  { %1138 = vmatpush2.msra.mxu0 %v775_v55  ;;  %v832_v55 = vld [vmem:[%s9411_s6 + $0x4f8] sm:$0xff] }
 0x17d   :  { %1139 = vmatprep.subr.mxu0 %v772_v56  ;;  %v2285_v56 = vld [vmem:[%s9414_s9 + $0x90] sm:$0xff] }
 0x17e   :  { %1140 = vmatpush2.msra.mxu0 %v771_v58  ;;  %v831_v58 = vld [vmem:[%s9411_s6 + $0x4f0] sm:$0xff] }
 0x17f   :  { %1141 = vmatprep.subr.mxu0 %v768_v59  ;;  %v2284_v59 = vld [vmem:[%s9414_s9 + $0x88] sm:$0xff] }
 0x180   :  { %1142 = vmatpush2.msra.mxu0 %v767_v60  ;;  %v828_v60 = vld [vmem:[%s9411_s6 + $0x4d8] sm:$0xff] }
 0x181   :  { %1143 = vmatprep.subr.mxu0 %v764_v61  ;;  %v2283_v61 = vld [vmem:[%s9414_s9 + $0x80] sm:$0xff] }
 0x182   :  { %1144 = vmatpush2.msra.mxu0 %v763_v62  ;;  %v827_v62 = vld [vmem:[%s9411_s6 + $0x4d0] sm:$0xff] }
 0x183   :  { %1145 = vmatprep.subr.mxu0 %v760_v63  ;;  %v2282_v63 = vld [vmem:[%s9414_s9 + $0x78] sm:$0xff] }
 0x184   :  { %1146 = vmatpush2.msra.mxu0 %v759_v0  ;;  %v824_v0 = vld [vmem:[%s9411_s6 + $0x4b8] sm:$0xff] }
 0x185   :  { %1147 = vmatprep.subr.mxu0 %v756_v2  ;;  %v2281_v2 = vld [vmem:[%s9414_s9 + $0x70] sm:$0xff] }
 0x186   :  { %v593_v14 = vpop.f32.mrf.mxu0  ;;  %v664_v15 = vpop.f32.mrf.mxu1  ;;  %1148 = vmatpush2.msra.mxu0 %v755_v4  ;;  %v2280_v4 = vld [vmem:[%s9414_s9 + $0x68] sm:$0xff] }
 0x187   :  { %v594_v17 = vadd.f32 %v593_v14, %v376_v3  ;;  %1149 = vmatprep.subr.mxu0 %v752_v11  ;;  %v823_v3 = vld [vmem:[%s9411_s6 + $0x4b0] sm:$0xff]  ;;  %v820_v11 = vld [vmem:[%s9411_s6 + $0x498] sm:$0xff] }
 0x188   :  { %v595_v19 = vpop.f32.mrf.mxu0  ;;  %1150 = vmatpush2.msra.mxu0 %v751_v13  ;;  %v666_v23 = vpop.f32.mrf.mxu1  ;;  %v819_v13 = vld [vmem:[%s9411_s6 + $0x490] sm:$0xff]  ;;  %v2278_v14 = vld [vmem:[%s9414_s9 + $0x58] sm:$0xff] }
 0x189   :  { %v596_v20 = vadd.f32 %v595_v19, %v380_v12  ;;  %1151 = vmatprep.subr.mxu0 %v748_v16  ;;  %v5537_v22 = vadd.f32 %v664_v15, %v594_v17  ;;  %v2279_v12 = vld [vmem:[%s9414_s9 + $0x60] sm:$0xff]  ;;  %v816_v15 = vld [vmem:[%s9411_s6 + $0x478] sm:$0xff]  ;;  %v2277_v16 = vld [vmem:[%s9414_s9 + $0x50] sm:$0xff] }
 0x18a   :  { %1152 = vmatpush2.msra.mxu0 %v747_v18  ;;  %v815_v17 = vld [vmem:[%s9411_s6 + $0x470] sm:$0xff]  ;;  %v2276_v18 = vld [vmem:[%s9414_s9 + $0x48] sm:$0xff]  ;;  %v812_v19 = vld [vmem:[%s9411_s6 + $0x458] sm:$0xff] }
 0x18b   :  { %v667_v25 = vadd.f32 %v666_v23, %v596_v20  ;;  %1153 = vmatprep.subr.mxu0 %v744_v57  ;;  %v671_v30 = vmax.f32 %v5537_v22, 0.0  ;;  %v2275_v57 = vld [vmem:[%s9414_s9 + $0x40] sm:$0xff]  ;;  %v811_v20 = vld [vmem:[%s9411_s6 + $0x450] sm:$0xff]  ;;  %v808_v23 = vld [vmem:[%s9411_s6 + $0x438] sm:$0xff] }
 0x18c   :  { %1154 = vmatpush2.msra.mxu0 %v743_v21  ;;  %v2274_v21 = vld [vmem:[%s9414_s9 + $0x38] sm:$0xff]  ;;  %v2301_v22 = vld [vmem:[%s9414_s9 + $0x110] sm:$0xff] }
 0x18d   :  { %v672_v29 = vmax.f32 %v667_v25, 0.0  ;;  %1155 = vmatprep.subr.mxu0 %v740_v24  ;;  %v2273_v24 = vld [vmem:[%s9414_s9 + $0x30] sm:$0xff] }
 0x18e   :  { %1156 = vmatpush2.msra.mxu0 %v739_v26  ;;  %v807_v25 = vld [vmem:[%s9411_s6 + $0x430] sm:$0xff]  ;;  %v2272_v26 = vld [vmem:[%s9414_s9 + $0x28] sm:$0xff] }
 0x18f   :  { %1086 = vmatprep.mubr.f32.mxu1 %v672_v29  ;;  %1158 = vmatmul.mubr.f32.vlgmr.msra.gmra.mxu0 %v669_v10  ;;  %v2298_v10 = vld [vmem:[%s9414_s9 + $0xf8] sm:$0xff] }
 0x190   :  { %1087 = vmatmul.mubr.f32.vlgmr.msra.gmra.mxu1 %v671_v30  ;;  %2395 = vmatprep.subr.mxu0 %v2298_v10  ;;  %v927_v10 = vld [vmem:[%s9411_s6 + $0x7f0] sm:$0xff] }
 0x191   :  { %1165 = vmatpush1.msra.mxu1 %v863_v33  ;;  %1228 = vmatprep.mubr.f32.mxu1 %v672_v29  ;;  %v804_v29 = vld [vmem:[%s9411_s6 + $0x418] sm:$0xff]  ;;  %v2271_v33 = vld [vmem:[%s9414_s9 + $0x20] sm:$0xff] }
 0x192   :  { %1166 = vmatprep.subr.mxu1 %v860_v34  ;;  %2396 = vmatpush1.msra.mxu0 %v2297_v37  ;;  %v803_v34 = vld [vmem:[%s9411_s6 + $0x410] sm:$0xff]  ;;  %v2268_v37 = vld [vmem:[%s9414_s9 + $0x8] sm:$0xff] }
 0x193   :  { %1167 = vmatpush1.msra.mxu1 %v859_v35  ;;  %2397 = vmatprep.subr.mxu0 %v2296_v38  ;;  %v2270_v35 = vld [vmem:[%s9414_s9 + $0x18] sm:$0xff] }
 0x194   :  { %1168 = vmatprep.subr.mxu1 %v856_v36  ;;  %2398 = vmatpush1.msra.mxu0 %v2295_v40  ;;  %v928_v36 = vld [vmem:[%s9411_s6 + $0x7f8] sm:$0xff]  ;;  %v923_v40 = vld [vmem:[%s9411_s6 + $0x7d0] sm:$0xff] }
 0x195   :  { %1169 = vmatpush1.msra.mxu1 %v855_v1  ;;  %2399 = vmatprep.subr.mxu0 %v2294_v42  ;;  %v2269_v1 = vld [vmem:[%s9414_s9 + $0x10] sm:$0xff]  ;;  %v924_v38 = vld [vmem:[%s9411_s6 + $0x7d8] sm:$0xff] }
 0x196   :  { %1170 = vmatprep.subr.mxu1 %v852_v39  ;;  %2400 = vmatpush1.msra.mxu0 %v2293_v44  ;;  %v2267_v39 = vld [vmem:[%s9414_s9] sm:$0xff]  ;;  %v920_v42 = vld [vmem:[%s9411_s6 + $0x7b8] sm:$0xff]  ;;  %v919_v44 = vld [vmem:[%s9411_s6 + $0x7b0] sm:$0xff] }
 0x197   :  { %1171 = vmatpush1.msra.mxu1 %v851_v41  ;;  %2401 = vmatprep.subr.mxu0 %v2292_v46  ;;  %v2330_v41 = vld [vmem:[%s9414_s9 + $0x1f8] sm:$0xff] }
 0x198   :  { %1172 = vmatprep.subr.mxu1 %v848_v43  ;;  %2402 = vmatpush1.msra.mxu0 %v2291_v48  ;;  %v2329_v43 = vld [vmem:[%s9414_s9 + $0x1f0] sm:$0xff]  ;;  %v916_v46 = vld [vmem:[%s9411_s6 + $0x798] sm:$0xff] }
 0x199   :  { %1173 = vmatpush1.msra.mxu1 %v847_v45  ;;  %2403 = vmatprep.subr.mxu0 %v2290_v50  ;;  %v2328_v45 = vld [vmem:[%s9414_s9 + $0x1e8] sm:$0xff]  ;;  %v915_v48 = vld [vmem:[%s9411_s6 + $0x790] sm:$0xff]  ;;  %v912_v50 = vld [vmem:[%s9411_s6 + $0x778] sm:$0xff] }
 0x19a   :  { %1174 = vmatprep.subr.mxu1 %v844_v47  ;;  %2404 = vmatpush1.msra.mxu0 %v2289_v52  ;;  %v2327_v47 = vld [vmem:[%s9414_s9 + $0x1e0] sm:$0xff]  ;;  %v911_v52 = vld [vmem:[%s9411_s6 + $0x770] sm:$0xff] }
 0x19b   :  { %1175 = vmatpush1.msra.mxu1 %v843_v49  ;;  %2405 = vmatprep.subr.mxu0 %v2288_v27  ;;  %v2326_v49 = vld [vmem:[%s9414_s9 + $0x1d8] sm:$0xff] }
 0x19c   :  { %1176 = vmatprep.subr.mxu1 %v840_v51  ;;  %2406 = vmatpush1.msra.mxu0 %v2287_v31  ;;  %v2325_v51 = vld [vmem:[%s9414_s9 + $0x1d0] sm:$0xff]  ;;  %v908_v27 = vld [vmem:[%s9411_s6 + $0x758] sm:$0xff] }
 0x19d   :  { %1177 = vmatpush1.msra.mxu1 %v839_v53  ;;  %2407 = vmatprep.subr.mxu0 %v2286_v54  ;;  %v2324_v53 = vld [vmem:[%s9414_s9 + $0x1c8] sm:$0xff]  ;;  %v907_v31 = vld [vmem:[%s9411_s6 + $0x750] sm:$0xff]  ;;  %v904_v54 = vld [vmem:[%s9411_s6 + $0x738] sm:$0xff] }
 0x19e   :  { %1178 = vmatprep.subr.mxu1 %v836_v28  ;;  %2408 = vmatpush1.msra.mxu0 %v2285_v56  ;;  %v2323_v28 = vld [vmem:[%s9414_s9 + $0x1c0] sm:$0xff]  ;;  %v903_v56 = vld [vmem:[%s9411_s6 + $0x730] sm:$0xff] }
 0x19f   :  { %1179 = vmatpush1.msra.mxu1 %v835_v32  ;;  %2409 = vmatprep.subr.mxu0 %v2284_v59  ;;  %v2322_v32 = vld [vmem:[%s9414_s9 + $0x1b8] sm:$0xff] }
 0x1a0   :  { %1180 = vmatprep.subr.mxu1 %v832_v55  ;;  %2410 = vmatpush1.msra.mxu0 %v2283_v61  ;;  %v2321_v55 = vld [vmem:[%s9414_s9 + $0x1b0] sm:$0xff]  ;;  %v900_v59 = vld [vmem:[%s9411_s6 + $0x718] sm:$0xff] }
 0x1a1   :  { %1181 = vmatpush1.msra.mxu1 %v831_v58  ;;  %2411 = vmatprep.subr.mxu0 %v2282_v63  ;;  %v2320_v58 = vld [vmem:[%s9414_s9 + $0x1a8] sm:$0xff]  ;;  %v899_v61 = vld [vmem:[%s9411_s6 + $0x710] sm:$0xff]  ;;  %v896_v63 = vld [vmem:[%s9411_s6 + $0x6f8] sm:$0xff] }
 0x1a2   :  { %1182 = vmatprep.subr.mxu1 %v828_v60  ;;  %2412 = vmatpush1.msra.mxu0 %v2281_v2  ;;  %v2319_v60 = vld [vmem:[%s9414_s9 + $0x1a0] sm:$0xff]  ;;  %v895_v2 = vld [vmem:[%s9411_s6 + $0x6f0] sm:$0xff] }
 0x1a3   :  { %1183 = vmatpush1.msra.mxu1 %v827_v62  ;;  %2413 = vmatprep.subr.mxu0 %v2280_v4  ;;  %v2318_v62 = vld [vmem:[%s9414_s9 + $0x198] sm:$0xff] }
 0x1a4   :  { %1184 = vmatprep.subr.mxu1 %v824_v0  ;;  %2414 = vmatpush1.msra.mxu0 %v2279_v12  ;;  %v2317_v0 = vld [vmem:[%s9414_s9 + $0x190] sm:$0xff]  ;;  %v892_v4 = vld [vmem:[%s9411_s6 + $0x6d8] sm:$0xff] }
 0x1a5   :  { %1185 = vmatpush1.msra.mxu1 %v823_v3  ;;  %2415 = vmatprep.subr.mxu0 %v2278_v14  ;;  %v2316_v3 = vld [vmem:[%s9414_s9 + $0x188] sm:$0xff]  ;;  %v891_v12 = vld [vmem:[%s9411_s6 + $0x6d0] sm:$0xff]  ;;  %v888_v14 = vld [vmem:[%s9411_s6 + $0x6b8] sm:$0xff] }
 0x1a6   :  { %1186 = vmatprep.subr.mxu1 %v820_v11  ;;  %2416 = vmatpush1.msra.mxu0 %v2277_v16  ;;  %v2315_v11 = vld [vmem:[%s9414_s9 + $0x180] sm:$0xff]  ;;  %v887_v16 = vld [vmem:[%s9411_s6 + $0x6b0] sm:$0xff] }
 0x1a7   :  { %1187 = vmatpush1.msra.mxu1 %v819_v13  ;;  %2417 = vmatprep.subr.mxu0 %v2276_v18  ;;  %v2314_v13 = vld [vmem:[%s9414_s9 + $0x178] sm:$0xff] }
 0x1a8   :  { %1188 = vmatprep.subr.mxu1 %v816_v15  ;;  %2418 = vmatpush1.msra.mxu0 %v2275_v57  ;;  %v2313_v15 = vld [vmem:[%s9414_s9 + $0x170] sm:$0xff]  ;;  %v884_v18 = vld [vmem:[%s9411_s6 + $0x698] sm:$0xff] }
 0x1a9   :  { %1189 = vmatpush1.msra.mxu1 %v815_v17  ;;  %2419 = vmatprep.subr.mxu0 %v2274_v21  ;;  %v2312_v17 = vld [vmem:[%s9414_s9 + $0x168] sm:$0xff]  ;;  %v883_v57 = vld [vmem:[%s9411_s6 + $0x690] sm:$0xff]  ;;  %v880_v21 = vld [vmem:[%s9411_s6 + $0x678] sm:$0xff] }
 0x1aa   :  { %1190 = vmatprep.subr.mxu1 %v812_v19  ;;  %2420 = vmatpush1.msra.mxu0 %v2273_v24  ;;  %v2311_v19 = vld [vmem:[%s9414_s9 + $0x160] sm:$0xff]  ;;  %v879_v24 = vld [vmem:[%s9411_s6 + $0x670] sm:$0xff] }
 0x1ab   :  { %1191 = vmatpush1.msra.mxu1 %v811_v20  ;;  %2421 = vmatprep.subr.mxu0 %v2272_v26  ;;  %v2310_v20 = vld [vmem:[%s9414_s9 + $0x158] sm:$0xff] }
 0x1ac   :  { %1192 = vmatprep.subr.mxu1 %v808_v23  ;;  %2422 = vmatpush1.msra.mxu0 %v2271_v33  ;;  %v2309_v23 = vld [vmem:[%s9414_s9 + $0x150] sm:$0xff]  ;;  %v876_v26 = vld [vmem:[%s9411_s6 + $0x658] sm:$0xff] }
 0x1ad   :  { %1193 = vmatpush1.msra.mxu1 %v807_v25  ;;  %2423 = vmatprep.subr.mxu0 %v2270_v35  ;;  %v2308_v25 = vld [vmem:[%s9414_s9 + $0x148] sm:$0xff]  ;;  %v875_v33 = vld [vmem:[%s9411_s6 + $0x650] sm:$0xff]  ;;  %v872_v35 = vld [vmem:[%s9411_s6 + $0x638] sm:$0xff] }
 0x1ae   :  { %1194 = vmatprep.subr.mxu1 %v804_v29  ;;  %2424 = vmatpush1.msra.mxu0 %v2269_v1  ;;  %v2307_v29 = vld [vmem:[%s9414_s9 + $0x140] sm:$0xff]  ;;  %v871_v1 = vld [vmem:[%s9411_s6 + $0x630] sm:$0xff] }
 0x1af   :  { %1195 = vmatpush1.msra.mxu1 %v803_v34  ;;  %2425 = vmatprep.subr.mxu0 %v2268_v37  ;;  %v2306_v34 = vld [vmem:[%s9414_s9 + $0x138] sm:$0xff]  ;;  %v867_v37 = vld [vmem:[%s9411_s6 + $0x610] sm:$0xff] }
 0x1b0   :  { %1196 = vmatprep.subr.mxu1 %v928_v36  ;;  %2426 = vmatpush1.msra.mxu0 %v2267_v39  ;;  %v2305_v36 = vld [vmem:[%s9414_s9 + $0x130] sm:$0xff]  ;;  %v2303_v39 = vld [vmem:[%s9414_s9 + $0x120] sm:$0xff] }
 0x1b1   :  { %1197 = vmatpush2.msra.mxu1 %v927_v10  ;;  %2427 = vmatprep.subr.mxu0 %v2330_v41  ;;  %v868_v10 = vld [vmem:[%s9411_s6 + $0x618] sm:$0xff] }
 0x1b2   :  { %1198 = vmatprep.subr.mxu1 %v924_v38  ;;  %2428 = vmatpush2.msra.mxu0 %v2329_v43  ;;  %v2304_v38 = vld [vmem:[%s9414_s9 + $0x128] sm:$0xff]  ;;  %v2362_v41 = vld [vmem:[%s9414_s9 + $0x2f8] sm:$0xff]  ;;  %v2361_v43 = vld [vmem:[%s9414_s9 + $0x2f0] sm:$0xff] }
 0x1b3   :  { %1199 = vmatpush2.msra.mxu1 %v923_v40  ;;  %2429 = vmatprep.subr.mxu0 %v2328_v45  ;;  %v2302_v40 = vld [vmem:[%s9414_s9 + $0x118] sm:$0xff] }
 0x1b4   :  { %1200 = vmatprep.subr.mxu1 %v920_v42  ;;  %2430 = vmatpush2.msra.mxu0 %v2327_v47  ;;  %v2299_v42 = vld [vmem:[%s9414_s9 + $0x100] sm:$0xff]  ;;  %v1274_v45 = vld [vmem:[%s9413_s8 + $0xf8] sm:$0xff] }
 0x1b5   :  { %1201 = vmatpush2.msra.mxu1 %v919_v44  ;;  %2431 = vmatprep.subr.mxu0 %v2326_v49  ;;  %v2360_v44 = vld [vmem:[%s9414_s9 + $0x2e8] sm:$0xff]  ;;  %v2358_v47 = vld [vmem:[%s9414_s9 + $0x2d8] sm:$0xff] }
 0x1b6   :  { %1202 = vmatprep.subr.mxu1 %v916_v46  ;;  %2432 = vmatpush2.msra.mxu0 %v2325_v51  ;;  %v2359_v46 = vld [vmem:[%s9414_s9 + $0x2e0] sm:$0xff]  ;;  %v2356_v49 = vld [vmem:[%s9414_s9 + $0x2c8] sm:$0xff]  ;;  %v2354_v51 = vld [vmem:[%s9414_s9 + $0x2b8] sm:$0xff] }
 0x1b7   :  { %1203 = vmatpush2.msra.mxu1 %v915_v48  ;;  %2433 = vmatprep.subr.mxu0 %v2324_v53  ;;  %v2357_v48 = vld [vmem:[%s9414_s9 + $0x2d0] sm:$0xff]  ;;  %v2352_v53 = vld [vmem:[%s9414_s9 + $0x2a8] sm:$0xff] }
 0x1b8   :  { %1204 = vmatprep.subr.mxu1 %v912_v50  ;;  %2434 = vmatpush2.msra.mxu0 %v2323_v28  ;;  %v2355_v50 = vld [vmem:[%s9414_s9 + $0x2c0] sm:$0xff]  ;;  %v2350_v28 = vld [vmem:[%s9414_s9 + $0x298] sm:$0xff] }
 0x1b9   :  { %1205 = vmatpush2.msra.mxu1 %v911_v52  ;;  %2435 = vmatprep.subr.mxu0 %v2322_v32  ;;  %v2353_v52 = vld [vmem:[%s9414_s9 + $0x2b0] sm:$0xff]  ;;  %v2348_v32 = vld [vmem:[%s9414_s9 + $0x288] sm:$0xff] }
 0x1ba   :  { %1206 = vmatprep.subr.mxu1 %v908_v27  ;;  %2436 = vmatpush2.msra.mxu0 %v2321_v55  ;;  %v2351_v27 = vld [vmem:[%s9414_s9 + $0x2a0] sm:$0xff]  ;;  %v2346_v55 = vld [vmem:[%s9414_s9 + $0x278] sm:$0xff] }
 0x1bb   :  { %1207 = vmatpush2.msra.mxu1 %v907_v31  ;;  %2437 = vmatprep.subr.mxu0 %v2320_v58  ;;  %v2349_v31 = vld [vmem:[%s9414_s9 + $0x290] sm:$0xff]  ;;  %v2344_v58 = vld [vmem:[%s9414_s9 + $0x268] sm:$0xff] }
 0x1bc   :  { %1208 = vmatprep.subr.mxu1 %v904_v54  ;;  %2438 = vmatpush2.msra.mxu0 %v2319_v60  ;;  %v2347_v54 = vld [vmem:[%s9414_s9 + $0x280] sm:$0xff]  ;;  %v2342_v60 = vld [vmem:[%s9414_s9 + $0x258] sm:$0xff] }
 0x1bd   :  { %1209 = vmatpush2.msra.mxu1 %v903_v56  ;;  %2439 = vmatprep.subr.mxu0 %v2318_v62  ;;  %v2345_v56 = vld [vmem:[%s9414_s9 + $0x270] sm:$0xff]  ;;  %v2340_v62 = vld [vmem:[%s9414_s9 + $0x248] sm:$0xff] }
 0x1be   :  { %1210 = vmatprep.subr.mxu1 %v900_v59  ;;  %2440 = vmatpush2.msra.mxu0 %v2317_v0  ;;  %v2343_v59 = vld [vmem:[%s9414_s9 + $0x260] sm:$0xff]  ;;  %v2338_v0 = vld [vmem:[%s9414_s9 + $0x238] sm:$0xff] }
 0x1bf   :  { %1211 = vmatpush2.msra.mxu1 %v899_v61  ;;  %2441 = vmatprep.subr.mxu0 %v2316_v3  ;;  %v2341_v61 = vld [vmem:[%s9414_s9 + $0x250] sm:$0xff]  ;;  %v2336_v3 = vld [vmem:[%s9414_s9 + $0x228] sm:$0xff] }
 0x1c0   :  { %1212 = vmatprep.subr.mxu1 %v896_v63  ;;  %2442 = vmatpush2.msra.mxu0 %v2315_v11  ;;  %v2339_v63 = vld [vmem:[%s9414_s9 + $0x240] sm:$0xff]  ;;  %v2334_v11 = vld [vmem:[%s9414_s9 + $0x218] sm:$0xff] }
 0x1c1   :  { %1213 = vmatpush2.msra.mxu1 %v895_v2  ;;  %2443 = vmatprep.subr.mxu0 %v2314_v13  ;;  %v2337_v2 = vld [vmem:[%s9414_s9 + $0x230] sm:$0xff]  ;;  %v2332_v13 = vld [vmem:[%s9414_s9 + $0x208] sm:$0xff] }
 0x1c2   :  { %1214 = vmatprep.subr.mxu1 %v892_v4  ;;  %2444 = vmatpush2.msra.mxu0 %v2313_v15  ;;  %v2335_v4 = vld [vmem:[%s9414_s9 + $0x220] sm:$0xff]  ;;  %v2394_v15 = vld [vmem:[%s9414_s9 + $0x3f8] sm:$0xff] }
 0x1c3   :  { %1215 = vmatpush2.msra.mxu1 %v891_v12  ;;  %2445 = vmatprep.subr.mxu0 %v2312_v17  ;;  %v2333_v12 = vld [vmem:[%s9414_s9 + $0x210] sm:$0xff]  ;;  %v2392_v17 = vld [vmem:[%s9414_s9 + $0x3e8] sm:$0xff] }
 0x1c4   :  { %1216 = vmatprep.subr.mxu1 %v888_v14  ;;  %2446 = vmatpush2.msra.mxu0 %v2311_v19  ;;  %v2331_v14 = vld [vmem:[%s9414_s9 + $0x200] sm:$0xff]  ;;  %v2390_v19 = vld [vmem:[%s9414_s9 + $0x3d8] sm:$0xff] }
 0x1c5   :  { %1217 = vmatpush2.msra.mxu1 %v887_v16  ;;  %2447 = vmatprep.subr.mxu0 %v2310_v20  ;;  %v2393_v16 = vld [vmem:[%s9414_s9 + $0x3f0] sm:$0xff]  ;;  %v2388_v20 = vld [vmem:[%s9414_s9 + $0x3c8] sm:$0xff] }
 0x1c6   :  { %1218 = vmatprep.subr.mxu1 %v884_v18  ;;  %2448 = vmatpush2.msra.mxu0 %v2309_v23  ;;  %v2391_v18 = vld [vmem:[%s9414_s9 + $0x3e0] sm:$0xff]  ;;  %v2386_v23 = vld [vmem:[%s9414_s9 + $0x3b8] sm:$0xff] }
 0x1c7   :  { %1219 = vmatpush2.msra.mxu1 %v883_v57  ;;  %2449 = vmatprep.subr.mxu0 %v2308_v25  ;;  %v2389_v57 = vld [vmem:[%s9414_s9 + $0x3d0] sm:$0xff]  ;;  %v2384_v25 = vld [vmem:[%s9414_s9 + $0x3a8] sm:$0xff] }
 0x1c8   :  { %1220 = vmatprep.subr.mxu1 %v880_v21  ;;  %2450 = vmatpush2.msra.mxu0 %v2307_v29  ;;  %v2387_v21 = vld [vmem:[%s9414_s9 + $0x3c0] sm:$0xff]  ;;  %v2382_v29 = vld [vmem:[%s9414_s9 + $0x398] sm:$0xff] }
 0x1c9   :  { %1221 = vmatpush2.msra.mxu1 %v879_v24  ;;  %2451 = vmatprep.subr.mxu0 %v2306_v34  ;;  %v2385_v24 = vld [vmem:[%s9414_s9 + $0x3b0] sm:$0xff]  ;;  %v2380_v34 = vld [vmem:[%s9414_s9 + $0x388] sm:$0xff] }
 0x1ca   :  { %1222 = vmatprep.subr.mxu1 %v876_v26  ;;  %2452 = vmatpush2.msra.mxu0 %v2305_v36  ;;  %v2383_v26 = vld [vmem:[%s9414_s9 + $0x3a0] sm:$0xff]  ;;  %v2378_v36 = vld [vmem:[%s9414_s9 + $0x378] sm:$0xff] }
 0x1cb   :  { %1223 = vmatpush2.msra.mxu1 %v875_v33  ;;  %2453 = vmatprep.subr.mxu0 %v2304_v38  ;;  %v2381_v33 = vld [vmem:[%s9414_s9 + $0x390] sm:$0xff]  ;;  %v2374_v38 = vld [vmem:[%s9414_s9 + $0x358] sm:$0xff] }
 0x1cc   :  { %1224 = vmatprep.subr.mxu1 %v872_v35  ;;  %2454 = vmatpush2.msra.mxu0 %v2303_v39  ;;  %v2379_v35 = vld [vmem:[%s9414_s9 + $0x380] sm:$0xff]  ;;  %v2373_v39 = vld [vmem:[%s9414_s9 + $0x350] sm:$0xff] }
 0x1cd   :  { %1225 = vmatpush2.msra.mxu1 %v871_v1  ;;  %2455 = vmatprep.subr.mxu0 %v2302_v40  ;;  %v2377_v1 = vld [vmem:[%s9414_s9 + $0x370] sm:$0xff]  ;;  %v2372_v40 = vld [vmem:[%s9414_s9 + $0x348] sm:$0xff] }
 0x1ce   :  { %1226 = vmatprep.subr.mxu1 %v868_v10  ;;  %2456 = vmatpush2.msra.mxu0 %v2301_v22  ;;  %v2376_v10 = vld [vmem:[%s9414_s9 + $0x368] sm:$0xff]  ;;  %v2371_v22 = vld [vmem:[%s9414_s9 + $0x340] sm:$0xff] }
 0x1cf   :  { %1227 = vmatpush2.msra.mxu1 %v867_v37  ;;  %v2375_v37 = vld [vmem:[%s9414_s9 + $0x360] sm:$0xff] }
 0x1d0   :  { %1229 = vmatmul.mubr.f32.vlgmr.msra.gmra.mxu1 %v671_v30  ;;  %v2300_v30 = vld [vmem:[%s9414_s9 + $0x108] sm:$0xff]  ;;  %2466 = vmatprep.subr.mxu1 %v2362_v41  ;;  %v2369_v41 = vld [vmem:[%s9414_s9 + $0x330] sm:$0xff] }
 0x1d1   :  { %2457 = vmatprep.subr.mxu0 %v2300_v30  ;;  %2467 = vmatpush1.msra.mxu1 %v2361_v43  ;;  %v2370_v30 = vld [vmem:[%s9414_s9 + $0x338] sm:$0xff]  ;;  %v2367_v43 = vld [vmem:[%s9414_s9 + $0x320] sm:$0xff] }
 0x1d2   :  { %2458 = vmatpush2.msra.mxu0 %v2299_v42  ;;  %2468 = vmatprep.subr.mxu1 %v2360_v44  ;;  %v2368_v42 = vld [vmem:[%s9414_s9 + $0x328] sm:$0xff]  ;;  %v2366_v44 = vld [vmem:[%s9414_s9 + $0x318] sm:$0xff] }
 0x1d3   :  { %2713 = vmatprep.subr.mxu0 %v1274_v45  ;;  %2469 = vmatpush1.msra.mxu1 %v2359_v46  ;;  %v2365_v45 = vld [vmem:[%s9414_s9 + $0x310] sm:$0xff]  ;;  %v2364_v46 = vld [vmem:[%s9414_s9 + $0x308] sm:$0xff] }
 0x1d4   :  { %2470 = vmatprep.subr.mxu1 %v2358_v47  ;;  %v2363_v47 = vld [vmem:[%s9414_s9 + $0x300] sm:$0xff] }
 0x1d5   :  { %2471 = vmatpush1.msra.mxu1 %v2357_v48  ;;  %v1338_v48 = vld [vmem:[%s9413_s8 + $0x2f8] sm:$0xff] }
 0x1d6   :  { %2472 = vmatprep.subr.mxu1 %v2356_v49  ;;  %v4061_v49 = vmov 1983009808  }
 0x1d7   :  { %2473 = vmatpush1.msra.mxu1 %v2355_v50  ;;  %v2547_v50 = vunpack.c.l.s4 %v4061_v49  ;;  %v1295_v49 = vld [vmem:[%s9413_s8 + $0x1a0] sm:$0xff] }
 0x1d8   :  { %2474 = vmatprep.subr.mxu1 %v2354_v51 }
 0x1d9   :  { %2475 = vmatpush1.msra.mxu1 %v2353_v52  ;;  %v2548_v51 = vunpack.c.0.s8 %v2547_v50  ;;  %v1294_v50 = vld [vmem:[%s9413_s8 + $0x198] sm:$0xff] }
 0x1da   :  { %2476 = vmatprep.subr.mxu1 %v2352_v53 }
 0x1db   :  { %2477 = vmatpush1.msra.mxu1 %v2351_v27  ;;  %v6132_v53 = vsub.s32 %v2548_v51, %v4526_v5  ;;  %v6137_v27 = vld [vmem:[%s9412_s7] sm:$0xf]  ;;  %v1293_v51 = vld [vmem:[%s9413_s8 + $0x190] sm:$0xff] }
 0x1dc   :  { %2478 = vmatprep.subr.mxu1 %v2350_v28  ;;  %v6142_v28 = vld [vmem:[%s9405_s0] sm:$0xff] }
 0x1dd   :  { %2479 = vmatpush1.msra.mxu1 %v2349_v31  ;;  %v938_v31 = vrot.slane %v6137_v27, %v4532_v7  ;;  %v6150_v5 = vrot.slane %v6142_v28, %v6132_v53 }
 0x1de   :  { %2480 = vmatprep.subr.mxu1 %v2348_v32  ;;  %v934_v32 = vrot.slane %v6137_v27, %v4529_v6 }
 0x1df   :  { %2481 = vmatpush1.msra.mxu1 %v2347_v54 }
 0x1e0   :  { %2482 = vmatprep.subr.mxu1 %v2346_v55 }
 0x1e1   :  { %2483 = vmatpush1.msra.mxu1 %v2345_v56 }
 0x1e2   :  { %2484 = vmatprep.subr.mxu1 %v2344_v58 }
 0x1e3   :  { %2485 = vmatpush1.msra.mxu1 %v2343_v59 }
 0x1e4   :  { %2486 = vmatprep.subr.mxu1 %v2342_v60 }
 0x1e5   :  { %2487 = vmatpush1.msra.mxu1 %v2341_v61  ;;  %v2560_v61 = vcombine.high %v6150_v5, %v6150_v5 }
 0x1e6   :  { %2488 = vmatprep.subr.mxu1 %v2340_v62 }
 0x1e7   :  { %2489 = vmatpush1.msra.mxu1 %v2339_v63  ;;  %v1273_v63 = vld [vmem:[%s9413_s8 + $0xf0] sm:$0xff] }
 0x1e8   :  { %2490 = vmatprep.subr.mxu1 %v2338_v0  ;;  %v1272_v0 = vld [vmem:[%s9413_s8 + $0xe8] sm:$0xff] }
 0x1e9   :  { %2491 = vmatpush1.msra.mxu1 %v2337_v2  ;;  %v1271_v2 = vld [vmem:[%s9413_s8 + $0xe0] sm:$0xff] }
 0x1ea   :  { %2492 = vmatprep.subr.mxu1 %v2336_v3  ;;  %v1270_v3 = vld [vmem:[%s9413_s8 + $0xd8] sm:$0xff] }
 0x1eb   :  { %2493 = vmatpush1.msra.mxu1 %v2335_v4  ;;  %v1269_v4 = vld [vmem:[%s9413_s8 + $0xd0] sm:$0xff] }
 0x1ec   :  { %2494 = vmatprep.subr.mxu1 %v2334_v11  ;;  %v1268_v11 = vld [vmem:[%s9413_s8 + $0xc8] sm:$0xff] }
 0x1ed   :  { %2495 = vmatpush1.msra.mxu1 %v2333_v12  ;;  %v1267_v12 = vld [vmem:[%s9413_s8 + $0xc0] sm:$0xff] }
 0x1ee   :  { %2496 = vmatprep.subr.mxu1 %v2332_v13  ;;  %v1266_v13 = vld [vmem:[%s9413_s8 + $0xb8] sm:$0xff] }
 0x1ef   :  { %2497 = vmatpush1.msra.mxu1 %v2331_v14  ;;  %v1265_v14 = vld [vmem:[%s9413_s8 + $0xb0] sm:$0xff] }
 0x1f0   :  { %2498 = vmatprep.subr.mxu1 %v2394_v15  ;;  %v1264_v15 = vld [vmem:[%s9413_s8 + $0xa8] sm:$0xff] }
 0x1f1   :  { %2499 = vmatpush2.msra.mxu1 %v2393_v16  ;;  %v1263_v16 = vld [vmem:[%s9413_s8 + $0xa0] sm:$0xff] }
 0x1f2   :  { %2500 = vmatprep.subr.mxu1 %v2392_v17  ;;  %v1262_v17 = vld [vmem:[%s9413_s8 + $0x98] sm:$0xff] }
 0x1f3   :  { %2501 = vmatpush2.msra.mxu1 %v2391_v18  ;;  %v1261_v18 = vld [vmem:[%s9413_s8 + $0x90] sm:$0xff] }
 0x1f4   :  { %2502 = vmatprep.subr.mxu1 %v2390_v19  ;;  %v1260_v19 = vld [vmem:[%s9413_s8 + $0x88] sm:$0xff] }
 0x1f5   :  { %2503 = vmatpush2.msra.mxu1 %v2389_v57  ;;  %v1259_v57 = vld [vmem:[%s9413_s8 + $0x80] sm:$0xff] }
 0x1f6   :  { %2504 = vmatprep.subr.mxu1 %v2388_v20  ;;  %v1258_v20 = vld [vmem:[%s9413_s8 + $0x78] sm:$0xff] }
 0x1f7   :  { %2505 = vmatpush2.msra.mxu1 %v2387_v21  ;;  %v1257_v21 = vld [vmem:[%s9413_s8 + $0x70] sm:$0xff] }
 0x1f8   :  { %2506 = vmatprep.subr.mxu1 %v2386_v23  ;;  %v1256_v23 = vld [vmem:[%s9413_s8 + $0x68] sm:$0xff] }
 0x1f9   :  { %2507 = vmatpush2.msra.mxu1 %v2385_v24  ;;  %v1255_v24 = vld [vmem:[%s9413_s8 + $0x60] sm:$0xff] }
 0x1fa   :  { %2508 = vmatprep.subr.mxu1 %v2384_v25  ;;  %v1254_v25 = vld [vmem:[%s9413_s8 + $0x58] sm:$0xff] }
 0x1fb   :  { %2509 = vmatpush2.msra.mxu1 %v2383_v26  ;;  %v1253_v26 = vld [vmem:[%s9413_s8 + $0x50] sm:$0xff] }
 0x1fc   :  { %2510 = vmatprep.subr.mxu1 %v2382_v29  ;;  %v1252_v29 = vld [vmem:[%s9413_s8 + $0x48] sm:$0xff] }
 0x1fd   :  { %2511 = vmatpush2.msra.mxu1 %v2381_v33  ;;  %v1251_v33 = vld [vmem:[%s9413_s8 + $0x40] sm:$0xff] }
 0x1fe   :  { %2512 = vmatprep.subr.mxu1 %v2380_v34  ;;  %v1250_v34 = vld [vmem:[%s9413_s8 + $0x38] sm:$0xff] }
 0x1ff   :  { %2513 = vmatpush2.msra.mxu1 %v2379_v35  ;;  %v1249_v35 = vld [vmem:[%s9413_s8 + $0x30] sm:$0xff] }
 0x200   :  { %2514 = vmatprep.subr.mxu1 %v2378_v36  ;;  %v1248_v36 = vld [vmem:[%s9413_s8 + $0x28] sm:$0xff] }
 0x201   :  { %2515 = vmatpush2.msra.mxu1 %v2377_v1  ;;  %v1247_v1 = vld [vmem:[%s9413_s8 + $0x20] sm:$0xff] }
 0x202   :  { %2516 = vmatprep.subr.mxu1 %v2376_v10  ;;  %v1246_v10 = vld [vmem:[%s9413_s8 + $0x18] sm:$0xff] }
 0x203   :  { %2517 = vmatpush2.msra.mxu1 %v2375_v37  ;;  %v1245_v37 = vld [vmem:[%s9413_s8 + $0x10] sm:$0xff] }
 0x204   :  { %2518 = vmatprep.subr.mxu1 %v2374_v38  ;;  %v1244_v38 = vld [vmem:[%s9413_s8 + $0x8] sm:$0xff] }
 0x205   :  { %2519 = vmatpush2.msra.mxu1 %v2373_v39  ;;  %v1243_v39 = vld [vmem:[%s9413_s8] sm:$0xff] }
 0x206   :  { %2520 = vmatprep.subr.mxu1 %v2372_v40  ;;  %v1306_v40 = vld [vmem:[%s9413_s8 + $0x1f8] sm:$0xff] }
 0x207   :  { %2521 = vmatpush2.msra.mxu1 %v2371_v22  ;;  %v1305_v22 = vld [vmem:[%s9413_s8 + $0x1f0] sm:$0xff] }
 0x208   :  { %2522 = vmatprep.subr.mxu1 %v2370_v30  ;;  %v1304_v30 = vld [vmem:[%s9413_s8 + $0x1e8] sm:$0xff] }
 0x209   :  { %2523 = vmatpush2.msra.mxu1 %v2369_v41  ;;  %v1303_v41 = vld [vmem:[%s9413_s8 + $0x1e0] sm:$0xff] }
 0x20a   :  { %2524 = vmatprep.subr.mxu1 %v2368_v42  ;;  %v1302_v42 = vld [vmem:[%s9413_s8 + $0x1d8] sm:$0xff] }
 0x20b   :  { %2525 = vmatpush2.msra.mxu1 %v2367_v43  ;;  %v1301_v43 = vld [vmem:[%s9413_s8 + $0x1d0] sm:$0xff] }
 0x20c   :  { %2526 = vmatprep.subr.mxu1 %v2366_v44  ;;  %v1300_v44 = vld [vmem:[%s9413_s8 + $0x1c8] sm:$0xff] }
 0x20d   :  { %2527 = vmatpush2.msra.mxu1 %v2365_v45  ;;  %v1299_v45 = vld [vmem:[%s9413_s8 + $0x1c0] sm:$0xff] }
 0x20e   :  { %2528 = vmatprep.subr.mxu1 %v2364_v46  ;;  %v1298_v46 = vld [vmem:[%s9413_s8 + $0x1b8] sm:$0xff] }
 0x20f   :  { %2529 = vmatpush2.msra.mxu1 %v2363_v47  ;;  %v1017_v52 = vpop.f32.mrf.mxu0  ;;  %v1297_v47 = vld [vmem:[%s9413_s8 + $0x1b0] sm:$0xff] }
 0x210   :  { %2784 = vmatprep.subr.mxu1 %v1338_v48  ;;  %v1018_v58 = vadd.f32 %v1017_v52, %v934_v32  ;;  %v1296_v48 = vld [vmem:[%s9413_s8 + $0x1a8] sm:$0xff]  ;;  %v1290_v32 = vld [vmem:[%s9413_s8 + $0x178] sm:$0xff] }
 0x211   :  { %v1019_v54 = vpop.f32.mrf.mxu0  ;;  %v1292_v52 = vld [vmem:[%s9413_s8 + $0x188] sm:$0xff] }
 0x212   :  { %v1020_v56 = vadd.f32 %v1019_v54, %v938_v31  ;;  %v1291_v31 = vld [vmem:[%s9413_s8 + $0x180] sm:$0xff]  ;;  %v1289_v54 = vld [vmem:[%s9413_s8 + $0x170] sm:$0xff] }
 0x250   :  { %v1088_v55 = vpop.f32.mrf.mxu1 }
 0x251   :  { %v1089_v62 = vadd.f32 %v1088_v55, %v1018_v58  ;;  %v1288_v55 = vld [vmem:[%s9413_s8 + $0x168] sm:$0xff]  ;;  %v1286_v58 = vld [vmem:[%s9413_s8 + $0x158] sm:$0xff] }
 0x252   :  { %v1090_v59 = vpop.f32.mrf.mxu1 }
 0x253   :  { %v1091_v60 = vadd.f32 %v1090_v59, %v1020_v56  ;;  %v1287_v56 = vld [vmem:[%s9413_s8 + $0x160] sm:$0xff]  ;;  %v1285_v59 = vld [vmem:[%s9413_s8 + $0x150] sm:$0xff] }
 0x255   :  { %2459 = vmatprep.mubr.f32.mxu0 %v1091_v60  ;;  %v1284_v60 = vld [vmem:[%s9413_s8 + $0x148] sm:$0xff] }
 0x256   :  { %2460 = vmatmul.mubr.f32.vlgmr.msra.gmra.mxu0 %v1089_v62  ;;  %v1283_v62 = vld [vmem:[%s9413_s8 + $0x140] sm:$0xff] }
 0x257   :  { %2714 = vmatpush1.msra.mxu0 %v1273_v63  ;;  %2777 = vmatprep.mubr.f32.mxu0 %v2560_v61  ;;  %v1159_v61 = vpop.f32.mrf.mxu0  ;;  %v1282_v63 = vld [vmem:[%s9413_s8 + $0x138] sm:$0xff] }
 0x258   :  { %2715 = vmatprep.subr.mxu0 %v1272_v0  ;;  %v1281_v0 = vld [vmem:[%s9413_s8 + $0x130] sm:$0xff] }
 0x259   :  { %2716 = vmatpush1.msra.mxu0 %v1271_v2  ;;  %v946_v2 = vrot.slane %v6137_v27, %v4538_v9 }
 0x25a   :  { %2717 = vmatprep.subr.mxu0 %v1270_v3  ;;  %v1280_v3 = vld [vmem:[%s9413_s8 + $0x128] sm:$0xff] }
 0x25b   :  { %2718 = vmatpush1.msra.mxu0 %v1269_v4  ;;  %v942_v4 = vrot.slane %v6137_v27, %v4535_v8  ;;  %v1276_v8 = vld [vmem:[%s9413_s8 + $0x108] sm:$0xff] }
 0x25c   :  { %2719 = vmatprep.subr.mxu0 %v1268_v11  ;;  %v1161_v11 = vpop.f32.mrf.mxu0 }
 0x25d   :  { %2720 = vmatpush1.msra.mxu0 %v1267_v12  ;;  %v1279_v12 = vld [vmem:[%s9413_s8 + $0x120] sm:$0xff]  ;;  %v1160_v27 = vadd.f32 %v1159_v61, %v942_v4  ;;  %v1382_v61 = vld [vmem:[%s9413_s8 + $0x458] sm:$0xff] }
 0x25e   :  { %2721 = vmatprep.subr.mxu0 %v1266_v13  ;;  %v1278_v13 = vld [vmem:[%s9413_s8 + $0x118] sm:$0xff]  ;;  %v1379_v4 = vld [vmem:[%s9413_s8 + $0x440] sm:$0xff] }
 0x25f   :  { %2722 = vmatpush1.msra.mxu0 %v1265_v14  ;;  %v1277_v14 = vld [vmem:[%s9413_s8 + $0x110] sm:$0xff] }
 0x260   :  { %2723 = vmatprep.subr.mxu0 %v1264_v15  ;;  %v1162_v15 = vadd.f32 %v1161_v11, %v946_v2  ;;  %v1380_v2 = vld [vmem:[%s9413_s8 + $0x448] sm:$0xff]  ;;  %v1313_v11 = vld [vmem:[%s9413_s8 + $0x230] sm:$0xff] }
 0x261   :  { %2724 = vmatpush1.msra.mxu0 %v1263_v16 }
 0x262   :  { %2725 = vmatprep.subr.mxu0 %v1262_v17  ;;  %v1275_v17 = vld [vmem:[%s9413_s8 + $0x100] sm:$0xff] }
 0x263   :  { %2726 = vmatpush1.msra.mxu0 %v1261_v18 }
 0x264   :  { %2727 = vmatprep.subr.mxu0 %v1260_v19  ;;  %v1402_v19 = vld [vmem:[%s9413_s8 + $0x4f8] sm:$0xff] }
 0x265   :  { %2728 = vmatpush1.msra.mxu0 %v1259_v57 }
 0x266   :  { %2729 = vmatprep.subr.mxu0 %v1258_v20  ;;  %v1337_v20 = vld [vmem:[%s9413_s8 + $0x2f0] sm:$0xff] }
 0x267   :  { %2730 = vmatpush1.msra.mxu0 %v1257_v21  ;;  %v1336_v21 = vld [vmem:[%s9413_s8 + $0x2e8] sm:$0xff] }
 0x268   :  { %2731 = vmatprep.subr.mxu0 %v1256_v23  ;;  %v1401_v23 = vld [vmem:[%s9413_s8 + $0x4f0] sm:$0xff] }
 0x269   :  { %2732 = vmatpush1.msra.mxu0 %v1255_v24  ;;  %v1335_v24 = vld [vmem:[%s9413_s8 + $0x2e0] sm:$0xff] }
 0x26a   :  { %2733 = vmatprep.subr.mxu0 %v1254_v25  ;;  %v1400_v25 = vld [vmem:[%s9413_s8 + $0x4e8] sm:$0xff] }
 0x26b   :  { %2734 = vmatpush1.msra.mxu0 %v1253_v26  ;;  %v1334_v26 = vld [vmem:[%s9413_s8 + $0x2d8] sm:$0xff] }
 0x26c   :  { %2735 = vmatprep.subr.mxu0 %v1252_v29  ;;  %v1399_v29 = vld [vmem:[%s9413_s8 + $0x4e0] sm:$0xff] }
 0x26d   :  { %2736 = vmatpush1.msra.mxu0 %v1251_v33  ;;  %v1333_v33 = vld [vmem:[%s9413_s8 + $0x2d0] sm:$0xff] }
 0x26e   :  { %2737 = vmatprep.subr.mxu0 %v1250_v34  ;;  %v1398_v34 = vld [vmem:[%s9413_s8 + $0x4d8] sm:$0xff] }
 0x26f   :  { %2738 = vmatpush1.msra.mxu0 %v1249_v35  ;;  %v1397_v35 = vld [vmem:[%s9413_s8 + $0x4d0] sm:$0xff] }
 0x270   :  { %2739 = vmatprep.subr.mxu0 %v1248_v36  ;;  %v1331_v36 = vld [vmem:[%s9413_s8 + $0x2c0] sm:$0xff] }
 0x271   :  { %2740 = vmatpush1.msra.mxu0 %v1247_v1  ;;  %v1396_v1 = vld [vmem:[%s9413_s8 + $0x4c8] sm:$0xff] }
 0x272   :  { %2741 = vmatprep.subr.mxu0 %v1246_v10  ;;  %v1330_v10 = vld [vmem:[%s9413_s8 + $0x2b8] sm:$0xff] }
 0x273   :  { %2742 = vmatpush1.msra.mxu0 %v1245_v37  ;;  %v1395_v37 = vld [vmem:[%s9413_s8 + $0x4c0] sm:$0xff] }
 0x274   :  { %2743 = vmatprep.subr.mxu0 %v1244_v38  ;;  %v1329_v38 = vld [vmem:[%s9413_s8 + $0x2b0] sm:$0xff] }
 0x275   :  { %2744 = vmatpush1.msra.mxu0 %v1243_v39  ;;  %v1394_v39 = vld [vmem:[%s9413_s8 + $0x4b8] sm:$0xff] }
 0x276   :  { %2745 = vmatprep.subr.mxu0 %v1306_v40  ;;  %v1328_v40 = vld [vmem:[%s9413_s8 + $0x2a8] sm:$0xff] }
 0x277   :  { %2746 = vmatpush2.msra.mxu0 %v1305_v22  ;;  %v1393_v22 = vld [vmem:[%s9413_s8 + $0x4b0] sm:$0xff] }
 0x278   :  { %2747 = vmatprep.subr.mxu0 %v1304_v30  ;;  %v1327_v30 = vld [vmem:[%s9413_s8 + $0x2a0] sm:$0xff] }
 0x279   :  { %2748 = vmatpush2.msra.mxu0 %v1303_v41  ;;  %v1392_v41 = vld [vmem:[%s9413_s8 + $0x4a8] sm:$0xff] }
 0x27a   :  { %2749 = vmatprep.subr.mxu0 %v1302_v42  ;;  %v1326_v42 = vld [vmem:[%s9413_s8 + $0x298] sm:$0xff] }
 0x27b   :  { %2750 = vmatpush2.msra.mxu0 %v1301_v43  ;;  %v1391_v43 = vld [vmem:[%s9413_s8 + $0x4a0] sm:$0xff] }
 0x27c   :  { %2751 = vmatprep.subr.mxu0 %v1300_v44  ;;  %v1325_v44 = vld [vmem:[%s9413_s8 + $0x290] sm:$0xff] }
 0x27d   :  { %2752 = vmatpush2.msra.mxu0 %v1299_v45  ;;  %v1390_v45 = vld [vmem:[%s9413_s8 + $0x498] sm:$0xff] }
 0x27e   :  { %2753 = vmatprep.subr.mxu0 %v1298_v46  ;;  %v1324_v46 = vld [vmem:[%s9413_s8 + $0x288] sm:$0xff] }
 0x27f   :  { %2754 = vmatpush2.msra.mxu0 %v1297_v47  ;;  %v1389_v47 = vld [vmem:[%s9413_s8 + $0x490] sm:$0xff] }
 0x280   :  { %2755 = vmatprep.subr.mxu0 %v1296_v48  ;;  %v1323_v48 = vld [vmem:[%s9413_s8 + $0x280] sm:$0xff] }
 0x281   :  { %2756 = vmatpush2.msra.mxu0 %v1295_v49  ;;  %v1388_v49 = vld [vmem:[%s9413_s8 + $0x488] sm:$0xff] }
 0x282   :  { %2757 = vmatprep.subr.mxu0 %v1294_v50  ;;  %v1322_v50 = vld [vmem:[%s9413_s8 + $0x278] sm:$0xff] }
 0x283   :  { %2758 = vmatpush2.msra.mxu0 %v1293_v51  ;;  %v1387_v51 = vld [vmem:[%s9413_s8 + $0x480] sm:$0xff] }
 0x284   :  { %2759 = vmatprep.subr.mxu0 %v1292_v52  ;;  %v1321_v52 = vld [vmem:[%s9413_s8 + $0x270] sm:$0xff] }
 0x285   :  { %2760 = vmatpush2.msra.mxu0 %v1291_v31  ;;  %v1386_v31 = vld [vmem:[%s9413_s8 + $0x478] sm:$0xff] }
 0x286   :  { %2761 = vmatprep.subr.mxu0 %v1290_v32  ;;  %v1320_v32 = vld [vmem:[%s9413_s8 + $0x268] sm:$0xff] }
 0x287   :  { %2762 = vmatpush2.msra.mxu0 %v1289_v54  ;;  %v1385_v54 = vld [vmem:[%s9413_s8 + $0x470] sm:$0xff] }
 0x288   :  { %2763 = vmatprep.subr.mxu0 %v1288_v55  ;;  %v1319_v55 = vld [vmem:[%s9413_s8 + $0x260] sm:$0xff] }
 0x289   :  { %2764 = vmatpush2.msra.mxu0 %v1287_v56  ;;  %v1384_v56 = vld [vmem:[%s9413_s8 + $0x468] sm:$0xff] }
 0x28a   :  { %2765 = vmatprep.subr.mxu0 %v1286_v58  ;;  %v1318_v58 = vld [vmem:[%s9413_s8 + $0x258] sm:$0xff] }
 0x28b   :  { %2766 = vmatpush2.msra.mxu0 %v1285_v59  ;;  %v1383_v59 = vld [vmem:[%s9413_s8 + $0x460] sm:$0xff] }
 0x28c   :  { %2767 = vmatprep.subr.mxu0 %v1284_v60  ;;  %v1317_v60 = vld [vmem:[%s9413_s8 + $0x250] sm:$0xff] }
 0x28d   :  { %2768 = vmatpush2.msra.mxu0 %v1283_v62  ;;  %v1316_v62 = vld [vmem:[%s9413_s8 + $0x248] sm:$0xff] }
 0x28e   :  { %2769 = vmatprep.subr.mxu0 %v1282_v63  ;;  %v1381_v63 = vld [vmem:[%s9413_s8 + $0x450] sm:$0xff] }
 0x28f   :  { %2770 = vmatpush2.msra.mxu0 %v1281_v0  ;;  %v1315_v0 = vld [vmem:[%s9413_s8 + $0x240] sm:$0xff] }
 0x290   :  { %v1230_v9 = vpop.f32.mrf.mxu1  ;;  %2771 = vmatprep.subr.mxu0 %v1280_v3  ;;  %v1314_v3 = vld [vmem:[%s9413_s8 + $0x238] sm:$0xff] }
 0x291   :  { %2772 = vmatpush2.msra.mxu0 %v1279_v12  ;;  %v1231_v57 = vadd.f32 %v1230_v9, %v1160_v27  ;;  %v1378_v12 = vld [vmem:[%s9413_s8 + $0x438] sm:$0xff]  ;;  %v1377_v9 = vld [vmem:[%s9413_s8 + $0x430] sm:$0xff]  ;;  %v1375_v27 = vld [vmem:[%s9413_s8 + $0x420] sm:$0xff] }
 0x292   :  { %v1232_v16 = vpop.f32.mrf.mxu1  ;;  %2773 = vmatprep.subr.mxu0 %v1278_v13  ;;  %v1312_v13 = vld [vmem:[%s9413_s8 + $0x228] sm:$0xff] }
 0x293   :  { %v1233_v18 = vadd.f32 %v1232_v16, %v1162_v15  ;;  %2774 = vmatpush2.msra.mxu0 %v1277_v14  ;;  %v1311_v14 = vld [vmem:[%s9413_s8 + $0x220] sm:$0xff]  ;;  %v1376_v15 = vld [vmem:[%s9413_s8 + $0x428] sm:$0xff]  ;;  %v1309_v16 = vld [vmem:[%s9413_s8 + $0x210] sm:$0xff] }
 0x294   :  { %2775 = vmatprep.subr.mxu0 %v1276_v8  ;;  %v1310_v8 = vld [vmem:[%s9413_s8 + $0x218] sm:$0xff] }
 0x295   :  { %2530 = vmatprep.mubr.f32.mxu1 %v1233_v18  ;;  %2776 = vmatpush2.msra.mxu0 %v1275_v17  ;;  %v1374_v17 = vld [vmem:[%s9413_s8 + $0x418] sm:$0xff]  ;;  %v1308_v18 = vld [vmem:[%s9413_s8 + $0x208] sm:$0xff] }
 0x296   :  { %2531 = vmatmul.mubr.f32.vlgmr.msra.gmra.mxu1 %v1231_v57  ;;  %2855 = vmatprep.subr.mxu0 %v1402_v19  ;;  %v1373_v19 = vld [vmem:[%s9413_s8 + $0x410] sm:$0xff]  ;;  %v1307_v57 = vld [vmem:[%s9413_s8 + $0x200] sm:$0xff] }
 0x297   :  { %2785 = vmatpush1.msra.mxu1 %v1337_v20  ;;  %2778 = vmatmul.mubr.f32.vlgmr.msra.gmra.mxu0 %v6150_v5  ;;  %v1332_v5 = vld [vmem:[%s9413_s8 + $0x2c8] sm:$0xff] }
 0x298   :  { %2786 = vmatprep.subr.mxu1 %v1336_v21  ;;  %2856 = vmatpush1.msra.mxu0 %v1401_v23  ;;  %v1372_v20 = vld [vmem:[%s9413_s8 + $0x408] sm:$0xff]  ;;  %v1370_v21 = vld [vmem:[%s9413_s8 + $0x3f8] sm:$0xff]  ;;  %v1371_v23 = vld [vmem:[%s9413_s8 + $0x400] sm:$0xff] }
 0x299   :  { %2787 = vmatpush1.msra.mxu1 %v1335_v24  ;;  %2857 = vmatprep.subr.mxu0 %v1400_v25  ;;  %v1369_v24 = vld [vmem:[%s9413_s8 + $0x3f0] sm:$0xff]  ;;  %v1434_v25 = vld [vmem:[%s9413_s8 + $0x5f8] sm:$0xff] }
 0x29a   :  { %2788 = vmatprep.subr.mxu1 %v1334_v26  ;;  %2858 = vmatpush1.msra.mxu0 %v1399_v29  ;;  %v1368_v26 = vld [vmem:[%s9413_s8 + $0x3e8] sm:$0xff]  ;;  %v1433_v29 = vld [vmem:[%s9413_s8 + $0x5f0] sm:$0xff] }
 0x29b   :  { %2789 = vmatpush1.msra.mxu1 %v1333_v33  ;;  %2859 = vmatprep.subr.mxu0 %v1398_v34  ;;  %v1367_v33 = vld [vmem:[%s9413_s8 + $0x3e0] sm:$0xff]  ;;  %v1432_v34 = vld [vmem:[%s9413_s8 + $0x5e8] sm:$0xff] }
 0x29c   :  { %2790 = vmatprep.subr.mxu1 %v1332_v5  ;;  %2860 = vmatpush1.msra.mxu0 %v1397_v35  ;;  %v1366_v5 = vld [vmem:[%s9413_s8 + $0x3d8] sm:$0xff]  ;;  %v1431_v35 = vld [vmem:[%s9413_s8 + $0x5e0] sm:$0xff] }
 0x29d   :  { %2791 = vmatpush1.msra.mxu1 %v1331_v36  ;;  %2861 = vmatprep.subr.mxu0 %v1396_v1  ;;  %v1365_v36 = vld [vmem:[%s9413_s8 + $0x3d0] sm:$0xff]  ;;  %v1430_v1 = vld [vmem:[%s9413_s8 + $0x5d8] sm:$0xff] }
 0x29e   :  { %2792 = vmatprep.subr.mxu1 %v1330_v10  ;;  %2862 = vmatpush1.msra.mxu0 %v1395_v37  ;;  %v1364_v10 = vld [vmem:[%s9413_s8 + $0x3c8] sm:$0xff]  ;;  %v1429_v37 = vld [vmem:[%s9413_s8 + $0x5d0] sm:$0xff] }
 0x29f   :  { %2793 = vmatpush1.msra.mxu1 %v1329_v38  ;;  %2863 = vmatprep.subr.mxu0 %v1394_v39  ;;  %v1363_v38 = vld [vmem:[%s9413_s8 + $0x3c0] sm:$0xff]  ;;  %v1428_v39 = vld [vmem:[%s9413_s8 + $0x5c8] sm:$0xff] }
 0x2a0   :  { %2794 = vmatprep.subr.mxu1 %v1328_v40  ;;  %2864 = vmatpush1.msra.mxu0 %v1393_v22  ;;  %v1362_v40 = vld [vmem:[%s9413_s8 + $0x3b8] sm:$0xff]  ;;  %v1427_v22 = vld [vmem:[%s9413_s8 + $0x5c0] sm:$0xff] }
 0x2a1   :  { %2795 = vmatpush1.msra.mxu1 %v1327_v30  ;;  %2865 = vmatprep.subr.mxu0 %v1392_v41  ;;  %v1361_v30 = vld [vmem:[%s9413_s8 + $0x3b0] sm:$0xff]  ;;  %v1426_v41 = vld [vmem:[%s9413_s8 + $0x5b8] sm:$0xff] }
 0x2a2   :  { %2796 = vmatprep.subr.mxu1 %v1326_v42  ;;  %2866 = vmatpush1.msra.mxu0 %v1391_v43  ;;  %v1360_v42 = vld [vmem:[%s9413_s8 + $0x3a8] sm:$0xff]  ;;  %v1425_v43 = vld [vmem:[%s9413_s8 + $0x5b0] sm:$0xff] }
 0x2a3   :  { %2797 = vmatpush1.msra.mxu1 %v1325_v44  ;;  %2867 = vmatprep.subr.mxu0 %v1390_v45  ;;  %v1359_v44 = vld [vmem:[%s9413_s8 + $0x3a0] sm:$0xff]  ;;  %v1424_v45 = vld [vmem:[%s9413_s8 + $0x5a8] sm:$0xff] }
 0x2a4   :  { %2798 = vmatprep.subr.mxu1 %v1324_v46  ;;  %2868 = vmatpush1.msra.mxu0 %v1389_v47  ;;  %v1358_v46 = vld [vmem:[%s9413_s8 + $0x398] sm:$0xff]  ;;  %v1423_v47 = vld [vmem:[%s9413_s8 + $0x5a0] sm:$0xff] }
 0x2a5   :  { %2799 = vmatpush1.msra.mxu1 %v1323_v48  ;;  %2869 = vmatprep.subr.mxu0 %v1388_v49  ;;  %v1357_v48 = vld [vmem:[%s9413_s8 + $0x390] sm:$0xff]  ;;  %v1422_v49 = vld [vmem:[%s9413_s8 + $0x598] sm:$0xff] }
 0x2a6   :  { %2800 = vmatprep.subr.mxu1 %v1322_v50  ;;  %2870 = vmatpush1.msra.mxu0 %v1387_v51  ;;  %v1356_v50 = vld [vmem:[%s9413_s8 + $0x388] sm:$0xff]  ;;  %v1421_v51 = vld [vmem:[%s9413_s8 + $0x590] sm:$0xff] }
 0x2a7   :  { %2801 = vmatpush1.msra.mxu1 %v1321_v52  ;;  %2871 = vmatprep.subr.mxu0 %v1386_v31  ;;  %v1355_v52 = vld [vmem:[%s9413_s8 + $0x380] sm:$0xff]  ;;  %v1420_v31 = vld [vmem:[%s9413_s8 + $0x588] sm:$0xff] }
 0x2a8   :  { %2802 = vmatprep.subr.mxu1 %v1320_v32  ;;  %2872 = vmatpush1.msra.mxu0 %v1385_v54  ;;  %v1354_v32 = vld [vmem:[%s9413_s8 + $0x378] sm:$0xff]  ;;  %v1419_v54 = vld [vmem:[%s9413_s8 + $0x580] sm:$0xff] }
 0x2a9   :  { %2803 = vmatpush1.msra.mxu1 %v1319_v55  ;;  %2873 = vmatprep.subr.mxu0 %v1384_v56  ;;  %v1353_v55 = vld [vmem:[%s9413_s8 + $0x370] sm:$0xff]  ;;  %v1418_v56 = vld [vmem:[%s9413_s8 + $0x578] sm:$0xff] }
 0x2aa   :  { %2804 = vmatprep.subr.mxu1 %v1318_v58  ;;  %2874 = vmatpush1.msra.mxu0 %v1383_v59  ;;  %v1352_v58 = vld [vmem:[%s9413_s8 + $0x368] sm:$0xff]  ;;  %v1417_v59 = vld [vmem:[%s9413_s8 + $0x570] sm:$0xff] }
 0x2ab   :  { %2805 = vmatpush1.msra.mxu1 %v1317_v60  ;;  %2875 = vmatprep.subr.mxu0 %v1382_v61  ;;  %v1351_v60 = vld [vmem:[%s9413_s8 + $0x360] sm:$0xff]  ;;  %v1416_v61 = vld [vmem:[%s9413_s8 + $0x568] sm:$0xff] }
 0x2ac   :  { %2806 = vmatprep.subr.mxu1 %v1316_v62  ;;  %2876 = vmatpush1.msra.mxu0 %v1381_v63  ;;  %v1350_v62 = vld [vmem:[%s9413_s8 + $0x358] sm:$0xff]  ;;  %v1415_v63 = vld [vmem:[%s9413_s8 + $0x560] sm:$0xff] }
 0x2ad   :  { %2807 = vmatpush1.msra.mxu1 %v1315_v0  ;;  %2877 = vmatprep.subr.mxu0 %v1380_v2  ;;  %v1349_v0 = vld [vmem:[%s9413_s8 + $0x350] sm:$0xff]  ;;  %v1414_v2 = vld [vmem:[%s9413_s8 + $0x558] sm:$0xff] }
 0x2ae   :  { %2808 = vmatprep.subr.mxu1 %v1314_v3  ;;  %2878 = vmatpush1.msra.mxu0 %v1379_v4  ;;  %v2545_v3 = vcombine.high %v6142_v28, %v6142_v28  ;;  %v1348_v4 = vld [vmem:[%s9413_s8 + $0x348] sm:$0xff] }
 0x2af   :  { %2809 = vmatpush1.msra.mxu1 %v1313_v11  ;;  %2879 = vmatprep.subr.mxu0 %v1378_v12  ;;  %v1413_v11 = vld [vmem:[%s9413_s8 + $0x550] sm:$0xff]  ;;  %v1347_v12 = vld [vmem:[%s9413_s8 + $0x340] sm:$0xff]  ;;  %v1412_v28 = vld [vmem:[%s9413_s8 + $0x548] sm:$0xff] }
 0x2b0   :  { %2810 = vmatprep.subr.mxu1 %v1312_v13  ;;  %2880 = vmatpush1.msra.mxu0 %v1377_v9  ;;  %v1346_v13 = vld [vmem:[%s9413_s8 + $0x338] sm:$0xff]  ;;  %v1411_v9 = vld [vmem:[%s9413_s8 + $0x540] sm:$0xff] }
 0x2b1   :  { %2811 = vmatpush1.msra.mxu1 %v1311_v14  ;;  %2881 = vmatprep.subr.mxu0 %v1376_v15  ;;  %v1345_v14 = vld [vmem:[%s9413_s8 + $0x330] sm:$0xff]  ;;  %v1410_v15 = vld [vmem:[%s9413_s8 + $0x538] sm:$0xff] }
 0x2b2   :  { %2812 = vmatprep.subr.mxu1 %v1310_v8  ;;  %2882 = vmatpush1.msra.mxu0 %v1375_v27  ;;  %v2559_v8 = vrot.slane %v2545_v3, %v6132_v53  ;;  %v1344_v27 = vld [vmem:[%s9413_s8 + $0x328] sm:$0xff] }
 0x2b3   :  { %2813 = vmatpush1.msra.mxu1 %v1309_v16  ;;  %2883 = vmatprep.subr.mxu0 %v1374_v17  ;;  %v1409_v16 = vld [vmem:[%s9413_s8 + $0x530] sm:$0xff]  ;;  %v6702_v17 = vld [vmem:[%s9405_s0 + $0x8] sm:$0xff] }
 0x2b4   :  { %2814 = vmatprep.subr.mxu1 %v1308_v18  ;;  %2884 = vmatpush1.msra.mxu0 %v1373_v19  ;;  %v1343_v18 = vld [vmem:[%s9413_s8 + $0x320] sm:$0xff]  ;;  %v1408_v19 = vld [vmem:[%s9413_s8 + $0x528] sm:$0xff] }
 0x2b5   :  { %2815 = vmatpush1.msra.mxu1 %v1307_v57  ;;  %2885 = vmatprep.subr.mxu0 %v1372_v20  ;;  %v1342_v57 = vld [vmem:[%s9413_s8 + $0x318] sm:$0xff]  ;;  %v1407_v20 = vld [vmem:[%s9413_s8 + $0x520] sm:$0xff]  ;;  %v1448_v3 = vld [vmem:[%s9413_s8 + $0x668] sm:$0xff] }
 0x2b6   :  { %2816 = vmatprep.subr.mxu1 %v1370_v21  ;;  %2886 = vmatpush1.msra.mxu0 %v1371_v23  ;;  %v1341_v21 = vld [vmem:[%s9413_s8 + $0x310] sm:$0xff]  ;;  %v1406_v23 = vld [vmem:[%s9413_s8 + $0x518] sm:$0xff] }
 0x2b7   :  { %2817 = vmatpush2.msra.mxu1 %v1369_v24  ;;  %2887 = vmatprep.subr.mxu0 %v1434_v25  ;;  %v2561_v24 = vcombine.high %v2559_v8, %v2559_v8  ;;  %v2569_v25 = vrot.slane %v6702_v17, %v6132_v53 }
 0x2b8   :  { %2818 = vmatprep.subr.mxu1 %v1368_v26  ;;  %2888 = vmatpush2.msra.mxu0 %v1433_v29  ;;  %v1340_v26 = vld [vmem:[%s9413_s8 + $0x308] sm:$0xff]  ;;  %v1339_v29 = vld [vmem:[%s9413_s8 + $0x300] sm:$0xff] }
 0x2b9   :  { %2819 = vmatpush2.msra.mxu1 %v1367_v33  ;;  %2889 = vmatprep.subr.mxu0 %v1432_v34  ;;  %v1405_v33 = vld [vmem:[%s9413_s8 + $0x510] sm:$0xff]  ;;  %v1404_v34 = vld [vmem:[%s9413_s8 + $0x508] sm:$0xff] }
 0x2ba   :  { %2820 = vmatprep.subr.mxu1 %v1366_v5  ;;  %2890 = vmatpush2.msra.mxu0 %v1431_v35  ;;  %v1466_v5 = vld [vmem:[%s9413_s8 + $0x6f8] sm:$0xff]  ;;  %v1403_v35 = vld [vmem:[%s9413_s8 + $0x500] sm:$0xff] }
 0x2bb   :  { %2821 = vmatpush2.msra.mxu1 %v1365_v36  ;;  %2891 = vmatprep.subr.mxu0 %v1430_v1  ;;  %v2577_v36 = vcombine.high %v2569_v25, %v2569_v25  ;;  %v1465_v1 = vld [vmem:[%s9413_s8 + $0x6f0] sm:$0xff] }
 0x2bc   :  { %2822 = vmatprep.subr.mxu1 %v1364_v10  ;;  %2892 = vmatpush2.msra.mxu0 %v1429_v37  ;;  %v1464_v10 = vld [vmem:[%s9413_s8 + $0x6e8] sm:$0xff]  ;;  %v1530_v37 = vld [vmem:[%s9413_s8 + $0x8f8] sm:$0xff] }
 0x2bd   :  { %2823 = vmatpush2.msra.mxu1 %v1363_v38  ;;  %2893 = vmatprep.subr.mxu0 %v1428_v39  ;;  %v1463_v38 = vld [vmem:[%s9413_s8 + $0x6e0] sm:$0xff]  ;;  %v1529_v39 = vld [vmem:[%s9413_s8 + $0x8f0] sm:$0xff] }
 0x2be   :  { %2824 = vmatprep.subr.mxu1 %v1362_v40  ;;  %2894 = vmatpush2.msra.mxu0 %v1427_v22  ;;  %v1462_v40 = vld [vmem:[%s9413_s8 + $0x6d8] sm:$0xff]  ;;  %v1528_v22 = vld [vmem:[%s9413_s8 + $0x8e8] sm:$0xff] }
 0x2bf   :  { %2825 = vmatpush2.msra.mxu1 %v1361_v30  ;;  %2895 = vmatprep.subr.mxu0 %v1426_v41  ;;  %v1461_v30 = vld [vmem:[%s9413_s8 + $0x6d0] sm:$0xff]  ;;  %v1527_v41 = vld [vmem:[%s9413_s8 + $0x8e0] sm:$0xff] }
 0x2c0   :  { %2826 = vmatprep.subr.mxu1 %v1360_v42  ;;  %2896 = vmatpush2.msra.mxu0 %v1425_v43  ;;  %v1460_v42 = vld [vmem:[%s9413_s8 + $0x6c8] sm:$0xff]  ;;  %v1526_v43 = vld [vmem:[%s9413_s8 + $0x8d8] sm:$0xff] }
 0x2c1   :  { %2827 = vmatpush2.msra.mxu1 %v1359_v44  ;;  %2897 = vmatprep.subr.mxu0 %v1424_v45  ;;  %v1459_v44 = vld [vmem:[%s9413_s8 + $0x6c0] sm:$0xff]  ;;  %v1525_v45 = vld [vmem:[%s9413_s8 + $0x8d0] sm:$0xff] }
 0x2c2   :  { %2828 = vmatprep.subr.mxu1 %v1358_v46  ;;  %2898 = vmatpush2.msra.mxu0 %v1423_v47  ;;  %v1458_v46 = vld [vmem:[%s9413_s8 + $0x6b8] sm:$0xff]  ;;  %v1524_v47 = vld [vmem:[%s9413_s8 + $0x8c8] sm:$0xff] }
 0x2c3   :  { %2829 = vmatpush2.msra.mxu1 %v1357_v48  ;;  %2899 = vmatprep.subr.mxu0 %v1422_v49  ;;  %v1457_v48 = vld [vmem:[%s9413_s8 + $0x6b0] sm:$0xff]  ;;  %v1523_v49 = vld [vmem:[%s9413_s8 + $0x8c0] sm:$0xff] }
 0x2c4   :  { %2830 = vmatprep.subr.mxu1 %v1356_v50  ;;  %2900 = vmatpush2.msra.mxu0 %v1421_v51  ;;  %v1456_v50 = vld [vmem:[%s9413_s8 + $0x6a8] sm:$0xff]  ;;  %v1522_v51 = vld [vmem:[%s9413_s8 + $0x8b8] sm:$0xff] }
 0x2c5   :  { %2831 = vmatpush2.msra.mxu1 %v1355_v52  ;;  %2901 = vmatprep.subr.mxu0 %v1420_v31  ;;  %v1455_v52 = vld [vmem:[%s9413_s8 + $0x6a0] sm:$0xff]  ;;  %v1521_v31 = vld [vmem:[%s9413_s8 + $0x8b0] sm:$0xff] }
 0x2c6   :  { %2832 = vmatprep.subr.mxu1 %v1354_v32  ;;  %2902 = vmatpush2.msra.mxu0 %v1419_v54  ;;  %v1454_v32 = vld [vmem:[%s9413_s8 + $0x698] sm:$0xff]  ;;  %v1520_v54 = vld [vmem:[%s9413_s8 + $0x8a8] sm:$0xff] }
 0x2c7   :  { %2833 = vmatpush2.msra.mxu1 %v1353_v55  ;;  %2903 = vmatprep.subr.mxu0 %v1418_v56  ;;  %v1453_v55 = vld [vmem:[%s9413_s8 + $0x690] sm:$0xff]  ;;  %v1519_v56 = vld [vmem:[%s9413_s8 + $0x8a0] sm:$0xff] }
 0x2c8   :  { %2834 = vmatprep.subr.mxu1 %v1352_v58  ;;  %2904 = vmatpush2.msra.mxu0 %v1417_v59  ;;  %v1452_v58 = vld [vmem:[%s9413_s8 + $0x688] sm:$0xff]  ;;  %v1518_v59 = vld [vmem:[%s9413_s8 + $0x898] sm:$0xff] }
 0x2c9   :  { %2835 = vmatpush2.msra.mxu1 %v1351_v60  ;;  %2905 = vmatprep.subr.mxu0 %v1416_v61  ;;  %v1451_v60 = vld [vmem:[%s9413_s8 + $0x680] sm:$0xff]  ;;  %v1517_v61 = vld [vmem:[%s9413_s8 + $0x890] sm:$0xff] }
 0x2ca   :  { %2836 = vmatprep.subr.mxu1 %v1350_v62  ;;  %2906 = vmatpush2.msra.mxu0 %v1415_v63  ;;  %v1450_v62 = vld [vmem:[%s9413_s8 + $0x678] sm:$0xff]  ;;  %v1516_v63 = vld [vmem:[%s9413_s8 + $0x888] sm:$0xff] }
 0x2cb   :  { %2837 = vmatpush2.msra.mxu1 %v1349_v0  ;;  %2907 = vmatprep.subr.mxu0 %v1414_v2  ;;  %v1449_v0 = vld [vmem:[%s9413_s8 + $0x670] sm:$0xff]  ;;  %v1515_v2 = vld [vmem:[%s9413_s8 + $0x880] sm:$0xff] }
 0x2cc   :  { %2838 = vmatprep.subr.mxu1 %v1348_v4  ;;  %2908 = vmatpush2.msra.mxu0 %v1413_v11  ;;  %v1514_v4 = vld [vmem:[%s9413_s8 + $0x878] sm:$0xff]  ;;  %v1447_v11 = vld [vmem:[%s9413_s8 + $0x660] sm:$0xff] }
 0x2cd   :  { %2839 = vmatpush2.msra.mxu1 %v1347_v12  ;;  %2909 = vmatprep.subr.mxu0 %v1412_v28  ;;  %v1513_v12 = vld [vmem:[%s9413_s8 + $0x870] sm:$0xff]  ;;  %v1446_v28 = vld [vmem:[%s9413_s8 + $0x658] sm:$0xff] }
 0x2ce   :  { %2840 = vmatprep.subr.mxu1 %v1346_v13  ;;  %2910 = vmatpush2.msra.mxu0 %v1411_v9  ;;  %v1512_v13 = vld [vmem:[%s9413_s8 + $0x868] sm:$0xff]  ;;  %v1445_v9 = vld [vmem:[%s9413_s8 + $0x650] sm:$0xff] }
 0x2cf   :  { %2841 = vmatpush2.msra.mxu1 %v1345_v14  ;;  %2911 = vmatprep.subr.mxu0 %v1410_v15  ;;  %v1511_v14 = vld [vmem:[%s9413_s8 + $0x860] sm:$0xff]  ;;  %v1444_v15 = vld [vmem:[%s9413_s8 + $0x648] sm:$0xff] }
 0x2d0   :  { %2842 = vmatprep.subr.mxu1 %v1344_v27  ;;  %2912 = vmatpush2.msra.mxu0 %v1409_v16  ;;  %v1443_v27 = vld [vmem:[%s9413_s8 + $0x640] sm:$0xff]  ;;  %v1509_v16 = vld [vmem:[%s9413_s8 + $0x850] sm:$0xff] }
 0x2d1   :  { %2843 = vmatpush2.msra.mxu1 %v1343_v18  ;;  %2913 = vmatprep.subr.mxu0 %v1408_v19  ;;  %v1442_v18 = vld [vmem:[%s9413_s8 + $0x638] sm:$0xff]  ;;  %v1508_v19 = vld [vmem:[%s9413_s8 + $0x848] sm:$0xff] }
 0x2d2   :  { %2844 = vmatprep.subr.mxu1 %v1342_v57  ;;  %2914 = vmatpush2.msra.mxu0 %v1407_v20  ;;  %v1441_v57 = vld [vmem:[%s9413_s8 + $0x630] sm:$0xff]  ;;  %v1507_v20 = vld [vmem:[%s9413_s8 + $0x840] sm:$0xff] }
 0x2d3   :  { %2845 = vmatpush2.msra.mxu1 %v1341_v21  ;;  %2915 = vmatprep.subr.mxu0 %v1406_v23  ;;  %v1440_v21 = vld [vmem:[%s9413_s8 + $0x628] sm:$0xff]  ;;  %v1506_v23 = vld [vmem:[%s9413_s8 + $0x838] sm:$0xff] }
 0x2d4   :  { %2846 = vmatprep.subr.mxu1 %v1340_v26  ;;  %2848 = vmatprep.mubr.f32.mxu1 %v2561_v24  ;;  %v1439_v24 = vld [vmem:[%s9413_s8 + $0x620] sm:$0xff]  ;;  %v1438_v26 = vld [vmem:[%s9413_s8 + $0x618] sm:$0xff] }
 0x2d5   :  { %2847 = vmatpush2.msra.mxu1 %v1339_v29  ;;  %2916 = vmatpush2.msra.mxu0 %v1405_v33  ;;  %v1504_v29 = vld [vmem:[%s9413_s8 + $0x828] sm:$0xff]  ;;  %v1437_v33 = vld [vmem:[%s9413_s8 + $0x610] sm:$0xff] }
 0x2d6   :  { %2849 = vmatmul.mubr.f32.vlgmr.msra.gmra.mxu1 %v2559_v8  ;;  %2917 = vmatprep.subr.mxu0 %v1404_v34  ;;  %v1510_v8 = vld [vmem:[%s9413_s8 + $0x858] sm:$0xff]  ;;  %v1503_v34 = vld [vmem:[%s9413_s8 + $0x820] sm:$0xff] }
 0x2d7   :  { %2926 = vmatprep.subr.mxu1 %v1466_v5  ;;  %2918 = vmatpush2.msra.mxu0 %v1403_v35  ;;  %v1436_v5 = vld [vmem:[%s9413_s8 + $0x608] sm:$0xff]  ;;  %v1502_v35 = vld [vmem:[%s9413_s8 + $0x818] sm:$0xff] }
 0x2d8   :  { %2919 = vmatprep.mubr.f32.mxu0 %v2577_v36  ;;  %2927 = vmatpush1.msra.mxu1 %v1465_v1  ;;  %v1435_v36 = vld [vmem:[%s9413_s8 + $0x600] sm:$0xff]  ;;  %v1501_v1 = vld [vmem:[%s9413_s8 + $0x810] sm:$0xff] }
 0x2d9   :  { %2920 = vmatmul.mubr.f32.vlgmr.msra.gmra.mxu0 %v2569_v25  ;;  %2928 = vmatprep.subr.mxu1 %v1464_v10  ;;  %v1505_v25 = vld [vmem:[%s9413_s8 + $0x830] sm:$0xff]  ;;  %v1498_v10 = vld [vmem:[%s9413_s8 + $0x7f8] sm:$0xff] }
 0x2da   :  { %2997 = vmatprep.subr.mxu0 %v1530_v37  ;;  %2929 = vmatpush1.msra.mxu1 %v1463_v38  ;;  %v1500_v37 = vld [vmem:[%s9413_s8 + $0x808] sm:$0xff]  ;;  %v1497_v38 = vld [vmem:[%s9413_s8 + $0x7f0] sm:$0xff] }
 0x2db   :  { %2998 = vmatpush1.msra.mxu0 %v1529_v39  ;;  %2930 = vmatprep.subr.mxu1 %v1462_v40  ;;  %v1499_v39 = vld [vmem:[%s9413_s8 + $0x800] sm:$0xff]  ;;  %v1496_v40 = vld [vmem:[%s9413_s8 + $0x7e8] sm:$0xff] }
 0x2dc   :  { %2999 = vmatprep.subr.mxu0 %v1528_v22  ;;  %2931 = vmatpush1.msra.mxu1 %v1461_v30  ;;  %v1562_v22 = vld [vmem:[%s9413_s8 + $0x9f8] sm:$0xff]  ;;  %v1495_v30 = vld [vmem:[%s9413_s8 + $0x7e0] sm:$0xff] }
 0x2dd   :  { %3000 = vmatpush1.msra.mxu0 %v1527_v41  ;;  %2932 = vmatprep.subr.mxu1 %v1460_v42  ;;  %v1561_v41 = vld [vmem:[%s9413_s8 + $0x9f0] sm:$0xff]  ;;  %v1494_v42 = vld [vmem:[%s9413_s8 + $0x7d8] sm:$0xff] }
 0x2de   :  { %3001 = vmatprep.subr.mxu0 %v1526_v43  ;;  %2933 = vmatpush1.msra.mxu1 %v1459_v44  ;;  %v1560_v43 = vld [vmem:[%s9413_s8 + $0x9e8] sm:$0xff]  ;;  %v1493_v44 = vld [vmem:[%s9413_s8 + $0x7d0] sm:$0xff] }
 0x2df   :  { %3002 = vmatpush1.msra.mxu0 %v1525_v45  ;;  %2934 = vmatprep.subr.mxu1 %v1458_v46  ;;  %v1559_v45 = vld [vmem:[%s9413_s8 + $0x9e0] sm:$0xff]  ;;  %v1492_v46 = vld [vmem:[%s9413_s8 + $0x7c8] sm:$0xff] }
 0x2e0   :  { %3003 = vmatprep.subr.mxu0 %v1524_v47  ;;  %2935 = vmatpush1.msra.mxu1 %v1457_v48  ;;  %v1558_v47 = vld [vmem:[%s9413_s8 + $0x9d8] sm:$0xff]  ;;  %v1491_v48 = vld [vmem:[%s9413_s8 + $0x7c0] sm:$0xff] }
 0x2e1   :  { %3004 = vmatpush1.msra.mxu0 %v1523_v49  ;;  %2936 = vmatprep.subr.mxu1 %v1456_v50  ;;  %v1557_v49 = vld [vmem:[%s9413_s8 + $0x9d0] sm:$0xff]  ;;  %v1490_v50 = vld [vmem:[%s9413_s8 + $0x7b8] sm:$0xff] }
 0x2e2   :  { %3005 = vmatprep.subr.mxu0 %v1522_v51  ;;  %2937 = vmatpush1.msra.mxu1 %v1455_v52  ;;  %v1556_v51 = vld [vmem:[%s9413_s8 + $0x9c8] sm:$0xff]  ;;  %v1489_v52 = vld [vmem:[%s9413_s8 + $0x7b0] sm:$0xff] }
 0x2e3   :  { %3006 = vmatpush1.msra.mxu0 %v1521_v31  ;;  %2938 = vmatprep.subr.mxu1 %v1454_v32  ;;  %v1555_v31 = vld [vmem:[%s9413_s8 + $0x9c0] sm:$0xff]  ;;  %v1488_v32 = vld [vmem:[%s9413_s8 + $0x7a8] sm:$0xff] }
 0x2e4   :  { %3007 = vmatprep.subr.mxu0 %v1520_v54  ;;  %2939 = vmatpush1.msra.mxu1 %v1453_v55  ;;  %v1554_v54 = vld [vmem:[%s9413_s8 + $0x9b8] sm:$0xff]  ;;  %v1487_v55 = vld [vmem:[%s9413_s8 + $0x7a0] sm:$0xff] }
 0x2e5   :  { %3008 = vmatpush1.msra.mxu0 %v1519_v56  ;;  %2940 = vmatprep.subr.mxu1 %v1452_v58  ;;  %v1553_v56 = vld [vmem:[%s9413_s8 + $0x9b0] sm:$0xff]  ;;  %v1486_v58 = vld [vmem:[%s9413_s8 + $0x798] sm:$0xff] }
 0x2e6   :  { %3009 = vmatprep.subr.mxu0 %v1518_v59  ;;  %2941 = vmatpush1.msra.mxu1 %v1451_v60  ;;  %v1552_v59 = vld [vmem:[%s9413_s8 + $0x9a8] sm:$0xff]  ;;  %v1485_v60 = vld [vmem:[%s9413_s8 + $0x790] sm:$0xff] }
 0x2e7   :  { %3010 = vmatpush1.msra.mxu0 %v1517_v61  ;;  %2942 = vmatprep.subr.mxu1 %v1450_v62  ;;  %v1551_v61 = vld [vmem:[%s9413_s8 + $0x9a0] sm:$0xff]  ;;  %v1484_v62 = vld [vmem:[%s9413_s8 + $0x788] sm:$0xff] }
 0x2e8   :  { %3011 = vmatprep.subr.mxu0 %v1516_v63  ;;  %2943 = vmatpush1.msra.mxu1 %v1449_v0  ;;  %v1550_v63 = vld [vmem:[%s9413_s8 + $0x998] sm:$0xff]  ;;  %v1483_v0 = vld [vmem:[%s9413_s8 + $0x780] sm:$0xff] }
 0x2e9   :  { %3012 = vmatpush1.msra.mxu0 %v1515_v2  ;;  %2944 = vmatprep.subr.mxu1 %v1448_v3  ;;  %v1549_v2 = vld [vmem:[%s9413_s8 + $0x990] sm:$0xff]  ;;  %v1482_v3 = vld [vmem:[%s9413_s8 + $0x778] sm:$0xff] }
 0x2ea   :  { %3013 = vmatprep.subr.mxu0 %v1514_v4  ;;  %2945 = vmatpush1.msra.mxu1 %v1447_v11  ;;  %v1548_v4 = vld [vmem:[%s9413_s8 + $0x988] sm:$0xff]  ;;  %v1481_v11 = vld [vmem:[%s9413_s8 + $0x770] sm:$0xff] }
 0x2eb   :  { %3014 = vmatpush1.msra.mxu0 %v1513_v12  ;;  %2946 = vmatprep.subr.mxu1 %v1446_v28  ;;  %v1547_v12 = vld [vmem:[%s9413_s8 + $0x980] sm:$0xff]  ;;  %v1480_v28 = vld [vmem:[%s9413_s8 + $0x768] sm:$0xff] }
 0x2ec   :  { %3015 = vmatprep.subr.mxu0 %v1512_v13  ;;  %2947 = vmatpush1.msra.mxu1 %v1445_v9  ;;  %v1546_v13 = vld [vmem:[%s9413_s8 + $0x978] sm:$0xff]  ;;  %v1479_v9 = vld [vmem:[%s9413_s8 + $0x760] sm:$0xff] }
 0x2ed   :  { %3016 = vmatpush1.msra.mxu0 %v1511_v14  ;;  %2948 = vmatprep.subr.mxu1 %v1444_v15  ;;  %v1545_v14 = vld [vmem:[%s9413_s8 + $0x970] sm:$0xff]  ;;  %v1478_v15 = vld [vmem:[%s9413_s8 + $0x758] sm:$0xff] }
 0x2ee   :  { %3017 = vmatprep.subr.mxu0 %v1510_v8  ;;  %2949 = vmatpush1.msra.mxu1 %v1443_v27  ;;  %v1544_v8 = vld [vmem:[%s9413_s8 + $0x968] sm:$0xff]  ;;  %v1477_v27 = vld [vmem:[%s9413_s8 + $0x750] sm:$0xff] }
 0x2ef   :  { %3018 = vmatpush1.msra.mxu0 %v1509_v16  ;;  %2950 = vmatprep.subr.mxu1 %v1442_v18  ;;  %v1543_v16 = vld [vmem:[%s9413_s8 + $0x960] sm:$0xff]  ;;  %v1476_v18 = vld [vmem:[%s9413_s8 + $0x748] sm:$0xff] }
 0x2f0   :  { %3019 = vmatprep.subr.mxu0 %v1508_v19  ;;  %2951 = vmatpush1.msra.mxu1 %v1441_v57  ;;  %v1542_v19 = vld [vmem:[%s9413_s8 + $0x958] sm:$0xff]  ;;  %v1475_v57 = vld [vmem:[%s9413_s8 + $0x740] sm:$0xff] }
 0x2f1   :  { %3020 = vmatpush1.msra.mxu0 %v1507_v20  ;;  %2952 = vmatprep.subr.mxu1 %v1440_v21  ;;  %v2562_v20 = vcombine.high %v6702_v17, %v6702_v17  ;;  %v1541_v21 = vld [vmem:[%s9413_s8 + $0x950] sm:$0xff] }
 0x2f2   :  { %3021 = vmatprep.subr.mxu0 %v1506_v23  ;;  %2953 = vmatpush1.msra.mxu1 %v1439_v24  ;;  %v1474_v23 = vld [vmem:[%s9413_s8 + $0x738] sm:$0xff]  ;;  %v1540_v24 = vld [vmem:[%s9413_s8 + $0x948] sm:$0xff]  ;;  %v1473_v17 = vld [vmem:[%s9413_s8 + $0x730] sm:$0xff] }
 0x2f3   :  { %3022 = vmatpush1.msra.mxu0 %v1505_v25  ;;  %2954 = vmatprep.subr.mxu1 %v1438_v26  ;;  %v1539_v25 = vld [vmem:[%s9413_s8 + $0x940] sm:$0xff]  ;;  %v1472_v26 = vld [vmem:[%s9413_s8 + $0x728] sm:$0xff] }
 0x2f4   :  { %3023 = vmatprep.subr.mxu0 %v1504_v29  ;;  %2955 = vmatpush1.msra.mxu1 %v1437_v33  ;;  %v1538_v29 = vld [vmem:[%s9413_s8 + $0x938] sm:$0xff]  ;;  %v1471_v33 = vld [vmem:[%s9413_s8 + $0x720] sm:$0xff] }
 0x2f5   :  { %3024 = vmatpush1.msra.mxu0 %v1503_v34  ;;  %2956 = vmatprep.subr.mxu1 %v1436_v5  ;;  %v2576_v34 = vrot.slane %v2562_v20, %v6132_v53  ;;  %v7096_v5 = vld [vmem:[%s9405_s0 + $0x10] sm:$0xff]  ;;  %v1575_v20 = vld [vmem:[%s9413_s8 + $0xa60] sm:$0xff] }
 0x2f6   :  { %3025 = vmatprep.subr.mxu0 %v1502_v35  ;;  %2957 = vmatpush1.msra.mxu1 %v1435_v36  ;;  %v1537_v35 = vld [vmem:[%s9413_s8 + $0x930] sm:$0xff]  ;;  %v1470_v36 = vld [vmem:[%s9413_s8 + $0x718] sm:$0xff] }
 0x2f7   :  { %3026 = vmatpush1.msra.mxu0 %v1501_v1  ;;  %2958 = vmatprep.subr.mxu1 %v1498_v10  ;;  %v1536_v1 = vld [vmem:[%s9413_s8 + $0x928] sm:$0xff]  ;;  %v1469_v10 = vld [vmem:[%s9413_s8 + $0x710] sm:$0xff] }
 0x2f8   :  { %3027 = vmatprep.subr.mxu0 %v1500_v37  ;;  %2959 = vmatpush2.msra.mxu1 %v1497_v38  ;;  %v1535_v37 = vld [vmem:[%s9413_s8 + $0x920] sm:$0xff]  ;;  %v1468_v38 = vld [vmem:[%s9413_s8 + $0x708] sm:$0xff] }
 0x2f9   :  { %3028 = vmatpush1.msra.mxu0 %v1499_v39  ;;  %2960 = vmatprep.subr.mxu1 %v1496_v40  ;;  %v2586_v39 = vrot.slane %v7096_v5, %v6132_v53  ;;  %v1534_v40 = vld [vmem:[%s9413_s8 + $0x918] sm:$0xff] }
 0x2fa   :  { %3029 = vmatprep.subr.mxu0 %v1562_v22  ;;  %2961 = vmatpush2.msra.mxu1 %v1495_v30  ;;  %v1467_v22 = vld [vmem:[%s9413_s8 + $0x700] sm:$0xff]  ;;  %v2578_v30 = vcombine.high %v2576_v34, %v2576_v34 }
 0x2fb   :  { %3030 = vmatpush2.msra.mxu0 %v1561_v41  ;;  %2962 = vmatprep.subr.mxu1 %v1494_v42  ;;  %v1533_v41 = vld [vmem:[%s9413_s8 + $0x910] sm:$0xff]  ;;  %v1532_v42 = vld [vmem:[%s9413_s8 + $0x908] sm:$0xff] }
 0x2fc   :  { %3031 = vmatprep.subr.mxu0 %v1560_v43  ;;  %2963 = vmatpush2.msra.mxu1 %v1493_v44  ;;  %v1594_v43 = vld [vmem:[%s9413_s8 + $0xaf8] sm:$0xff]  ;;  %v1531_v44 = vld [vmem:[%s9413_s8 + $0x900] sm:$0xff] }
 0x2fd   :  { %3032 = vmatpush2.msra.mxu0 %v1559_v45  ;;  %2964 = vmatprep.subr.mxu1 %v1492_v46  ;;  %v2594_v45 = vcombine.high %v2586_v39, %v2586_v39  ;;  %v1593_v46 = vld [vmem:[%s9413_s8 + $0xaf0] sm:$0xff] }
 0x2fe   :  { %3033 = vmatprep.subr.mxu0 %v1558_v47  ;;  %2965 = vmatpush2.msra.mxu1 %v1491_v48  ;;  %v1592_v47 = vld [vmem:[%s9413_s8 + $0xae8] sm:$0xff]  ;;  %v1658_v48 = vld [vmem:[%s9413_s8 + $0xcf8] sm:$0xff] }
 0x2ff   :  { %3034 = vmatpush2.msra.mxu0 %v1557_v49  ;;  %2966 = vmatprep.subr.mxu1 %v1490_v50  ;;  %v1591_v49 = vld [vmem:[%s9413_s8 + $0xae0] sm:$0xff]  ;;  %v1657_v50 = vld [vmem:[%s9413_s8 + $0xcf0] sm:$0xff] }
 0x300   :  { %3035 = vmatprep.subr.mxu0 %v1556_v51  ;;  %2967 = vmatpush2.msra.mxu1 %v1489_v52  ;;  %v1590_v51 = vld [vmem:[%s9413_s8 + $0xad8] sm:$0xff]  ;;  %v1656_v52 = vld [vmem:[%s9413_s8 + $0xce8] sm:$0xff] }
 0x301   :  { %3036 = vmatpush2.msra.mxu0 %v1555_v31  ;;  %2968 = vmatprep.subr.mxu1 %v1488_v32  ;;  %v1589_v31 = vld [vmem:[%s9413_s8 + $0xad0] sm:$0xff]  ;;  %v1655_v32 = vld [vmem:[%s9413_s8 + $0xce0] sm:$0xff] }
 0x302   :  { %3037 = vmatprep.subr.mxu0 %v1554_v54  ;;  %2969 = vmatpush2.msra.mxu1 %v1487_v55  ;;  %v1588_v54 = vld [vmem:[%s9413_s8 + $0xac8] sm:$0xff]  ;;  %v1654_v55 = vld [vmem:[%s9413_s8 + $0xcd8] sm:$0xff] }
 0x303   :  { %3038 = vmatpush2.msra.mxu0 %v1553_v56  ;;  %2970 = vmatprep.subr.mxu1 %v1486_v58  ;;  %v1587_v56 = vld [vmem:[%s9413_s8 + $0xac0] sm:$0xff]  ;;  %v1653_v58 = vld [vmem:[%s9413_s8 + $0xcd0] sm:$0xff] }
 0x304   :  { %3039 = vmatprep.subr.mxu0 %v1552_v59  ;;  %2971 = vmatpush2.msra.mxu1 %v1485_v60  ;;  %v1586_v59 = vld [vmem:[%s9413_s8 + $0xab8] sm:$0xff]  ;;  %v1652_v60 = vld [vmem:[%s9413_s8 + $0xcc8] sm:$0xff] }
 0x305   :  { %3040 = vmatpush2.msra.mxu0 %v1551_v61  ;;  %2972 = vmatprep.subr.mxu1 %v1484_v62  ;;  %v1585_v61 = vld [vmem:[%s9413_s8 + $0xab0] sm:$0xff]  ;;  %v1651_v62 = vld [vmem:[%s9413_s8 + $0xcc0] sm:$0xff] }
 0x306   :  { %3041 = vmatprep.subr.mxu0 %v1550_v63  ;;  %2973 = vmatpush2.msra.mxu1 %v1483_v0  ;;  %v1584_v63 = vld [vmem:[%s9413_s8 + $0xaa8] sm:$0xff]  ;;  %v1650_v0 = vld [vmem:[%s9413_s8 + $0xcb8] sm:$0xff] }
 0x307   :  { %3042 = vmatpush2.msra.mxu0 %v1549_v2  ;;  %2974 = vmatprep.subr.mxu1 %v1482_v3  ;;  %v1583_v2 = vld [vmem:[%s9413_s8 + $0xaa0] sm:$0xff]  ;;  %v1649_v3 = vld [vmem:[%s9413_s8 + $0xcb0] sm:$0xff] }
 0x308   :  { %3043 = vmatprep.subr.mxu0 %v1548_v4  ;;  %2975 = vmatpush2.msra.mxu1 %v1481_v11  ;;  %v1582_v4 = vld [vmem:[%s9413_s8 + $0xa98] sm:$0xff]  ;;  %v1648_v11 = vld [vmem:[%s9413_s8 + $0xca8] sm:$0xff] }
 0x309   :  { %3044 = vmatpush2.msra.mxu0 %v1547_v12  ;;  %2976 = vmatprep.subr.mxu1 %v1480_v28  ;;  %v1581_v12 = vld [vmem:[%s9413_s8 + $0xa90] sm:$0xff]  ;;  %v1647_v28 = vld [vmem:[%s9413_s8 + $0xca0] sm:$0xff] }
 0x30a   :  { %3045 = vmatprep.subr.mxu0 %v1546_v13  ;;  %2977 = vmatpush2.msra.mxu1 %v1479_v9  ;;  %v1580_v13 = vld [vmem:[%s9413_s8 + $0xa88] sm:$0xff]  ;;  %v1646_v9 = vld [vmem:[%s9413_s8 + $0xc98] sm:$0xff] }
 0x30b   :  { %3046 = vmatpush2.msra.mxu0 %v1545_v14  ;;  %2978 = vmatprep.subr.mxu1 %v1478_v15  ;;  %v1579_v14 = vld [vmem:[%s9413_s8 + $0xa80] sm:$0xff]  ;;  %v1645_v15 = vld [vmem:[%s9413_s8 + $0xc90] sm:$0xff] }
 0x30c   :  { %3047 = vmatprep.subr.mxu0 %v1544_v8  ;;  %2979 = vmatpush2.msra.mxu1 %v1477_v27  ;;  %v1578_v8 = vld [vmem:[%s9413_s8 + $0xa78] sm:$0xff]  ;;  %v1644_v27 = vld [vmem:[%s9413_s8 + $0xc88] sm:$0xff] }
 0x30d   :  { %3048 = vmatpush2.msra.mxu0 %v1543_v16  ;;  %2980 = vmatprep.subr.mxu1 %v1476_v18  ;;  %v1577_v16 = vld [vmem:[%s9413_s8 + $0xa70] sm:$0xff]  ;;  %v1643_v18 = vld [vmem:[%s9413_s8 + $0xc80] sm:$0xff] }
 0x30e   :  { %3049 = vmatprep.subr.mxu0 %v1542_v19  ;;  %2981 = vmatpush2.msra.mxu1 %v1475_v57  ;;  %v1576_v19 = vld [vmem:[%s9413_s8 + $0xa68] sm:$0xff]  ;;  %v1642_v57 = vld [vmem:[%s9413_s8 + $0xc78] sm:$0xff] }
 0x30f   :  { %3050 = vmatpush2.msra.mxu0 %v1541_v21  ;;  %2982 = vmatprep.subr.mxu1 %v1474_v23  ;;  %v1641_v21 = vld [vmem:[%s9413_s8 + $0xc70] sm:$0xff]  ;;  %v1574_v23 = vld [vmem:[%s9413_s8 + $0xa58] sm:$0xff] }
 0x310   :  { %3051 = vmatprep.subr.mxu0 %v1540_v24  ;;  %2983 = vmatpush2.msra.mxu1 %v1473_v17  ;;  %v1640_v24 = vld [vmem:[%s9413_s8 + $0xc68] sm:$0xff]  ;;  %v1573_v17 = vld [vmem:[%s9413_s8 + $0xa50] sm:$0xff] }
 0x311   :  { %3052 = vmatpush2.msra.mxu0 %v1539_v25  ;;  %2984 = vmatprep.subr.mxu1 %v1472_v26  ;;  %v1639_v25 = vld [vmem:[%s9413_s8 + $0xc60] sm:$0xff]  ;;  %v1572_v26 = vld [vmem:[%s9413_s8 + $0xa48] sm:$0xff] }
 0x312   :  { %3053 = vmatprep.subr.mxu0 %v1538_v29  ;;  %2985 = vmatpush2.msra.mxu1 %v1471_v33  ;;  %v1638_v29 = vld [vmem:[%s9413_s8 + $0xc58] sm:$0xff]  ;;  %v1571_v33 = vld [vmem:[%s9413_s8 + $0xa40] sm:$0xff] }
 0x313   :  { %3054 = vmatpush2.msra.mxu0 %v1537_v35  ;;  %2986 = vmatprep.subr.mxu1 %v1470_v36  ;;  %v1570_v35 = vld [vmem:[%s9413_s8 + $0xa38] sm:$0xff]  ;;  %v1636_v36 = vld [vmem:[%s9413_s8 + $0xc48] sm:$0xff] }
 0x314   :  { %3055 = vmatprep.subr.mxu0 %v1536_v1  ;;  %2987 = vmatpush2.msra.mxu1 %v1469_v10  ;;  %v1569_v1 = vld [vmem:[%s9413_s8 + $0xa30] sm:$0xff]  ;;  %v1635_v10 = vld [vmem:[%s9413_s8 + $0xc40] sm:$0xff] }
 0x315   :  { %3056 = vmatpush2.msra.mxu0 %v1535_v37  ;;  %2988 = vmatprep.subr.mxu1 %v1468_v38  ;;  %v1568_v37 = vld [vmem:[%s9413_s8 + $0xa28] sm:$0xff]  ;;  %v1634_v38 = vld [vmem:[%s9413_s8 + $0xc38] sm:$0xff] }
 0x316   :  { %3057 = vmatprep.subr.mxu0 %v1534_v40  ;;  %2989 = vmatpush2.msra.mxu1 %v1467_v22  ;;  %v1633_v40 = vld [vmem:[%s9413_s8 + $0xc30] sm:$0xff]  ;;  %v1566_v22 = vld [vmem:[%s9413_s8 + $0xa18] sm:$0xff] }
 0x317   :  { %2990 = vmatprep.mubr.f32.mxu1 %v2578_v30  ;;  %3058 = vmatpush2.msra.mxu0 %v1533_v41  ;;  %v1632_v30 = vld [vmem:[%s9413_s8 + $0xc28] sm:$0xff]  ;;  %v1565_v41 = vld [vmem:[%s9413_s8 + $0xa10] sm:$0xff] }
 0x318   :  { %2991 = vmatmul.mubr.f32.vlgmr.msra.gmra.mxu1 %v2576_v34  ;;  %3059 = vmatprep.subr.mxu0 %v1532_v42  ;;  %v1637_v34 = vld [vmem:[%s9413_s8 + $0xc50] sm:$0xff]  ;;  %v1631_v42 = vld [vmem:[%s9413_s8 + $0xc20] sm:$0xff] }
 0x319   :  { %3068 = vmatprep.subr.mxu1 %v1594_v43  ;;  %3060 = vmatpush2.msra.mxu0 %v1531_v44  ;;  %v1564_v43 = vld [vmem:[%s9413_s8 + $0xa08] sm:$0xff]  ;;  %v1630_v44 = vld [vmem:[%s9413_s8 + $0xc18] sm:$0xff] }
 0x31a   :  { %3061 = vmatprep.mubr.f32.mxu0 %v2594_v45  ;;  %3069 = vmatpush1.msra.mxu1 %v1593_v46  ;;  %v1563_v45 = vld [vmem:[%s9413_s8 + $0xa00] sm:$0xff]  ;;  %v1629_v46 = vld [vmem:[%s9413_s8 + $0xc10] sm:$0xff] }
 0x31b   :  { %3062 = vmatmul.mubr.f32.vlgmr.msra.gmra.mxu0 %v2586_v39  ;;  %3070 = vmatprep.subr.mxu1 %v1592_v47  ;;  %v1567_v39 = vld [vmem:[%s9413_s8 + $0xa20] sm:$0xff]  ;;  %v1626_v47 = vld [vmem:[%s9413_s8 + $0xbf8] sm:$0xff] }
 0x31c   :  { %3139 = vmatprep.subr.mxu0 %v1658_v48  ;;  %3071 = vmatpush1.msra.mxu1 %v1591_v49  ;;  %v1628_v48 = vld [vmem:[%s9413_s8 + $0xc08] sm:$0xff]  ;;  %v1625_v49 = vld [vmem:[%s9413_s8 + $0xbf0] sm:$0xff] }
 0x31d   :  { %3140 = vmatpush1.msra.mxu0 %v1657_v50  ;;  %3072 = vmatprep.subr.mxu1 %v1590_v51  ;;  %v1627_v50 = vld [vmem:[%s9413_s8 + $0xc00] sm:$0xff]  ;;  %v1624_v51 = vld [vmem:[%s9413_s8 + $0xbe8] sm:$0xff] }
 0x31e   :  { %3141 = vmatprep.subr.mxu0 %v1656_v52  ;;  %3073 = vmatpush1.msra.mxu1 %v1589_v31  ;;  %v1690_v52 = vld [vmem:[%s9413_s8 + $0xdf8] sm:$0xff]  ;;  %v1623_v31 = vld [vmem:[%s9413_s8 + $0xbe0] sm:$0xff] }
 0x31f   :  { %3142 = vmatpush1.msra.mxu0 %v1655_v32  ;;  %3074 = vmatprep.subr.mxu1 %v1588_v54  ;;  %v1689_v32 = vld [vmem:[%s9413_s8 + $0xdf0] sm:$0xff]  ;;  %v1622_v54 = vld [vmem:[%s9413_s8 + $0xbd8] sm:$0xff] }
 0x320   :  { %3143 = vmatprep.subr.mxu0 %v1654_v55  ;;  %3075 = vmatpush1.msra.mxu1 %v1587_v56  ;;  %v1688_v55 = vld [vmem:[%s9413_s8 + $0xde8] sm:$0xff]  ;;  %v1621_v56 = vld [vmem:[%s9413_s8 + $0xbd0] sm:$0xff] }
 0x321   :  { %3144 = vmatpush1.msra.mxu0 %v1653_v58  ;;  %3076 = vmatprep.subr.mxu1 %v1586_v59  ;;  %v1687_v58 = vld [vmem:[%s9413_s8 + $0xde0] sm:$0xff]  ;;  %v1620_v59 = vld [vmem:[%s9413_s8 + $0xbc8] sm:$0xff] }
 0x322   :  { %3145 = vmatprep.subr.mxu0 %v1652_v60  ;;  %3077 = vmatpush1.msra.mxu1 %v1585_v61  ;;  %v1686_v60 = vld [vmem:[%s9413_s8 + $0xdd8] sm:$0xff]  ;;  %v1619_v61 = vld [vmem:[%s9413_s8 + $0xbc0] sm:$0xff] }
 0x323   :  { %3146 = vmatpush1.msra.mxu0 %v1651_v62  ;;  %3078 = vmatprep.subr.mxu1 %v1584_v63  ;;  %v1685_v62 = vld [vmem:[%s9413_s8 + $0xdd0] sm:$0xff]  ;;  %v1618_v63 = vld [vmem:[%s9413_s8 + $0xbb8] sm:$0xff] }
 0x324   :  { %3147 = vmatprep.subr.mxu0 %v1650_v0  ;;  %3079 = vmatpush1.msra.mxu1 %v1583_v2  ;;  %v1684_v0 = vld [vmem:[%s9413_s8 + $0xdc8] sm:$0xff]  ;;  %v1617_v2 = vld [vmem:[%s9413_s8 + $0xbb0] sm:$0xff] }
 0x325   :  { %3148 = vmatpush1.msra.mxu0 %v1649_v3  ;;  %3080 = vmatprep.subr.mxu1 %v1582_v4  ;;  %v1683_v3 = vld [vmem:[%s9413_s8 + $0xdc0] sm:$0xff]  ;;  %v1616_v4 = vld [vmem:[%s9413_s8 + $0xba8] sm:$0xff] }
 0x326   :  { %3149 = vmatprep.subr.mxu0 %v1648_v11  ;;  %3081 = vmatpush1.msra.mxu1 %v1581_v12  ;;  %v1682_v11 = vld [vmem:[%s9413_s8 + $0xdb8] sm:$0xff]  ;;  %v1615_v12 = vld [vmem:[%s9413_s8 + $0xba0] sm:$0xff] }
 0x327   :  { %3150 = vmatpush1.msra.mxu0 %v1647_v28  ;;  %3082 = vmatprep.subr.mxu1 %v1580_v13  ;;  %v1681_v28 = vld [vmem:[%s9413_s8 + $0xdb0] sm:$0xff]  ;;  %v1614_v13 = vld [vmem:[%s9413_s8 + $0xb98] sm:$0xff] }
 0x328   :  { %3151 = vmatprep.subr.mxu0 %v1646_v9  ;;  %3083 = vmatpush1.msra.mxu1 %v1579_v14  ;;  %v1680_v9 = vld [vmem:[%s9413_s8 + $0xda8] sm:$0xff]  ;;  %v1613_v14 = vld [vmem:[%s9413_s8 + $0xb90] sm:$0xff] }
 0x329   :  { %3152 = vmatpush1.msra.mxu0 %v1645_v15  ;;  %3084 = vmatprep.subr.mxu1 %v1578_v8  ;;  %v1679_v15 = vld [vmem:[%s9413_s8 + $0xda0] sm:$0xff]  ;;  %v1612_v8 = vld [vmem:[%s9413_s8 + $0xb88] sm:$0xff] }
 0x32a   :  { %3153 = vmatprep.subr.mxu0 %v1644_v27  ;;  %3085 = vmatpush1.msra.mxu1 %v1577_v16  ;;  %v1678_v27 = vld [vmem:[%s9413_s8 + $0xd98] sm:$0xff]  ;;  %v1611_v16 = vld [vmem:[%s9413_s8 + $0xb80] sm:$0xff] }
 0x32b   :  { %3154 = vmatpush1.msra.mxu0 %v1643_v18  ;;  %3086 = vmatprep.subr.mxu1 %v1576_v19  ;;  %v1677_v18 = vld [vmem:[%s9413_s8 + $0xd90] sm:$0xff]  ;;  %v1610_v19 = vld [vmem:[%s9413_s8 + $0xb78] sm:$0xff] }
 0x32c   :  { %3155 = vmatprep.subr.mxu0 %v1642_v57  ;;  %3087 = vmatpush1.msra.mxu1 %v1575_v20  ;;  %v1676_v57 = vld [vmem:[%s9413_s8 + $0xd88] sm:$0xff]  ;;  %v1609_v20 = vld [vmem:[%s9413_s8 + $0xb70] sm:$0xff] }
 0x32d   :  { %3156 = vmatpush1.msra.mxu0 %v1641_v21  ;;  %3088 = vmatprep.subr.mxu1 %v1574_v23  ;;  %v1675_v21 = vld [vmem:[%s9413_s8 + $0xd80] sm:$0xff]  ;;  %v1608_v23 = vld [vmem:[%s9413_s8 + $0xb68] sm:$0xff] }
 0x32e   :  { %3157 = vmatprep.subr.mxu0 %v1640_v24  ;;  %3089 = vmatpush1.msra.mxu1 %v1573_v17  ;;  %v1674_v24 = vld [vmem:[%s9413_s8 + $0xd78] sm:$0xff]  ;;  %v1607_v17 = vld [vmem:[%s9413_s8 + $0xb60] sm:$0xff] }
 0x32f   :  { %3158 = vmatpush1.msra.mxu0 %v1639_v25  ;;  %3090 = vmatprep.subr.mxu1 %v1572_v26  ;;  %v1673_v25 = vld [vmem:[%s9413_s8 + $0xd70] sm:$0xff]  ;;  %v1606_v26 = vld [vmem:[%s9413_s8 + $0xb58] sm:$0xff] }
 0x330   :  { %3159 = vmatprep.subr.mxu0 %v1638_v29  ;;  %3091 = vmatpush1.msra.mxu1 %v1571_v33  ;;  %v1672_v29 = vld [vmem:[%s9413_s8 + $0xd68] sm:$0xff]  ;;  %v1605_v33 = vld [vmem:[%s9413_s8 + $0xb50] sm:$0xff] }
 0x331   :  { %3160 = vmatpush1.msra.mxu0 %v1637_v34  ;;  %3092 = vmatprep.subr.mxu1 %v1570_v35  ;;  %v1671_v34 = vld [vmem:[%s9413_s8 + $0xd60] sm:$0xff]  ;;  %v1604_v35 = vld [vmem:[%s9413_s8 + $0xb48] sm:$0xff] }
 0x332   :  { %3161 = vmatprep.subr.mxu0 %v1636_v36  ;;  %3093 = vmatpush1.msra.mxu1 %v1569_v1  ;;  %v1670_v36 = vld [vmem:[%s9413_s8 + $0xd58] sm:$0xff]  ;;  %v1603_v1 = vld [vmem:[%s9413_s8 + $0xb40] sm:$0xff] }
 0x333   :  { %3162 = vmatpush1.msra.mxu0 %v1635_v10  ;;  %3094 = vmatprep.subr.mxu1 %v1568_v37  ;;  %v2579_v10 = vcombine.high %v7096_v5, %v7096_v5  ;;  %v1669_v37 = vld [vmem:[%s9413_s8 + $0xd50] sm:$0xff] }
 0x334   :  { %3163 = vmatprep.subr.mxu0 %v1634_v38  ;;  %3095 = vmatpush1.msra.mxu1 %v1567_v39  ;;  %v1602_v38 = vld [vmem:[%s9413_s8 + $0xb38] sm:$0xff]  ;;  %v1668_v39 = vld [vmem:[%s9413_s8 + $0xd48] sm:$0xff]  ;;  %v1601_v5 = vld [vmem:[%s9413_s8 + $0xb30] sm:$0xff] }
 0x335   :  { %3164 = vmatpush1.msra.mxu0 %v1633_v40  ;;  %3096 = vmatprep.subr.mxu1 %v1566_v22  ;;  %v1667_v40 = vld [vmem:[%s9413_s8 + $0xd40] sm:$0xff]  ;;  %v1600_v22 = vld [vmem:[%s9413_s8 + $0xb28] sm:$0xff] }
 0x336   :  { %3165 = vmatprep.subr.mxu0 %v1632_v30  ;;  %3097 = vmatpush1.msra.mxu1 %v1565_v41  ;;  %v1666_v30 = vld [vmem:[%s9413_s8 + $0xd38] sm:$0xff]  ;;  %v1599_v41 = vld [vmem:[%s9413_s8 + $0xb20] sm:$0xff] }
 0x337   :  { %3166 = vmatpush1.msra.mxu0 %v1631_v42  ;;  %3098 = vmatprep.subr.mxu1 %v1564_v43  ;;  %v2593_v42 = vrot.slane %v2579_v10, %v6132_v53  ;;  %v7490_v43 = vld [vmem:[%s9405_s0 + $0x18] sm:$0xff]  ;;  %v1703_v10 = vld [vmem:[%s9413_s8 + $0xe60] sm:$0xff] }
 0x338   :  { %3167 = vmatprep.subr.mxu0 %v1630_v44  ;;  %3099 = vmatpush1.msra.mxu1 %v1563_v45  ;;  %v1665_v44 = vld [vmem:[%s9413_s8 + $0xd30] sm:$0xff]  ;;  %v1598_v45 = vld [vmem:[%s9413_s8 + $0xb18] sm:$0xff] }
 0x339   :  { %3168 = vmatpush1.msra.mxu0 %v1629_v46  ;;  %3100 = vmatprep.subr.mxu1 %v1626_v47  ;;  %v1664_v46 = vld [vmem:[%s9413_s8 + $0xd28] sm:$0xff]  ;;  %v1597_v47 = vld [vmem:[%s9413_s8 + $0xb10] sm:$0xff] }
 0x33a   :  { %3169 = vmatprep.subr.mxu0 %v1628_v48  ;;  %3101 = vmatpush2.msra.mxu1 %v1625_v49  ;;  %v1663_v48 = vld [vmem:[%s9413_s8 + $0xd20] sm:$0xff]  ;;  %v1596_v49 = vld [vmem:[%s9413_s8 + $0xb08] sm:$0xff] }
 0x33b   :  { %3170 = vmatpush1.msra.mxu0 %v1627_v50  ;;  %3102 = vmatprep.subr.mxu1 %v1624_v51  ;;  %v2603_v50 = vrot.slane %v7490_v43, %v6132_v53  ;;  %v1662_v51 = vld [vmem:[%s9413_s8 + $0xd18] sm:$0xff] }
 0x33c   :  { %3171 = vmatprep.subr.mxu0 %v1690_v52  ;;  %3103 = vmatpush2.msra.mxu1 %v1623_v31  ;;  %v1595_v52 = vld [vmem:[%s9413_s8 + $0xb00] sm:$0xff]  ;;  %v2595_v31 = vcombine.high %v2593_v42, %v2593_v42 }
 0x33d   :  { %3172 = vmatpush2.msra.mxu0 %v1689_v32  ;;  %3104 = vmatprep.subr.mxu1 %v1622_v54  ;;  %v1661_v32 = vld [vmem:[%s9413_s8 + $0xd10] sm:$0xff]  ;;  %v1660_v54 = vld [vmem:[%s9413_s8 + $0xd08] sm:$0xff] }
 0x33e   :  { %3173 = vmatprep.subr.mxu0 %v1688_v55  ;;  %3105 = vmatpush2.msra.mxu1 %v1621_v56  ;;  %v1722_v55 = vld [vmem:[%s9413_s8 + $0xef8] sm:$0xff]  ;;  %v1659_v56 = vld [vmem:[%s9413_s8 + $0xd00] sm:$0xff] }
 0x33f   :  { %3174 = vmatpush2.msra.mxu0 %v1687_v58  ;;  %3106 = vmatprep.subr.mxu1 %v1620_v59  ;;  %v2611_v58 = vcombine.high %v2603_v50, %v2603_v50  ;;  %v1721_v59 = vld [vmem:[%s9413_s8 + $0xef0] sm:$0xff] }
 0x340   :  { %3175 = vmatprep.subr.mxu0 %v1686_v60  ;;  %3107 = vmatpush2.msra.mxu1 %v1619_v61  ;;  %v1720_v60 = vld [vmem:[%s9413_s8 + $0xee8] sm:$0xff]  ;;  %v1786_v61 = vld [vmem:[%s9413_s8 + $0x10f8] sm:$0xff] }
 0x341   :  { %3176 = vmatpush2.msra.mxu0 %v1685_v62  ;;  %3108 = vmatprep.subr.mxu1 %v1618_v63  ;;  %v1719_v62 = vld [vmem:[%s9413_s8 + $0xee0] sm:$0xff]  ;;  %v1785_v63 = vld [vmem:[%s9413_s8 + $0x10f0] sm:$0xff] }
 0x342   :  { %3177 = vmatprep.subr.mxu0 %v1684_v0  ;;  %3109 = vmatpush2.msra.mxu1 %v1617_v2  ;;  %v1718_v0 = vld [vmem:[%s9413_s8 + $0xed8] sm:$0xff]  ;;  %v1784_v2 = vld [vmem:[%s9413_s8 + $0x10e8] sm:$0xff] }
 0x343   :  { %3178 = vmatpush2.msra.mxu0 %v1683_v3  ;;  %3110 = vmatprep.subr.mxu1 %v1616_v4  ;;  %v1717_v3 = vld [vmem:[%s9413_s8 + $0xed0] sm:$0xff]  ;;  %v1783_v4 = vld [vmem:[%s9413_s8 + $0x10e0] sm:$0xff] }
 0x344   :  { %3179 = vmatprep.subr.mxu0 %v1682_v11  ;;  %3111 = vmatpush2.msra.mxu1 %v1615_v12  ;;  %v1716_v11 = vld [vmem:[%s9413_s8 + $0xec8] sm:$0xff]  ;;  %v1782_v12 = vld [vmem:[%s9413_s8 + $0x10d8] sm:$0xff] }
 0x345   :  { %3180 = vmatpush2.msra.mxu0 %v1681_v28  ;;  %3112 = vmatprep.subr.mxu1 %v1614_v13  ;;  %v1715_v28 = vld [vmem:[%s9413_s8 + $0xec0] sm:$0xff]  ;;  %v1781_v13 = vld [vmem:[%s9413_s8 + $0x10d0] sm:$0xff] }
 0x346   :  { %3181 = vmatprep.subr.mxu0 %v1680_v9  ;;  %3113 = vmatpush2.msra.mxu1 %v1613_v14  ;;  %v1714_v9 = vld [vmem:[%s9413_s8 + $0xeb8] sm:$0xff]  ;;  %v1780_v14 = vld [vmem:[%s9413_s8 + $0x10c8] sm:$0xff] }
 0x347   :  { %3182 = vmatpush2.msra.mxu0 %v1679_v15  ;;  %3114 = vmatprep.subr.mxu1 %v1612_v8  ;;  %v1713_v15 = vld [vmem:[%s9413_s8 + $0xeb0] sm:$0xff]  ;;  %v1779_v8 = vld [vmem:[%s9413_s8 + $0x10c0] sm:$0xff] }
 0x348   :  { %3183 = vmatprep.subr.mxu0 %v1678_v27  ;;  %3115 = vmatpush2.msra.mxu1 %v1611_v16  ;;  %v1712_v27 = vld [vmem:[%s9413_s8 + $0xea8] sm:$0xff]  ;;  %v1778_v16 = vld [vmem:[%s9413_s8 + $0x10b8] sm:$0xff] }
 0x349   :  { %3184 = vmatpush2.msra.mxu0 %v1677_v18  ;;  %3116 = vmatprep.subr.mxu1 %v1610_v19  ;;  %v1711_v18 = vld [vmem:[%s9413_s8 + $0xea0] sm:$0xff]  ;;  %v1777_v19 = vld [vmem:[%s9413_s8 + $0x10b0] sm:$0xff] }
 0x34a   :  { %3185 = vmatprep.subr.mxu0 %v1676_v57  ;;  %3117 = vmatpush2.msra.mxu1 %v1609_v20  ;;  %v1710_v57 = vld [vmem:[%s9413_s8 + $0xe98] sm:$0xff]  ;;  %v1776_v20 = vld [vmem:[%s9413_s8 + $0x10a8] sm:$0xff] }
 0x34b   :  { %3186 = vmatpush2.msra.mxu0 %v1675_v21  ;;  %3118 = vmatprep.subr.mxu1 %v1608_v23  ;;  %v1709_v21 = vld [vmem:[%s9413_s8 + $0xe90] sm:$0xff]  ;;  %v1775_v23 = vld [vmem:[%s9413_s8 + $0x10a0] sm:$0xff] }
 0x34c   :  { %3187 = vmatprep.subr.mxu0 %v1674_v24  ;;  %3119 = vmatpush2.msra.mxu1 %v1607_v17  ;;  %v1708_v24 = vld [vmem:[%s9413_s8 + $0xe88] sm:$0xff]  ;;  %v1774_v17 = vld [vmem:[%s9413_s8 + $0x1098] sm:$0xff] }
 0x34d   :  { %3188 = vmatpush2.msra.mxu0 %v1673_v25  ;;  %3120 = vmatprep.subr.mxu1 %v1606_v26  ;;  %v1707_v25 = vld [vmem:[%s9413_s8 + $0xe80] sm:$0xff]  ;;  %v1773_v26 = vld [vmem:[%s9413_s8 + $0x1090] sm:$0xff] }
 0x34e   :  { %3189 = vmatprep.subr.mxu0 %v1672_v29  ;;  %3121 = vmatpush2.msra.mxu1 %v1605_v33  ;;  %v1706_v29 = vld [vmem:[%s9413_s8 + $0xe78] sm:$0xff]  ;;  %v1772_v33 = vld [vmem:[%s9413_s8 + $0x1088] sm:$0xff] }
 0x34f   :  { %3190 = vmatpush2.msra.mxu0 %v1671_v34  ;;  %3122 = vmatprep.subr.mxu1 %v1604_v35  ;;  %v1705_v34 = vld [vmem:[%s9413_s8 + $0xe70] sm:$0xff]  ;;  %v1771_v35 = vld [vmem:[%s9413_s8 + $0x1080] sm:$0xff] }
 0x350   :  { %3191 = vmatprep.subr.mxu0 %v1670_v36  ;;  %3123 = vmatpush2.msra.mxu1 %v1603_v1  ;;  %v1704_v36 = vld [vmem:[%s9413_s8 + $0xe68] sm:$0xff]  ;;  %v1770_v1 = vld [vmem:[%s9413_s8 + $0x1078] sm:$0xff] }
 0x351   :  { %3192 = vmatpush2.msra.mxu0 %v1669_v37  ;;  %3124 = vmatprep.subr.mxu1 %v1602_v38  ;;  %v1769_v37 = vld [vmem:[%s9413_s8 + $0x1070] sm:$0xff]  ;;  %v1702_v38 = vld [vmem:[%s9413_s8 + $0xe58] sm:$0xff] }
 0x352   :  { %3193 = vmatprep.subr.mxu0 %v1668_v39  ;;  %3125 = vmatpush2.msra.mxu1 %v1601_v5  ;;  %v1768_v39 = vld [vmem:[%s9413_s8 + $0x1068] sm:$0xff]  ;;  %v1701_v5 = vld [vmem:[%s9413_s8 + $0xe50] sm:$0xff] }
 0x353   :  { %3194 = vmatpush2.msra.mxu0 %v1667_v40  ;;  %3126 = vmatprep.subr.mxu1 %v1600_v22  ;;  %v1767_v40 = vld [vmem:[%s9413_s8 + $0x1060] sm:$0xff]  ;;  %v1700_v22 = vld [vmem:[%s9413_s8 + $0xe48] sm:$0xff] }
 0x354   :  { %3195 = vmatprep.subr.mxu0 %v1666_v30  ;;  %3127 = vmatpush2.msra.mxu1 %v1599_v41  ;;  %v1766_v30 = vld [vmem:[%s9413_s8 + $0x1058] sm:$0xff]  ;;  %v1699_v41 = vld [vmem:[%s9413_s8 + $0xe40] sm:$0xff] }
 0x355   :  { %3196 = vmatpush2.msra.mxu0 %v1665_v44  ;;  %3128 = vmatprep.subr.mxu1 %v1598_v45  ;;  %v1698_v44 = vld [vmem:[%s9413_s8 + $0xe38] sm:$0xff]  ;;  %v1764_v45 = vld [vmem:[%s9413_s8 + $0x1048] sm:$0xff] }
 0x356   :  { %3197 = vmatprep.subr.mxu0 %v1664_v46  ;;  %3129 = vmatpush2.msra.mxu1 %v1597_v47  ;;  %v1697_v46 = vld [vmem:[%s9413_s8 + $0xe30] sm:$0xff]  ;;  %v1763_v47 = vld [vmem:[%s9413_s8 + $0x1040] sm:$0xff] }
 0x357   :  { %3198 = vmatpush2.msra.mxu0 %v1663_v48  ;;  %3130 = vmatprep.subr.mxu1 %v1596_v49  ;;  %v1696_v48 = vld [vmem:[%s9413_s8 + $0xe28] sm:$0xff]  ;;  %v1762_v49 = vld [vmem:[%s9413_s8 + $0x1038] sm:$0xff] }
 0x358   :  { %3199 = vmatprep.subr.mxu0 %v1662_v51  ;;  %3131 = vmatpush2.msra.mxu1 %v1595_v52  ;;  %v1761_v51 = vld [vmem:[%s9413_s8 + $0x1030] sm:$0xff]  ;;  %v1694_v52 = vld [vmem:[%s9413_s8 + $0xe18] sm:$0xff] }
 0x359   :  { %3132 = vmatprep.mubr.f32.mxu1 %v2595_v31  ;;  %3200 = vmatpush2.msra.mxu0 %v1661_v32  ;;  %v1760_v31 = vld [vmem:[%s9413_s8 + $0x1028] sm:$0xff]  ;;  %v1693_v32 = vld [vmem:[%s9413_s8 + $0xe10] sm:$0xff] }
 0x35a   :  { %3133 = vmatmul.mubr.f32.vlgmr.msra.gmra.mxu1 %v2593_v42  ;;  %3201 = vmatprep.subr.mxu0 %v1660_v54  ;;  %v1765_v42 = vld [vmem:[%s9413_s8 + $0x1050] sm:$0xff]  ;;  %v1759_v54 = vld [vmem:[%s9413_s8 + $0x1020] sm:$0xff] }
 0x35b   :  { %3210 = vmatprep.subr.mxu1 %v1722_v55  ;;  %3202 = vmatpush2.msra.mxu0 %v1659_v56  ;;  %v1692_v55 = vld [vmem:[%s9413_s8 + $0xe08] sm:$0xff]  ;;  %v1758_v56 = vld [vmem:[%s9413_s8 + $0x1018] sm:$0xff] }
 0x35c   :  { %3203 = vmatprep.mubr.f32.mxu0 %v2611_v58  ;;  %3211 = vmatpush1.msra.mxu1 %v1721_v59  ;;  %v1691_v58 = vld [vmem:[%s9413_s8 + $0xe00] sm:$0xff]  ;;  %v1757_v59 = vld [vmem:[%s9413_s8 + $0x1010] sm:$0xff] }
 0x35d   :  { %3204 = vmatmul.mubr.f32.vlgmr.msra.gmra.mxu0 %v2603_v50  ;;  %3212 = vmatprep.subr.mxu1 %v1720_v60  ;;  %v1695_v50 = vld [vmem:[%s9413_s8 + $0xe20] sm:$0xff]  ;;  %v1754_v60 = vld [vmem:[%s9413_s8 + $0xff8] sm:$0xff] }
 0x35e   :  { %3281 = vmatprep.subr.mxu0 %v1786_v61  ;;  %3213 = vmatpush1.msra.mxu1 %v1719_v62  ;;  %v1756_v61 = vld [vmem:[%s9413_s8 + $0x1008] sm:$0xff]  ;;  %v1753_v62 = vld [vmem:[%s9413_s8 + $0xff0] sm:$0xff] }
 0x35f   :  { %3282 = vmatpush1.msra.mxu0 %v1785_v63  ;;  %3214 = vmatprep.subr.mxu1 %v1718_v0  ;;  %v1755_v63 = vld [vmem:[%s9413_s8 + $0x1000] sm:$0xff]  ;;  %v1752_v0 = vld [vmem:[%s9413_s8 + $0xfe8] sm:$0xff] }
 0x360   :  { %3283 = vmatprep.subr.mxu0 %v1784_v2  ;;  %3215 = vmatpush1.msra.mxu1 %v1717_v3  ;;  %v1818_v2 = vld [vmem:[%s9413_s8 + $0x11f8] sm:$0xff]  ;;  %v1751_v3 = vld [vmem:[%s9413_s8 + $0xfe0] sm:$0xff] }
 0x361   :  { %3284 = vmatpush1.msra.mxu0 %v1783_v4  ;;  %3216 = vmatprep.subr.mxu1 %v1716_v11  ;;  %v1817_v4 = vld [vmem:[%s9413_s8 + $0x11f0] sm:$0xff]  ;;  %v1750_v11 = vld [vmem:[%s9413_s8 + $0xfd8] sm:$0xff] }
 0x362   :  { %3285 = vmatprep.subr.mxu0 %v1782_v12  ;;  %3217 = vmatpush1.msra.mxu1 %v1715_v28  ;;  %v1816_v12 = vld [vmem:[%s9413_s8 + $0x11e8] sm:$0xff]  ;;  %v1749_v28 = vld [vmem:[%s9413_s8 + $0xfd0] sm:$0xff] }
 0x363   :  { %3286 = vmatpush1.msra.mxu0 %v1781_v13  ;;  %3218 = vmatprep.subr.mxu1 %v1714_v9  ;;  %v1815_v13 = vld [vmem:[%s9413_s8 + $0x11e0] sm:$0xff]  ;;  %v1748_v9 = vld [vmem:[%s9413_s8 + $0xfc8] sm:$0xff] }
 0x364   :  { %3287 = vmatprep.subr.mxu0 %v1780_v14  ;;  %3219 = vmatpush1.msra.mxu1 %v1713_v15  ;;  %v1814_v14 = vld [vmem:[%s9413_s8 + $0x11d8] sm:$0xff]  ;;  %v1747_v15 = vld [vmem:[%s9413_s8 + $0xfc0] sm:$0xff] }
 0x365   :  { %3288 = vmatpush1.msra.mxu0 %v1779_v8  ;;  %3220 = vmatprep.subr.mxu1 %v1712_v27  ;;  %v1813_v8 = vld [vmem:[%s9413_s8 + $0x11d0] sm:$0xff]  ;;  %v1746_v27 = vld [vmem:[%s9413_s8 + $0xfb8] sm:$0xff] }
 0x366   :  { %3289 = vmatprep.subr.mxu0 %v1778_v16  ;;  %3221 = vmatpush1.msra.mxu1 %v1711_v18  ;;  %v1812_v16 = vld [vmem:[%s9413_s8 + $0x11c8] sm:$0xff]  ;;  %v1745_v18 = vld [vmem:[%s9413_s8 + $0xfb0] sm:$0xff] }
 0x367   :  { %3290 = vmatpush1.msra.mxu0 %v1777_v19  ;;  %3222 = vmatprep.subr.mxu1 %v1710_v57  ;;  %v1811_v19 = vld [vmem:[%s9413_s8 + $0x11c0] sm:$0xff]  ;;  %v1744_v57 = vld [vmem:[%s9413_s8 + $0xfa8] sm:$0xff] }
 0x368   :  { %3291 = vmatprep.subr.mxu0 %v1776_v20  ;;  %3223 = vmatpush1.msra.mxu1 %v1709_v21  ;;  %v1810_v20 = vld [vmem:[%s9413_s8 + $0x11b8] sm:$0xff]  ;;  %v1743_v21 = vld [vmem:[%s9413_s8 + $0xfa0] sm:$0xff] }
 0x369   :  { %3292 = vmatpush1.msra.mxu0 %v1775_v23  ;;  %3224 = vmatprep.subr.mxu1 %v1708_v24  ;;  %v1809_v23 = vld [vmem:[%s9413_s8 + $0x11b0] sm:$0xff]  ;;  %v1742_v24 = vld [vmem:[%s9413_s8 + $0xf98] sm:$0xff] }
 0x36a   :  { %3293 = vmatprep.subr.mxu0 %v1774_v17  ;;  %3225 = vmatpush1.msra.mxu1 %v1707_v25  ;;  %v1808_v17 = vld [vmem:[%s9413_s8 + $0x11a8] sm:$0xff]  ;;  %v1741_v25 = vld [vmem:[%s9413_s8 + $0xf90] sm:$0xff] }
 0x36b   :  { %3294 = vmatpush1.msra.mxu0 %v1773_v26  ;;  %3226 = vmatprep.subr.mxu1 %v1706_v29  ;;  %v1807_v26 = vld [vmem:[%s9413_s8 + $0x11a0] sm:$0xff]  ;;  %v1740_v29 = vld [vmem:[%s9413_s8 + $0xf88] sm:$0xff] }
 0x36c   :  { %3295 = vmatprep.subr.mxu0 %v1772_v33  ;;  %3227 = vmatpush1.msra.mxu1 %v1705_v34  ;;  %v1806_v33 = vld [vmem:[%s9413_s8 + $0x1198] sm:$0xff]  ;;  %v1739_v34 = vld [vmem:[%s9413_s8 + $0xf80] sm:$0xff] }
 0x36d   :  { %3296 = vmatpush1.msra.mxu0 %v1771_v35  ;;  %3228 = vmatprep.subr.mxu1 %v1704_v36  ;;  %v1805_v35 = vld [vmem:[%s9413_s8 + $0x1190] sm:$0xff]  ;;  %v1738_v36 = vld [vmem:[%s9413_s8 + $0xf78] sm:$0xff] }
 0x36e   :  { %3297 = vmatprep.subr.mxu0 %v1770_v1  ;;  %3229 = vmatpush1.msra.mxu1 %v1703_v10  ;;  %v1804_v1 = vld [vmem:[%s9413_s8 + $0x1188] sm:$0xff]  ;;  %v1737_v10 = vld [vmem:[%s9413_s8 + $0xf70] sm:$0xff] }
 0x36f   :  { %3298 = vmatpush1.msra.mxu0 %v1769_v37  ;;  %3230 = vmatprep.subr.mxu1 %v1702_v38  ;;  %v1803_v37 = vld [vmem:[%s9413_s8 + $0x1180] sm:$0xff]  ;;  %v1736_v38 = vld [vmem:[%s9413_s8 + $0xf68] sm:$0xff] }
 0x370   :  { %3299 = vmatprep.subr.mxu0 %v1768_v39  ;;  %3231 = vmatpush1.msra.mxu1 %v1701_v5  ;;  %v1802_v39 = vld [vmem:[%s9413_s8 + $0x1178] sm:$0xff]  ;;  %v1735_v5 = vld [vmem:[%s9413_s8 + $0xf60] sm:$0xff] }
 0x371   :  { %3300 = vmatpush1.msra.mxu0 %v1767_v40  ;;  %3232 = vmatprep.subr.mxu1 %v1700_v22  ;;  %v1801_v40 = vld [vmem:[%s9413_s8 + $0x1170] sm:$0xff]  ;;  %v1734_v22 = vld [vmem:[%s9413_s8 + $0xf58] sm:$0xff] }
 0x372   :  { %3301 = vmatprep.subr.mxu0 %v1766_v30  ;;  %3233 = vmatpush1.msra.mxu1 %v1699_v41  ;;  %v1800_v30 = vld [vmem:[%s9413_s8 + $0x1168] sm:$0xff]  ;;  %v1733_v41 = vld [vmem:[%s9413_s8 + $0xf50] sm:$0xff] }
 0x373   :  { %3302 = vmatpush1.msra.mxu0 %v1765_v42  ;;  %3234 = vmatprep.subr.mxu1 %v1698_v44  ;;  %v1799_v42 = vld [vmem:[%s9413_s8 + $0x1160] sm:$0xff]  ;;  %v1732_v44 = vld [vmem:[%s9413_s8 + $0xf48] sm:$0xff] }
 0x374   :  { %3303 = vmatprep.subr.mxu0 %v1764_v45  ;;  %3235 = vmatpush1.msra.mxu1 %v1697_v46  ;;  %v1798_v45 = vld [vmem:[%s9413_s8 + $0x1158] sm:$0xff]  ;;  %v1731_v46 = vld [vmem:[%s9413_s8 + $0xf40] sm:$0xff] }
 0x375   :  { %3304 = vmatpush1.msra.mxu0 %v1763_v47  ;;  %3236 = vmatprep.subr.mxu1 %v1696_v48  ;;  %v2596_v47 = vcombine.high %v7490_v43, %v7490_v43  ;;  %v1797_v48 = vld [vmem:[%s9413_s8 + $0x1150] sm:$0xff] }
 0x376   :  { %3305 = vmatprep.subr.mxu0 %v1762_v49  ;;  %3237 = vmatpush1.msra.mxu1 %v1695_v50  ;;  %v1730_v49 = vld [vmem:[%s9413_s8 + $0xf38] sm:$0xff]  ;;  %v1796_v50 = vld [vmem:[%s9413_s8 + $0x1148] sm:$0xff]  ;;  %v1729_v43 = vld [vmem:[%s9413_s8 + $0xf30] sm:$0xff] }
 0x377   :  { %3306 = vmatpush1.msra.mxu0 %v1761_v51  ;;  %3238 = vmatprep.subr.mxu1 %v1694_v52  ;;  %v1795_v51 = vld [vmem:[%s9413_s8 + $0x1140] sm:$0xff]  ;;  %v1728_v52 = vld [vmem:[%s9413_s8 + $0xf28] sm:$0xff] }
 0x378   :  { %3307 = vmatprep.subr.mxu0 %v1760_v31  ;;  %3239 = vmatpush1.msra.mxu1 %v1693_v32  ;;  %v1794_v31 = vld [vmem:[%s9413_s8 + $0x1138] sm:$0xff]  ;;  %v1727_v32 = vld [vmem:[%s9413_s8 + $0xf20] sm:$0xff] }
 0x379   :  { %3308 = vmatpush1.msra.mxu0 %v1759_v54  ;;  %3240 = vmatprep.subr.mxu1 %v1692_v55  ;;  %v2610_v54 = vrot.slane %v2596_v47, %v6132_v53  ;;  %v7884_v55 = vld [vmem:[%s9405_s0 + $0x20] sm:$0xff] }
 0x37a   :  { %3309 = vmatprep.subr.mxu0 %v1758_v56  ;;  %3241 = vmatpush1.msra.mxu1 %v1691_v58  ;;  %v1793_v56 = vld [vmem:[%s9413_s8 + $0x1130] sm:$0xff]  ;;  %v1726_v58 = vld [vmem:[%s9413_s8 + $0xf18] sm:$0xff]  ;;  %v1831_v47 = vld [vmem:[%s9413_s8 + $0x1260] sm:$0xff] }
 0x37b   :  { %3310 = vmatpush1.msra.mxu0 %v1757_v59  ;;  %3242 = vmatprep.subr.mxu1 %v1754_v60  ;;  %v1792_v59 = vld [vmem:[%s9413_s8 + $0x1128] sm:$0xff]  ;;  %v1725_v60 = vld [vmem:[%s9413_s8 + $0xf10] sm:$0xff] }
 0x37c   :  { %3311 = vmatprep.subr.mxu0 %v1756_v61  ;;  %3243 = vmatpush2.msra.mxu1 %v1753_v62  ;;  %v1791_v61 = vld [vmem:[%s9413_s8 + $0x1120] sm:$0xff]  ;;  %v1724_v62 = vld [vmem:[%s9413_s8 + $0xf08] sm:$0xff] }
 0x37d   :  { %3312 = vmatpush1.msra.mxu0 %v1755_v63  ;;  %3244 = vmatprep.subr.mxu1 %v1752_v0  ;;  %v2620_v63 = vrot.slane %v7884_v55, %v6132_v53  ;;  %v1790_v0 = vld [vmem:[%s9413_s8 + $0x1118] sm:$0xff] }
 0x37e   :  { %3313 = vmatprep.subr.mxu0 %v1818_v2  ;;  %3245 = vmatpush2.msra.mxu1 %v1751_v3  ;;  %v1723_v2 = vld [vmem:[%s9413_s8 + $0xf00] sm:$0xff]  ;;  %v2612_v3 = vcombine.high %v2610_v54, %v2610_v54 }
 0x37f   :  { %3314 = vmatpush2.msra.mxu0 %v1817_v4  ;;  %3246 = vmatprep.subr.mxu1 %v1750_v11  ;;  %v1789_v4 = vld [vmem:[%s9413_s8 + $0x1110] sm:$0xff]  ;;  %v1788_v11 = vld [vmem:[%s9413_s8 + $0x1108] sm:$0xff] }
 0x380   :  { %3315 = vmatprep.subr.mxu0 %v1816_v12  ;;  %3247 = vmatpush2.msra.mxu1 %v1749_v28  ;;  %v1850_v12 = vld [vmem:[%s9413_s8 + $0x12f8] sm:$0xff]  ;;  %v1787_v28 = vld [vmem:[%s9413_s8 + $0x1100] sm:$0xff] }
 0x381   :  { %3316 = vmatpush2.msra.mxu0 %v1815_v13  ;;  %3248 = vmatprep.subr.mxu1 %v1748_v9  ;;  %v2628_v13 = vcombine.high %v2620_v63, %v2620_v63  ;;  %v1849_v9 = vld [vmem:[%s9413_s8 + $0x12f0] sm:$0xff] }
 0x382   :  { %3317 = vmatprep.subr.mxu0 %v1814_v14  ;;  %3249 = vmatpush2.msra.mxu1 %v1747_v15  ;;  %v1848_v14 = vld [vmem:[%s9413_s8 + $0x12e8] sm:$0xff]  ;;  %v1914_v15 = vld [vmem:[%s9413_s8 + $0x14f8] sm:$0xff] }
 0x383   :  { %3318 = vmatpush2.msra.mxu0 %v1813_v8  ;;  %3250 = vmatprep.subr.mxu1 %v1746_v27  ;;  %v1847_v8 = vld [vmem:[%s9413_s8 + $0x12e0] sm:$0xff]  ;;  %v1913_v27 = vld [vmem:[%s9413_s8 + $0x14f0] sm:$0xff] }
 0x384   :  { %3319 = vmatprep.subr.mxu0 %v1812_v16  ;;  %3251 = vmatpush2.msra.mxu1 %v1745_v18  ;;  %v1846_v16 = vld [vmem:[%s9413_s8 + $0x12d8] sm:$0xff]  ;;  %v1912_v18 = vld [vmem:[%s9413_s8 + $0x14e8] sm:$0xff] }
 0x385   :  { %3320 = vmatpush2.msra.mxu0 %v1811_v19  ;;  %3252 = vmatprep.subr.mxu1 %v1744_v57  ;;  %v1845_v19 = vld [vmem:[%s9413_s8 + $0x12d0] sm:$0xff]  ;;  %v1911_v57 = vld [vmem:[%s9413_s8 + $0x14e0] sm:$0xff] }
 0x386   :  { %3321 = vmatprep.subr.mxu0 %v1810_v20  ;;  %3253 = vmatpush2.msra.mxu1 %v1743_v21  ;;  %v1844_v20 = vld [vmem:[%s9413_s8 + $0x12c8] sm:$0xff]  ;;  %v1910_v21 = vld [vmem:[%s9413_s8 + $0x14d8] sm:$0xff] }
 0x387   :  { %3322 = vmatpush2.msra.mxu0 %v1809_v23  ;;  %3254 = vmatprep.subr.mxu1 %v1742_v24  ;;  %v1843_v23 = vld [vmem:[%s9413_s8 + $0x12c0] sm:$0xff]  ;;  %v1909_v24 = vld [vmem:[%s9413_s8 + $0x14d0] sm:$0xff] }
 0x388   :  { %3323 = vmatprep.subr.mxu0 %v1808_v17  ;;  %3255 = vmatpush2.msra.mxu1 %v1741_v25  ;;  %v1842_v17 = vld [vmem:[%s9413_s8 + $0x12b8] sm:$0xff]  ;;  %v1908_v25 = vld [vmem:[%s9413_s8 + $0x14c8] sm:$0xff] }
 0x389   :  { %3324 = vmatpush2.msra.mxu0 %v1807_v26  ;;  %3256 = vmatprep.subr.mxu1 %v1740_v29  ;;  %v1841_v26 = vld [vmem:[%s9413_s8 + $0x12b0] sm:$0xff]  ;;  %v1907_v29 = vld [vmem:[%s9413_s8 + $0x14c0] sm:$0xff] }
 0x38a   :  { %3325 = vmatprep.subr.mxu0 %v1806_v33  ;;  %3257 = vmatpush2.msra.mxu1 %v1739_v34  ;;  %v1840_v33 = vld [vmem:[%s9413_s8 + $0x12a8] sm:$0xff]  ;;  %v1906_v34 = vld [vmem:[%s9413_s8 + $0x14b8] sm:$0xff] }
 0x38b   :  { %3326 = vmatpush2.msra.mxu0 %v1805_v35  ;;  %3258 = vmatprep.subr.mxu1 %v1738_v36  ;;  %v1839_v35 = vld [vmem:[%s9413_s8 + $0x12a0] sm:$0xff]  ;;  %v1905_v36 = vld [vmem:[%s9413_s8 + $0x14b0] sm:$0xff] }
 0x38c   :  { %3327 = vmatprep.subr.mxu0 %v1804_v1  ;;  %3259 = vmatpush2.msra.mxu1 %v1737_v10  ;;  %v1838_v1 = vld [vmem:[%s9413_s8 + $0x1298] sm:$0xff]  ;;  %v1904_v10 = vld [vmem:[%s9413_s8 + $0x14a8] sm:$0xff] }
 0x38d   :  { %3328 = vmatpush2.msra.mxu0 %v1803_v37  ;;  %3260 = vmatprep.subr.mxu1 %v1736_v38  ;;  %v1837_v37 = vld [vmem:[%s9413_s8 + $0x1290] sm:$0xff]  ;;  %v1903_v38 = vld [vmem:[%s9413_s8 + $0x14a0] sm:$0xff] }
 0x38e   :  { %3329 = vmatprep.subr.mxu0 %v1802_v39  ;;  %3261 = vmatpush2.msra.mxu1 %v1735_v5  ;;  %v1836_v39 = vld [vmem:[%s9413_s8 + $0x1288] sm:$0xff]  ;;  %v1902_v5 = vld [vmem:[%s9413_s8 + $0x1498] sm:$0xff] }
 0x38f   :  { %3330 = vmatpush2.msra.mxu0 %v1801_v40  ;;  %3262 = vmatprep.subr.mxu1 %v1734_v22  ;;  %v1835_v40 = vld [vmem:[%s9413_s8 + $0x1280] sm:$0xff]  ;;  %v1901_v22 = vld [vmem:[%s9413_s8 + $0x1490] sm:$0xff] }
 0x390   :  { %3331 = vmatprep.subr.mxu0 %v1800_v30  ;;  %3263 = vmatpush2.msra.mxu1 %v1733_v41  ;;  %v1834_v30 = vld [vmem:[%s9413_s8 + $0x1278] sm:$0xff]  ;;  %v1900_v41 = vld [vmem:[%s9413_s8 + $0x1488] sm:$0xff] }
 0x391   :  { %3332 = vmatpush2.msra.mxu0 %v1799_v42  ;;  %3264 = vmatprep.subr.mxu1 %v1732_v44  ;;  %v1833_v42 = vld [vmem:[%s9413_s8 + $0x1270] sm:$0xff]  ;;  %v1899_v44 = vld [vmem:[%s9413_s8 + $0x1480] sm:$0xff] }
 0x392   :  { %3333 = vmatprep.subr.mxu0 %v1798_v45  ;;  %3265 = vmatpush2.msra.mxu1 %v1731_v46  ;;  %v1832_v45 = vld [vmem:[%s9413_s8 + $0x1268] sm:$0xff]  ;;  %v1898_v46 = vld [vmem:[%s9413_s8 + $0x1478] sm:$0xff] }
 0x393   :  { %3334 = vmatpush2.msra.mxu0 %v1797_v48  ;;  %3266 = vmatprep.subr.mxu1 %v1730_v49  ;;  %v1897_v48 = vld [vmem:[%s9413_s8 + $0x1470] sm:$0xff]  ;;  %v1830_v49 = vld [vmem:[%s9413_s8 + $0x1258] sm:$0xff] }
 0x394   :  { %3335 = vmatprep.subr.mxu0 %v1796_v50  ;;  %3267 = vmatpush2.msra.mxu1 %v1729_v43  ;;  %v1896_v50 = vld [vmem:[%s9413_s8 + $0x1468] sm:$0xff]  ;;  %v1829_v43 = vld [vmem:[%s9413_s8 + $0x1250] sm:$0xff] }
 0x395   :  { %3336 = vmatpush2.msra.mxu0 %v1795_v51  ;;  %3268 = vmatprep.subr.mxu1 %v1728_v52  ;;  %v1895_v51 = vld [vmem:[%s9413_s8 + $0x1460] sm:$0xff]  ;;  %v1828_v52 = vld [vmem:[%s9413_s8 + $0x1248] sm:$0xff] }
 0x396   :  { %3337 = vmatprep.subr.mxu0 %v1794_v31  ;;  %3269 = vmatpush2.msra.mxu1 %v1727_v32  ;;  %v1894_v31 = vld [vmem:[%s9413_s8 + $0x1458] sm:$0xff]  ;;  %v1827_v32 = vld [vmem:[%s9413_s8 + $0x1240] sm:$0xff] }
 0x397   :  { %3338 = vmatpush2.msra.mxu0 %v1793_v56  ;;  %3270 = vmatprep.subr.mxu1 %v1726_v58  ;;  %v1826_v56 = vld [vmem:[%s9413_s8 + $0x1238] sm:$0xff]  ;;  %v1892_v58 = vld [vmem:[%s9413_s8 + $0x1448] sm:$0xff] }
 0x398   :  { %3339 = vmatprep.subr.mxu0 %v1792_v59  ;;  %3271 = vmatpush2.msra.mxu1 %v1725_v60  ;;  %v1825_v59 = vld [vmem:[%s9413_s8 + $0x1230] sm:$0xff]  ;;  %v1891_v60 = vld [vmem:[%s9413_s8 + $0x1440] sm:$0xff] }
 0x399   :  { %3340 = vmatpush2.msra.mxu0 %v1791_v61  ;;  %3272 = vmatprep.subr.mxu1 %v1724_v62  ;;  %v1824_v61 = vld [vmem:[%s9413_s8 + $0x1228] sm:$0xff]  ;;  %v1890_v62 = vld [vmem:[%s9413_s8 + $0x1438] sm:$0xff] }
 0x39a   :  { %3341 = vmatprep.subr.mxu0 %v1790_v0  ;;  %3273 = vmatpush2.msra.mxu1 %v1723_v2  ;;  %v1889_v0 = vld [vmem:[%s9413_s8 + $0x1430] sm:$0xff]  ;;  %v1822_v2 = vld [vmem:[%s9413_s8 + $0x1218] sm:$0xff] }
 0x39b   :  { %3274 = vmatprep.mubr.f32.mxu1 %v2612_v3  ;;  %3342 = vmatpush2.msra.mxu0 %v1789_v4  ;;  %v1888_v3 = vld [vmem:[%s9413_s8 + $0x1428] sm:$0xff]  ;;  %v1821_v4 = vld [vmem:[%s9413_s8 + $0x1210] sm:$0xff] }
 0x39c   :  { %3275 = vmatmul.mubr.f32.vlgmr.msra.gmra.mxu1 %v2610_v54  ;;  %3343 = vmatprep.subr.mxu0 %v1788_v11  ;;  %v1893_v54 = vld [vmem:[%s9413_s8 + $0x1450] sm:$0xff]  ;;  %v1887_v11 = vld [vmem:[%s9413_s8 + $0x1420] sm:$0xff] }
 0x39d   :  { %3352 = vmatprep.subr.mxu1 %v1850_v12  ;;  %3344 = vmatpush2.msra.mxu0 %v1787_v28  ;;  %v1820_v12 = vld [vmem:[%s9413_s8 + $0x1208] sm:$0xff]  ;;  %v1886_v28 = vld [vmem:[%s9413_s8 + $0x1418] sm:$0xff] }
 0x39e   :  { %3345 = vmatprep.mubr.f32.mxu0 %v2628_v13  ;;  %3353 = vmatpush1.msra.mxu1 %v1849_v9  ;;  %v1819_v13 = vld [vmem:[%s9413_s8 + $0x1200] sm:$0xff]  ;;  %v1885_v9 = vld [vmem:[%s9413_s8 + $0x1410] sm:$0xff] }
 0x39f   :  { %3346 = vmatmul.mubr.f32.vlgmr.msra.gmra.mxu0 %v2620_v63  ;;  %3354 = vmatprep.subr.mxu1 %v1848_v14  ;;  %v1823_v63 = vld [vmem:[%s9413_s8 + $0x1220] sm:$0xff]  ;;  %v1882_v14 = vld [vmem:[%s9413_s8 + $0x13f8] sm:$0xff] }
 0x3a0   :  { %3423 = vmatprep.subr.mxu0 %v1914_v15  ;;  %3355 = vmatpush1.msra.mxu1 %v1847_v8  ;;  %v1884_v15 = vld [vmem:[%s9413_s8 + $0x1408] sm:$0xff]  ;;  %v1881_v8 = vld [vmem:[%s9413_s8 + $0x13f0] sm:$0xff] }
 0x3a1   :  { %3424 = vmatpush1.msra.mxu0 %v1913_v27  ;;  %3356 = vmatprep.subr.mxu1 %v1846_v16  ;;  %v1883_v27 = vld [vmem:[%s9413_s8 + $0x1400] sm:$0xff]  ;;  %v1880_v16 = vld [vmem:[%s9413_s8 + $0x13e8] sm:$0xff] }
 0x3a2   :  { %3425 = vmatprep.subr.mxu0 %v1912_v18  ;;  %3357 = vmatpush1.msra.mxu1 %v1845_v19  ;;  %v1946_v18 = vld [vmem:[%s9413_s8 + $0x15f8] sm:$0xff]  ;;  %v1879_v19 = vld [vmem:[%s9413_s8 + $0x13e0] sm:$0xff] }
 0x3a3   :  { %3426 = vmatpush1.msra.mxu0 %v1911_v57  ;;  %3358 = vmatprep.subr.mxu1 %v1844_v20  ;;  %v1945_v57 = vld [vmem:[%s9413_s8 + $0x15f0] sm:$0xff]  ;;  %v1878_v20 = vld [vmem:[%s9413_s8 + $0x13d8] sm:$0xff] }
 0x3a4   :  { %3427 = vmatprep.subr.mxu0 %v1910_v21  ;;  %3359 = vmatpush1.msra.mxu1 %v1843_v23  ;;  %v1944_v21 = vld [vmem:[%s9413_s8 + $0x15e8] sm:$0xff]  ;;  %v1877_v23 = vld [vmem:[%s9413_s8 + $0x13d0] sm:$0xff] }
 0x3a5   :  { %3428 = vmatpush1.msra.mxu0 %v1909_v24  ;;  %3360 = vmatprep.subr.mxu1 %v1842_v17  ;;  %v1943_v24 = vld [vmem:[%s9413_s8 + $0x15e0] sm:$0xff]  ;;  %v1876_v17 = vld [vmem:[%s9413_s8 + $0x13c8] sm:$0xff] }
 0x3a6   :  { %3429 = vmatprep.subr.mxu0 %v1908_v25  ;;  %3361 = vmatpush1.msra.mxu1 %v1841_v26  ;;  %v1942_v25 = vld [vmem:[%s9413_s8 + $0x15d8] sm:$0xff]  ;;  %v1875_v26 = vld [vmem:[%s9413_s8 + $0x13c0] sm:$0xff] }
 0x3a7   :  { %3430 = vmatpush1.msra.mxu0 %v1907_v29  ;;  %3362 = vmatprep.subr.mxu1 %v1840_v33  ;;  %v1941_v29 = vld [vmem:[%s9413_s8 + $0x15d0] sm:$0xff]  ;;  %v1874_v33 = vld [vmem:[%s9413_s8 + $0x13b8] sm:$0xff] }
 0x3a8   :  { %3431 = vmatprep.subr.mxu0 %v1906_v34  ;;  %3363 = vmatpush1.msra.mxu1 %v1839_v35  ;;  %v1940_v34 = vld [vmem:[%s9413_s8 + $0x15c8] sm:$0xff]  ;;  %v1873_v35 = vld [vmem:[%s9413_s8 + $0x13b0] sm:$0xff] }
 0x3a9   :  { %3432 = vmatpush1.msra.mxu0 %v1905_v36  ;;  %3364 = vmatprep.subr.mxu1 %v1838_v1  ;;  %v1939_v36 = vld [vmem:[%s9413_s8 + $0x15c0] sm:$0xff]  ;;  %v1872_v1 = vld [vmem:[%s9413_s8 + $0x13a8] sm:$0xff] }
 0x3aa   :  { %3433 = vmatprep.subr.mxu0 %v1904_v10  ;;  %3365 = vmatpush1.msra.mxu1 %v1837_v37  ;;  %v1938_v10 = vld [vmem:[%s9413_s8 + $0x15b8] sm:$0xff]  ;;  %v1871_v37 = vld [vmem:[%s9413_s8 + $0x13a0] sm:$0xff] }
 0x3ab   :  { %3434 = vmatpush1.msra.mxu0 %v1903_v38  ;;  %3366 = vmatprep.subr.mxu1 %v1836_v39  ;;  %v1937_v38 = vld [vmem:[%s9413_s8 + $0x15b0] sm:$0xff]  ;;  %v1870_v39 = vld [vmem:[%s9413_s8 + $0x1398] sm:$0xff] }
 0x3ac   :  { %3435 = vmatprep.subr.mxu0 %v1902_v5  ;;  %3367 = vmatpush1.msra.mxu1 %v1835_v40  ;;  %v1936_v5 = vld [vmem:[%s9413_s8 + $0x15a8] sm:$0xff]  ;;  %v1869_v40 = vld [vmem:[%s9413_s8 + $0x1390] sm:$0xff] }
 0x3ad   :  { %3436 = vmatpush1.msra.mxu0 %v1901_v22  ;;  %3368 = vmatprep.subr.mxu1 %v1834_v30  ;;  %v1935_v22 = vld [vmem:[%s9413_s8 + $0x15a0] sm:$0xff]  ;;  %v1868_v30 = vld [vmem:[%s9413_s8 + $0x1388] sm:$0xff] }
 0x3ae   :  { %3437 = vmatprep.subr.mxu0 %v1900_v41  ;;  %3369 = vmatpush1.msra.mxu1 %v1833_v42  ;;  %v1934_v41 = vld [vmem:[%s9413_s8 + $0x1598] sm:$0xff]  ;;  %v1867_v42 = vld [vmem:[%s9413_s8 + $0x1380] sm:$0xff] }
 0x3af   :  { %3438 = vmatpush1.msra.mxu0 %v1899_v44  ;;  %3370 = vmatprep.subr.mxu1 %v1832_v45  ;;  %v1933_v44 = vld [vmem:[%s9413_s8 + $0x1590] sm:$0xff]  ;;  %v1866_v45 = vld [vmem:[%s9413_s8 + $0x1378] sm:$0xff] }
 0x3b0   :  { %3439 = vmatprep.subr.mxu0 %v1898_v46  ;;  %3371 = vmatpush1.msra.mxu1 %v1831_v47  ;;  %v1932_v46 = vld [vmem:[%s9413_s8 + $0x1588] sm:$0xff]  ;;  %v1865_v47 = vld [vmem:[%s9413_s8 + $0x1370] sm:$0xff] }
 0x3b1   :  { %3440 = vmatpush1.msra.mxu0 %v1897_v48  ;;  %3372 = vmatprep.subr.mxu1 %v1830_v49  ;;  %v1931_v48 = vld [vmem:[%s9413_s8 + $0x1580] sm:$0xff]  ;;  %v1864_v49 = vld [vmem:[%s9413_s8 + $0x1368] sm:$0xff] }
 0x3b2   :  { %3441 = vmatprep.subr.mxu0 %v1896_v50  ;;  %3373 = vmatpush1.msra.mxu1 %v1829_v43  ;;  %v1930_v50 = vld [vmem:[%s9413_s8 + $0x1578] sm:$0xff]  ;;  %v1863_v43 = vld [vmem:[%s9413_s8 + $0x1360] sm:$0xff] }
 0x3b3   :  { %3442 = vmatpush1.msra.mxu0 %v1895_v51  ;;  %3374 = vmatprep.subr.mxu1 %v1828_v52  ;;  %v1929_v51 = vld [vmem:[%s9413_s8 + $0x1570] sm:$0xff]  ;;  %v1862_v52 = vld [vmem:[%s9413_s8 + $0x1358] sm:$0xff] }
 0x3b4   :  { %3443 = vmatprep.subr.mxu0 %v1894_v31  ;;  %3375 = vmatpush1.msra.mxu1 %v1827_v32  ;;  %v1928_v31 = vld [vmem:[%s9413_s8 + $0x1568] sm:$0xff]  ;;  %v1861_v32 = vld [vmem:[%s9413_s8 + $0x1350] sm:$0xff] }
 0x3b5   :  { %3444 = vmatpush1.msra.mxu0 %v1893_v54  ;;  %3376 = vmatprep.subr.mxu1 %v1826_v56  ;;  %v1927_v54 = vld [vmem:[%s9413_s8 + $0x1560] sm:$0xff]  ;;  %v1860_v56 = vld [vmem:[%s9413_s8 + $0x1348] sm:$0xff] }
 0x3b6   :  { %3445 = vmatprep.subr.mxu0 %v1892_v58  ;;  %3377 = vmatpush1.msra.mxu1 %v1825_v59  ;;  %v1926_v58 = vld [vmem:[%s9413_s8 + $0x1558] sm:$0xff]  ;;  %v1859_v59 = vld [vmem:[%s9413_s8 + $0x1340] sm:$0xff] }
 0x3b7   :  { %3446 = vmatpush1.msra.mxu0 %v1891_v60  ;;  %3378 = vmatprep.subr.mxu1 %v1824_v61  ;;  %v2613_v60 = vcombine.high %v7884_v55, %v7884_v55  ;;  %v1925_v61 = vld [vmem:[%s9413_s8 + $0x1550] sm:$0xff] }
 0x3b8   :  { %3447 = vmatprep.subr.mxu0 %v1890_v62  ;;  %3379 = vmatpush1.msra.mxu1 %v1823_v63  ;;  %v1858_v62 = vld [vmem:[%s9413_s8 + $0x1338] sm:$0xff]  ;;  %v1924_v63 = vld [vmem:[%s9413_s8 + $0x1548] sm:$0xff]  ;;  %v1857_v55 = vld [vmem:[%s9413_s8 + $0x1330] sm:$0xff] }
 0x3b9   :  { %3448 = vmatpush1.msra.mxu0 %v1889_v0  ;;  %3380 = vmatprep.subr.mxu1 %v1822_v2  ;;  %v1923_v0 = vld [vmem:[%s9413_s8 + $0x1540] sm:$0xff]  ;;  %v1856_v2 = vld [vmem:[%s9413_s8 + $0x1328] sm:$0xff] }
 0x3ba   :  { %3449 = vmatprep.subr.mxu0 %v1888_v3  ;;  %3381 = vmatpush1.msra.mxu1 %v1821_v4  ;;  %v1922_v3 = vld [vmem:[%s9413_s8 + $0x1538] sm:$0xff]  ;;  %v1855_v4 = vld [vmem:[%s9413_s8 + $0x1320] sm:$0xff] }
 0x3bb   :  { %3450 = vmatpush1.msra.mxu0 %v1887_v11  ;;  %3382 = vmatprep.subr.mxu1 %v1820_v12  ;;  %v2627_v11 = vrot.slane %v2613_v60, %v6132_v53  ;;  %v8278_v12 = vld [vmem:[%s9405_s0 + $0x28] sm:$0xff]  ;;  %v1959_v60 = vld [vmem:[%s9413_s8 + $0x1660] sm:$0xff] }
 0x3bc   :  { %3451 = vmatprep.subr.mxu0 %v1886_v28  ;;  %3383 = vmatpush1.msra.mxu1 %v1819_v13  ;;  %v1921_v28 = vld [vmem:[%s9413_s8 + $0x1530] sm:$0xff]  ;;  %v1854_v13 = vld [vmem:[%s9413_s8 + $0x1318] sm:$0xff] }
 0x3bd   :  { %3452 = vmatpush1.msra.mxu0 %v1885_v9  ;;  %3384 = vmatprep.subr.mxu1 %v1882_v14  ;;  %v1920_v9 = vld [vmem:[%s9413_s8 + $0x1528] sm:$0xff]  ;;  %v1853_v14 = vld [vmem:[%s9413_s8 + $0x1310] sm:$0xff] }
 0x3be   :  { %3453 = vmatprep.subr.mxu0 %v1884_v15  ;;  %3385 = vmatpush2.msra.mxu1 %v1881_v8  ;;  %v1919_v15 = vld [vmem:[%s9413_s8 + $0x1520] sm:$0xff]  ;;  %v1852_v8 = vld [vmem:[%s9413_s8 + $0x1308] sm:$0xff] }
 0x3bf   :  { %3454 = vmatpush1.msra.mxu0 %v1883_v27  ;;  %3386 = vmatprep.subr.mxu1 %v1880_v16  ;;  %v2637_v27 = vrot.slane %v8278_v12, %v6132_v53  ;;  %v1918_v16 = vld [vmem:[%s9413_s8 + $0x1518] sm:$0xff] }
 0x3c0   :  { %3455 = vmatprep.subr.mxu0 %v1946_v18  ;;  %3387 = vmatpush2.msra.mxu1 %v1879_v19  ;;  %v1851_v18 = vld [vmem:[%s9413_s8 + $0x1300] sm:$0xff]  ;;  %v2629_v19 = vcombine.high %v2627_v11, %v2627_v11 }
 0x3c1   :  { %3456 = vmatpush2.msra.mxu0 %v1945_v57  ;;  %3388 = vmatprep.subr.mxu1 %v1878_v20  ;;  %v1917_v57 = vld [vmem:[%s9413_s8 + $0x1510] sm:$0xff]  ;;  %v1916_v20 = vld [vmem:[%s9413_s8 + $0x1508] sm:$0xff] }
 0x3c2   :  { %3457 = vmatprep.subr.mxu0 %v1944_v21  ;;  %3389 = vmatpush2.msra.mxu1 %v1877_v23  ;;  %v1978_v21 = vld [vmem:[%s9413_s8 + $0x16f8] sm:$0xff]  ;;  %v1915_v23 = vld [vmem:[%s9413_s8 + $0x1500] sm:$0xff] }
 0x3c3   :  { %3458 = vmatpush2.msra.mxu0 %v1943_v24  ;;  %3390 = vmatprep.subr.mxu1 %v1876_v17  ;;  %v2645_v24 = vcombine.high %v2637_v27, %v2637_v27  ;;  %v1977_v17 = vld [vmem:[%s9413_s8 + $0x16f0] sm:$0xff] }
 0x3c4   :  { %3459 = vmatprep.subr.mxu0 %v1942_v25  ;;  %3391 = vmatpush2.msra.mxu1 %v1875_v26  ;;  %v1976_v25 = vld [vmem:[%s9413_s8 + $0x16e8] sm:$0xff]  ;;  %v2042_v26 = vld [vmem:[%s9413_s8 + $0x18f8] sm:$0xff] }
 0x3c5   :  { %3460 = vmatpush2.msra.mxu0 %v1941_v29  ;;  %3392 = vmatprep.subr.mxu1 %v1874_v33  ;;  %v1975_v29 = vld [vmem:[%s9413_s8 + $0x16e0] sm:$0xff]  ;;  %v2041_v33 = vld [vmem:[%s9413_s8 + $0x18f0] sm:$0xff] }
 0x3c6   :  { %3461 = vmatprep.subr.mxu0 %v1940_v34  ;;  %3393 = vmatpush2.msra.mxu1 %v1873_v35  ;;  %v1974_v34 = vld [vmem:[%s9413_s8 + $0x16d8] sm:$0xff]  ;;  %v2040_v35 = vld [vmem:[%s9413_s8 + $0x18e8] sm:$0xff] }
 0x3c7   :  { %3462 = vmatpush2.msra.mxu0 %v1939_v36  ;;  %3394 = vmatprep.subr.mxu1 %v1872_v1  ;;  %v1973_v36 = vld [vmem:[%s9413_s8 + $0x16d0] sm:$0xff]  ;;  %v2039_v1 = vld [vmem:[%s9413_s8 + $0x18e0] sm:$0xff] }
 0x3c8   :  { %3463 = vmatprep.subr.mxu0 %v1938_v10  ;;  %3395 = vmatpush2.msra.mxu1 %v1871_v37  ;;  %v1972_v10 = vld [vmem:[%s9413_s8 + $0x16c8] sm:$0xff]  ;;  %v2038_v37 = vld [vmem:[%s9413_s8 + $0x18d8] sm:$0xff] }
 0x3c9   :  { %3464 = vmatpush2.msra.mxu0 %v1937_v38  ;;  %3396 = vmatprep.subr.mxu1 %v1870_v39  ;;  %v1971_v38 = vld [vmem:[%s9413_s8 + $0x16c0] sm:$0xff]  ;;  %v2037_v39 = vld [vmem:[%s9413_s8 + $0x18d0] sm:$0xff] }
 0x3ca   :  { %3465 = vmatprep.subr.mxu0 %v1936_v5  ;;  %3397 = vmatpush2.msra.mxu1 %v1869_v40  ;;  %v1970_v5 = vld [vmem:[%s9413_s8 + $0x16b8] sm:$0xff]  ;;  %v2036_v40 = vld [vmem:[%s9413_s8 + $0x18c8] sm:$0xff] }
 0x3cb   :  { %3466 = vmatpush2.msra.mxu0 %v1935_v22  ;;  %3398 = vmatprep.subr.mxu1 %v1868_v30  ;;  %v1969_v22 = vld [vmem:[%s9413_s8 + $0x16b0] sm:$0xff]  ;;  %v2035_v30 = vld [vmem:[%s9413_s8 + $0x18c0] sm:$0xff] }
 0x3cc   :  { %3467 = vmatprep.subr.mxu0 %v1934_v41  ;;  %3399 = vmatpush2.msra.mxu1 %v1867_v42  ;;  %v1968_v41 = vld [vmem:[%s9413_s8 + $0x16a8] sm:$0xff]  ;;  %v2034_v42 = vld [vmem:[%s9413_s8 + $0x18b8] sm:$0xff] }
 0x3cd   :  { %3468 = vmatpush2.msra.mxu0 %v1933_v44  ;;  %3400 = vmatprep.subr.mxu1 %v1866_v45  ;;  %v1967_v44 = vld [vmem:[%s9413_s8 + $0x16a0] sm:$0xff]  ;;  %v2033_v45 = vld [vmem:[%s9413_s8 + $0x18b0] sm:$0xff] }
 0x3ce   :  { %3469 = vmatprep.subr.mxu0 %v1932_v46  ;;  %3401 = vmatpush2.msra.mxu1 %v1865_v47  ;;  %v1966_v46 = vld [vmem:[%s9413_s8 + $0x1698] sm:$0xff]  ;;  %v2032_v47 = vld [vmem:[%s9413_s8 + $0x18a8] sm:$0xff] }
 0x3cf   :  { %3470 = vmatpush2.msra.mxu0 %v1931_v48  ;;  %3402 = vmatprep.subr.mxu1 %v1864_v49  ;;  %v1965_v48 = vld [vmem:[%s9413_s8 + $0x1690] sm:$0xff]  ;;  %v2031_v49 = vld [vmem:[%s9413_s8 + $0x18a0] sm:$0xff] }
 0x3d0   :  { %3471 = vmatprep.subr.mxu0 %v1930_v50  ;;  %3403 = vmatpush2.msra.mxu1 %v1863_v43  ;;  %v1964_v50 = vld [vmem:[%s9413_s8 + $0x1688] sm:$0xff]  ;;  %v2030_v43 = vld [vmem:[%s9413_s8 + $0x1898] sm:$0xff] }
 0x3d1   :  { %3472 = vmatpush2.msra.mxu0 %v1929_v51  ;;  %3404 = vmatprep.subr.mxu1 %v1862_v52  ;;  %v1963_v51 = vld [vmem:[%s9413_s8 + $0x1680] sm:$0xff]  ;;  %v2029_v52 = vld [vmem:[%s9413_s8 + $0x1890] sm:$0xff] }
 0x3d2   :  { %3473 = vmatprep.subr.mxu0 %v1928_v31  ;;  %3405 = vmatpush2.msra.mxu1 %v1861_v32  ;;  %v1962_v31 = vld [vmem:[%s9413_s8 + $0x1678] sm:$0xff]  ;;  %v2028_v32 = vld [vmem:[%s9413_s8 + $0x1888] sm:$0xff] }
 0x3d3   :  { %3474 = vmatpush2.msra.mxu0 %v1927_v54  ;;  %3406 = vmatprep.subr.mxu1 %v1860_v56  ;;  %v1961_v54 = vld [vmem:[%s9413_s8 + $0x1670] sm:$0xff]  ;;  %v2027_v56 = vld [vmem:[%s9413_s8 + $0x1880] sm:$0xff] }
 0x3d4   :  { %3475 = vmatprep.subr.mxu0 %v1926_v58  ;;  %3407 = vmatpush2.msra.mxu1 %v1859_v59  ;;  %v1960_v58 = vld [vmem:[%s9413_s8 + $0x1668] sm:$0xff]  ;;  %v2026_v59 = vld [vmem:[%s9413_s8 + $0x1878] sm:$0xff] }
 0x3d5   :  { %3476 = vmatpush2.msra.mxu0 %v1925_v61  ;;  %3408 = vmatprep.subr.mxu1 %v1858_v62  ;;  %v2025_v61 = vld [vmem:[%s9413_s8 + $0x1870] sm:$0xff]  ;;  %v1958_v62 = vld [vmem:[%s9413_s8 + $0x1658] sm:$0xff] }
 0x3d6   :  { %3477 = vmatprep.subr.mxu0 %v1924_v63  ;;  %3409 = vmatpush2.msra.mxu1 %v1857_v55  ;;  %v2024_v63 = vld [vmem:[%s9413_s8 + $0x1868] sm:$0xff]  ;;  %v1957_v55 = vld [vmem:[%s9413_s8 + $0x1650] sm:$0xff] }
 0x3d7   :  { %3478 = vmatpush2.msra.mxu0 %v1923_v0  ;;  %3410 = vmatprep.subr.mxu1 %v1856_v2  ;;  %v2023_v0 = vld [vmem:[%s9413_s8 + $0x1860] sm:$0xff]  ;;  %v1956_v2 = vld [vmem:[%s9413_s8 + $0x1648] sm:$0xff] }
 0x3d8   :  { %3479 = vmatprep.subr.mxu0 %v1922_v3  ;;  %3411 = vmatpush2.msra.mxu1 %v1855_v4  ;;  %v2022_v3 = vld [vmem:[%s9413_s8 + $0x1858] sm:$0xff]  ;;  %v1955_v4 = vld [vmem:[%s9413_s8 + $0x1640] sm:$0xff] }
 0x3d9   :  { %3480 = vmatpush2.msra.mxu0 %v1921_v28  ;;  %3412 = vmatprep.subr.mxu1 %v1854_v13  ;;  %v1954_v28 = vld [vmem:[%s9413_s8 + $0x1638] sm:$0xff]  ;;  %v2020_v13 = vld [vmem:[%s9413_s8 + $0x1848] sm:$0xff] }
 0x3da   :  { %3481 = vmatprep.subr.mxu0 %v1920_v9  ;;  %3413 = vmatpush2.msra.mxu1 %v1853_v14  ;;  %v1953_v9 = vld [vmem:[%s9413_s8 + $0x1630] sm:$0xff]  ;;  %v2019_v14 = vld [vmem:[%s9413_s8 + $0x1840] sm:$0xff] }
 0x3db   :  { %3482 = vmatpush2.msra.mxu0 %v1919_v15  ;;  %3414 = vmatprep.subr.mxu1 %v1852_v8  ;;  %v1952_v15 = vld [vmem:[%s9413_s8 + $0x1628] sm:$0xff]  ;;  %v2018_v8 = vld [vmem:[%s9413_s8 + $0x1838] sm:$0xff] }
 0x3dc   :  { %3483 = vmatprep.subr.mxu0 %v1918_v16  ;;  %3415 = vmatpush2.msra.mxu1 %v1851_v18  ;;  %v2017_v16 = vld [vmem:[%s9413_s8 + $0x1830] sm:$0xff]  ;;  %v1950_v18 = vld [vmem:[%s9413_s8 + $0x1618] sm:$0xff] }
 0x3dd   :  { %3416 = vmatprep.mubr.f32.mxu1 %v2629_v19  ;;  %3484 = vmatpush2.msra.mxu0 %v1917_v57  ;;  %v2016_v19 = vld [vmem:[%s9413_s8 + $0x1828] sm:$0xff]  ;;  %v1949_v57 = vld [vmem:[%s9413_s8 + $0x1610] sm:$0xff] }
 0x3de   :  { %3417 = vmatmul.mubr.f32.vlgmr.msra.gmra.mxu1 %v2627_v11  ;;  %3485 = vmatprep.subr.mxu0 %v1916_v20  ;;  %v2021_v11 = vld [vmem:[%s9413_s8 + $0x1850] sm:$0xff]  ;;  %v2015_v20 = vld [vmem:[%s9413_s8 + $0x1820] sm:$0xff] }
 0x3df   :  { %3494 = vmatprep.subr.mxu1 %v1978_v21  ;;  %3486 = vmatpush2.msra.mxu0 %v1915_v23  ;;  %v1948_v21 = vld [vmem:[%s9413_s8 + $0x1608] sm:$0xff]  ;;  %v2014_v23 = vld [vmem:[%s9413_s8 + $0x1818] sm:$0xff] }
 0x3e0   :  { %3487 = vmatprep.mubr.f32.mxu0 %v2645_v24  ;;  %3495 = vmatpush1.msra.mxu1 %v1977_v17  ;;  %v1947_v24 = vld [vmem:[%s9413_s8 + $0x1600] sm:$0xff]  ;;  %v2013_v17 = vld [vmem:[%s9413_s8 + $0x1810] sm:$0xff] }
 0x3e1   :  { %3488 = vmatmul.mubr.f32.vlgmr.msra.gmra.mxu0 %v2637_v27  ;;  %3496 = vmatprep.subr.mxu1 %v1976_v25  ;;  %v1951_v27 = vld [vmem:[%s9413_s8 + $0x1620] sm:$0xff]  ;;  %v2010_v25 = vld [vmem:[%s9413_s8 + $0x17f8] sm:$0xff] }
 0x3e2   :  { %3565 = vmatprep.subr.mxu0 %v2042_v26  ;;  %3497 = vmatpush1.msra.mxu1 %v1975_v29  ;;  %v2012_v26 = vld [vmem:[%s9413_s8 + $0x1808] sm:$0xff]  ;;  %v2009_v29 = vld [vmem:[%s9413_s8 + $0x17f0] sm:$0xff] }
 0x3e3   :  { %3566 = vmatpush1.msra.mxu0 %v2041_v33  ;;  %3498 = vmatprep.subr.mxu1 %v1974_v34  ;;  %v2011_v33 = vld [vmem:[%s9413_s8 + $0x1800] sm:$0xff]  ;;  %v2008_v34 = vld [vmem:[%s9413_s8 + $0x17e8] sm:$0xff] }
 0x3e4   :  { %3567 = vmatprep.subr.mxu0 %v2040_v35  ;;  %3499 = vmatpush1.msra.mxu1 %v1973_v36  ;;  %v2074_v35 = vld [vmem:[%s9413_s8 + $0x19f8] sm:$0xff]  ;;  %v2007_v36 = vld [vmem:[%s9413_s8 + $0x17e0] sm:$0xff] }
 0x3e5   :  { %3568 = vmatpush1.msra.mxu0 %v2039_v1  ;;  %3500 = vmatprep.subr.mxu1 %v1972_v10  ;;  %v2073_v1 = vld [vmem:[%s9413_s8 + $0x19f0] sm:$0xff]  ;;  %v2006_v10 = vld [vmem:[%s9413_s8 + $0x17d8] sm:$0xff] }
 0x3e6   :  { %3569 = vmatprep.subr.mxu0 %v2038_v37  ;;  %3501 = vmatpush1.msra.mxu1 %v1971_v38  ;;  %v2072_v37 = vld [vmem:[%s9413_s8 + $0x19e8] sm:$0xff]  ;;  %v2005_v38 = vld [vmem:[%s9413_s8 + $0x17d0] sm:$0xff] }
 0x3e7   :  { %3570 = vmatpush1.msra.mxu0 %v2037_v39  ;;  %3502 = vmatprep.subr.mxu1 %v1970_v5  ;;  %v2071_v39 = vld [vmem:[%s9413_s8 + $0x19e0] sm:$0xff]  ;;  %v2004_v5 = vld [vmem:[%s9413_s8 + $0x17c8] sm:$0xff] }
 0x3e8   :  { %3571 = vmatprep.subr.mxu0 %v2036_v40  ;;  %3503 = vmatpush1.msra.mxu1 %v1969_v22  ;;  %v2070_v40 = vld [vmem:[%s9413_s8 + $0x19d8] sm:$0xff]  ;;  %v2003_v22 = vld [vmem:[%s9413_s8 + $0x17c0] sm:$0xff] }
 0x3e9   :  { %3572 = vmatpush1.msra.mxu0 %v2035_v30  ;;  %3504 = vmatprep.subr.mxu1 %v1968_v41  ;;  %v2069_v30 = vld [vmem:[%s9413_s8 + $0x19d0] sm:$0xff]  ;;  %v2002_v41 = vld [vmem:[%s9413_s8 + $0x17b8] sm:$0xff] }
 0x3ea   :  { %3573 = vmatprep.subr.mxu0 %v2034_v42  ;;  %3505 = vmatpush1.msra.mxu1 %v1967_v44  ;;  %v2068_v42 = vld [vmem:[%s9413_s8 + $0x19c8] sm:$0xff]  ;;  %v2001_v44 = vld [vmem:[%s9413_s8 + $0x17b0] sm:$0xff] }
 0x3eb   :  { %3574 = vmatpush1.msra.mxu0 %v2033_v45  ;;  %3506 = vmatprep.subr.mxu1 %v1966_v46  ;;  %v2067_v45 = vld [vmem:[%s9413_s8 + $0x19c0] sm:$0xff]  ;;  %v2000_v46 = vld [vmem:[%s9413_s8 + $0x17a8] sm:$0xff] }
 0x3ec   :  { %3575 = vmatprep.subr.mxu0 %v2032_v47  ;;  %3507 = vmatpush1.msra.mxu1 %v1965_v48  ;;  %v2066_v47 = vld [vmem:[%s9413_s8 + $0x19b8] sm:$0xff]  ;;  %v1999_v48 = vld [vmem:[%s9413_s8 + $0x17a0] sm:$0xff] }
 0x3ed   :  { %3576 = vmatpush1.msra.mxu0 %v2031_v49  ;;  %3508 = vmatprep.subr.mxu1 %v1964_v50  ;;  %v2065_v49 = vld [vmem:[%s9413_s8 + $0x19b0] sm:$0xff]  ;;  %v1998_v50 = vld [vmem:[%s9413_s8 + $0x1798] sm:$0xff] }
 0x3ee   :  { %3577 = vmatprep.subr.mxu0 %v2030_v43  ;;  %3509 = vmatpush1.msra.mxu1 %v1963_v51  ;;  %v2064_v43 = vld [vmem:[%s9413_s8 + $0x19a8] sm:$0xff]  ;;  %v1997_v51 = vld [vmem:[%s9413_s8 + $0x1790] sm:$0xff] }
 0x3ef   :  { %3578 = vmatpush1.msra.mxu0 %v2029_v52  ;;  %3510 = vmatprep.subr.mxu1 %v1962_v31  ;;  %v2063_v52 = vld [vmem:[%s9413_s8 + $0x19a0] sm:$0xff]  ;;  %v1996_v31 = vld [vmem:[%s9413_s8 + $0x1788] sm:$0xff] }
 0x3f0   :  { %3579 = vmatprep.subr.mxu0 %v2028_v32  ;;  %3511 = vmatpush1.msra.mxu1 %v1961_v54  ;;  %v2062_v32 = vld [vmem:[%s9413_s8 + $0x1998] sm:$0xff]  ;;  %v1995_v54 = vld [vmem:[%s9413_s8 + $0x1780] sm:$0xff] }
 0x3f1   :  { %3580 = vmatpush1.msra.mxu0 %v2027_v56  ;;  %3512 = vmatprep.subr.mxu1 %v1960_v58  ;;  %v2061_v56 = vld [vmem:[%s9413_s8 + $0x1990] sm:$0xff]  ;;  %v1994_v58 = vld [vmem:[%s9413_s8 + $0x1778] sm:$0xff] }
 0x3f2   :  { %3581 = vmatprep.subr.mxu0 %v2026_v59  ;;  %3513 = vmatpush1.msra.mxu1 %v1959_v60  ;;  %v2060_v59 = vld [vmem:[%s9413_s8 + $0x1988] sm:$0xff]  ;;  %v1993_v60 = vld [vmem:[%s9413_s8 + $0x1770] sm:$0xff] }
 0x3f3   :  { %3582 = vmatpush1.msra.mxu0 %v2025_v61  ;;  %3514 = vmatprep.subr.mxu1 %v1958_v62  ;;  %v2059_v61 = vld [vmem:[%s9413_s8 + $0x1980] sm:$0xff]  ;;  %v1992_v62 = vld [vmem:[%s9413_s8 + $0x1768] sm:$0xff] }
 0x3f4   :  { %3583 = vmatprep.subr.mxu0 %v2024_v63  ;;  %3515 = vmatpush1.msra.mxu1 %v1957_v55  ;;  %v2058_v63 = vld [vmem:[%s9413_s8 + $0x1978] sm:$0xff]  ;;  %v1991_v55 = vld [vmem:[%s9413_s8 + $0x1760] sm:$0xff] }
 0x3f5   :  { %3584 = vmatpush1.msra.mxu0 %v2023_v0  ;;  %3516 = vmatprep.subr.mxu1 %v1956_v2  ;;  %v2057_v0 = vld [vmem:[%s9413_s8 + $0x1970] sm:$0xff]  ;;  %v1990_v2 = vld [vmem:[%s9413_s8 + $0x1758] sm:$0xff] }
 0x3f6   :  { %3585 = vmatprep.subr.mxu0 %v2022_v3  ;;  %3517 = vmatpush1.msra.mxu1 %v1955_v4  ;;  %v2056_v3 = vld [vmem:[%s9413_s8 + $0x1968] sm:$0xff]  ;;  %v1989_v4 = vld [vmem:[%s9413_s8 + $0x1750] sm:$0xff] }
 0x3f7   :  { %3586 = vmatpush1.msra.mxu0 %v2021_v11  ;;  %3518 = vmatprep.subr.mxu1 %v1954_v28  ;;  %v2055_v11 = vld [vmem:[%s9413_s8 + $0x1960] sm:$0xff]  ;;  %v1988_v28 = vld [vmem:[%s9413_s8 + $0x1748] sm:$0xff] }
 0x3f8   :  { %3587 = vmatprep.subr.mxu0 %v2020_v13  ;;  %3519 = vmatpush1.msra.mxu1 %v1953_v9  ;;  %v2054_v13 = vld [vmem:[%s9413_s8 + $0x1958] sm:$0xff]  ;;  %v1987_v9 = vld [vmem:[%s9413_s8 + $0x1740] sm:$0xff] }
 0x3f9   :  { %3588 = vmatpush1.msra.mxu0 %v2019_v14  ;;  %3520 = vmatprep.subr.mxu1 %v1952_v15  ;;  %v2630_v14 = vcombine.high %v8278_v12, %v8278_v12  ;;  %v2053_v15 = vld [vmem:[%s9413_s8 + $0x1950] sm:$0xff] }
 0x3fa   :  { %3589 = vmatprep.subr.mxu0 %v2018_v8  ;;  %3521 = vmatpush1.msra.mxu1 %v1951_v27  ;;  %v1986_v8 = vld [vmem:[%s9413_s8 + $0x1738] sm:$0xff]  ;;  %v2052_v27 = vld [vmem:[%s9413_s8 + $0x1948] sm:$0xff]  ;;  %v1985_v12 = vld [vmem:[%s9413_s8 + $0x1730] sm:$0xff] }
 0x3fb   :  { %3590 = vmatpush1.msra.mxu0 %v2017_v16  ;;  %3522 = vmatprep.subr.mxu1 %v1950_v18  ;;  %v2051_v16 = vld [vmem:[%s9413_s8 + $0x1940] sm:$0xff]  ;;  %v1984_v18 = vld [vmem:[%s9413_s8 + $0x1728] sm:$0xff] }
 0x3fc   :  { %3591 = vmatprep.subr.mxu0 %v2016_v19  ;;  %3523 = vmatpush1.msra.mxu1 %v1949_v57  ;;  %v2050_v19 = vld [vmem:[%s9413_s8 + $0x1938] sm:$0xff]  ;;  %v1983_v57 = vld [vmem:[%s9413_s8 + $0x1720] sm:$0xff] }
 0x3fd   :  { %3592 = vmatpush1.msra.mxu0 %v2015_v20  ;;  %3524 = vmatprep.subr.mxu1 %v1948_v21  ;;  %v2644_v20 = vrot.slane %v2630_v14, %v6132_v53  ;;  %v8672_v21 = vld [vmem:[%s9405_s0 + $0x30] sm:$0xff]  ;;  %v2087_v14 = vld [vmem:[%s9413_s8 + $0x1a60] sm:$0xff] }
 0x3fe   :  { %3593 = vmatprep.subr.mxu0 %v2014_v23  ;;  %3525 = vmatpush1.msra.mxu1 %v1947_v24  ;;  %v2049_v23 = vld [vmem:[%s9413_s8 + $0x1930] sm:$0xff]  ;;  %v1982_v24 = vld [vmem:[%s9413_s8 + $0x1718] sm:$0xff] }
 0x3ff   :  { %3594 = vmatpush1.msra.mxu0 %v2013_v17  ;;  %3526 = vmatprep.subr.mxu1 %v2010_v25  ;;  %v2048_v17 = vld [vmem:[%s9413_s8 + $0x1928] sm:$0xff]  ;;  %v1981_v25 = vld [vmem:[%s9413_s8 + $0x1710] sm:$0xff] }
 0x400   :  { %3595 = vmatprep.subr.mxu0 %v2012_v26  ;;  %3527 = vmatpush2.msra.mxu1 %v2009_v29  ;;  %v2047_v26 = vld [vmem:[%s9413_s8 + $0x1920] sm:$0xff]  ;;  %v1980_v29 = vld [vmem:[%s9413_s8 + $0x1708] sm:$0xff] }
 0x401   :  { %3596 = vmatpush1.msra.mxu0 %v2011_v33  ;;  %3528 = vmatprep.subr.mxu1 %v2008_v34  ;;  %v2654_v33 = vrot.slane %v8672_v21, %v6132_v53  ;;  %v2046_v34 = vld [vmem:[%s9413_s8 + $0x1918] sm:$0xff] }
 0x402   :  { %3597 = vmatprep.subr.mxu0 %v2074_v35  ;;  %3529 = vmatpush2.msra.mxu1 %v2007_v36  ;;  %v1979_v35 = vld [vmem:[%s9413_s8 + $0x1700] sm:$0xff]  ;;  %v2646_v36 = vcombine.high %v2644_v20, %v2644_v20 }
 0x403   :  { %3598 = vmatpush2.msra.mxu0 %v2073_v1  ;;  %3530 = vmatprep.subr.mxu1 %v2006_v10  ;;  %v2045_v1 = vld [vmem:[%s9413_s8 + $0x1910] sm:$0xff]  ;;  %v2044_v10 = vld [vmem:[%s9413_s8 + $0x1908] sm:$0xff] }
 0x404   :  { %3599 = vmatprep.subr.mxu0 %v2072_v37  ;;  %3531 = vmatpush2.msra.mxu1 %v2005_v38  ;;  %v2106_v37 = vld [vmem:[%s9413_s8 + $0x1af8] sm:$0xff]  ;;  %v2043_v38 = vld [vmem:[%s9413_s8 + $0x1900] sm:$0xff] }
 0x405   :  { %3600 = vmatpush2.msra.mxu0 %v2071_v39  ;;  %3532 = vmatprep.subr.mxu1 %v2004_v5  ;;  %v2662_v39 = vcombine.high %v2654_v33, %v2654_v33  ;;  %v2105_v5 = vld [vmem:[%s9413_s8 + $0x1af0] sm:$0xff] }
 0x406   :  { %3601 = vmatprep.subr.mxu0 %v2070_v40  ;;  %3533 = vmatpush2.msra.mxu1 %v2003_v22  ;;  %v2104_v40 = vld [vmem:[%s9413_s8 + $0x1ae8] sm:$0xff]  ;;  %v2170_v22 = vld [vmem:[%s9413_s8 + $0x1cf8] sm:$0xff] }
 0x407   :  { %3602 = vmatpush2.msra.mxu0 %v2069_v30  ;;  %3534 = vmatprep.subr.mxu1 %v2002_v41  ;;  %v2103_v30 = vld [vmem:[%s9413_s8 + $0x1ae0] sm:$0xff]  ;;  %v2169_v41 = vld [vmem:[%s9413_s8 + $0x1cf0] sm:$0xff] }
 0x408   :  { %3603 = vmatprep.subr.mxu0 %v2068_v42  ;;  %3535 = vmatpush2.msra.mxu1 %v2001_v44  ;;  %v2102_v42 = vld [vmem:[%s9413_s8 + $0x1ad8] sm:$0xff]  ;;  %v2168_v44 = vld [vmem:[%s9413_s8 + $0x1ce8] sm:$0xff] }
 0x409   :  { %3604 = vmatpush2.msra.mxu0 %v2067_v45  ;;  %3536 = vmatprep.subr.mxu1 %v2000_v46  ;;  %v2101_v45 = vld [vmem:[%s9413_s8 + $0x1ad0] sm:$0xff]  ;;  %v2167_v46 = vld [vmem:[%s9413_s8 + $0x1ce0] sm:$0xff] }
 0x40a   :  { %3605 = vmatprep.subr.mxu0 %v2066_v47  ;;  %3537 = vmatpush2.msra.mxu1 %v1999_v48  ;;  %v2100_v47 = vld [vmem:[%s9413_s8 + $0x1ac8] sm:$0xff]  ;;  %v2166_v48 = vld [vmem:[%s9413_s8 + $0x1cd8] sm:$0xff] }
 0x40b   :  { %3606 = vmatpush2.msra.mxu0 %v2065_v49  ;;  %3538 = vmatprep.subr.mxu1 %v1998_v50  ;;  %v2099_v49 = vld [vmem:[%s9413_s8 + $0x1ac0] sm:$0xff]  ;;  %v2165_v50 = vld [vmem:[%s9413_s8 + $0x1cd0] sm:$0xff] }
 0x40c   :  { %3607 = vmatprep.subr.mxu0 %v2064_v43  ;;  %3539 = vmatpush2.msra.mxu1 %v1997_v51  ;;  %v2098_v43 = vld [vmem:[%s9413_s8 + $0x1ab8] sm:$0xff]  ;;  %v2164_v51 = vld [vmem:[%s9413_s8 + $0x1cc8] sm:$0xff] }
 0x40d   :  { %3608 = vmatpush2.msra.mxu0 %v2063_v52  ;;  %3540 = vmatprep.subr.mxu1 %v1996_v31  ;;  %v2097_v52 = vld [vmem:[%s9413_s8 + $0x1ab0] sm:$0xff]  ;;  %v2163_v31 = vld [vmem:[%s9413_s8 + $0x1cc0] sm:$0xff] }
 0x40e   :  { %3609 = vmatprep.subr.mxu0 %v2062_v32  ;;  %3541 = vmatpush2.msra.mxu1 %v1995_v54  ;;  %v2096_v32 = vld [vmem:[%s9413_s8 + $0x1aa8] sm:$0xff]  ;;  %v2162_v54 = vld [vmem:[%s9413_s8 + $0x1cb8] sm:$0xff] }
 0x40f   :  { %3610 = vmatpush2.msra.mxu0 %v2061_v56  ;;  %3542 = vmatprep.subr.mxu1 %v1994_v58  ;;  %v2095_v56 = vld [vmem:[%s9413_s8 + $0x1aa0] sm:$0xff]  ;;  %v2161_v58 = vld [vmem:[%s9413_s8 + $0x1cb0] sm:$0xff] }
 0x410   :  { %3611 = vmatprep.subr.mxu0 %v2060_v59  ;;  %3543 = vmatpush2.msra.mxu1 %v1993_v60  ;;  %v2094_v59 = vld [vmem:[%s9413_s8 + $0x1a98] sm:$0xff]  ;;  %v2160_v60 = vld [vmem:[%s9413_s8 + $0x1ca8] sm:$0xff] }
 0x411   :  { %3612 = vmatpush2.msra.mxu0 %v2059_v61  ;;  %3544 = vmatprep.subr.mxu1 %v1992_v62  ;;  %v2093_v61 = vld [vmem:[%s9413_s8 + $0x1a90] sm:$0xff]  ;;  %v2159_v62 = vld [vmem:[%s9413_s8 + $0x1ca0] sm:$0xff] }
 0x412   :  { %3613 = vmatprep.subr.mxu0 %v2058_v63  ;;  %3545 = vmatpush2.msra.mxu1 %v1991_v55  ;;  %v2092_v63 = vld [vmem:[%s9413_s8 + $0x1a88] sm:$0xff]  ;;  %v2158_v55 = vld [vmem:[%s9413_s8 + $0x1c98] sm:$0xff] }
 0x413   :  { %3614 = vmatpush2.msra.mxu0 %v2057_v0  ;;  %3546 = vmatprep.subr.mxu1 %v1990_v2  ;;  %v2091_v0 = vld [vmem:[%s9413_s8 + $0x1a80] sm:$0xff]  ;;  %v2157_v2 = vld [vmem:[%s9413_s8 + $0x1c90] sm:$0xff] }
 0x414   :  { %3615 = vmatprep.subr.mxu0 %v2056_v3  ;;  %3547 = vmatpush2.msra.mxu1 %v1989_v4  ;;  %v2090_v3 = vld [vmem:[%s9413_s8 + $0x1a78] sm:$0xff]  ;;  %v2156_v4 = vld [vmem:[%s9413_s8 + $0x1c88] sm:$0xff] }
 0x415   :  { %3616 = vmatpush2.msra.mxu0 %v2055_v11  ;;  %3548 = vmatprep.subr.mxu1 %v1988_v28  ;;  %v2089_v11 = vld [vmem:[%s9413_s8 + $0x1a70] sm:$0xff]  ;;  %v2155_v28 = vld [vmem:[%s9413_s8 + $0x1c80] sm:$0xff] }
 0x416   :  { %3617 = vmatprep.subr.mxu0 %v2054_v13  ;;  %3549 = vmatpush2.msra.mxu1 %v1987_v9  ;;  %v2088_v13 = vld [vmem:[%s9413_s8 + $0x1a68] sm:$0xff]  ;;  %v2154_v9 = vld [vmem:[%s9413_s8 + $0x1c78] sm:$0xff] }
 0x417   :  { %3618 = vmatpush2.msra.mxu0 %v2053_v15  ;;  %3550 = vmatprep.subr.mxu1 %v1986_v8  ;;  %v2153_v15 = vld [vmem:[%s9413_s8 + $0x1c70] sm:$0xff]  ;;  %v2086_v8 = vld [vmem:[%s9413_s8 + $0x1a58] sm:$0xff] }
 0x418   :  { %3619 = vmatprep.subr.mxu0 %v2052_v27  ;;  %3551 = vmatpush2.msra.mxu1 %v1985_v12  ;;  %v2152_v27 = vld [vmem:[%s9413_s8 + $0x1c68] sm:$0xff]  ;;  %v2085_v12 = vld [vmem:[%s9413_s8 + $0x1a50] sm:$0xff] }
 0x419   :  { %3620 = vmatpush2.msra.mxu0 %v2051_v16  ;;  %3552 = vmatprep.subr.mxu1 %v1984_v18  ;;  %v2151_v16 = vld [vmem:[%s9413_s8 + $0x1c60] sm:$0xff]  ;;  %v2084_v18 = vld [vmem:[%s9413_s8 + $0x1a48] sm:$0xff] }
 0x41a   :  { %3621 = vmatprep.subr.mxu0 %v2050_v19  ;;  %3553 = vmatpush2.msra.mxu1 %v1983_v57  ;;  %v2150_v19 = vld [vmem:[%s9413_s8 + $0x1c58] sm:$0xff]  ;;  %v2083_v57 = vld [vmem:[%s9413_s8 + $0x1a40] sm:$0xff] }
 0x41b   :  { %3622 = vmatpush2.msra.mxu0 %v2049_v23  ;;  %3554 = vmatprep.subr.mxu1 %v1982_v24  ;;  %v2082_v23 = vld [vmem:[%s9413_s8 + $0x1a38] sm:$0xff]  ;;  %v2148_v24 = vld [vmem:[%s9413_s8 + $0x1c48] sm:$0xff] }
 0x41c   :  { %3623 = vmatprep.subr.mxu0 %v2048_v17  ;;  %3555 = vmatpush2.msra.mxu1 %v1981_v25  ;;  %v2081_v17 = vld [vmem:[%s9413_s8 + $0x1a30] sm:$0xff]  ;;  %v2147_v25 = vld [vmem:[%s9413_s8 + $0x1c40] sm:$0xff] }
 0x41d   :  { %3624 = vmatpush2.msra.mxu0 %v2047_v26  ;;  %3556 = vmatprep.subr.mxu1 %v1980_v29  ;;  %v2080_v26 = vld [vmem:[%s9413_s8 + $0x1a28] sm:$0xff]  ;;  %v2146_v29 = vld [vmem:[%s9413_s8 + $0x1c38] sm:$0xff] }
 0x41e   :  { %3625 = vmatprep.subr.mxu0 %v2046_v34  ;;  %3557 = vmatpush2.msra.mxu1 %v1979_v35  ;;  %v2145_v34 = vld [vmem:[%s9413_s8 + $0x1c30] sm:$0xff]  ;;  %v2078_v35 = vld [vmem:[%s9413_s8 + $0x1a18] sm:$0xff] }
 0x41f   :  { %3558 = vmatprep.mubr.f32.mxu1 %v2646_v36  ;;  %3626 = vmatpush2.msra.mxu0 %v2045_v1  ;;  %v2144_v36 = vld [vmem:[%s9413_s8 + $0x1c28] sm:$0xff]  ;;  %v2077_v1 = vld [vmem:[%s9413_s8 + $0x1a10] sm:$0xff] }
 0x420   :  { %3559 = vmatmul.mubr.f32.vlgmr.msra.gmra.mxu1 %v2644_v20  ;;  %3627 = vmatprep.subr.mxu0 %v2044_v10  ;;  %v2149_v20 = vld [vmem:[%s9413_s8 + $0x1c50] sm:$0xff]  ;;  %v2143_v10 = vld [vmem:[%s9413_s8 + $0x1c20] sm:$0xff] }
 0x421   :  { %3636 = vmatprep.subr.mxu1 %v2106_v37  ;;  %3628 = vmatpush2.msra.mxu0 %v2043_v38  ;;  %v2076_v37 = vld [vmem:[%s9413_s8 + $0x1a08] sm:$0xff]  ;;  %v2142_v38 = vld [vmem:[%s9413_s8 + $0x1c18] sm:$0xff] }
 0x422   :  { %3629 = vmatprep.mubr.f32.mxu0 %v2662_v39  ;;  %3637 = vmatpush1.msra.mxu1 %v2105_v5  ;;  %v2075_v39 = vld [vmem:[%s9413_s8 + $0x1a00] sm:$0xff]  ;;  %v2141_v5 = vld [vmem:[%s9413_s8 + $0x1c10] sm:$0xff] }
 0x423   :  { %3630 = vmatmul.mubr.f32.vlgmr.msra.gmra.mxu0 %v2654_v33  ;;  %3638 = vmatprep.subr.mxu1 %v2104_v40  ;;  %v2079_v33 = vld [vmem:[%s9413_s8 + $0x1a20] sm:$0xff]  ;;  %v2138_v40 = vld [vmem:[%s9413_s8 + $0x1bf8] sm:$0xff] }
 0x424   :  { %3707 = vmatprep.subr.mxu0 %v2170_v22  ;;  %3639 = vmatpush1.msra.mxu1 %v2103_v30  ;;  %v2140_v22 = vld [vmem:[%s9413_s8 + $0x1c08] sm:$0xff]  ;;  %v2137_v30 = vld [vmem:[%s9413_s8 + $0x1bf0] sm:$0xff] }
 0x425   :  { %3708 = vmatpush1.msra.mxu0 %v2169_v41  ;;  %3640 = vmatprep.subr.mxu1 %v2102_v42  ;;  %v2139_v41 = vld [vmem:[%s9413_s8 + $0x1c00] sm:$0xff]  ;;  %v2136_v42 = vld [vmem:[%s9413_s8 + $0x1be8] sm:$0xff] }
 0x426   :  { %3709 = vmatprep.subr.mxu0 %v2168_v44  ;;  %3641 = vmatpush1.msra.mxu1 %v2101_v45  ;;  %v2202_v44 = vld [vmem:[%s9413_s8 + $0x1df8] sm:$0xff]  ;;  %v2135_v45 = vld [vmem:[%s9413_s8 + $0x1be0] sm:$0xff] }
 0x427   :  { %3710 = vmatpush1.msra.mxu0 %v2167_v46  ;;  %3642 = vmatprep.subr.mxu1 %v2100_v47  ;;  %v2201_v46 = vld [vmem:[%s9413_s8 + $0x1df0] sm:$0xff]  ;;  %v2134_v47 = vld [vmem:[%s9413_s8 + $0x1bd8] sm:$0xff] }
 0x428   :  { %3711 = vmatprep.subr.mxu0 %v2166_v48  ;;  %3643 = vmatpush1.msra.mxu1 %v2099_v49  ;;  %v2200_v48 = vld [vmem:[%s9413_s8 + $0x1de8] sm:$0xff]  ;;  %v2133_v49 = vld [vmem:[%s9413_s8 + $0x1bd0] sm:$0xff] }
 0x429   :  { %3712 = vmatpush1.msra.mxu0 %v2165_v50  ;;  %3644 = vmatprep.subr.mxu1 %v2098_v43  ;;  %v2199_v50 = vld [vmem:[%s9413_s8 + $0x1de0] sm:$0xff]  ;;  %v2132_v43 = vld [vmem:[%s9413_s8 + $0x1bc8] sm:$0xff] }
 0x42a   :  { %3713 = vmatprep.subr.mxu0 %v2164_v51  ;;  %3645 = vmatpush1.msra.mxu1 %v2097_v52  ;;  %v2198_v51 = vld [vmem:[%s9413_s8 + $0x1dd8] sm:$0xff]  ;;  %v2131_v52 = vld [vmem:[%s9413_s8 + $0x1bc0] sm:$0xff] }
 0x42b   :  { %3714 = vmatpush1.msra.mxu0 %v2163_v31  ;;  %3646 = vmatprep.subr.mxu1 %v2096_v32  ;;  %v2197_v31 = vld [vmem:[%s9413_s8 + $0x1dd0] sm:$0xff]  ;;  %v2130_v32 = vld [vmem:[%s9413_s8 + $0x1bb8] sm:$0xff] }
 0x42c   :  { %3715 = vmatprep.subr.mxu0 %v2162_v54  ;;  %3647 = vmatpush1.msra.mxu1 %v2095_v56  ;;  %v2196_v54 = vld [vmem:[%s9413_s8 + $0x1dc8] sm:$0xff]  ;;  %v2129_v56 = vld [vmem:[%s9413_s8 + $0x1bb0] sm:$0xff] }
 0x42d   :  { %3716 = vmatpush1.msra.mxu0 %v2161_v58  ;;  %3648 = vmatprep.subr.mxu1 %v2094_v59  ;;  %v2195_v58 = vld [vmem:[%s9413_s8 + $0x1dc0] sm:$0xff]  ;;  %v2128_v59 = vld [vmem:[%s9413_s8 + $0x1ba8] sm:$0xff] }
 0x42e   :  { %3717 = vmatprep.subr.mxu0 %v2160_v60  ;;  %3649 = vmatpush1.msra.mxu1 %v2093_v61  ;;  %v2194_v60 = vld [vmem:[%s9413_s8 + $0x1db8] sm:$0xff]  ;;  %v2127_v61 = vld [vmem:[%s9413_s8 + $0x1ba0] sm:$0xff] }
 0x42f   :  { %3718 = vmatpush1.msra.mxu0 %v2159_v62  ;;  %3650 = vmatprep.subr.mxu1 %v2092_v63  ;;  %v2193_v62 = vld [vmem:[%s9413_s8 + $0x1db0] sm:$0xff]  ;;  %v2126_v63 = vld [vmem:[%s9413_s8 + $0x1b98] sm:$0xff] }
 0x430   :  { %3719 = vmatprep.subr.mxu0 %v2158_v55  ;;  %3651 = vmatpush1.msra.mxu1 %v2091_v0  ;;  %v2192_v55 = vld [vmem:[%s9413_s8 + $0x1da8] sm:$0xff]  ;;  %v2125_v0 = vld [vmem:[%s9413_s8 + $0x1b90] sm:$0xff] }
 0x431   :  { %3720 = vmatpush1.msra.mxu0 %v2157_v2  ;;  %3652 = vmatprep.subr.mxu1 %v2090_v3  ;;  %v2191_v2 = vld [vmem:[%s9413_s8 + $0x1da0] sm:$0xff]  ;;  %v2124_v3 = vld [vmem:[%s9413_s8 + $0x1b88] sm:$0xff] }
 0x432   :  { %3721 = vmatprep.subr.mxu0 %v2156_v4  ;;  %3653 = vmatpush1.msra.mxu1 %v2089_v11  ;;  %v2190_v4 = vld [vmem:[%s9413_s8 + $0x1d98] sm:$0xff]  ;;  %v2123_v11 = vld [vmem:[%s9413_s8 + $0x1b80] sm:$0xff] }
 0x433   :  { %3722 = vmatpush1.msra.mxu0 %v2155_v28  ;;  %3654 = vmatprep.subr.mxu1 %v2088_v13  ;;  %v2189_v28 = vld [vmem:[%s9413_s8 + $0x1d90] sm:$0xff]  ;;  %v2122_v13 = vld [vmem:[%s9413_s8 + $0x1b78] sm:$0xff] }
 0x434   :  { %3723 = vmatprep.subr.mxu0 %v2154_v9  ;;  %3655 = vmatpush1.msra.mxu1 %v2087_v14  ;;  %v2188_v9 = vld [vmem:[%s9413_s8 + $0x1d88] sm:$0xff]  ;;  %v2121_v14 = vld [vmem:[%s9413_s8 + $0x1b70] sm:$0xff] }
 0x435   :  { %3724 = vmatpush1.msra.mxu0 %v2153_v15  ;;  %3656 = vmatprep.subr.mxu1 %v2086_v8  ;;  %v2187_v15 = vld [vmem:[%s9413_s8 + $0x1d80] sm:$0xff]  ;;  %v2120_v8 = vld [vmem:[%s9413_s8 + $0x1b68] sm:$0xff] }
 0x436   :  { %3725 = vmatprep.subr.mxu0 %v2152_v27  ;;  %3657 = vmatpush1.msra.mxu1 %v2085_v12  ;;  %v2186_v27 = vld [vmem:[%s9413_s8 + $0x1d78] sm:$0xff]  ;;  %v2119_v12 = vld [vmem:[%s9413_s8 + $0x1b60] sm:$0xff] }
 0x437   :  { %3726 = vmatpush1.msra.mxu0 %v2151_v16  ;;  %3658 = vmatprep.subr.mxu1 %v2084_v18  ;;  %v2185_v16 = vld [vmem:[%s9413_s8 + $0x1d70] sm:$0xff]  ;;  %v2118_v18 = vld [vmem:[%s9413_s8 + $0x1b58] sm:$0xff] }
 0x438   :  { %3727 = vmatprep.subr.mxu0 %v2150_v19  ;;  %3659 = vmatpush1.msra.mxu1 %v2083_v57  ;;  %v2184_v19 = vld [vmem:[%s9413_s8 + $0x1d68] sm:$0xff]  ;;  %v2117_v57 = vld [vmem:[%s9413_s8 + $0x1b50] sm:$0xff] }
 0x439   :  { %3728 = vmatpush1.msra.mxu0 %v2149_v20  ;;  %3660 = vmatprep.subr.mxu1 %v2082_v23  ;;  %v2183_v20 = vld [vmem:[%s9413_s8 + $0x1d60] sm:$0xff]  ;;  %v2116_v23 = vld [vmem:[%s9413_s8 + $0x1b48] sm:$0xff] }
 0x43a   :  { %3729 = vmatprep.subr.mxu0 %v2148_v24  ;;  %3661 = vmatpush1.msra.mxu1 %v2081_v17  ;;  %v2182_v24 = vld [vmem:[%s9413_s8 + $0x1d58] sm:$0xff]  ;;  %v2115_v17 = vld [vmem:[%s9413_s8 + $0x1b40] sm:$0xff] }
 0x43b   :  { %3730 = vmatpush1.msra.mxu0 %v2147_v25  ;;  %3662 = vmatprep.subr.mxu1 %v2080_v26  ;;  %v2647_v25 = vcombine.high %v8672_v21, %v8672_v21  ;;  %v2181_v26 = vld [vmem:[%s9413_s8 + $0x1d50] sm:$0xff] }
 0x43c   :  { %3731 = vmatprep.subr.mxu0 %v2146_v29  ;;  %3663 = vmatpush1.msra.mxu1 %v2079_v33  ;;  %v2114_v29 = vld [vmem:[%s9413_s8 + $0x1b38] sm:$0xff]  ;;  %v2180_v33 = vld [vmem:[%s9413_s8 + $0x1d48] sm:$0xff]  ;;  %v2113_v21 = vld [vmem:[%s9413_s8 + $0x1b30] sm:$0xff] }
 0x43d   :  { %3732 = vmatpush1.msra.mxu0 %v2145_v34  ;;  %3664 = vmatprep.subr.mxu1 %v2078_v35  ;;  %v2179_v34 = vld [vmem:[%s9413_s8 + $0x1d40] sm:$0xff]  ;;  %v2112_v35 = vld [vmem:[%s9413_s8 + $0x1b28] sm:$0xff] }
 0x43e   :  { %3733 = vmatprep.subr.mxu0 %v2144_v36  ;;  %3665 = vmatpush1.msra.mxu1 %v2077_v1  ;;  %v2178_v36 = vld [vmem:[%s9413_s8 + $0x1d38] sm:$0xff]  ;;  %v2111_v1 = vld [vmem:[%s9413_s8 + $0x1b20] sm:$0xff] }
 0x43f   :  { %3734 = vmatpush1.msra.mxu0 %v2143_v10  ;;  %3666 = vmatprep.subr.mxu1 %v2076_v37  ;;  %v2661_v10 = vrot.slane %v2647_v25, %v6132_v53  ;;  %v1242_v37 = vld [vmem:[%s9405_s0 + $0x38] sm:$0xff]  ;;  %v2264_v25 = vld [vmem:[%s9413_s8 + $0x1fe8] sm:$0xff] }
 0x440   :  { %3735 = vmatprep.subr.mxu0 %v2142_v38  ;;  %3667 = vmatpush1.msra.mxu1 %v2075_v39  ;;  %v2177_v38 = vld [vmem:[%s9413_s8 + $0x1d30] sm:$0xff]  ;;  %v2110_v39 = vld [vmem:[%s9413_s8 + $0x1b18] sm:$0xff] }
 0x441   :  { %3736 = vmatpush1.msra.mxu0 %v2141_v5  ;;  %3668 = vmatprep.subr.mxu1 %v2138_v40  ;;  %v2664_v5 = vcombine.high %v1242_v37, %v1242_v37  ;;  %v2176_v40 = vld [vmem:[%s9413_s8 + $0x1d28] sm:$0xff] }
 0x442   :  { %3737 = vmatprep.subr.mxu0 %v2140_v22  ;;  %3669 = vmatpush2.msra.mxu1 %v2137_v30  ;;  %v2109_v22 = vld [vmem:[%s9413_s8 + $0x1b10] sm:$0xff]  ;;  %v2175_v30 = vld [vmem:[%s9413_s8 + $0x1d20] sm:$0xff] }
 0x443   :  { %3738 = vmatpush1.msra.mxu0 %v2139_v41  ;;  %3670 = vmatprep.subr.mxu1 %v2136_v42  ;;  %v2108_v41 = vld [vmem:[%s9413_s8 + $0x1b08] sm:$0xff]  ;;  %v2671_v42 = vrot.slane %v1242_v37, %v6132_v53  ;;  %v2254_v37 = vld [vmem:[%s9413_s8 + $0x1f98] sm:$0xff] }
 0x444   :  { %3739 = vmatprep.subr.mxu0 %v2202_v44  ;;  %3671 = vmatpush2.msra.mxu1 %v2135_v45  ;;  %v2174_v44 = vld [vmem:[%s9413_s8 + $0x1d18] sm:$0xff]  ;;  %v2107_v45 = vld [vmem:[%s9413_s8 + $0x1b00] sm:$0xff] }
 0x445   :  { %3740 = vmatpush2.msra.mxu0 %v2201_v46  ;;  %3672 = vmatprep.subr.mxu1 %v2134_v47  ;;  %v2663_v46 = vcombine.high %v2661_v10, %v2661_v10  ;;  %v2173_v47 = vld [vmem:[%s9413_s8 + $0x1d10] sm:$0xff] }
 0x446   :  { %3741 = vmatprep.subr.mxu0 %v2200_v48  ;;  %3673 = vmatpush2.msra.mxu1 %v2133_v49  ;;  %v9095_v48 = vrot.slane %v2664_v5, %v6132_v53  ;;  %v2172_v49 = vld [vmem:[%s9413_s8 + $0x1d08] sm:$0xff]  ;;  %v2233_v53 = vld [vmem:[%s9413_s8 + $0x1ef0] sm:$0xff]  ;;  %v2251_v5 = vld [vmem:[%s9413_s8 + $0x1f80] sm:$0xff] }
 0x447   :  { %3742 = vmatpush2.msra.mxu0 %v2199_v50  ;;  %3674 = vmatprep.subr.mxu1 %v2132_v43  ;;  %v2234_v50 = vld [vmem:[%s9413_s8 + $0x1ef8] sm:$0xff]  ;;  %v2171_v43 = vld [vmem:[%s9413_s8 + $0x1d00] sm:$0xff] }
 0x448   :  { %3743 = vmatprep.subr.mxu0 %v2198_v51  ;;  %3675 = vmatpush2.msra.mxu1 %v2131_v52  ;;  %v2679_v51 = vcombine.high %v2671_v42, %v2671_v42  ;;  %v2232_v52 = vld [vmem:[%s9413_s8 + $0x1ee8] sm:$0xff] }
 0x449   :  { %3744 = vmatpush2.msra.mxu0 %v2197_v31  ;;  %3676 = vmatprep.subr.mxu1 %v2130_v32  ;;  %v2680_v31 = vcombine.high %v9095_v48, %v9095_v48  ;;  %v2231_v32 = vld [vmem:[%s9413_s8 + $0x1ee0] sm:$0xff] }
 0x44a   :  { %3745 = vmatprep.subr.mxu0 %v2196_v54  ;;  %3677 = vmatpush2.msra.mxu1 %v2129_v56  ;;  %v2230_v54 = vld [vmem:[%s9413_s8 + $0x1ed8] sm:$0xff]  ;;  %v2229_v56 = vld [vmem:[%s9413_s8 + $0x1ed0] sm:$0xff] }
 0x44b   :  { %3746 = vmatpush2.msra.mxu0 %v2195_v58  ;;  %3678 = vmatprep.subr.mxu1 %v2128_v59  ;;  %v2228_v58 = vld [vmem:[%s9413_s8 + $0x1ec8] sm:$0xff]  ;;  %v2227_v59 = vld [vmem:[%s9413_s8 + $0x1ec0] sm:$0xff] }
 0x44c   :  { %3747 = vmatprep.subr.mxu0 %v2194_v60  ;;  %3679 = vmatpush2.msra.mxu1 %v2127_v61  ;;  %v2226_v60 = vld [vmem:[%s9413_s8 + $0x1eb8] sm:$0xff]  ;;  %v2225_v61 = vld [vmem:[%s9413_s8 + $0x1eb0] sm:$0xff] }
 0x44d   :  { %3748 = vmatpush2.msra.mxu0 %v2193_v62  ;;  %3680 = vmatprep.subr.mxu1 %v2126_v63  ;;  %v2224_v62 = vld [vmem:[%s9413_s8 + $0x1ea8] sm:$0xff]  ;;  %v2223_v63 = vld [vmem:[%s9413_s8 + $0x1ea0] sm:$0xff] }
 0x44e   :  { %3749 = vmatprep.subr.mxu0 %v2192_v55  ;;  %3681 = vmatpush2.msra.mxu1 %v2125_v0  ;;  %v2222_v55 = vld [vmem:[%s9413_s8 + $0x1e98] sm:$0xff]  ;;  %v2221_v0 = vld [vmem:[%s9413_s8 + $0x1e90] sm:$0xff] }
 0x44f   :  { %3750 = vmatpush2.msra.mxu0 %v2191_v2  ;;  %3682 = vmatprep.subr.mxu1 %v2124_v3  ;;  %v2220_v2 = vld [vmem:[%s9413_s8 + $0x1e88] sm:$0xff]  ;;  %v2219_v3 = vld [vmem:[%s9413_s8 + $0x1e80] sm:$0xff] }
 0x450   :  { %3751 = vmatprep.subr.mxu0 %v2190_v4  ;;  %3683 = vmatpush2.msra.mxu1 %v2123_v11  ;;  %v2218_v4 = vld [vmem:[%s9413_s8 + $0x1e78] sm:$0xff]  ;;  %v2217_v11 = vld [vmem:[%s9413_s8 + $0x1e70] sm:$0xff] }
 0x451   :  { %3752 = vmatpush2.msra.mxu0 %v2189_v28  ;;  %3684 = vmatprep.subr.mxu1 %v2122_v13  ;;  %v2216_v28 = vld [vmem:[%s9413_s8 + $0x1e68] sm:$0xff]  ;;  %v2215_v13 = vld [vmem:[%s9413_s8 + $0x1e60] sm:$0xff] }
 0x452   :  { %3753 = vmatprep.subr.mxu0 %v2188_v9  ;;  %3685 = vmatpush2.msra.mxu1 %v2121_v14  ;;  %v2214_v9 = vld [vmem:[%s9413_s8 + $0x1e58] sm:$0xff]  ;;  %v2213_v14 = vld [vmem:[%s9413_s8 + $0x1e50] sm:$0xff] }
 0x453   :  { %3754 = vmatpush2.msra.mxu0 %v2187_v15  ;;  %3686 = vmatprep.subr.mxu1 %v2120_v8  ;;  %v2212_v15 = vld [vmem:[%s9413_s8 + $0x1e48] sm:$0xff]  ;;  %v2211_v8 = vld [vmem:[%s9413_s8 + $0x1e40] sm:$0xff] }
 0x454   :  { %3755 = vmatprep.subr.mxu0 %v2186_v27  ;;  %3687 = vmatpush2.msra.mxu1 %v2119_v12  ;;  %v2210_v27 = vld [vmem:[%s9413_s8 + $0x1e38] sm:$0xff]  ;;  %v2209_v12 = vld [vmem:[%s9413_s8 + $0x1e30] sm:$0xff] }
 0x455   :  { %3756 = vmatpush2.msra.mxu0 %v2185_v16  ;;  %3688 = vmatprep.subr.mxu1 %v2118_v18  ;;  %v2208_v16 = vld [vmem:[%s9413_s8 + $0x1e28] sm:$0xff]  ;;  %v2207_v18 = vld [vmem:[%s9413_s8 + $0x1e20] sm:$0xff] }
 0x456   :  { %3757 = vmatprep.subr.mxu0 %v2184_v19  ;;  %3689 = vmatpush2.msra.mxu1 %v2117_v57  ;;  %v2206_v19 = vld [vmem:[%s9413_s8 + $0x1e18] sm:$0xff]  ;;  %v2205_v57 = vld [vmem:[%s9413_s8 + $0x1e10] sm:$0xff] }
 0x457   :  { %3758 = vmatpush2.msra.mxu0 %v2183_v20  ;;  %3690 = vmatprep.subr.mxu1 %v2116_v23  ;;  %v2204_v20 = vld [vmem:[%s9413_s8 + $0x1e08] sm:$0xff]  ;;  %v2203_v23 = vld [vmem:[%s9413_s8 + $0x1e00] sm:$0xff] }
 0x458   :  { %3759 = vmatprep.subr.mxu0 %v2182_v24  ;;  %3691 = vmatpush2.msra.mxu1 %v2115_v17  ;;  %v2266_v24 = vld [vmem:[%s9413_s8 + $0x1ff8] sm:$0xff]  ;;  %v2265_v17 = vld [vmem:[%s9413_s8 + $0x1ff0] sm:$0xff] }
 0x459   :  { %3760 = vmatpush2.msra.mxu0 %v2181_v26  ;;  %3692 = vmatprep.subr.mxu1 %v2114_v29  ;;  %v2263_v26 = vld [vmem:[%s9413_s8 + $0x1fe0] sm:$0xff]  ;;  %v2262_v29 = vld [vmem:[%s9413_s8 + $0x1fd8] sm:$0xff] }
 0x45a   :  { %3761 = vmatprep.subr.mxu0 %v2180_v33  ;;  %3693 = vmatpush2.msra.mxu1 %v2113_v21  ;;  %v2261_v33 = vld [vmem:[%s9413_s8 + $0x1fd0] sm:$0xff]  ;;  %v2260_v21 = vld [vmem:[%s9413_s8 + $0x1fc8] sm:$0xff] }
 0x45b   :  { %3762 = vmatpush2.msra.mxu0 %v2179_v34  ;;  %3694 = vmatprep.subr.mxu1 %v2112_v35  ;;  %v2259_v34 = vld [vmem:[%s9413_s8 + $0x1fc0] sm:$0xff]  ;;  %v2258_v35 = vld [vmem:[%s9413_s8 + $0x1fb8] sm:$0xff] }
 0x45c   :  { %3763 = vmatprep.subr.mxu0 %v2178_v36  ;;  %3695 = vmatpush2.msra.mxu1 %v2111_v1  ;;  %v2257_v36 = vld [vmem:[%s9413_s8 + $0x1fb0] sm:$0xff]  ;;  %v2256_v1 = vld [vmem:[%s9413_s8 + $0x1fa8] sm:$0xff] }
 0x45d   :  { %3764 = vmatpush2.msra.mxu0 %v2177_v38  ;;  %3696 = vmatprep.subr.mxu1 %v2110_v39  ;;  %v2253_v38 = vld [vmem:[%s9413_s8 + $0x1f90] sm:$0xff]  ;;  %v2252_v39 = vld [vmem:[%s9413_s8 + $0x1f88] sm:$0xff] }
 0x45e   :  { %3765 = vmatprep.subr.mxu0 %v2176_v40  ;;  %3697 = vmatpush2.msra.mxu1 %v2109_v22  ;;  %v2250_v40 = vld [vmem:[%s9413_s8 + $0x1f78] sm:$0xff]  ;;  %v2249_v22 = vld [vmem:[%s9413_s8 + $0x1f70] sm:$0xff] }
 0x45f   :  { %3766 = vmatpush2.msra.mxu0 %v2175_v30  ;;  %3698 = vmatprep.subr.mxu1 %v2108_v41  ;;  %v2248_v30 = vld [vmem:[%s9413_s8 + $0x1f68] sm:$0xff]  ;;  %v2247_v41 = vld [vmem:[%s9413_s8 + $0x1f60] sm:$0xff] }
 0x460   :  { %3767 = vmatprep.subr.mxu0 %v2174_v44  ;;  %3699 = vmatpush2.msra.mxu1 %v2107_v45  ;;  %v2245_v44 = vld [vmem:[%s9413_s8 + $0x1f50] sm:$0xff]  ;;  %v2244_v45 = vld [vmem:[%s9413_s8 + $0x1f48] sm:$0xff] }
 0x461   :  { %3700 = vmatprep.mubr.f32.mxu1 %v2663_v46  ;;  %3768 = vmatpush2.msra.mxu0 %v2173_v47  ;;  %v2243_v46 = vld [vmem:[%s9413_s8 + $0x1f40] sm:$0xff]  ;;  %v2242_v47 = vld [vmem:[%s9413_s8 + $0x1f38] sm:$0xff] }
 0x462   :  { %3701 = vmatmul.mubr.f32.vlgmr.msra.gmra.mxu1 %v2661_v10  ;;  %3769 = vmatprep.subr.mxu0 %v2172_v49  ;;  %v2255_v10 = vld [vmem:[%s9413_s8 + $0x1fa0] sm:$0xff]  ;;  %v2241_v49 = vld [vmem:[%s9413_s8 + $0x1f30] sm:$0xff] }
 0x463   :  { %3778 = vmatprep.subr.mxu1 %v2234_v50  ;;  %3770 = vmatpush2.msra.mxu0 %v2171_v43  ;;  %v2240_v50 = vld [vmem:[%s9413_s8 + $0x1f28] sm:$0xff]  ;;  %v2239_v43 = vld [vmem:[%s9413_s8 + $0x1f20] sm:$0xff] }
 0x464   :  { %3771 = vmatprep.mubr.f32.mxu0 %v2679_v51  ;;  %3779 = vmatpush1.msra.mxu1 %v2233_v53  ;;  %v2238_v51 = vld [vmem:[%s9413_s8 + $0x1f18] sm:$0xff]  ;;  %v2237_v53 = vld [vmem:[%s9413_s8 + $0x1f10] sm:$0xff] }
 0x465   :  { %3772 = vmatmul.mubr.f32.vlgmr.msra.gmra.mxu0 %v2671_v42  ;;  %3780 = vmatprep.subr.mxu1 %v2232_v52  ;;  %v2246_v42 = vld [vmem:[%s9413_s8 + $0x1f58] sm:$0xff]  ;;  %v2236_v52 = vld [vmem:[%s9413_s8 + $0x1f08] sm:$0xff] }
 0x466   :  { %3781 = vmatpush1.msra.mxu1 %v2231_v32  ;;  %3842 = vmatprep.mubr.f32.mxu1 %v2680_v31  ;;  %v2235_v31 = vld [vmem:[%s9413_s8 + $0x1f00] sm:$0xff]  ;;  %v3896_v32 = vld [vmem:[%s9416_s11 + $0xf8] sm:$0xff] }
 0x467   :  { %3782 = vmatprep.subr.mxu1 %v2230_v54  ;;  %v3880_v54 = vld [vmem:[%s9416_s11 + $0x78] sm:$0xff]  ;;  %3991 = vmatprep.subr.mxu0 %v3896_v32 }
 0x468   :  { %3783 = vmatpush1.msra.mxu1 %v2229_v56  ;;  %v3895_v56 = vld [vmem:[%s9416_s11 + $0xf0] sm:$0xff]  ;;  %3992 = vmatpush3.msra.mxu0 %v3880_v54 }
 0x469   :  { %3784 = vmatprep.subr.mxu1 %v2228_v58  ;;  %v3879_v58 = vld [vmem:[%s9416_s11 + $0x70] sm:$0xff]  ;;  %3993 = vmatprep.subr.mxu0 %v3895_v56 }
 0x46a   :  { %3785 = vmatpush1.msra.mxu1 %v2227_v59  ;;  %v3878_v59 = vld [vmem:[%s9416_s11 + $0x68] sm:$0xff]  ;;  %3994 = vmatpush3.msra.mxu0 %v3879_v58 }
 0x46b   :  { %3786 = vmatprep.subr.mxu1 %v2226_v60  ;;  %v3893_v60 = vld [vmem:[%s9416_s11 + $0xe0] sm:$0xff] }
 0x46c   :  { %3787 = vmatpush1.msra.mxu1 %v2225_v61  ;;  %v3877_v61 = vld [vmem:[%s9416_s11 + $0x60] sm:$0xff] }
 0x46d   :  { %3788 = vmatprep.subr.mxu1 %v2224_v62  ;;  %v3892_v62 = vld [vmem:[%s9416_s11 + $0xd8] sm:$0xff] }
 0x46e   :  { %3789 = vmatpush1.msra.mxu1 %v2223_v63  ;;  %v3876_v63 = vld [vmem:[%s9416_s11 + $0x58] sm:$0xff] }
 0x46f   :  { %3790 = vmatprep.subr.mxu1 %v2222_v55  ;;  %v3891_v55 = vld [vmem:[%s9416_s11 + $0xd0] sm:$0xff] }
 0x470   :  { %3791 = vmatpush1.msra.mxu1 %v2221_v0  ;;  %v3875_v0 = vld [vmem:[%s9416_s11 + $0x50] sm:$0xff] }
 0x471   :  { %3792 = vmatprep.subr.mxu1 %v2220_v2  ;;  %v3890_v2 = vld [vmem:[%s9416_s11 + $0xc8] sm:$0xff] }
 0x472   :  { %3793 = vmatpush1.msra.mxu1 %v2219_v3  ;;  %v3874_v3 = vld [vmem:[%s9416_s11 + $0x48] sm:$0xff] }
 0x473   :  { %3794 = vmatprep.subr.mxu1 %v2218_v4  ;;  %v3889_v4 = vld [vmem:[%s9416_s11 + $0xc0] sm:$0xff] }
 0x474   :  { %3795 = vmatpush1.msra.mxu1 %v2217_v11  ;;  %v3873_v11 = vld [vmem:[%s9416_s11 + $0x40] sm:$0xff] }
 0x475   :  { %3796 = vmatprep.subr.mxu1 %v2216_v28  ;;  %v3888_v28 = vld [vmem:[%s9416_s11 + $0xb8] sm:$0xff] }
 0x476   :  { %3797 = vmatpush1.msra.mxu1 %v2215_v13  ;;  %v3872_v13 = vld [vmem:[%s9416_s11 + $0x38] sm:$0xff] }
 0x477   :  { %3798 = vmatprep.subr.mxu1 %v2214_v9  ;;  %v3887_v9 = vld [vmem:[%s9416_s11 + $0xb0] sm:$0xff] }
 0x478   :  { %3799 = vmatpush1.msra.mxu1 %v2213_v14  ;;  %v3871_v14 = vld [vmem:[%s9416_s11 + $0x30] sm:$0xff] }
 0x479   :  { %3800 = vmatprep.subr.mxu1 %v2212_v15  ;;  %v3886_v15 = vld [vmem:[%s9416_s11 + $0xa8] sm:$0xff] }
 0x47a   :  { %3801 = vmatpush1.msra.mxu1 %v2211_v8  ;;  %v3870_v8 = vld [vmem:[%s9416_s11 + $0x28] sm:$0xff] }
 0x47b   :  { %3802 = vmatprep.subr.mxu1 %v2210_v27  ;;  %v3885_v27 = vld [vmem:[%s9416_s11 + $0xa0] sm:$0xff] }
 0x47c   :  { %3803 = vmatpush1.msra.mxu1 %v2209_v12  ;;  %v3869_v12 = vld [vmem:[%s9416_s11 + $0x20] sm:$0xff] }
 0x47d   :  { %3804 = vmatprep.subr.mxu1 %v2208_v16  ;;  %v3884_v16 = vld [vmem:[%s9416_s11 + $0x98] sm:$0xff] }
 0x47e   :  { %3805 = vmatpush1.msra.mxu1 %v2207_v18  ;;  %v3868_v18 = vld [vmem:[%s9416_s11 + $0x18] sm:$0xff] }
 0x47f   :  { %3806 = vmatprep.subr.mxu1 %v2206_v19  ;;  %v3883_v19 = vld [vmem:[%s9416_s11 + $0x90] sm:$0xff] }
 0x480   :  { %3807 = vmatpush1.msra.mxu1 %v2205_v57  ;;  %v3867_v57 = vld [vmem:[%s9416_s11 + $0x10] sm:$0xff] }
 0x481   :  { %3808 = vmatprep.subr.mxu1 %v2204_v20  ;;  %v3882_v20 = vld [vmem:[%s9416_s11 + $0x88] sm:$0xff] }
 0x482   :  { %3809 = vmatpush1.msra.mxu1 %v2203_v23  ;;  %v3866_v23 = vld [vmem:[%s9416_s11 + $0x8] sm:$0xff] }
 0x483   :  { %3810 = vmatprep.subr.mxu1 %v2266_v24  ;;  %v3881_v24 = vld [vmem:[%s9416_s11 + $0x80] sm:$0xff] }
 0x484   :  { %3811 = vmatpush2.msra.mxu1 %v2265_v17  ;;  %v3865_v17 = vld [vmem:[%s9416_s11] sm:$0xff] }
 0x485   :  { %3812 = vmatprep.subr.mxu1 %v2264_v25  ;;  %v2461_v25 = vpop.f32.mrf.mxu0 }
 0x486   :  { %3813 = vmatpush2.msra.mxu1 %v2263_v26  ;;  %v2532_v26 = vpop.f32.mrf.mxu1 }
 0x487   :  { %3814 = vmatprep.subr.mxu1 %v2262_v29  ;;  %v2463_v29 = vpop.f32.mrf.mxu0 }
 0x488   :  { %3815 = vmatpush2.msra.mxu1 %v2261_v33  ;;  %v2534_v33 = vpop.f32.mrf.mxu1 }
 0x489   :  { %3816 = vmatprep.subr.mxu1 %v2260_v21  ;;  %v2779_v21 = vpop.f32.mrf.mxu0 }
 0x48a   :  { %3817 = vmatpush2.msra.mxu1 %v2259_v34  ;;  %v2533_v34 = vadd.f32 %v2532_v26, %v2461_v25  ;;  %v3849_v26 = vld [vmem:[%s9415_s10] sm:$0x3] }
 0x48b   :  { %3818 = vmatprep.subr.mxu1 %v2258_v35  ;;  %v2850_v35 = vpop.f32.mrf.mxu1 }
 0x48c   :  { %3819 = vmatpush2.msra.mxu1 %v2257_v36  ;;  %v2535_v36 = vadd.f32 %v2534_v33, %v2463_v29 }
 0x48d   :  { %3820 = vmatprep.subr.mxu1 %v2256_v1  ;;  %v2781_v1 = vpop.f32.mrf.mxu0 }
 0x48e   :  { %3821 = vmatpush2.msra.mxu1 %v2255_v10  ;;  %v2780_v10 = vadd.f32 %v2779_v21, %v2533_v34  ;;  %v3854_v34 = vrot.slane %v3849_v26, %v4529_v6 }
 0x48f   :  { %3822 = vmatprep.subr.mxu1 %v2254_v37  ;;  %v2852_v37 = vpop.f32.mrf.mxu1 }
 0x490   :  { %3823 = vmatpush2.msra.mxu1 %v2253_v38  ;;  %v2921_v38 = vpop.f32.mrf.mxu0 }
 0x491   :  { %3824 = vmatprep.subr.mxu1 %v2252_v39  ;;  %v2782_v39 = vadd.f32 %v2781_v1, %v2535_v36  ;;  %v3858_v1 = vrot.slane %v3849_v26, %v4532_v7 }
 0x492   :  { %3825 = vmatpush2.msra.mxu1 %v2251_v5  ;;  %v2851_v5 = vadd.f32 %v2850_v35, %v2780_v10 }
 0x493   :  { %3826 = vmatprep.subr.mxu1 %v2250_v40  ;;  %v2992_v40 = vpop.f32.mrf.mxu1 }
 0x494   :  { %3827 = vmatpush2.msra.mxu1 %v2249_v22  ;;  %v2853_v22 = vadd.f32 %v2852_v37, %v2782_v39 }
 0x495   :  { %3828 = vmatprep.subr.mxu1 %v2248_v30  ;;  %v2923_v30 = vpop.f32.mrf.mxu0 }
 0x496   :  { %3829 = vmatpush2.msra.mxu1 %v2247_v41  ;;  %v2922_v41 = vadd.f32 %v2921_v38, %v2851_v5 }
 0x497   :  { %3830 = vmatprep.subr.mxu1 %v2246_v42  ;;  %v2994_v42 = vpop.f32.mrf.mxu1 }
 0x498   :  { %3831 = vmatpush2.msra.mxu1 %v2245_v44  ;;  %v3063_v44 = vpop.f32.mrf.mxu0 }
 0x499   :  { %3832 = vmatprep.subr.mxu1 %v2244_v45  ;;  %v2924_v45 = vadd.f32 %v2923_v30, %v2853_v22  ;;  %v3990_v30 = vld [vmem:[%s9417_s12] ss:$0 sm:$0xff] }
 0x49a   :  { %3833 = vmatpush2.msra.mxu1 %v2243_v46  ;;  %v2993_v46 = vadd.f32 %v2992_v40, %v2922_v41 }
 0x49b   :  { %3834 = vmatprep.subr.mxu1 %v2242_v47  ;;  %v3134_v47 = vpop.f32.mrf.mxu1 }
 0x49c   :  { %3835 = vmatpush2.msra.mxu1 %v2241_v49  ;;  %v2995_v49 = vadd.f32 %v2994_v42, %v2924_v45 }
 0x49d   :  { %3836 = vmatprep.subr.mxu1 %v2240_v50  ;;  %v3065_v50 = vpop.f32.mrf.mxu0 }
 0x49e   :  { %3837 = vmatpush2.msra.mxu1 %v2239_v43  ;;  %v3064_v43 = vadd.f32 %v3063_v44, %v2993_v46 }
 0x49f   :  { %3838 = vmatprep.subr.mxu1 %v2238_v51  ;;  %v3136_v51 = vpop.f32.mrf.mxu1 }
 0x4a0   :  { %3839 = vmatpush2.msra.mxu1 %v2237_v53  ;;  %v3205_v53 = vpop.f32.mrf.mxu0 }
 0x4a1   :  { %3840 = vmatprep.subr.mxu1 %v2236_v52  ;;  %v3066_v52 = vadd.f32 %v3065_v50, %v2995_v49  ;;  %v3276_v32 = vpop.f32.mrf.mxu1 }
 0x4a2   :  { %3841 = vmatpush2.msra.mxu1 %v2235_v31  ;;  %v3135_v31 = vadd.f32 %v3134_v47, %v3064_v43  ;;  %v3207_v56 = vpop.f32.mrf.mxu0 }
 0x4a3   :  { %3843 = vmatmul.mubr.f32.vlgmr.msra.gmra.mxu1 %v9095_v48  ;;  %v3894_v48 = vld [vmem:[%s9416_s11 + $0xe8] sm:$0xff]  ;;  %v3137_v54 = vadd.f32 %v3136_v51, %v3066_v52 }
 0x4a4   :  { %3995 = vmatprep.subr.mxu0 %v3894_v48  ;;  %v3206_v58 = vadd.f32 %v3205_v53, %v3135_v31  ;;  %v3278_v48 = vpop.f32.mrf.mxu1 }
 0x4a5   :  { %3996 = vmatpush3.msra.mxu0 %v3878_v59  ;;  %v3347_v59 = vpop.f32.mrf.mxu0 }
 0x4a6   :  { %3997 = vmatprep.subr.mxu0 %v3893_v60  ;;  %v3208_v60 = vadd.f32 %v3207_v56, %v3137_v54 }
 0x4a7   :  { %3998 = vmatpush3.msra.mxu0 %v3877_v61  ;;  %v3277_v61 = vadd.f32 %v3276_v32, %v3206_v58 }
 0x4a8   :  { %3999 = vmatprep.subr.mxu0 %v3892_v62  ;;  %v3418_v62 = vpop.f32.mrf.mxu1 }
 0x4a9   :  { %4000 = vmatpush3.msra.mxu0 %v3876_v63  ;;  %v3279_v63 = vadd.f32 %v3278_v48, %v3208_v60 }
 0x4aa   :  { %4001 = vmatprep.subr.mxu0 %v3891_v55  ;;  %v3349_v55 = vpop.f32.mrf.mxu0 }
 0x4ab   :  { %4002 = vmatpush3.msra.mxu0 %v3875_v0  ;;  %v3348_v0 = vadd.f32 %v3347_v59, %v3277_v61 }
 0x4ac   :  { %4003 = vmatprep.subr.mxu0 %v3890_v2  ;;  %v3420_v2 = vpop.f32.mrf.mxu1 }
 0x4ad   :  { %4004 = vmatpush3.msra.mxu0 %v3874_v3  ;;  %v3489_v3 = vpop.f32.mrf.mxu0 }
 0x4ae   :  { %4005 = vmatprep.subr.mxu0 %v3889_v4  ;;  %v3350_v4 = vadd.f32 %v3349_v55, %v3279_v63 }
 0x4af   :  { %4006 = vmatpush3.msra.mxu0 %v3873_v11  ;;  %v3419_v11 = vadd.f32 %v3418_v62, %v3348_v0 }
 0x4b0   :  { %4007 = vmatprep.subr.mxu0 %v3888_v28 }
 0x4b1   :  { %4008 = vmatpush3.msra.mxu0 %v3872_v13  ;;  %v3421_v13 = vadd.f32 %v3420_v2, %v3350_v4 }
 0x4b2   :  { %4009 = vmatprep.subr.mxu0 %v3887_v9  ;;  %v3491_v9 = vpop.f32.mrf.mxu0 }
 0x4b3   :  { %4010 = vmatpush3.msra.mxu0 %v3871_v14  ;;  %v3490_v14 = vadd.f32 %v3489_v3, %v3419_v11 }
 0x4b4   :  { %4011 = vmatprep.subr.mxu0 %v3886_v15 }
 0x4b5   :  { %4012 = vmatpush3.msra.mxu0 %v3870_v8 }
 0x4b6   :  { %4013 = vmatprep.subr.mxu0 %v3885_v27  ;;  %v3492_v27 = vadd.f32 %v3491_v9, %v3421_v13 }
 0x4b7   :  { %4014 = vmatpush3.msra.mxu0 %v3869_v12 }
 0x4b8   :  { %4015 = vmatprep.subr.mxu0 %v3884_v16 }
 0x4b9   :  { %4016 = vmatpush3.msra.mxu0 %v3868_v18 }
 0x4ba   :  { %4017 = vmatprep.subr.mxu0 %v3883_v19 }
 0x4bb   :  { %4018 = vmatpush3.msra.mxu0 %v3867_v57 }
 0x4bc   :  { %4019 = vmatprep.subr.mxu0 %v3882_v20 }
 0x4bd   :  { %4020 = vmatpush3.msra.mxu0 %v3866_v23 }
 0x4be   :  { %4021 = vmatprep.subr.mxu0 %v3881_v24 }
 0x4bf   :  { %4022 = vmatpush3.msra.mxu0 %v3865_v17 }
 0x4e0   :  { %v3560_v28 = vpop.f32.mrf.mxu1 }
 0x4e1   :  { %v3561_v12 = vadd.f32 %v3560_v28, %v3490_v14 }
 0x4e2   :  { %v3562_v15 = vpop.f32.mrf.mxu1 }
 0x4e3   :  { %v3631_v8 = vpop.f32.mrf.mxu0  ;;  %v3563_v18 = vadd.f32 %v3562_v15, %v3492_v27 }
 0x4e4   :  { %v3632_v57 = vadd.f32 %v3631_v8, %v3561_v12 }
 0x4e5   :  { %v3633_v19 = vpop.f32.mrf.mxu0 }
 0x4e6   :  { %v3634_v24 = vadd.f32 %v3633_v19, %v3563_v18 }
 0x522   :  { %v3702_v16 = vpop.f32.mrf.mxu1 }
 0x523   :  { %v3703_v17 = vadd.f32 %v3702_v16, %v3632_v57 }
 0x524   :  { %v3704_v20 = vpop.f32.mrf.mxu1 }
 0x525   :  { %v3773_v23 = vpop.f32.mrf.mxu0  ;;  %v3705_v25 = vadd.f32 %v3704_v20, %v3634_v24 }
 0x526   :  { %v3774_v33 = vadd.f32 %v3773_v23, %v3703_v17 }
 0x527   :  { %v3775_v29 = vpop.f32.mrf.mxu0 }
 0x528   :  { %v3776_v35 = vadd.f32 %v3775_v29, %v3705_v25 }
 0x563   :  { %v3844_v21 = vpop.f32.mrf.mxu1 }
 0x564   :  { %v3845_v36 = vadd.f32 %v3844_v21, %v3774_v33 }
 0x565   :  { %v3846_v10 = vpop.f32.mrf.mxu1 }
 0x566   :  { %v3847_v37 = vadd.f32 %v3846_v10, %v3776_v35  ;;  %v3861_v38 = vadd.f32 %v3854_v34, %v3845_v36 }
 0x568   :  { %v3862_v39 = vadd.f32 %v3858_v1, %v3847_v37  ;;  %v3863_v40 = vmax.f32 %v3861_v38, 0.0 }
 0x56a   :  { %v3864_v5 = vmax.f32 %v3862_v39, 0.0 }
 0x56c   :  { %3968 = vmatprep.mubr.f32.mxu0 %v3864_v5 }
 0x56d   :  { %3969 = vmatmul.mubr.f32.vlgmr.msra.gmra.mxu0 %v3863_v40 }
 0x62d   :  { %v4023_v22 = vpop.f32.mrf.mxu0 }
 0x62f   :  { %v4024_v41 = vpop.f32.mrf.mxu0 }
 0x630   :  { %v4025_v6 = vadd.f32 %v4024_v41, %v4023_v22 }
 0x632   :  { %v3971_v42 = vadd.f32 %v4025_v6, %v3990_v30 }
 0x634   :  { %3975 = vst.msk [vmem:[#allocation2] sm:$0x3] %vm3974_vm0, %v3971_v42 }
 0x635   :  { %4049 = shalt.err (!%p4046_p4)
}
 0x636   :  { %3985 = dma.vmem_to_hbm [thread:$0]  %s3983_s17, 32, %s9418_s13, [#allocation3]  }
 0x637   :  { %4058 = dma.done.wait [#allocation3], 32  }
 0x638   :  { %4059 = vsyncadd [#allocation3], 4294967264 }
 0x639   :  { %3989 = vsyncpa [#allocation3], 1 }

</bundles_post_ra>
